<compile_context>
chip_gen: v7x
topology: tpu7x:2x2x1
jax: 0.10.0
libtpu: 0.0.40
codegen_flags: <defaults>
</compile_context>

<pallas_src>
import functools

import jax
import jax.numpy as jnp
from jax.experimental import pallas as pl
from jax.experimental.pallas import tpu as pltpu


def _round_up(x, m):
    return (x + m - 1) // m * m


# Per-sample row stride inside a stacked block: 104 = round_up(100, 8) keeps every block
# sublane-aligned for any TB and leaves >= 11 spare rows for the conv2 tap offsets.
_S = 104


# -----------------------------------------------------------------------------
# Stage 1: fused conv stack.  One grid step == TB samples stacked along M.
# -----------------------------------------------------------------------------
def _conv_kernel(p_ref, w1_ref, b1_ref, w2_ref, b2_ref, w3_ref, b3_ref,
                 out_ref, act1_ref, lhs2_ref, act2_ref, lhs3_ref, act3_ref, *, tb):
    f32, bf16 = jnp.float32, jnp.bfloat16
    m2 = (tb - 1) * _S + 89     # conv2 rows computed (last sample stops at local row 88)
    m3 = (tb - 1) * _S + 67     # conv3 rows computed (last sample stops at local row 66)

    # ---- conv1 (8x8 s4) == ONE matmul over all tb stacked samples (space-to-depth) ----
    a1 = jnp.dot(p_ref[...], w1_ref[...], preferred_element_type=f32)       # (tb*_S, 128)
    act1_ref[...] = jnp.maximum(a1 + b1_ref[...], 0.0).astype(bf16)

    # ---- conv2 (4x4 s2 == 2x2 s1 on the s2d layout): K-concat the 4 taps ----
    # lanes [q*128,(q+1)*128) of lhs2 hold act1 shifted by tap offset q in {0,1,10,11}.
    for q, off in enumerate((0, 1, 10, 11)):
        lhs2_ref[:, q * 128:(q + 1) * 128] = act1_ref[off:off + m2, :]
    a2 = jnp.dot(lhs2_ref[...], w2_ref[...], preferred_element_type=f32)    # (m2, 64)
    act2_ref[...] = jnp.maximum(a2 + b2_ref[...], 0.0).astype(bf16)

    # ---- conv3 (3x3 s1): K-concat the 9 taps (offsets ki*10+kj <= 22) ----
    for j in range(9):
        off = (j // 3) * 10 + (j % 3)
        lhs3_ref[:, j * 64:(j + 1) * 64] = act2_ref[off:off + m3, :]
    a3 = jnp.dot(lhs3_ref[...], w3_ref[...], preferred_element_type=f32)    # (m3, 64)
    act3_ref[...] = jnp.maximum(a3 + b3_ref[...], 0.0).astype(bf16)

    # ---- emit the 49 valid (h, w) rows per sample in (h*7+w, c) order ----
    for s in range(tb):
        base = s * _S
        for hh in range(7):
            out_ref[s, hh * 7:(hh + 1) * 7, :] = \
                act3_ref[base + hh * 10: base + hh * 10 + 7, :]


# -----------------------------------------------------------------------------
# Stage 2: fc1 + fc2, batched over all samples (weights streamed once per batch).
# -----------------------------------------------------------------------------
def _fc_kernel(x_ref, wf1_ref, bf1_ref, wf2_ref, bf2_ref, out_ref):
    f32, bf16 = jnp.float32, jnp.bfloat16
    h = jnp.dot(x_ref[...], wf1_ref[...], preferred_element_type=f32)       # (bn, 512)
    h = jnp.maximum(h + bf1_ref[...], 0.0).astype(bf16)
    y = jnp.dot(h, wf2_ref[...], preferred_element_type=f32) + bf2_ref[...]
    out_ref[...] = y


# -----------------------------------------------------------------------------
# Host-side glue (tiny tensors / one-time weight relayout)
# -----------------------------------------------------------------------------
def _conv1_patches(x):
    """x: (N, C, 84, 84) f32 -> conv1 im2col patches (N, 100, 256*C) bf16.

    Row r = bh*10 + bw covers the 2x2 block of conv1 outputs (oh1, ow1) = (2bh+dh, 2bw+dw).
    For q = dh*2 + dw, column block [q*64C, (q+1)*64C) holds the 8x8xC input window
    starting at (8bh+4dh, 8bw+4dw), flattened in (ki, kj, c) order.
    """
    n, c, _, _ = x.shape
    xb = x.astype(jnp.bfloat16).transpose(0, 2, 3, 1)                        # NHWC
    cols = []
    for i in range(8):
        for j in range(8):
            cols.append(xb[:, i:i + 77:4, j:j + 77:4, :])                    # (N, 20, 20, C)
    p = jnp.stack(cols, axis=3).reshape(n, 20, 20, 8, 8, c)
    p = p.reshape(n, 10, 2, 10, 2, 8, 8, c).transpose(0, 1, 3, 2, 4, 5, 6, 7)
    return p.reshape(n, 100, 4 * 64 * c)


def prepare_params(params):
    """One-time re-layout of PyTorch-convention params into kernel-ready bf16 layout."""
    f32, bf16 = jnp.float32, jnp.bfloat16

    w1 = params["conv1_w"]                                  # (32, C, 8, 8)
    c_in = w1.shape[1]
    kq = 64 * c_in
    w1q = w1.transpose(2, 3, 1, 0).reshape(kq, 32)          # [(ki,kj,c), o]
    w1big = jnp.zeros((4 * kq, 128), f32)
    for q in range(4):                                      # block-diagonal over quadrants
        w1big = w1big.at[q * kq:(q + 1) * kq, q * 32:(q + 1) * 32].set(w1q)
    b1 = jnp.tile(params["conv1_b"], 4).reshape(1, 128)

    # conv2: K-concatenate the 4 (kbh,kbw) taps -> (512, 64)
    w2r = (params["conv2_w"].transpose(2, 3, 1, 0)          # (ki, kj, c, o)
           .reshape(2, 2, 2, 2, 32, 64)                     # (kbh, dh, kbw, dw, c, o)
           .transpose(0, 2, 1, 3, 4, 5)                     # (kbh, kbw, dh, dw, c, o)
           .reshape(512, 64))
    b2 = params["conv2_b"].reshape(1, 64)

    # conv3: K-concatenate the 9 (ki,kj) taps -> (576, 64)
    w3r = params["conv3_w"].transpose(2, 3, 1, 0).reshape(576, 64)
    b3 = params["conv3_b"].reshape(1, 64)

    # fc1: fold nn.Flatten's (c, h, w) ordering into the weight -> row = (h*7+w)*64 + c
    wf1 = (params["fc1_w"].reshape(512, 64, 7, 7)
           .transpose(2, 3, 1, 0)
           .reshape(3136, 512))
    bf1 = params["fc1_b"].reshape(1, 512)

    wf2 = params["fc2_w"]                                   # (out_dim, 512)
    out_dim = wf2.shape[0]
    out_pad = _round_up(out_dim, 128)
    wf2r = jnp.zeros((512, out_pad), f32).at[:, :out_dim].set(wf2.T)
    bf2 = jnp.zeros((1, out_pad), f32).at[0, :out_dim].set(params["fc2_b"])

    return {
        "w1": w1big.astype(bf16), "b1": b1.astype(f32),
        "w2": w2r.astype(bf16), "b2": b2.astype(f32),
        "w3": w3r.astype(bf16), "b3": b3.astype(f32),
        "wf1": wf1.astype(bf16), "bf1": bf1.astype(f32),
        "wf2": wf2r.astype(bf16), "bf2": bf2.astype(f32),
    }


def mario_net_forward(prep, x, output_dim):
    n, c, h, w = x.shape
    assert (h, w) == (84, 84), "MarioNet is hard-wired to 84x84 inputs (Linear(3136, 512))"
    assert _S % 8 == 0 and _S >= 100
    k1 = 4 * 64 * c
    out_pad = prep["wf2"].shape[1]

    # ---- conv1 im2col / space-to-depth prologue (host XLA, tiny) ----
    patches = _conv1_patches(x)                                              # (n, 100, k1)

    # ---- stage 1: fused conv stack ----
    # TB samples per grid step; for small batches keep >=2 grid steps so both v7x cores run.
    tb = 8 if n >= 16 else max(1, (n + 1) // 2)
    n_conv = _round_up(n, tb)
    patches = jnp.pad(patches, ((0, n_conv - n), (0, _S - 100), (0, 0)))
    patches_flat = patches.reshape(n_conv * _S, k1)

    m1 = tb * _S
    m2 = (tb - 1) * _S + 89
    m3 = (tb - 1) * _S + 67

    conv_out = pl.pallas_call(
        functools.partial(_conv_kernel, tb=tb),
        out_shape=jax.ShapeDtypeStruct((n_conv, 49, 64), jnp.bfloat16),
        grid_spec=pltpu.PrefetchScalarGridSpec(
            num_scalar_prefetch=0,
            grid=(n_conv // tb,),
            in_specs=[
                pl.BlockSpec((m1, k1), lambda i: (i, 0)),          # stacked conv1 patches
                pl.BlockSpec((k1, 128), lambda i: (0, 0)),         # conv1 weight (VMEM-resident)
                pl.BlockSpec((1, 128), lambda i: (0, 0)),
                pl.BlockSpec((512, 64), lambda i: (0, 0)),         # conv2 weight (K-concat)
                pl.BlockSpec((1, 64), lambda i: (0, 0)),
                pl.BlockSpec((576, 64), lambda i: (0, 0)),         # conv3 weight (K-concat)
                pl.BlockSpec((1, 64), lambda i: (0, 0)),
            ],
            out_specs=pl.BlockSpec((tb, 49, 64), lambda i: (i, 0, 0)),
            scratch_shapes=[
                pltpu.VMEM((m1, 128), jnp.bfloat16),               # act1 (s2d conv1 output)
                pltpu.VMEM((m2, 512), jnp.bfloat16),               # conv2 K-concat LHS
                pltpu.VMEM((m2, 64), jnp.bfloat16),                # act2
                pltpu.VMEM((m3, 576), jnp.bfloat16),               # conv3 K-concat LHS
                pltpu.VMEM((m3, 64), jnp.bfloat16),                # act3
            ],
        ),
        compiler_params=pltpu.CompilerParams(
            dimension_semantics=("parallel",),
            vmem_limit_bytes=32 * 1024 * 1024,                     # ~7 MiB used; << 64 MiB (v7x)
        ),
    )(patches_flat, prep["w1"], prep["b1"], prep["w2"], prep["b2"],
      prep["w3"], prep["b3"])

    # ---- stage 2: fc1 + fc2 over the whole batch ----
    acts = conv_out.reshape(n_conv, 49 * 64)                                 # (n_conv, 3136)
    nf = _round_up(n, 8)
    bn = nf if nf <= 256 else 256
    nf = _round_up(nf, bn)
    if nf > n_conv:
        acts = jnp.pad(acts, ((0, nf - n_conv), (0, 0)))
    elif nf < n_conv:
        acts = acts[:nf]

    out = pl.pallas_call(
        _fc_kernel,
        out_shape=jax.ShapeDtypeStruct((nf, out_pad), jnp.float32),
        grid_spec=pltpu.PrefetchScalarGridSpec(
            num_scalar_prefetch=0,
            grid=(nf // bn,),
            in_specs=[
                pl.BlockSpec((bn, 3136), lambda i: (i, 0)),
                pl.BlockSpec((3136, 512), lambda i: (0, 0)),       # fc1 weight, loaded once/batch
                pl.BlockSpec((1, 512), lambda i: (0, 0)),
                pl.BlockSpec((512, out_pad), lambda i: (0, 0)),
                pl.BlockSpec((1, out_pad), lambda i: (0, 0)),
            ],
            out_specs=pl.BlockSpec((bn, out_pad), lambda i: (i, 0)),
        ),
        compiler_params=pltpu.CompilerParams(
            dimension_semantics=("parallel",),
            vmem_limit_bytes=32 * 1024 * 1024,
        ),
    )(acts, prep["wf1"], prep["bf1"], prep["wf2"], prep["bf2"])

    return out[:n, :output_dim]


# -----------------------------------------------------------------------------
# Parameter init (PyTorch layout) + plain-XLA reference for a sanity check
# -----------------------------------------------------------------------------
def init_params(key, c, output_dim):
    ks = jax.random.split(key, 10)

    def w_init(k, shape, fan_in):
        return jax.random.normal(k, shape, jnp.float32) / jnp.sqrt(float(fan_in))

    return {
        "conv1_w": w_init(ks[0], (32, c, 8, 8), c * 8 * 8),
        "conv1_b": w_init(ks[1], (32,), c * 8 * 8),
        "conv2_w": w_init(ks[2], (64, 32, 4, 4), 32 * 4 * 4),
        "conv2_b": w_init(ks[3], (64,), 32 * 4 * 4),
        "conv3_w": w_init(ks[4], (64, 64, 3, 3), 64 * 3 * 3),
        "conv3_b": w_init(ks[5], (64,), 64 * 3 * 3),
        "fc1_w": w_init(ks[6], (512, 3136), 3136),               # PyTorch (out, in)
        "fc1_b": w_init(ks[7], (512,), 3136),
        "fc2_w": w_init(ks[8], (output_dim, 512), 512),
        "fc2_b": w_init(ks[9], (output_dim,), 512),
    }


def mario_net_reference(params, x):
    """Plain-JAX f32 reference matching the PyTorch module exactly."""
    def conv(y, w_, b_, s):
        y = jax.lax.conv_general_dilated(
            y, w_, window_strides=(s, s), padding="VALID",
            dimension_numbers=("NCHW", "OIHW", "NCHW"))
        return jax.nn.relu(y + b_[None, :, None, None])

    y = conv(x, params["conv1_w"], params["conv1_b"], 4)
    y = conv(y, params["conv2_w"], params["conv2_b"], 2)
    y = conv(y, params["conv3_w"], params["conv3_b"], 1)
    y = y.reshape(y.shape[0], -1)
    y = jax.nn.relu(y @ params["fc1_w"].T + params["fc1_b"])
    return y @ params["fc2_w"].T + params["fc2_b"]


if __name__ == "__main__":
    key = jax.random.PRNGKey(0)
    k_in, k_par = jax.random.split(key)
    # 84x84 spatial size is mandated by the hard-coded Linear(3136, 512) (3136 = 64*7*7).
    batch, c, h, w = 2, 4, 84, 84
    output_dim = 5
    x = jax.random.normal(k_in, (batch, c, h, w), jnp.float32)
    params = init_params(k_par, c, output_dim)

    prep = prepare_params(params)          # one-time weight re-layout (not per forward)
    fwd = jax.jit(mario_net_forward, static_argnums=(2,))
    out = jax.block_until_ready(fwd(prep, x, output_dim))

    assert out.shape == (batch, output_dim)
    assert bool(jnp.isfinite(out).all())

    # Sanity check against the plain-XLA f32 reference (loose tol: kernel uses bf16 MXU inputs).
    ref = mario_net_reference(params, x)
    max_err = float(jnp.max(jnp.abs(out - ref)))
    scale = float(jnp.max(jnp.abs(ref)))
    assert max_err <= 0.1 * max(scale, 1.0) + 0.1, (max_err, scale)

    print("KERNEL_OK")
</pallas_src>

<mosaic_0001>
module attributes {stable_mosaic.version = 11 : i64} {
  func.func @_conv_kernel(%arg0: i32, %arg1: memref<104x1024xbf16, #tpu.memory_space<vmem>>, %arg2: memref<1024x128xbf16, #tpu.memory_space<vmem>>, %arg3: memref<1x128xf32, #tpu.memory_space<vmem>>, %arg4: memref<512x64xbf16, #tpu.memory_space<vmem>>, %arg5: memref<1x64xf32, #tpu.memory_space<vmem>>, %arg6: memref<576x64xbf16, #tpu.memory_space<vmem>>, %arg7: memref<1x64xf32, #tpu.memory_space<vmem>>, %arg8: memref<1x49x64xbf16, #tpu.memory_space<vmem>>, %arg9: memref<104x128xbf16, #tpu.memory_space<vmem>>, %arg10: memref<89x512xbf16, #tpu.memory_space<vmem>>, %arg11: memref<89x64xbf16, #tpu.memory_space<vmem>>, %arg12: memref<67x576xbf16, #tpu.memory_space<vmem>>, %arg13: memref<67x64xbf16, #tpu.memory_space<vmem>>) attributes {dimension_semantics = [#tpu.dimension_semantics<parallel>], iteration_bounds = array<i64: 2>, scalar_prefetch = 0 : i64, scratch_operands = 5 : i64, tpu.core_type = #tpu.core_type<tc>, window_params = [{transform_indices = @transform_0, window_bounds = array<i64: 104, 1024>}, {pipeline_mode = #tpu.pipeline_mode<synchronous>, transform_indices = @transform_1, window_bounds = array<i64: 1024, 128>}, {pipeline_mode = #tpu.pipeline_mode<synchronous>, transform_indices = @transform_2, window_bounds = array<i64: 1, 128>}, {pipeline_mode = #tpu.pipeline_mode<synchronous>, transform_indices = @transform_3, window_bounds = array<i64: 512, 64>}, {pipeline_mode = #tpu.pipeline_mode<synchronous>, transform_indices = @transform_4, window_bounds = array<i64: 1, 64>}, {pipeline_mode = #tpu.pipeline_mode<synchronous>, transform_indices = @transform_5, window_bounds = array<i64: 576, 64>}, {pipeline_mode = #tpu.pipeline_mode<synchronous>, transform_indices = @transform_6, window_bounds = array<i64: 1, 64>}, {transform_indices = @transform_7, window_bounds = array<i64: 1, 49, 64>}]} {
    %c0 = arith.constant 0 : index
    %c0_0 = arith.constant 0 : index
    %0 = vector.load %arg1[%c0, %c0_0] : memref<104x1024xbf16, #tpu.memory_space<vmem>>, vector<104x1024xbf16>
    %c0_1 = arith.constant 0 : index
    %c0_2 = arith.constant 0 : index
    %1 = vector.load %arg2[%c0_1, %c0_2] : memref<1024x128xbf16, #tpu.memory_space<vmem>>, vector<1024x128xbf16>
    %cst = arith.constant dense<0.000000e+00> : vector<104x128xf32>
    %2 = tpu.matmul %0, %1, %cst {dimension_numbers = #tpu.dot_dimension_numbers<[1], [0], [0], [1], [0, 0, 1, 1], [], []>} : vector<104x1024xbf16>, vector<1024x128xbf16>, vector<104x128xf32> -> vector<104x128xf32>
    %c0_3 = arith.constant 0 : index
    %c0_4 = arith.constant 0 : index
    %3 = vector.load %arg3[%c0_3, %c0_4] : memref<1x128xf32, #tpu.memory_space<vmem>>, vector<1x128xf32>
    %4 = vector.broadcast %3 : vector<1x128xf32> to vector<104x128xf32>
    %5 = arith.addf %2, %4 : vector<104x128xf32>
    %cst_5 = arith.constant 0.000000e+00 : f32
    %6 = vector.broadcast %cst_5 : f32 to vector<104x128xf32>
    %7 = arith.maximumf %5, %6 : vector<104x128xf32>
    %8 = arith.truncf %7 : vector<104x128xf32> to vector<104x128xbf16>
    %c0_6 = arith.constant 0 : index
    %c0_7 = arith.constant 0 : index
    %9 = vector.load %arg9[%c0_6, %c0_7] : memref<104x128xbf16, #tpu.memory_space<vmem>>, vector<104x128xbf16>
    tpu.vector_store %arg9[%c0_6, %c0_7], %8 {strides = array<i32>} : memref<104x128xbf16, #tpu.memory_space<vmem>>, vector<104x128xbf16>,
    %c0_8 = arith.constant 0 : index
    %c0_9 = arith.constant 0 : index
    %10 = vector.load %arg9[%c0_8, %c0_9] : memref<104x128xbf16, #tpu.memory_space<vmem>>, vector<89x128xbf16>
    %c0_10 = arith.constant 0 : index
    %c0_11 = arith.constant 0 : index
    %11 = vector.load %arg10[%c0_10, %c0_11] : memref<89x512xbf16, #tpu.memory_space<vmem>>, vector<89x128xbf16>
    tpu.vector_store %arg10[%c0_10, %c0_11], %10 {strides = array<i32>} : memref<89x512xbf16, #tpu.memory_space<vmem>>, vector<89x128xbf16>,
    %c1 = arith.constant 1 : index
    %c0_12 = arith.constant 0 : index
    %12 = vector.load %arg9[%c1, %c0_12] : memref<104x128xbf16, #tpu.memory_space<vmem>>, vector<89x128xbf16>
    %c0_13 = arith.constant 0 : index
    %c128 = arith.constant 128 : index
    %13 = vector.load %arg10[%c0_13, %c128] : memref<89x512xbf16, #tpu.memory_space<vmem>>, vector<89x128xbf16>
    tpu.vector_store %arg10[%c0_13, %c128], %12 {strides = array<i32>} : memref<89x512xbf16, #tpu.memory_space<vmem>>, vector<89x128xbf16>,
    %c10 = arith.constant 10 : index
    %c0_14 = arith.constant 0 : index
    %14 = vector.load %arg9[%c10, %c0_14] : memref<104x128xbf16, #tpu.memory_space<vmem>>, vector<89x128xbf16>
    %c0_15 = arith.constant 0 : index
    %c256 = arith.constant 256 : index
    %15 = vector.load %arg10[%c0_15, %c256] : memref<89x512xbf16, #tpu.memory_space<vmem>>, vector<89x128xbf16>
    tpu.vector_store %arg10[%c0_15, %c256], %14 {strides = array<i32>} : memref<89x512xbf16, #tpu.memory_space<vmem>>, vector<89x128xbf16>,
    %c11 = arith.constant 11 : index
    %c0_16 = arith.constant 0 : index
    %16 = vector.load %arg9[%c11, %c0_16] : memref<104x128xbf16, #tpu.memory_space<vmem>>, vector<89x128xbf16>
    %c0_17 = arith.constant 0 : index
    %c384 = arith.constant 384 : index
    %17 = vector.load %arg10[%c0_17, %c384] : memref<89x512xbf16, #tpu.memory_space<vmem>>, vector<89x128xbf16>
    tpu.vector_store %arg10[%c0_17, %c384], %16 {strides = array<i32>} : memref<89x512xbf16, #tpu.memory_space<vmem>>, vector<89x128xbf16>,
    %c0_18 = arith.constant 0 : index
    %c0_19 = arith.constant 0 : index
    %18 = vector.load %arg10[%c0_18, %c0_19] : memref<89x512xbf16, #tpu.memory_space<vmem>>, vector<89x512xbf16>
    %c0_20 = arith.constant 0 : index
    %c0_21 = arith.constant 0 : index
    %19 = vector.load %arg4[%c0_20, %c0_21] : memref<512x64xbf16, #tpu.memory_space<vmem>>, vector<512x64xbf16>
    %cst_22 = arith.constant dense<0.000000e+00> : vector<89x64xf32>
    %20 = tpu.matmul %18, %19, %cst_22 {dimension_numbers = #tpu.dot_dimension_numbers<[1], [0], [0], [1], [0, 0, 1, 1], [], []>} : vector<89x512xbf16>, vector<512x64xbf16>, vector<89x64xf32> -> vector<89x64xf32>
    %c0_23 = arith.constant 0 : index
    %c0_24 = arith.constant 0 : index
    %21 = vector.load %arg5[%c0_23, %c0_24] : memref<1x64xf32, #tpu.memory_space<vmem>>, vector<1x64xf32>
    %22 = vector.broadcast %21 : vector<1x64xf32> to vector<89x64xf32>
    %23 = arith.addf %20, %22 : vector<89x64xf32>
    %cst_25 = arith.constant 0.000000e+00 : f32
    %24 = vector.broadcast %cst_25 : f32 to vector<89x64xf32>
    %25 = arith.maximumf %23, %24 : vector<89x64xf32>
    %26 = arith.truncf %25 : vector<89x64xf32> to vector<89x64xbf16>
    %c0_26 = arith.constant 0 : index
    %c0_27 = arith.constant 0 : index
    %27 = vector.load %arg11[%c0_26, %c0_27] : memref<89x64xbf16, #tpu.memory_space<vmem>>, vector<89x64xbf16>
    tpu.vector_store %arg11[%c0_26, %c0_27], %26 {strides = array<i32>} : memref<89x64xbf16, #tpu.memory_space<vmem>>, vector<89x64xbf16>,
    %c0_28 = arith.constant 0 : index
    %c0_29 = arith.constant 0 : index
    %28 = vector.load %arg11[%c0_28, %c0_29] : memref<89x64xbf16, #tpu.memory_space<vmem>>, vector<67x64xbf16>
    %c0_30 = arith.constant 0 : index
    %c0_31 = arith.constant 0 : index
    %29 = vector.load %arg12[%c0_30, %c0_31] : memref<67x576xbf16, #tpu.memory_space<vmem>>, vector<67x64xbf16>
    tpu.vector_store %arg12[%c0_30, %c0_31], %28 {strides = array<i32>} : memref<67x576xbf16, #tpu.memory_space<vmem>>, vector<67x64xbf16>,
    %c1_32 = arith.constant 1 : index
    %c0_33 = arith.constant 0 : index
    %30 = vector.load %arg11[%c1_32, %c0_33] : memref<89x64xbf16, #tpu.memory_space<vmem>>, vector<67x64xbf16>
    %c0_34 = arith.constant 0 : index
    %c64 = arith.constant 64 : index
    %31 = vector.load %arg12[%c0_34, %c64] : memref<67x576xbf16, #tpu.memory_space<vmem>>, vector<67x64xbf16>
    tpu.vector_store %arg12[%c0_34, %c64], %30 {strides = array<i32>} : memref<67x576xbf16, #tpu.memory_space<vmem>>, vector<67x64xbf16>,
    %c2 = arith.constant 2 : index
    %c0_35 = arith.constant 0 : index
    %32 = vector.load %arg11[%c2, %c0_35] : memref<89x64xbf16, #tpu.memory_space<vmem>>, vector<67x64xbf16>
    %c0_36 = arith.constant 0 : index
    %c128_37 = arith.constant 128 : index
    %33 = vector.load %arg12[%c0_36, %c128_37] : memref<67x576xbf16, #tpu.memory_space<vmem>>, vector<67x64xbf16>
    tpu.vector_store %arg12[%c0_36, %c128_37], %32 {strides = array<i32>} : memref<67x576xbf16, #tpu.memory_space<vmem>>, vector<67x64xbf16>,
    %c10_38 = arith.constant 10 : index
    %c0_39 = arith.constant 0 : index
    %34 = vector.load %arg11[%c10_38, %c0_39] : memref<89x64xbf16, #tpu.memory_space<vmem>>, vector<67x64xbf16>
    %c0_40 = arith.constant 0 : index
    %c192 = arith.constant 192 : index
    %35 = vector.load %arg12[%c0_40, %c192] : memref<67x576xbf16, #tpu.memory_space<vmem>>, vector<67x64xbf16>
    tpu.vector_store %arg12[%c0_40, %c192], %34 {strides = array<i32>} : memref<67x576xbf16, #tpu.memory_space<vmem>>, vector<67x64xbf16>,
    %c11_41 = arith.constant 11 : index
    %c0_42 = arith.constant 0 : index
    %36 = vector.load %arg11[%c11_41, %c0_42] : memref<89x64xbf16, #tpu.memory_space<vmem>>, vector<67x64xbf16>
    %c0_43 = arith.constant 0 : index
    %c256_44 = arith.constant 256 : index
    %37 = vector.load %arg12[%c0_43, %c256_44] : memref<67x576xbf16, #tpu.memory_space<vmem>>, vector<67x64xbf16>
    tpu.vector_store %arg12[%c0_43, %c256_44], %36 {strides = array<i32>} : memref<67x576xbf16, #tpu.memory_space<vmem>>, vector<67x64xbf16>,
    %c12 = arith.constant 12 : index
    %c0_45 = arith.constant 0 : index
    %38 = vector.load %arg11[%c12, %c0_45] : memref<89x64xbf16, #tpu.memory_space<vmem>>, vector<67x64xbf16>
    %c0_46 = arith.constant 0 : index
    %c320 = arith.constant 320 : index
    %39 = vector.load %arg12[%c0_46, %c320] : memref<67x576xbf16, #tpu.memory_space<vmem>>, vector<67x64xbf16>
    tpu.vector_store %arg12[%c0_46, %c320], %38 {strides = array<i32>} : memref<67x576xbf16, #tpu.memory_space<vmem>>, vector<67x64xbf16>,
    %c20 = arith.constant 20 : index
    %c0_47 = arith.constant 0 : index
    %40 = vector.load %arg11[%c20, %c0_47] : memref<89x64xbf16, #tpu.memory_space<vmem>>, vector<67x64xbf16>
    %c0_48 = arith.constant 0 : index
    %c384_49 = arith.constant 384 : index
    %41 = vector.load %arg12[%c0_48, %c384_49] : memref<67x576xbf16, #tpu.memory_space<vmem>>, vector<67x64xbf16>
    tpu.vector_store %arg12[%c0_48, %c384_49], %40 {strides = array<i32>} : memref<67x576xbf16, #tpu.memory_space<vmem>>, vector<67x64xbf16>,
    %c21 = arith.constant 21 : index
    %c0_50 = arith.constant 0 : index
    %42 = vector.load %arg11[%c21, %c0_50] : memref<89x64xbf16, #tpu.memory_space<vmem>>, vector<67x64xbf16>
    %c0_51 = arith.constant 0 : index
    %c448 = arith.constant 448 : index
    %43 = vector.load %arg12[%c0_51, %c448] : memref<67x576xbf16, #tpu.memory_space<vmem>>, vector<67x64xbf16>
    tpu.vector_store %arg12[%c0_51, %c448], %42 {strides = array<i32>} : memref<67x576xbf16, #tpu.memory_space<vmem>>, vector<67x64xbf16>,
    %c22 = arith.constant 22 : index
    %c0_52 = arith.constant 0 : index
    %44 = vector.load %arg11[%c22, %c0_52] : memref<89x64xbf16, #tpu.memory_space<vmem>>, vector<67x64xbf16>
    %c0_53 = arith.constant 0 : index
    %c512 = arith.constant 512 : index
    %45 = vector.load %arg12[%c0_53, %c512] : memref<67x576xbf16, #tpu.memory_space<vmem>>, vector<67x64xbf16>
    tpu.vector_store %arg12[%c0_53, %c512], %44 {strides = array<i32>} : memref<67x576xbf16, #tpu.memory_space<vmem>>, vector<67x64xbf16>,
    %c0_54 = arith.constant 0 : index
    %c0_55 = arith.constant 0 : index
    %46 = vector.load %arg12[%c0_54, %c0_55] : memref<67x576xbf16, #tpu.memory_space<vmem>>, vector<67x576xbf16>
    %c0_56 = arith.constant 0 : index
    %c0_57 = arith.constant 0 : index
    %47 = vector.load %arg6[%c0_56, %c0_57] : memref<576x64xbf16, #tpu.memory_space<vmem>>, vector<576x64xbf16>
    %cst_58 = arith.constant dense<0.000000e+00> : vector<67x64xf32>
    %48 = tpu.matmul %46, %47, %cst_58 {dimension_numbers = #tpu.dot_dimension_numbers<[1], [0], [0], [1], [0, 0, 1, 1], [], []>} : vector<67x576xbf16>, vector<576x64xbf16>, vector<67x64xf32> -> vector<67x64xf32>
    %c0_59 = arith.constant 0 : index
    %c0_60 = arith.constant 0 : index
    %49 = vector.load %arg7[%c0_59, %c0_60] : memref<1x64xf32, #tpu.memory_space<vmem>>, vector<1x64xf32>
    %50 = vector.broadcast %49 : vector<1x64xf32> to vector<67x64xf32>
    %51 = arith.addf %48, %50 : vector<67x64xf32>
    %cst_61 = arith.constant 0.000000e+00 : f32
    %52 = vector.broadcast %cst_61 : f32 to vector<67x64xf32>
    %53 = arith.maximumf %51, %52 : vector<67x64xf32>
    %54 = arith.truncf %53 : vector<67x64xf32> to vector<67x64xbf16>
    %c0_62 = arith.constant 0 : index
    %c0_63 = arith.constant 0 : index
    %55 = vector.load %arg13[%c0_62, %c0_63] : memref<67x64xbf16, #tpu.memory_space<vmem>>, vector<67x64xbf16>
    tpu.vector_store %arg13[%c0_62, %c0_63], %54 {strides = array<i32>} : memref<67x64xbf16, #tpu.memory_space<vmem>>, vector<67x64xbf16>,
    %c0_64 = arith.constant 0 : index
    %c0_65 = arith.constant 0 : index
    %56 = vector.load %arg13[%c0_64, %c0_65] : memref<67x64xbf16, #tpu.memory_space<vmem>>, vector<7x64xbf16>
    %c0_66 = arith.constant 0 : index
    %c0_67 = arith.constant 0 : index
    %c0_68 = arith.constant 0 : index
    %57 = vector.load %arg8[%c0_66, %c0_67, %c0_68] : memref<1x49x64xbf16, #tpu.memory_space<vmem>>, vector<1x7x64xbf16>
    %58 = vector.shape_cast %57 : vector<1x7x64xbf16> to vector<7x64xbf16>
    %59 = vector.shape_cast %56 : vector<7x64xbf16> to vector<1x7x64xbf16>
    tpu.vector_store %arg8[%c0_66, %c0_67, %c0_68], %59 {strides = array<i32>} : memref<1x49x64xbf16, #tpu.memory_space<vmem>>, vector<1x7x64xbf16>,
    %c10_69 = arith.constant 10 : index
    %c0_70 = arith.constant 0 : index
    %60 = vector.load %arg13[%c10_69, %c0_70] : memref<67x64xbf16, #tpu.memory_space<vmem>>, vector<7x64xbf16>
    %c0_71 = arith.constant 0 : index
    %c7 = arith.constant 7 : index
    %c0_72 = arith.constant 0 : index
    %61 = vector.load %arg8[%c0_71, %c7, %c0_72] : memref<1x49x64xbf16, #tpu.memory_space<vmem>>, vector<1x7x64xbf16>
    %62 = vector.shape_cast %61 : vector<1x7x64xbf16> to vector<7x64xbf16>
    %63 = vector.shape_cast %60 : vector<7x64xbf16> to vector<1x7x64xbf16>
    tpu.vector_store %arg8[%c0_71, %c7, %c0_72], %63 {strides = array<i32>} : memref<1x49x64xbf16, #tpu.memory_space<vmem>>, vector<1x7x64xbf16>,
    %c20_73 = arith.constant 20 : index
    %c0_74 = arith.constant 0 : index
    %64 = vector.load %arg13[%c20_73, %c0_74] : memref<67x64xbf16, #tpu.memory_space<vmem>>, vector<7x64xbf16>
    %c0_75 = arith.constant 0 : index
    %c14 = arith.constant 14 : index
    %c0_76 = arith.constant 0 : index
    %65 = vector.load %arg8[%c0_75, %c14, %c0_76] : memref<1x49x64xbf16, #tpu.memory_space<vmem>>, vector<1x7x64xbf16>
    %66 = vector.shape_cast %65 : vector<1x7x64xbf16> to vector<7x64xbf16>
    %67 = vector.shape_cast %64 : vector<7x64xbf16> to vector<1x7x64xbf16>
    tpu.vector_store %arg8[%c0_75, %c14, %c0_76], %67 {strides = array<i32>} : memref<1x49x64xbf16, #tpu.memory_space<vmem>>, vector<1x7x64xbf16>,
    %c30 = arith.constant 30 : index
    %c0_77 = arith.constant 0 : index
    %68 = vector.load %arg13[%c30, %c0_77] : memref<67x64xbf16, #tpu.memory_space<vmem>>, vector<7x64xbf16>
    %c0_78 = arith.constant 0 : index
    %c21_79 = arith.constant 21 : index
    %c0_80 = arith.constant 0 : index
    %69 = vector.load %arg8[%c0_78, %c21_79, %c0_80] : memref<1x49x64xbf16, #tpu.memory_space<vmem>>, vector<1x7x64xbf16>
    %70 = vector.shape_cast %69 : vector<1x7x64xbf16> to vector<7x64xbf16>
    %71 = vector.shape_cast %68 : vector<7x64xbf16> to vector<1x7x64xbf16>
    tpu.vector_store %arg8[%c0_78, %c21_79, %c0_80], %71 {strides = array<i32>} : memref<1x49x64xbf16, #tpu.memory_space<vmem>>, vector<1x7x64xbf16>,
    %c40 = arith.constant 40 : index
    %c0_81 = arith.constant 0 : index
    %72 = vector.load %arg13[%c40, %c0_81] : memref<67x64xbf16, #tpu.memory_space<vmem>>, vector<7x64xbf16>
    %c0_82 = arith.constant 0 : index
    %c28 = arith.constant 28 : index
    %c0_83 = arith.constant 0 : index
    %73 = vector.load %arg8[%c0_82, %c28, %c0_83] : memref<1x49x64xbf16, #tpu.memory_space<vmem>>, vector<1x7x64xbf16>
    %74 = vector.shape_cast %73 : vector<1x7x64xbf16> to vector<7x64xbf16>
    %75 = vector.shape_cast %72 : vector<7x64xbf16> to vector<1x7x64xbf16>
    tpu.vector_store %arg8[%c0_82, %c28, %c0_83], %75 {strides = array<i32>} : memref<1x49x64xbf16, #tpu.memory_space<vmem>>, vector<1x7x64xbf16>,
    %c50 = arith.constant 50 : index
    %c0_84 = arith.constant 0 : index
    %76 = vector.load %arg13[%c50, %c0_84] : memref<67x64xbf16, #tpu.memory_space<vmem>>, vector<7x64xbf16>
    %c0_85 = arith.constant 0 : index
    %c35 = arith.constant 35 : index
    %c0_86 = arith.constant 0 : index
    %77 = vector.load %arg8[%c0_85, %c35, %c0_86] : memref<1x49x64xbf16, #tpu.memory_space<vmem>>, vector<1x7x64xbf16>
    %78 = vector.shape_cast %77 : vector<1x7x64xbf16> to vector<7x64xbf16>
    %79 = vector.shape_cast %76 : vector<7x64xbf16> to vector<1x7x64xbf16>
    tpu.vector_store %arg8[%c0_85, %c35, %c0_86], %79 {strides = array<i32>} : memref<1x49x64xbf16, #tpu.memory_space<vmem>>, vector<1x7x64xbf16>,
    %c60 = arith.constant 60 : index
    %c0_87 = arith.constant 0 : index
    %80 = vector.load %arg13[%c60, %c0_87] : memref<67x64xbf16, #tpu.memory_space<vmem>>, vector<7x64xbf16>
    %c0_88 = arith.constant 0 : index
    %c42 = arith.constant 42 : index
    %c0_89 = arith.constant 0 : index
    %81 = vector.load %arg8[%c0_88, %c42, %c0_89] : memref<1x49x64xbf16, #tpu.memory_space<vmem>>, vector<1x7x64xbf16>
    %82 = vector.shape_cast %81 : vector<1x7x64xbf16> to vector<7x64xbf16>
    %83 = vector.shape_cast %80 : vector<7x64xbf16> to vector<1x7x64xbf16>
    tpu.vector_store %arg8[%c0_88, %c42, %c0_89], %83 {strides = array<i32>} : memref<1x49x64xbf16, #tpu.memory_space<vmem>>, vector<1x7x64xbf16>,
    return
  }
  func.func @transform_0(%arg0: i32) -> (i32, i32) {
    %c0_i32 = arith.constant 0 : i32
    %c0_i32_0 = arith.constant 0 : i32
    return %arg0, %c0_i32 : i32, i32
  }
  func.func @transform_1(%arg0: i32) -> (i32, i32) {
    %c0_i32 = arith.constant 0 : i32
    %c0_i32_0 = arith.constant 0 : i32
    %c0_i32_1 = arith.constant 0 : i32
    return %c0_i32, %c0_i32_0 : i32, i32
  }
  func.func @transform_2(%arg0: i32) -> (i32, i32) {
    %c0_i32 = arith.constant 0 : i32
    %c0_i32_0 = arith.constant 0 : i32
    %c0_i32_1 = arith.constant 0 : i32
    return %c0_i32, %c0_i32_0 : i32, i32
  }
  func.func @transform_3(%arg0: i32) -> (i32, i32) {
    %c0_i32 = arith.constant 0 : i32
    %c0_i32_0 = arith.constant 0 : i32
    %c0_i32_1 = arith.constant 0 : i32
    return %c0_i32, %c0_i32_0 : i32, i32
  }
  func.func @transform_4(%arg0: i32) -> (i32, i32) {
    %c0_i32 = arith.constant 0 : i32
    %c0_i32_0 = arith.constant 0 : i32
    %c0_i32_1 = arith.constant 0 : i32
    return %c0_i32, %c0_i32_0 : i32, i32
  }
  func.func @transform_5(%arg0: i32) -> (i32, i32) {
    %c0_i32 = arith.constant 0 : i32
    %c0_i32_0 = arith.constant 0 : i32
    %c0_i32_1 = arith.constant 0 : i32
    return %c0_i32, %c0_i32_0 : i32, i32
  }
  func.func @transform_6(%arg0: i32) -> (i32, i32) {
    %c0_i32 = arith.constant 0 : i32
    %c0_i32_0 = arith.constant 0 : i32
    %c0_i32_1 = arith.constant 0 : i32
    return %c0_i32, %c0_i32_0 : i32, i32
  }
  func.func @transform_7(%arg0: i32) -> (i32, i32, i32) {
    %c0_i32 = arith.constant 0 : i32
    %c0_i32_0 = arith.constant 0 : i32
    %c0_i32_1 = arith.constant 0 : i32
    return %arg0, %c0_i32, %c0_i32_0 : i32, i32, i32
  }
}

module attributes {stable_mosaic.version = 11 : i64} {
  func.func @_fc_kernel(%arg0: i32, %arg1: memref<8x3136xbf16, #tpu.memory_space<vmem>>, %arg2: memref<3136x512xbf16, #tpu.memory_space<vmem>>, %arg3: memref<1x512xf32, #tpu.memory_space<vmem>>, %arg4: memref<512x128xbf16, #tpu.memory_space<vmem>>, %arg5: memref<1x128xf32, #tpu.memory_space<vmem>>, %arg6: memref<8x128xf32, #tpu.memory_space<vmem>>) attributes {dimension_semantics = [#tpu.dimension_semantics<parallel>], iteration_bounds = array<i64: 1>, scalar_prefetch = 0 : i64, scratch_operands = 0 : i64, tpu.core_type = #tpu.core_type<tc>, window_params = [{transform_indices = @transform_0, window_bounds = array<i64: 8, 3136>}, {pipeline_mode = #tpu.pipeline_mode<synchronous>, transform_indices = @transform_1, window_bounds = array<i64: 3136, 512>}, {pipeline_mode = #tpu.pipeline_mode<synchronous>, transform_indices = @transform_2, window_bounds = array<i64: 1, 512>}, {pipeline_mode = #tpu.pipeline_mode<synchronous>, transform_indices = @transform_3, window_bounds = array<i64: 512, 128>}, {pipeline_mode = #tpu.pipeline_mode<synchronous>, transform_indices = @transform_4, window_bounds = array<i64: 1, 128>}, {transform_indices = @transform_5, window_bounds = array<i64: 8, 128>}]} {
    %c0 = arith.constant 0 : index
    %c0_0 = arith.constant 0 : index
    %0 = vector.load %arg1[%c0, %c0_0] : memref<8x3136xbf16, #tpu.memory_space<vmem>>, vector<8x3136xbf16>
    %c0_1 = arith.constant 0 : index
    %c0_2 = arith.constant 0 : index
    %1 = vector.load %arg2[%c0_1, %c0_2] : memref<3136x512xbf16, #tpu.memory_space<vmem>>, vector<3136x512xbf16>
    %cst = arith.constant dense<0.000000e+00> : vector<8x512xf32>
    %2 = tpu.matmul %0, %1, %cst {dimension_numbers = #tpu.dot_dimension_numbers<[1], [0], [0], [1], [0, 0, 1, 1], [], []>} : vector<8x3136xbf16>, vector<3136x512xbf16>, vector<8x512xf32> -> vector<8x512xf32>
    %c0_3 = arith.constant 0 : index
    %c0_4 = arith.constant 0 : index
    %3 = vector.load %arg3[%c0_3, %c0_4] : memref<1x512xf32, #tpu.memory_space<vmem>>, vector<1x512xf32>
    %4 = vector.broadcast %3 : vector<1x512xf32> to vector<8x512xf32>
    %5 = arith.addf %2, %4 : vector<8x512xf32>
    %cst_5 = arith.constant 0.000000e+00 : f32
    %6 = vector.broadcast %cst_5 : f32 to vector<8x512xf32>
    %7 = arith.maximumf %5, %6 : vector<8x512xf32>
    %8 = arith.truncf %7 : vector<8x512xf32> to vector<8x512xbf16>
    %c0_6 = arith.constant 0 : index
    %c0_7 = arith.constant 0 : index
    %9 = vector.load %arg4[%c0_6, %c0_7] : memref<512x128xbf16, #tpu.memory_space<vmem>>, vector<512x128xbf16>
    %cst_8 = arith.constant dense<0.000000e+00> : vector<8x128xf32>
    %10 = tpu.matmul %8, %9, %cst_8 {dimension_numbers = #tpu.dot_dimension_numbers<[1], [0], [0], [1], [0, 0, 1, 1], [], []>} : vector<8x512xbf16>, vector<512x128xbf16>, vector<8x128xf32> -> vector<8x128xf32>
    %c0_9 = arith.constant 0 : index
    %c0_10 = arith.constant 0 : index
    %11 = vector.load %arg5[%c0_9, %c0_10] : memref<1x128xf32, #tpu.memory_space<vmem>>, vector<1x128xf32>
    %12 = vector.broadcast %11 : vector<1x128xf32> to vector<8x128xf32>
    %13 = arith.addf %10, %12 : vector<8x128xf32>
    %c0_11 = arith.constant 0 : index
    %c0_12 = arith.constant 0 : index
    %14 = vector.load %arg6[%c0_11, %c0_12] : memref<8x128xf32, #tpu.memory_space<vmem>>, vector<8x128xf32>
    tpu.vector_store %arg6[%c0_11, %c0_12], %13 {strides = array<i32>} : memref<8x128xf32, #tpu.memory_space<vmem>>, vector<8x128xf32>,
    return
  }
  func.func @transform_0(%arg0: i32) -> (i32, i32) {
    %c0_i32 = arith.constant 0 : i32
    %c0_i32_0 = arith.constant 0 : i32
    return %arg0, %c0_i32 : i32, i32
  }
  func.func @transform_1(%arg0: i32) -> (i32, i32) {
    %c0_i32 = arith.constant 0 : i32
    %c0_i32_0 = arith.constant 0 : i32
    %c0_i32_1 = arith.constant 0 : i32
    return %c0_i32, %c0_i32_0 : i32, i32
  }
  func.func @transform_2(%arg0: i32) -> (i32, i32) {
    %c0_i32 = arith.constant 0 : i32
    %c0_i32_0 = arith.constant 0 : i32
    %c0_i32_1 = arith.constant 0 : i32
    return %c0_i32, %c0_i32_0 : i32, i32
  }
  func.func @transform_3(%arg0: i32) -> (i32, i32) {
    %c0_i32 = arith.constant 0 : i32
    %c0_i32_0 = arith.constant 0 : i32
    %c0_i32_1 = arith.constant 0 : i32
    return %c0_i32, %c0_i32_0 : i32, i32
  }
  func.func @transform_4(%arg0: i32) -> (i32, i32) {
    %c0_i32 = arith.constant 0 : i32
    %c0_i32_0 = arith.constant 0 : i32
    %c0_i32_1 = arith.constant 0 : i32
    return %c0_i32, %c0_i32_0 : i32, i32
  }
  func.func @transform_5(%arg0: i32) -> (i32, i32) {
    %c0_i32 = arith.constant 0 : i32
    %c0_i32_0 = arith.constant 0 : i32
    return %arg0, %c0_i32 : i32, i32
  }
}

</mosaic_0001>

<bundles_post_ra>
// kernel: mario_net_forward.2
= control target key start
LH: loop header
LB: loop body
LE: loop exit
PB: predicated region body
PF: predicated region fallthrough
CT: control target
= control target key end

     0   :  { %s5443_s24 = smov 0   ;;  %s6859_s0 = inlined_call_operand.vmem [shape: bf16[208,1024], index: 0, kind: input, shape index: {}]   ;;  %s6860_s1 = inlined_call_operand.vmem [shape: bf16[1024,128], index: 1, kind: input, shape index: {}]   ;;  %s6861_s2 = inlined_call_operand.vmem [shape: f32[1,128], index: 2, kind: input, shape index: {}]   ;;  %s6862_s3 = inlined_call_operand.vmem [shape: bf16[512,64], index: 3, kind: input, shape index: {}]   ;;  %s6863_s4 = inlined_call_operand.vmem [shape: f32[1,64], index: 4, kind: input, shape index: {}]   ;;  %s6864_s5 = inlined_call_operand.vmem [shape: bf16[576,64], index: 5, kind: input, shape index: {}]   ;;  %s6865_s6 = inlined_call_operand.vmem [shape: f32[1,64], index: 6, kind: input, shape index: {}]   ;;  %s6866_s7 = inlined_call_operand.vmem [shape: bf16[2,49,64], index: 7, kind: output, shape index: {}]  }
   0x1 LB: > { %s5449_s25 = sadd.s32 4294967295, %s5398_s24   ;;  %p4340_p0 = scmp.ge.s32.totalorder %s5398_s24, 1  ;;  %s5398_s24 = sphi %s5443_s24, %s17_s24  }
   0x2   : > { %p239_p1 = scmp.lt.s32.totalorder %s5398_s24, 3 }
   0x4   : > { %p240_p2 = pnand %p4340_p0, %p239_p1 }
   0x5   : > { %v5188_v0 = vld [vmem:[%s6860_s1 + $0x40] sm:$0xff] (!%p240_p2)   ;;  %v5192_v4 = vld [vmem:[%s6860_s1 + $0x48] sm:$0xff] (!%p240_p2)   ;;  %v5196_v8 = vld [vmem:[%s6860_s1 + $0x50] sm:$0xff] (!%p240_p2)   ;;  %s272_s12 = smul.u32 (!%p240_p2), 13, %s5449_s25  ;;  %vm1596_vm0 = vsmask.f32 (!%p240_p2), 3328 }
   0x6   : > { %243 = sbr.rel (%p240_p2) target bundleno = 1079 (0x437), region = 48  ;;  %v5189_v1 = vld [vmem:[%s6860_s1 + $0xc0] sm:$0xff] (!%p240_p2)   ;;  %4703 = vmatprep.subr.bf16.mxu0 (!%p240_p2), %v5188_v0  ;;  %v5193_v5 = vld [vmem:[%s6860_s1 + $0xc8] sm:$0xff] (!%p240_p2)   ;;  %v5197_v9 = vld [vmem:[%s6860_s1 + $0xd0] sm:$0xff] (!%p240_p2)   ;;  %vm1597_vm1 = vsmask.f32 (!%p240_p2), 7440 }
   0x7   : > { %v5190_v2 = vld [vmem:[%s6860_s1] sm:$0xff] (!%p240_p2)   ;;  %4761 = vmatprep.subr.bf16.mxu1 (!%p240_p2), %v5189_v1  ;;  %v5194_v6 = vld [vmem:[%s6860_s1 + $0x8] sm:$0xff] (!%p240_p2)   ;;  %v5198_v10 = vld [vmem:[%s6860_s1 + $0x10] sm:$0xff] (!%p240_p2)   ;;  %p273_p3 = scmp.lt.s32.totalorder (!%p240_p2), %s272_s12, 25  ;;  %vm1767_vm2 = vcmask (!%p240_p2), 1042432   ;;  %vm1768_vm3 = vcmask (!%p240_p2), 1046532  }
   0x8   : > { %v5191_v3 = vld [vmem:[%s6860_s1 + $0x80] sm:$0xff] (!%p240_p2)   ;;  %4704 = vmatpush3.bf16.msra.mxu0 (!%p240_p2), %v5190_v2  ;;  %v5195_v7 = vld [vmem:[%s6860_s1 + $0x88] sm:$0xff] (!%p240_p2)   ;;  %v5199_v11 = vld [vmem:[%s6860_s1 + $0x90] sm:$0xff] (!%p240_p2)   ;;  %vm1843_vm4 = vsmask.f32 (!%p240_p2), 2304  ;;  %vm1578_vm9 = vcmask (!%p240_p2), 1040384  }
   0x9   : > { %4762 = vmatpush3.bf16.msra.mxu1 (!%p240_p2), %v5191_v3  ;;  %4705 = vmatprep.subr.bf16.mxu0 (!%p240_p2), %v5192_v4  ;;  %v5200_v12 = vld [vmem:[%s6860_s1 + $0x58] sm:$0xff] (!%p240_p2)   ;;  %v5204_v16 = vld [vmem:[%s6860_s1 + $0x60] sm:$0xff] (!%p240_p2)   ;;  %v5208_v20 = vld [vmem:[%s6860_s1 + $0x68] sm:$0xff] (!%p240_p2)   ;;  %vm1844_vm5 = vsmask.f32 (!%p240_p2), 6416  ;;  %vm2620_vm12 = vcmask (!%p240_p2), 519168  }
   0xa   : > { %4763 = vmatprep.subr.bf16.mxu1 (!%p240_p2), %v5193_v5  ;;  %v5201_v13 = vld [vmem:[%s6860_s1 + $0xd8] sm:$0xff] (!%p240_p2)   ;;  %v5205_v17 = vld [vmem:[%s6860_s1 + $0xe0] sm:$0xff] (!%p240_p2)   ;;  %v5209_v21 = vld [vmem:[%s6860_s1 + $0xe8] sm:$0xff] (!%p240_p2)   ;;  %vm1579_vm10 = vsmask.f32 (!%p240_p2), 256  ;;  %vm3370_vm13 = vcmask (!%p240_p2), 1044484  }
   0xb   : > { %v5202_v14 = vld [vmem:[%s6860_s1 + $0x18] sm:$0xff] (!%p240_p2)   ;;  %v5206_v18 = vld [vmem:[%s6860_s1 + $0x20] sm:$0xff] (!%p240_p2)   ;;  %v5210_v22 = vld [vmem:[%s6860_s1 + $0x28] sm:$0xff] (!%p240_p2)   ;;  %s5400_s23 = smov (!%p240_p2), 64   ;;  %vm3081_vm14 = vcmask (!%p240_p2), 1041408   ;;  %vm3082_vm15 = vcmask (!%p240_p2), 1045508  }
   0xc   : > { %4706 = vmatpush3.bf16.msra.mxu0 (!%p240_p2), %v5194_v6  ;;  %v5203_v15 = vld [vmem:[%s6860_s1 + $0x98] sm:$0xff] (!%p240_p2)   ;;  %v5207_v19 = vld [vmem:[%s6860_s1 + $0xa0] sm:$0xff] (!%p240_p2)   ;;  %v5211_v23 = vld [vmem:[%s6860_s1 + $0xa8] sm:$0xff] (!%p240_p2)   ;;  %p279_p4 = scmp.lt.s32.totalorder (!%p240_p2), %s5449_s25, 1 }
   0xd   : > { %4764 = vmatpush3.bf16.msra.mxu1 %v5195_v7  ;;  %4707 = vmatprep.subr.bf16.mxu0 %v5196_v8  ;;  %s6892_s12 = smov (!%p273_p3, %s272_s12), 25  ;;  %v5212_v24 = vld [vmem:[%s6860_s1 + $0x70] sm:$0xff]   ;;  %v5216_v28 = vld [vmem:[%s6860_s1 + $0x78] sm:$0xff]   ;;  %v5220_v40 = vld [vmem:[%s6860_s1 + $0x140] sm:$0xff]  }
   0xe   : > { %4765 = vmatprep.subr.bf16.mxu1 %v5197_v9  ;;  %v5213_v25 = vld [vmem:[%s6860_s1 + $0xf0] sm:$0xff]   ;;  %s4633_s17 = sshll.u32 %s6892_s12, 5  ;;  %v5217_v29 = vld [vmem:[%s6860_s1 + $0xf8] sm:$0xff]   ;;  %v5221_v41 = vld [vmem:[%s6860_s1 + $0x100] sm:$0xff]   ;;  %s6894_s25 = smov (!%p279_p4, %s5449_s25), 1 }
   0xf   : > { %v5214_v26 = vld [vmem:[%s6860_s1 + $0x30] sm:$0xff]   ;;  %s5547_s28 = scalar_lea.vmem %s6859_s0, %s4633_s17  ;;  %v5218_v30 = vld [vmem:[%s6860_s1 + $0x38] sm:$0xff]   ;;  %v5222_v42 = vld [vmem:[%s6860_s1 + $0x1c0] sm:$0xff]   ;;  %s5176_s10 = smul.u32 28, %s6894_s25 }
  0x10   : > { %4708 = vmatpush3.bf16.msra.mxu0 %v5198_v10  ;;  %v5215_v27 = vld [vmem:[%s6860_s1 + $0xb0] sm:$0xff]   ;;  %v5219_v31 = vld [vmem:[%s6860_s1 + $0xb8] sm:$0xff]   ;;  %v285_v32 = vld [vmem:[%s5547_s28] sm:$0xff] }
  0x11   : > { %4766 = vmatpush3.bf16.msra.mxu1 %v5199_v11  ;;  %4709 = vmatprep.subr.bf16.mxu0 %v5200_v12  ;;  %v289_v33 = vld [vmem:[%s5547_s28 + $0x20] sm:$0xff]  ;;  %v286_v34 = vld [vmem:[%s5547_s28 + $0x8] sm:$0xff]  ;;  %v5228_v56 = vld [vmem:[%s6860_s1 + $0x150] sm:$0xff]   ;;  %s6788_s14 = scalar_lea.vmem %s6866_s7, %s5176_s10 }
  0x12   : > { %4767 = vmatprep.subr.bf16.mxu1 %v5201_v13  ;;  %v4345_v35 = vcombine.low %v285_v32, %v289_v33  ;;  %v4346_v36 = vcombine.high %v285_v32, %v289_v33  ;;  %v290_v37 = vld [vmem:[%s5547_s28 + $0x28] sm:$0xff]  ;;  %v5223_v43 = vld [vmem:[%s6860_s1 + $0x180] sm:$0xff]   ;;  %v5229_v63 = vld [vmem:[%s6860_s1 + $0x110] sm:$0xff]  }
  0x13   : > { %v4347_v38 = vcombine.low %v286_v34, %v290_v37  ;;  %v4348_v39 = vcombine.high %v286_v34, %v290_v37  ;;  %v293_v44 = vld [vmem:[%s5547_s28 + $0x40] sm:$0xff]  ;;  %v294_v47 = vld [vmem:[%s5547_s28 + $0x48] sm:$0xff]  ;;  %v5230_v0 = vld [vmem:[%s6860_s1 + $0x1d0] sm:$0xff]  }
  0x14   : > { %4710 = vmatpush3.bf16.msra.mxu0 %v5202_v14  ;;  %1156 = vmatprep.mubr.bf16.mxu0 %v4346_v36  ;;  %v297_v45 = vld [vmem:[%s5547_s28 + $0x60] sm:$0xff]  ;;  %v298_v48 = vld [vmem:[%s5547_s28 + $0x68] sm:$0xff]  ;;  %v5231_v1 = vld [vmem:[%s6860_s1 + $0x190] sm:$0xff]  }
  0x15   : > { %4768 = vmatpush3.bf16.msra.mxu1 %v5203_v15  ;;  %4711 = vmatprep.subr.bf16.mxu0 %v5204_v16  ;;  %v4354_v46 = vcombine.high %v293_v44, %v297_v45  ;;  %v4356_v49 = vcombine.high %v294_v47, %v298_v48  ;;  %v5224_v50 = vld [vmem:[%s6860_s1 + $0x148] sm:$0xff]   ;;  %v4353_v51 = vcombine.low %v293_v44, %v297_v45  ;;  %v301_v57 = vld [vmem:[%s5547_s28 + $0x80] sm:$0xff]  ;;  %v5232_v3 = vld [vmem:[%s6860_s1 + $0x158] sm:$0xff]  }
  0x16   : > { %4769 = vmatprep.subr.bf16.mxu1 %v5205_v17  ;;  %1244 = vmatprep.mubr.bf16.mxu1 %v4348_v39  ;;  %v5225_v52 = vld [vmem:[%s6860_s1 + $0x108] sm:$0xff]   ;;  %v4355_v53 = vcombine.low %v294_v47, %v298_v48  ;;  %v305_v58 = vld [vmem:[%s5547_s28 + $0xa0] sm:$0xff]  ;;  %v5233_v5 = vld [vmem:[%s6860_s1 + $0x118] sm:$0xff]  }
  0x17   : > { %v5226_v54 = vld [vmem:[%s6860_s1 + $0x1c8] sm:$0xff]   ;;  %v4362_v61 = vcombine.high %v301_v57, %v305_v58  ;;  %v4361_v2 = vcombine.low %v301_v57, %v305_v58  ;;  %v309_v6 = vld [vmem:[%s5547_s28 + $0xc0] sm:$0xff]  ;;  %v5234_v12 = vld [vmem:[%s6860_s1 + $0x1d8] sm:$0xff]  }
  0x18   : > { %4712 = vmatpush3.bf16.msra.mxu0 %v5206_v18  ;;  %v5227_v55 = vld [vmem:[%s6860_s1 + $0x188] sm:$0xff]   ;;  %v313_v7 = vld [vmem:[%s5547_s28 + $0xe0] sm:$0xff]  ;;  %v5235_v13 = vld [vmem:[%s6860_s1 + $0x198] sm:$0xff]  }
  0x19   : > { %4770 = vmatpush3.bf16.msra.mxu1 %v5207_v19  ;;  %4713 = vmatprep.subr.bf16.mxu0 %v5208_v20  ;;  %v302_v59 = vld [vmem:[%s5547_s28 + $0x88] sm:$0xff]  ;;  %v4370_v9 = vcombine.high %v309_v6, %v313_v7  ;;  %v5236_v14 = vld [vmem:[%s6860_s1 + $0x160] sm:$0xff]   ;;  %v4369_v16 = vcombine.low %v309_v6, %v313_v7  ;;  %v5252_v44 = vld [vmem:[%s6860_s1 + $0x178] sm:$0xff]  }
  0x1a   : > { %4771 = vmatprep.subr.bf16.mxu1 %v5209_v21  ;;  %v306_v60 = vld [vmem:[%s5547_s28 + $0xa8] sm:$0xff]  ;;  %v5237_v15 = vld [vmem:[%s6860_s1 + $0x120] sm:$0xff]   ;;  %v5253_v45 = vld [vmem:[%s6860_s1 + $0x138] sm:$0xff]  }
  0x1b   : > { %v4364_v62 = vcombine.high %v302_v59, %v306_v60  ;;  %v4363_v4 = vcombine.low %v302_v59, %v306_v60  ;;  %v310_v8 = vld [vmem:[%s5547_s28 + $0xc8] sm:$0xff]  ;;  %v5238_v17 = vld [vmem:[%s6860_s1 + $0x1e0] sm:$0xff]   ;;  %v5255_v48 = vld [vmem:[%s6860_s1 + $0x1b8] sm:$0xff]  }
  0x1c   : > { %4714 = vmatpush3.bf16.msra.mxu0 %v5210_v22  ;;  %v314_v10 = vld [vmem:[%s5547_s28 + $0xe8] sm:$0xff]  ;;  %v317_v18 = vld [vmem:[%s5547_s28 + $0x100] sm:$0xff]  ;;  %v295_v60 = vld [vmem:[%s5547_s28 + $0x50] sm:$0xff] }
  0x1d   : > { %4772 = vmatpush3.bf16.msra.mxu1 %v5211_v23  ;;  %4715 = vmatprep.subr.bf16.mxu0 %v5212_v24  ;;  %v4372_v11 = vcombine.high %v310_v8, %v314_v10  ;;  %v321_v19 = vld [vmem:[%s5547_s28 + $0x120] sm:$0xff]  ;;  %v4371_v20 = vcombine.low %v310_v8, %v314_v10  ;;  %v318_v22 = vld [vmem:[%s5547_s28 + $0x108] sm:$0xff]  ;;  %v304_v6 = vld [vmem:[%s5547_s28 + $0x98] sm:$0xff] }
  0x1e   : > { %4773 = vmatprep.subr.bf16.mxu1 %v5213_v25  ;;  %v4378_v21 = vcombine.high %v317_v18, %v321_v19  ;;  %v322_v23 = vld [vmem:[%s5547_s28 + $0x128] sm:$0xff]  ;;  %v5239_v25 = vld [vmem:[%s6860_s1 + $0x1a0] sm:$0xff]   ;;  %v4377_v34 = vcombine.low %v317_v18, %v321_v19  ;;  %v308_v7 = vld [vmem:[%s5547_s28 + $0xb8] sm:$0xff] }
  0x1f   : > { %v4380_v24 = vcombine.high %v318_v22, %v322_v23  ;;  %v326_v32 = vld [vmem:[%s5547_s28 + $0x148] sm:$0xff]  ;;  %v4379_v36 = vcombine.low %v318_v22, %v322_v23  ;;  %v320_v22 = vld [vmem:[%s5547_s28 + $0x118] sm:$0xff]  ;;  %vm5879_vm6 = vmor %vm1596_vm0, %vm1597_vm1 }
  0x20   : > { %4716 = vmatpush3.bf16.msra.mxu0 %v5214_v26  ;;  %v5240_v26 = vld [vmem:[%s6860_s1 + $0x168] sm:$0xff]   ;;  %v324_v23 = vld [vmem:[%s5547_s28 + $0x138] sm:$0xff]  ;;  %vm5887_vm7 = vmor %vm1767_vm2, %vm1768_vm3  ;;  %vm2655_vm3 = vsmask.f32 1280 }
  0x21   : > { %4774 = vmatpush3.bf16.msra.mxu1 %v5215_v27  ;;  %4717 = vmatprep.subr.bf16.mxu0 %v5216_v28  ;;  %v5241_v27 = vld [vmem:[%s6860_s1 + $0x128] sm:$0xff]   ;;  %vm5895_vm8 = vmor %vm1843_vm4, %vm1844_vm5  ;;  %vm3221_vm5 = vsmask.f32 5392 }
  0x22   : > { %4775 = vmatprep.subr.bf16.mxu1 %v5217_v29  ;;  %v5242_v28 = vld [vmem:[%s6860_s1 + $0x1e8] sm:$0xff]   ;;  %vm6092_vm11 = vmand %vm1578_vm9, %vm1579_vm10 }
  0x23   : > { %v5243_v29 = vld [vmem:[%s6860_s1 + $0x1a8] sm:$0xff]   ;;  %vm6252_vm1 = vmor %vm3081_vm14, %vm3082_vm15  ;;  %vm2654_vm14 = vcmask 517120  }
  0x24   : > { %4718 = vmatpush3.bf16.msra.mxu0 %v5218_v30  ;;  %v325_v30 = vld [vmem:[%s5547_s28 + $0x140] sm:$0xff]  ;;  %v330_v33 = vld [vmem:[%s5547_s28 + $0x168] sm:$0xff]  ;;  %vm6261_vm2 = vmor %vm1578_vm9, %vm3370_vm13  ;;  %vm2632_vm9 = vcmask 516096  }
  0x25   : > { %4776 = vmatpush3.bf16.msra.mxu1 %v5219_v31  ;;  %4819 = vmatprep.subr.bf16.mxu0 %v5220_v40  ;;  %v329_v31 = vld [vmem:[%s5547_s28 + $0x160] sm:$0xff]  ;;  %v4388_v39 = vcombine.high %v326_v32, %v330_v33  ;;  %v5246_v40 = vld [vmem:[%s6860_s1 + $0x1f0] sm:$0xff]   ;;  %vm6413_vm13 = vmand %vm2632_vm9, %vm1579_vm10 }
  0x26   : > { %4877 = vmatprep.subr.bf16.mxu1 %v5222_v42  ;;  %v4386_v37 = vcombine.high %v325_v30, %v329_v31  ;;  %v333_v42 = vld [vmem:[%s5547_s28 + $0x180] sm:$0xff]  ;;  %v4385_v47 = vcombine.low %v325_v30, %v329_v31  ;;  %v328_v30 = vld [vmem:[%s5547_s28 + $0x158] sm:$0xff]  ;;  %vm6486_vm15 = vmand %vm2654_vm14, %vm2655_vm3 }
  0x27   : > { %1157 = vmatmul.mubr.bf16.vlgmr.msra.gmra.mrb[0].mxu0 %v4345_v35  ;;  %v5244_v35 = vld [vmem:[%s6860_s1 + $0x170] sm:$0xff]   ;;  %v332_v31 = vld [vmem:[%s5547_s28 + $0x178] sm:$0xff] }
  0x28   : > { %1245 = vmatmul.mubr.bf16.vlgmr.msra.gmra.mrb[0].mxu1 %v4347_v38  ;;  %4820 = vmatpush3.bf16.msra.mxu0 %v5221_v41  ;;  %v5245_v38 = vld [vmem:[%s6860_s1 + $0x130] sm:$0xff]  }
  0x29   : > { %4878 = vmatpush3.bf16.msra.mxu1 %v5223_v43  ;;  %1164 = vmatprep.mubr.bf16.mxu0 %v4354_v46  ;;  %v5247_v41 = vld [vmem:[%s6860_s1 + $0x1b0] sm:$0xff]   ;;  %v334_v43 = vld [vmem:[%s5547_s28 + $0x188] sm:$0xff]  ;;  %v5254_v46 = vld [vmem:[%s6860_s1 + $0x1f8] sm:$0xff]  }
  0x2a   : > { %1252 = vmatprep.mubr.bf16.mxu1 %v4356_v49  ;;  %4821 = vmatprep.subr.bf16.mxu0 %v5224_v50  ;;  %v4387_v49 = vcombine.low %v326_v32, %v330_v33  ;;  %v4394_v50 = vcombine.high %v333_v42, %v333_v42  ;;  %v4395_v57 = vcombine.low %v334_v43, %v334_v43 }
  0x2b   : > { %4879 = vmatprep.subr.bf16.mxu1 %v5226_v54  ;;  %v288_v54 = vld [vmem:[%s5547_s28 + $0x18] sm:$0xff]  ;;  %v4383_v33 = vcombine.low %v320_v22, %v324_v23 }
  0x2c   : > { %4822 = vmatpush3.bf16.msra.mxu0 %v5225_v52  ;;  %v287_v52 = vld [vmem:[%s5547_s28 + $0x10] sm:$0xff] }
  0x2d   : > { %4880 = vmatpush3.bf16.msra.mxu1 %v5227_v55  ;;  %4823 = vmatprep.subr.bf16.mxu0 %v5228_v56  ;;  %v292_v55 = vld [vmem:[%s5547_s28 + $0x38] sm:$0xff]  ;;  %v4393_v56 = vcombine.low %v333_v42, %v333_v42 }
  0x2e   : > { %4881 = vmatprep.subr.bf16.mxu1 %v5230_v0  ;;  %v4352_v59 = vcombine.high %v288_v54, %v292_v55 }
  0x2f   : > { %1165 = vmatmul.mubr.bf16.gmra.mrb[4].mxu0 %v4353_v51  ;;  %v4396_v51 = vcombine.high %v334_v43, %v334_v43 }
  0x30   : > { %1253 = vmatmul.mubr.bf16.gmra.mrb[4].mxu1 %v4355_v53  ;;  %1172 = vmatprep.mubr.bf16.mxu0 %v4362_v61  ;;  %v291_v53 = vld [vmem:[%s5547_s28 + $0x30] sm:$0xff] }
  0x31   : > { %1260 = vmatprep.mubr.bf16.mxu1 %v4364_v62  ;;  %4824 = vmatpush3.bf16.msra.mxu0 %v5229_v63  ;;  %v4350_v58 = vcombine.high %v287_v52, %v291_v53  ;;  %v299_v61 = vld [vmem:[%s5547_s28 + $0x70] sm:$0xff]  ;;  %v296_v62 = vld [vmem:[%s5547_s28 + $0x58] sm:$0xff]  ;;  %v4349_v0 = vcombine.low %v287_v52, %v291_v53 }
  0x32   : > { %4882 = vmatpush3.bf16.msra.mxu1 %v5231_v1  ;;  %4825 = vmatprep.subr.bf16.mxu0 %v5232_v3  ;;  %v300_v63 = vld [vmem:[%s5547_s28 + $0x78] sm:$0xff]  ;;  %v4351_v1 = vcombine.low %v288_v54, %v292_v55  ;;  %v4357_v8 = vcombine.low %v295_v60, %v299_v61  ;;  %v5268_v52 = vld [vmem:[%s6862_s3 + $0x50] sm:$0xff]  }
  0x33   : > { %4883 = vmatprep.subr.bf16.mxu1 %v5234_v12  ;;  %v4360_v3 = vcombine.high %v296_v62, %v300_v63  ;;  %v311_v12 = vld [vmem:[%s5547_s28 + $0xd0] sm:$0xff] }
  0x34   : > { %v5269_v53 = vld [vmem:[%s6862_s3 + $0x10] sm:$0xff]  }
  0x35   : > { %4826 = vmatpush3.bf16.msra.mxu0 %v5233_v5  ;;  %v307_v5 = vld [vmem:[%s5547_s28 + $0xb0] sm:$0xff] }
  0x36   : > { %4884 = vmatpush3.bf16.msra.mxu1 %v5235_v13  ;;  %4827 = vmatprep.subr.bf16.mxu0 %v5236_v14  ;;  %v315_v13 = vld [vmem:[%s5547_s28 + $0xf0] sm:$0xff]  ;;  %v312_v14 = vld [vmem:[%s5547_s28 + $0xd8] sm:$0xff] }
  0x37   : > { %1173 = vmatmul.mubr.bf16.gmra.mrb[8].mxu0 %v4361_v2  ;;  %4885 = vmatprep.subr.bf16.mxu1 %v5238_v17  ;;  %v4358_v2 = vcombine.high %v295_v60, %v299_v61  ;;  %v4367_v17 = vcombine.low %v304_v6, %v308_v7  ;;  %v4374_v18 = vcombine.high %v311_v12, %v315_v13  ;;  %v5270_v54 = vld [vmem:[%s6862_s3 + $0xd0] sm:$0xff]   ;;  %v5276_v60 = vld [vmem:[%s6862_s3 + $0x60] sm:$0xff]  }
  0x38   : > { %1261 = vmatmul.mubr.bf16.gmra.mrb[8].mxu1 %v4363_v4  ;;  %1180 = vmatprep.mubr.bf16.mxu0 %v4370_v9  ;;  %v303_v4 = vld [vmem:[%s5547_s28 + $0x90] sm:$0xff]  ;;  %v4359_v9 = vcombine.low %v296_v62, %v300_v63  ;;  %v5277_v61 = vld [vmem:[%s6862_s3 + $0x20] sm:$0xff]   ;;  %v5280_v63 = vld [vmem:[%s6862_s3 + $0x68] sm:$0xff]  }
  0x39   : > { %1268 = vmatprep.mubr.bf16.mxu1 %v4372_v11  ;;  %4828 = vmatpush3.bf16.msra.mxu0 %v5237_v15  ;;  %v4366_v10 = vcombine.high %v303_v4, %v307_v5  ;;  %v4368_v11 = vcombine.high %v304_v6, %v308_v7  ;;  %v316_v15 = vld [vmem:[%s5547_s28 + $0xf8] sm:$0xff]  ;;  %v5271_v55 = vld [vmem:[%s6862_s3 + $0x90] sm:$0xff]   ;;  %v5278_v62 = vld [vmem:[%s6862_s3 + $0xe0] sm:$0xff]  }
  0x3a   : > { %4886 = vmatpush3.bf16.msra.mxu1 %v5239_v25  ;;  %4829 = vmatprep.subr.bf16.mxu0 %v5240_v26  ;;  %v4376_v19 = vcombine.high %v312_v14, %v316_v15  ;;  %v4375_v25 = vcombine.low %v312_v14, %v316_v15  ;;  %v5286_v6 = vld [vmem:[%s6862_s3 + $0xf0] sm:$0xff]   ;;  %v5288_v7 = vld [vmem:[%s6862_s3 + $0x78] sm:$0xff]   ;;  %v5802_v14 = vld [vmem:[%s6861_s2] ss:$0 sm:$0xff] }
  0x3b   : > { %4887 = vmatprep.subr.bf16.mxu1 %v5242_v28  ;;  %v327_v28 = vld [vmem:[%s5547_s28 + $0x150] sm:$0xff] }
  0x3d   : > { %4830 = vmatpush3.bf16.msra.mxu0 %v5241_v27  ;;  %v4384_v27 = vcombine.high %v320_v22, %v324_v23 }
  0x3e   : > { %4888 = vmatpush3.bf16.msra.mxu1 %v5243_v29  ;;  %4831 = vmatprep.subr.bf16.mxu0 %v5244_v35  ;;  %v331_v29 = vld [vmem:[%s5547_s28 + $0x170] sm:$0xff]  ;;  %v4392_v35 = vcombine.high %v328_v30, %v332_v31 }
  0x3f   : > { %1181 = vmatmul.mubr.bf16.gmra.mrb[12].mxu0 %v4369_v16  ;;  %4889 = vmatprep.subr.bf16.mxu1 %v5246_v40  ;;  %v4365_v16 = vcombine.low %v303_v4, %v307_v5  ;;  %v5283_v4 = vld [vmem:[%s6862_s3 + $0xa8] sm:$0xff]   ;;  %v5285_v5 = vld [vmem:[%s6862_s3 + $0x30] sm:$0xff]  }
  0x40   : > { %1269 = vmatmul.mubr.bf16.gmra.mrb[12].mxu1 %v4371_v20  ;;  %1188 = vmatprep.mubr.bf16.mxu0 %v4378_v21  ;;  %v319_v20 = vld [vmem:[%s5547_s28 + $0x110] sm:$0xff] }
  0x41   : > { %1276 = vmatprep.mubr.bf16.mxu1 %v4380_v24  ;;  %4832 = vmatpush3.bf16.msra.mxu0 %v5245_v38  ;;  %v323_v21 = vld [vmem:[%s5547_s28 + $0x130] sm:$0xff]  ;;  %v4373_v24 = vcombine.low %v311_v12, %v315_v13  ;;  %v4389_v38 = vcombine.low %v327_v28, %v331_v29 }
  0x42   : > { %4890 = vmatpush3.bf16.msra.mxu1 %v5247_v41  ;;  %4833 = vmatprep.subr.bf16.mxu0 %v5252_v44  ;;  %v4382_v26 = vcombine.high %v319_v20, %v323_v21  ;;  %v4381_v32 = vcombine.low %v319_v20, %v323_v21  ;;  %v5260_v44 = vld [vmem:[%s6862_s3 + $0x40] sm:$0xff]  }
  0x43   : > { %4891 = vmatprep.subr.bf16.mxu1 %v5254_v46  ;;  %v5262_v46 = vld [vmem:[%s6862_s3 + $0xc0] sm:$0xff]  }
  0x45   : > { %4834 = vmatpush3.bf16.msra.mxu0 %v5253_v45  ;;  %v5261_v45 = vld [vmem:[%s6862_s3] sm:$0xff]  }
  0x46   : > { %4892 = vmatpush3.bf16.msra.mxu1 %v5255_v48  ;;  %4935 = vmatprep.subr.bf16.mxu0 %v5260_v44  ;;  %v5264_v48 = vld [vmem:[%s6862_s3 + $0x48] sm:$0xff]  }
  0x47   : > { %1189 = vmatmul.mubr.bf16.gmra.mrb[16].mxu0 %v4377_v34  ;;  %v4390_v34 = vcombine.high %v327_v28, %v331_v29  ;;  %4987 = vmatprep.subr.bf16.mxu1 %v5262_v46 }
  0x48   : > { %1277 = vmatmul.mubr.bf16.gmra.mrb[16].mxu1 %v4379_v36  ;;  %1196 = vmatprep.mubr.bf16.mxu0 %v4386_v37  ;;  %v335_v36 = vld [vmem:[%s5547_s28 + $0x190] sm:$0xff]  ;;  %v336_v37 = vld [vmem:[%s5547_s28 + $0x198] sm:$0xff] }
  0x49   : > { %1284 = vmatprep.mubr.bf16.mxu1 %v4388_v39  ;;  %v4391_v39 = vcombine.low %v328_v30, %v332_v31  ;;  %v4398_v40 = vcombine.high %v335_v36, %v335_v36  ;;  %v4400_v41 = vcombine.high %v336_v37, %v336_v37  ;;  %v4397_v42 = vcombine.low %v335_v36, %v335_v36 }
  0x4a   : > { %v4399_v43 = vcombine.low %v336_v37, %v336_v37 }
  0x4f   : > { %1197 = vmatmul.mubr.bf16.gmra.mrb[20].mxu0 %v4385_v47  ;;  %v5263_v47 = vld [vmem:[%s6862_s3 + $0x80] sm:$0xff]  }
  0x50   : > { %1285 = vmatmul.mubr.bf16.gmra.mrb[20].mxu1 %v4387_v49  ;;  %1204 = vmatprep.mubr.bf16.mxu0 %v4394_v50  ;;  %v5265_v49 = vld [vmem:[%s6862_s3 + $0x8] sm:$0xff]  }
  0x51   : > { %1292 = vmatprep.mubr.bf16.mxu1 %v4396_v51  ;;  %v5266_v50 = vld [vmem:[%s6862_s3 + $0xc8] sm:$0xff]  }
  0x52   : > { %v5267_v51 = vld [vmem:[%s6862_s3 + $0x88] sm:$0xff]  }
  0x57   : > { %1205 = vmatmul.mubr.bf16.gmra.mrb[24].mxu0 %v4393_v56  ;;  %v5272_v56 = vld [vmem:[%s6862_s3 + $0x58] sm:$0xff]  }
  0x58   : > { %1293 = vmatmul.mubr.bf16.gmra.mrb[24].mxu1 %v4395_v57  ;;  %1332 = vmatprep.mubr.bf16.mxu0 %v4350_v58  ;;  %v5273_v57 = vld [vmem:[%s6862_s3 + $0x18] sm:$0xff]  }
  0x59   : > { %1420 = vmatprep.mubr.bf16.mxu1 %v4352_v59  ;;  %v5274_v58 = vld [vmem:[%s6862_s3 + $0xd8] sm:$0xff]  }
  0x5a   : > { %v5275_v59 = vld [vmem:[%s6862_s3 + $0x98] sm:$0xff]  }
  0x5f   : > { %1333 = vmatmul.mubr.bf16.vlgmr.msra.gmra.mrb[28].mxu0 %v4349_v0  ;;  %v5279_v0 = vld [vmem:[%s6862_s3 + $0xa0] sm:$0xff]  }
  0x60   : > { %1421 = vmatmul.mubr.bf16.vlgmr.msra.gmra.mrb[28].mxu1 %v4351_v1  ;;  %1340 = vmatprep.mubr.bf16.mxu0 %v4358_v2  ;;  %v5281_v1 = vld [vmem:[%s6862_s3 + $0x28] sm:$0xff]  }
  0x61   : > { %1428 = vmatprep.mubr.bf16.mxu1 %v4360_v3  ;;  %4936 = vmatpush3.bf16.msra.mxu0 %v5261_v45  ;;  %v5282_v2 = vld [vmem:[%s6862_s3 + $0xe8] sm:$0xff]   ;;  %v5284_v3 = vld [vmem:[%s6862_s3 + $0x70] sm:$0xff]  }
  0x62   : > { %4988 = vmatpush3.bf16.msra.mxu1 %v5263_v47  ;;  %4937 = vmatprep.subr.bf16.mxu0 %v5264_v48 }
  0x63   : > { %4989 = vmatprep.subr.bf16.mxu1 %v5266_v50 }
  0x65   : > { %4938 = vmatpush3.bf16.msra.mxu0 %v5265_v49 }
  0x66   : > { %4990 = vmatpush3.bf16.msra.mxu1 %v5267_v51  ;;  %4939 = vmatprep.subr.bf16.mxu0 %v5268_v52 }
  0x67   : > { %1341 = vmatmul.mubr.bf16.gmra.mrb[32].mxu0 %v4357_v8  ;;  %4991 = vmatprep.subr.bf16.mxu1 %v5270_v54  ;;  %v5287_v8 = vld [vmem:[%s6862_s3 + $0xb0] sm:$0xff]  }
  0x68   : > { %1429 = vmatmul.mubr.bf16.gmra.mrb[32].mxu1 %v4359_v9  ;;  %1348 = vmatprep.mubr.bf16.mxu0 %v4366_v10  ;;  %v5289_v9 = vld [vmem:[%s6862_s3 + $0x38] sm:$0xff]  }
  0x69   : > { %1436 = vmatprep.mubr.bf16.mxu1 %v4368_v11  ;;  %4940 = vmatpush3.bf16.msra.mxu0 %v5269_v53  ;;  %v5290_v10 = vld [vmem:[%s6862_s3 + $0xf8] sm:$0xff]  }
  0x6a   : > { %4992 = vmatpush3.bf16.msra.mxu1 %v5271_v55  ;;  %4941 = vmatprep.subr.bf16.mxu0 %v5272_v56  ;;  %v5291_v11 = vld [vmem:[%s6862_s3 + $0xb8] sm:$0xff]  }
  0x6b   : > { %4993 = vmatprep.subr.bf16.mxu1 %v5274_v58 }
  0x6d   : > { %4942 = vmatpush3.bf16.msra.mxu0 %v5273_v57 }
  0x6e   : > { %4994 = vmatpush3.bf16.msra.mxu1 %v5275_v59  ;;  %4943 = vmatprep.subr.bf16.mxu0 %v5276_v60 }
  0x6f   : > { %1349 = vmatmul.mubr.bf16.gmra.mrb[36].mxu0 %v4365_v16  ;;  %4995 = vmatprep.subr.bf16.mxu1 %v5278_v62 }
  0x70   : > { %1437 = vmatmul.mubr.bf16.gmra.mrb[36].mxu1 %v4367_v17  ;;  %1356 = vmatprep.mubr.bf16.mxu0 %v4374_v18 }
  0x71   : > { %1444 = vmatprep.mubr.bf16.mxu1 %v4376_v19  ;;  %4944 = vmatpush3.bf16.msra.mxu0 %v5277_v61 }
  0x72   : > { %4945 = vmatprep.subr.bf16.mxu0 %v5280_v63  ;;  %4996 = vmatpush3.bf16.msra.mxu1 %v5279_v0 }
  0x73   : > { %4997 = vmatprep.subr.bf16.mxu1 %v5282_v2 }
  0x75   : > { %4946 = vmatpush3.bf16.msra.mxu0 %v5281_v1 }
  0x76   : > { %4947 = vmatprep.subr.bf16.mxu0 %v5284_v3  ;;  %4998 = vmatpush3.bf16.msra.mxu1 %v5283_v4 }
  0x77   : > { %1357 = vmatmul.mubr.bf16.gmra.mrb[40].mxu0 %v4373_v24  ;;  %4999 = vmatprep.subr.bf16.mxu1 %v5286_v6 }
  0x78   : > { %1445 = vmatmul.mubr.bf16.gmra.mrb[40].mxu1 %v4375_v25  ;;  %1364 = vmatprep.mubr.bf16.mxu0 %v4382_v26 }
  0x79   : > { %1452 = vmatprep.mubr.bf16.mxu1 %v4384_v27  ;;  %4948 = vmatpush3.bf16.msra.mxu0 %v5285_v5 }
  0x7a   : > { %4949 = vmatprep.subr.bf16.mxu0 %v5288_v7  ;;  %5000 = vmatpush3.bf16.msra.mxu1 %v5287_v8 }
  0x7b   : > { %5001 = vmatprep.subr.bf16.mxu1 %v5290_v10 }
  0x7d   : > { %4950 = vmatpush3.bf16.msra.mxu0 %v5289_v9 }
  0x7e   : > { %5002 = vmatpush3.bf16.msra.mxu1 %v5291_v11 }
  0x7f   : > { %1365 = vmatmul.mubr.bf16.gmra.mrb[44].mxu0 %v4381_v32 }
  0x80   : > { %1453 = vmatmul.mubr.bf16.gmra.mrb[44].mxu1 %v4383_v33  ;;  %1372 = vmatprep.mubr.bf16.mxu0 %v4390_v34 }
  0x81   : > { %1460 = vmatprep.mubr.bf16.mxu1 %v4392_v35 }
  0x87   : > { %1373 = vmatmul.mubr.bf16.gmra.mrb[48].mxu0 %v4389_v38 }
  0x88   : > { %1461 = vmatmul.mubr.bf16.gmra.mrb[48].mxu1 %v4391_v39  ;;  %1380 = vmatprep.mubr.bf16.mxu0 %v4398_v40 }
  0x89   : > { %1468 = vmatprep.mubr.bf16.mxu1 %v4400_v41 }
  0x8f   : > { %1381 = vmatmul.mubr.bf16.gmra.mrb[52].mxu0 %v4397_v42 }
  0x90   : > { %1469 = vmatmul.mubr.bf16.gmra.mrb[52].mxu1 %v4399_v43 }
  0xfa   : > { %v4719_v12 = vpop.f32.mrb[0].mxu0 }
  0xfb   : > { %v4777_v13 = vpop.f32.mrb[0].mxu1  ;;  %v4720_v15 = vpop.f32.mrb[1].mxu0 }
  0xfc   : > { %v4721_v16 = vadd.f32 %v4720_v15, %v4719_v12  ;;  %v4778_v17 = vpop.f32.mrb[1].mxu1  ;;  %v4722_v18 = vpop.f32.mrb[2].mxu0 }
  0xfd   : > { %v4779_v19 = vadd.f32 %v4778_v17, %v4777_v13  ;;  %v4780_v20 = vpop.f32.mrb[2].mxu1  ;;  %v4723_v21 = vpop.f32.mrb[3].mxu0 }
  0xfe   : > { %v1159_v22 = vadd.f32 %v4721_v16, %v5802_v14  ;;  %v4724_v23 = vadd.f32 %v4723_v21, %v4722_v18  ;;  %v4781_v24 = vpop.f32.mrb[3].mxu1 }
  0xff   : > { %v4782_v25 = vadd.f32 %v4781_v24, %v4780_v20 }
 0x100   : > { %v5805_v26 = vadd.f32 %v4779_v19, %v1159_v22  ;;  %v1162_v27 = vadd.f32 %v4724_v23, %v5802_v14 }
 0x102   : > { %v5808_v28 = vadd.f32 %v4782_v25, %v1162_v27  ;;  %v4725_v29 = vpop.f32.mrb[4].mxu0 }
 0x103   : > { %v4783_v30 = vpop.f32.mrb[4].mxu1  ;;  %v4726_v31 = vpop.f32.mrb[5].mxu0 }
 0x104   : > { %v4727_v32 = vadd.f32 %v4726_v31, %v4725_v29  ;;  %v4784_v33 = vpop.f32.mrb[5].mxu1  ;;  %v4728_v34 = vpop.f32.mrb[6].mxu0 }
 0x105   : > { %v4785_v35 = vadd.f32 %v4784_v33, %v4783_v30  ;;  %v4786_v36 = vpop.f32.mrb[6].mxu1  ;;  %v4729_v37 = vpop.f32.mrb[7].mxu0 }
 0x106   : > { %v1167_v38 = vadd.f32 %v4727_v32, %v5802_v14  ;;  %v4730_v39 = vadd.f32 %v4729_v37, %v4728_v34  ;;  %v4787_v40 = vpop.f32.mrb[7].mxu1 }
 0x107   : > { %v4788_v41 = vadd.f32 %v4787_v40, %v4786_v36 }
 0x108   : > { %v5811_v42 = vadd.f32 %v4785_v35, %v1167_v38  ;;  %v1170_v43 = vadd.f32 %v4730_v39, %v5802_v14 }
 0x10a   : > { %v5814_v44 = vadd.f32 %v4788_v41, %v1170_v43  ;;  %v4731_v45 = vpop.f32.mrb[8].mxu0 }
 0x10b   : > { %v4789_v46 = vpop.f32.mrb[8].mxu1  ;;  %v4732_v47 = vpop.f32.mrb[9].mxu0 }
 0x10c   : > { %v4733_v48 = vadd.f32 %v4732_v47, %v4731_v45  ;;  %v4790_v49 = vpop.f32.mrb[9].mxu1  ;;  %v4734_v50 = vpop.f32.mrb[10].mxu0 }
 0x10d   : > { %v4791_v51 = vadd.f32 %v4790_v49, %v4789_v46  ;;  %v4792_v52 = vpop.f32.mrb[10].mxu1  ;;  %v4735_v53 = vpop.f32.mrb[11].mxu0 }
 0x10e   : > { %v1175_v54 = vadd.f32 %v4733_v48, %v5802_v14  ;;  %v4736_v55 = vadd.f32 %v4735_v53, %v4734_v50  ;;  %v4793_v56 = vpop.f32.mrb[11].mxu1 }
 0x10f   : > { %v4794_v57 = vadd.f32 %v4793_v56, %v4792_v52 }
 0x110   : > { %v5817_v58 = vadd.f32 %v4791_v51, %v1175_v54  ;;  %v1178_v59 = vadd.f32 %v4736_v55, %v5802_v14 }
 0x112   : > { %v5820_v60 = vadd.f32 %v4794_v57, %v1178_v59  ;;  %v4737_v61 = vpop.f32.mrb[12].mxu0 }
 0x113   : > { %v4795_v62 = vpop.f32.mrb[12].mxu1  ;;  %v4738_v63 = vpop.f32.mrb[13].mxu0 }
 0x114   : > { %v4739_v0 = vadd.f32 %v4738_v63, %v4737_v61  ;;  %v4796_v1 = vpop.f32.mrb[13].mxu1  ;;  %v4740_v2 = vpop.f32.mrb[14].mxu0 }
 0x115   : > { %v4797_v3 = vadd.f32 %v4796_v1, %v4795_v62  ;;  %v4798_v4 = vpop.f32.mrb[14].mxu1  ;;  %v4741_v5 = vpop.f32.mrb[15].mxu0 }
 0x116   : > { %v1183_v6 = vadd.f32 %v4739_v0, %v5802_v14  ;;  %v4742_v7 = vadd.f32 %v4741_v5, %v4740_v2  ;;  %v4799_v8 = vpop.f32.mrb[15].mxu1 }
 0x117   : > { %v4800_v9 = vadd.f32 %v4799_v8, %v4798_v4 }
 0x118   : > { %v5823_v10 = vadd.f32 %v4797_v3, %v1183_v6  ;;  %v1186_v11 = vadd.f32 %v4742_v7, %v5802_v14 }
 0x11a   : > { %v5826_v12 = vadd.f32 %v4800_v9, %v1186_v11  ;;  %v4743_v13 = vpop.f32.mrb[16].mxu0 }
 0x11b   : > { %v4801_v15 = vpop.f32.mrb[16].mxu1  ;;  %v4744_v16 = vpop.f32.mrb[17].mxu0 }
 0x11c   : > { %v4745_v17 = vadd.f32 %v4744_v16, %v4743_v13  ;;  %v4802_v18 = vpop.f32.mrb[17].mxu1  ;;  %v4746_v19 = vpop.f32.mrb[18].mxu0 }
 0x11d   : > { %v4803_v20 = vadd.f32 %v4802_v18, %v4801_v15  ;;  %v4804_v21 = vpop.f32.mrb[18].mxu1  ;;  %v4747_v22 = vpop.f32.mrb[19].mxu0 }
 0x11e   : > { %v1191_v23 = vadd.f32 %v4745_v17, %v5802_v14  ;;  %v4748_v24 = vadd.f32 %v4747_v22, %v4746_v19  ;;  %v4805_v25 = vpop.f32.mrb[19].mxu1 }
 0x11f   : > { %v4806_v27 = vadd.f32 %v4805_v25, %v4804_v21 }
 0x120   : > { %v5829_v29 = vadd.f32 %v4803_v20, %v1191_v23  ;;  %v1194_v30 = vadd.f32 %v4748_v24, %v5802_v14 }
 0x122   : > { %v5832_v31 = vadd.f32 %v4806_v27, %v1194_v30  ;;  %v4749_v32 = vpop.f32.mrb[20].mxu0 }
 0x123   : > { %v4807_v33 = vpop.f32.mrb[20].mxu1  ;;  %v4750_v34 = vpop.f32.mrb[21].mxu0 }
 0x124   : > { %v4751_v35 = vadd.f32 %v4750_v34, %v4749_v32  ;;  %v4808_v36 = vpop.f32.mrb[21].mxu1  ;;  %v4752_v37 = vpop.f32.mrb[22].mxu0 }
 0x125   : > { %v4809_v38 = vadd.f32 %v4808_v36, %v4807_v33  ;;  %v4810_v39 = vpop.f32.mrb[22].mxu1  ;;  %v4753_v40 = vpop.f32.mrb[23].mxu0 }
 0x126   : > { %v1199_v41 = vadd.f32 %v4751_v35, %v5802_v14  ;;  %v4754_v43 = vadd.f32 %v4753_v40, %v4752_v37  ;;  %v4811_v45 = vpop.f32.mrb[23].mxu1 }
 0x127   : > { %v4812_v46 = vadd.f32 %v4811_v45, %v4810_v39 }
 0x128   : > { %v5835_v47 = vadd.f32 %v4809_v38, %v1199_v41  ;;  %v1202_v48 = vadd.f32 %v4754_v43, %v5802_v14 }
 0x12a   : > { %v5838_v49 = vadd.f32 %v4812_v46, %v1202_v48  ;;  %v4755_v50 = vpop.f32.mrb[24].mxu0 }
 0x12b   : > { %v4813_v51 = vpop.f32.mrb[24].mxu1  ;;  %v4756_v52 = vpop.f32.mrb[25].mxu0 }
 0x12c   : > { %v4757_v53 = vadd.f32 %v4756_v52, %v4755_v50  ;;  %v4814_v54 = vpop.f32.mrb[25].mxu1  ;;  %v4758_v55 = vpop.f32.mrb[26].mxu0 }
 0x12d   : > { %v4815_v56 = vadd.f32 %v4814_v54, %v4813_v51  ;;  %v4816_v57 = vpop.f32.mrb[26].mxu1  ;;  %v4759_v59 = vpop.f32.mrb[27].mxu0 }
 0x12e   : > { %v1207_v61 = vadd.f32 %v4757_v53, %v5802_v14  ;;  %v4817_v62 = vpop.f32.mrb[27].mxu1 }
 0x130   : > { %v5841_v63 = vadd.f32 %v4815_v56, %v1207_v61 }
 0x132   : > { %v4835_v0 = vpop.f32.mrb[28].mxu0 }
 0x133   : > { %v4893_v1 = vpop.f32.mrb[28].mxu1  ;;  %v4836_v2 = vpop.f32.mrb[29].mxu0 }
 0x134   : > { %v4837_v3 = vadd.f32 %v4836_v2, %v4835_v0  ;;  %v4894_v4 = vpop.f32.mrb[29].mxu1  ;;  %v4838_v5 = vpop.f32.mrb[30].mxu0 }
 0x135   : > { %v4895_v6 = vadd.f32 %v4894_v4, %v4893_v1  ;;  %v4896_v7 = vpop.f32.mrb[30].mxu1  ;;  %v4839_v8 = vpop.f32.mrb[31].mxu0 }
 0x136   : > { %v1335_v9 = vadd.f32 %v4837_v3, %v5805_v26  ;;  %v4840_v11 = vadd.f32 %v4839_v8, %v4838_v5  ;;  %v4897_v13 = vpop.f32.mrb[31].mxu1 }
 0x137   : > { %v4898_v15 = vadd.f32 %v4897_v13, %v4896_v7 }
 0x138   : > { %v1423_v16 = vadd.f32 %v4895_v6, %v1335_v9  ;;  %v1338_v14 = vadd.f32 %v4840_v11, %v5808_v28 }
 0x13a   : > { %v1426_v17 = vadd.f32 %v4898_v15, %v1338_v14  ;;  %v4841_v18 = vpop.f32.mrb[32].mxu0  ;;  %v1476_v21 = vmax.f32 %v1423_v16, 0.0 }
 0x13b   : > { %v4899_v19 = vpop.f32.mrb[32].mxu1  ;;  %v4842_v20 = vpop.f32.mrb[33].mxu0 }
 0x13c   : > { %v1477_v22 = vmax.f32 %v1426_v17, 0.0  ;;  %v4843_v23 = vadd.f32 %v4842_v20, %v4841_v18  ;;  %v4900_v24 = vpop.f32.mrb[33].mxu1  ;;  %v4844_v25 = vpop.f32.mrb[34].mxu0 }
 0x13d   : > { %v4901_v27 = vadd.f32 %v4900_v24, %v4899_v19  ;;  %v4902_v30 = vpop.f32.mrb[34].mxu1  ;;  %v4845_v32 = vpop.f32.mrb[35].mxu0 }
 0x13e   : > { %v4671_v33 = vpack.c.bf16 %v1477_v22, %v1476_v21  ;;  %v1343_v26 = vadd.f32 %v4843_v23, %v5811_v42  ;;  %v4846_v34 = vadd.f32 %v4845_v32, %v4844_v25  ;;  %v4903_v35 = vpop.f32.mrb[35].mxu1 }
 0x13f   : > { %v4904_v36 = vadd.f32 %v4903_v35, %v4902_v30 }
 0x140   : > { %4672 = vst [vmem:[#allocation2] sm:$0xff] %v4671_v33   ;;  %v1431_v28 = vadd.f32 %v4901_v27, %v1343_v26  ;;  %v1346_v37 = vadd.f32 %v4846_v34, %v5814_v44 }
 0x142   : > { %v1434_v38 = vadd.f32 %v4904_v36, %v1346_v37  ;;  %v4847_v39 = vpop.f32.mrb[36].mxu0  ;;  %v1478_v43 = vmax.f32 %v1431_v28, 0.0 }
 0x143   : > { %v4905_v40 = vpop.f32.mrb[36].mxu1  ;;  %v4848_v41 = vpop.f32.mrb[37].mxu0 }
 0x144   : > { %v1479_v45 = vmax.f32 %v1434_v38, 0.0  ;;  %v4849_v46 = vadd.f32 %v4848_v41, %v4847_v39  ;;  %v4906_v48 = vpop.f32.mrb[37].mxu1  ;;  %v4850_v50 = vpop.f32.mrb[38].mxu0 }
 0x145   : > { %v4907_v51 = vadd.f32 %v4906_v48, %v4905_v40  ;;  %v4908_v52 = vpop.f32.mrb[38].mxu1  ;;  %v4851_v53 = vpop.f32.mrb[39].mxu0 }
 0x146   : > { %v4676_v42 = vpack.c.bf16 %v1479_v45, %v1478_v43  ;;  %v1351_v54 = vadd.f32 %v4849_v46, %v5817_v58  ;;  %v4852_v55 = vadd.f32 %v4851_v53, %v4850_v50  ;;  %v4909_v56 = vpop.f32.mrb[39].mxu1 }
 0x147   : > { %v1584_v57 = vld [vmem:[#allocation2] sm:$0xf]  ;;  %v1585_v59 = vld [vmem:[#allocation2 + $0x4] sm:$0xf]  ;;  %v4910_v44 = vadd.f32 %v4909_v56, %v4908_v52 }
 0x148   : > { %v1600_v61 = vshrl.u32 %v1584_v57, 16  ;;  %v1603_v62 = vshll.u32 %v1584_v57, 16  ;;  %v1609_v0 = vshll.u32 %v1585_v59, 16  ;;  %v1613_v1 = vshrl.u32 %v1585_v59, 16  ;;  %v1831_v2 = vld [vmem:[#allocation2 + $0x4] sm:$0xe] }
 0x149   : > { %4698 = vst [vmem:[#allocation2 + $0x8] sm:$0xff] %v4676_v42   ;;  %v5848_v3 = vld [vmem:[#allocation2 + $0x4] sm:$0xe]  ;;  %v1847_v4 = vshrl.u32 %v1831_v2, 16  ;;  %v1850_v5 = vshll.u32 %v1831_v2, 16  ;;  %v1439_v6 = vadd.f32 %v4907_v51, %v1351_v54  ;;  %v1354_v14 = vadd.f32 %v4852_v55, %v5820_v60 }
 0x14a   : > { %v1555_v7 = vld [vmem:[#allocation2] sm:$0xf]  ;;  %v1602_v8 = vrot.slane %v1600_v61, 4  ;;  %v1605_v9 = vrot.slane %v1603_v62, 5  ;;  %v5850_v58 = vrot.slane %v1609_v0, 5  ;;  %v1615_v11 = vrot.slane %v1613_v1, 4 }
 0x14b   : > { %v4853_v13 = vpop.f32.mrb[40].mxu0  ;;  %1567 = vst [vmem:[#allocation3] sm:$0xf] %v1555_v7  ;;  %v1849_v15 = vrot.slane %v1847_v4, 5  ;;  %v1852_v16 = vrot.slane %v1850_v5, 6  ;;  %v4911_v18 = vpop.f32.mrb[40].mxu1  ;;  %v1442_v32 = vadd.f32 %v4910_v44, %v1354_v14 }
 0x14c   : > { %v4854_v17 = vpop.f32.mrb[41].mxu0  ;;  %v1606_v19 = vor.u32 %v1605_v9, %v1602_v8  ;;  %v1616_v20 = vor.u32 %v1615_v11, %v5850_v58  ;;  %v4479_v21 = vrot.slane %v5848_v3, 9  ;;  %v4912_v24 = vpop.f32.mrb[41].mxu1  ;;  %v1556_v25 = vld [vmem:[#allocation2 + $0x4] sm:$0xf]  ;;  %v1480_v30 = vmax.f32 %v1439_v6, 0.0 }
 0x14d   : > { %v4855_v22 = vadd.f32 %v4854_v17, %v4853_v13  ;;  %v4856_v23 = vpop.f32.mrb[42].mxu0  ;;  %v1853_v27 = vor.u32 %v1852_v16, %v1849_v15  ;;  %v4913_v60 = vadd.f32 %v4912_v24, %v4911_v18  ;;  %v4914_v26 = vpop.f32.mrb[42].mxu1  ;;  %1568 = vst [vmem:[#allocation3 + $0x10] sm:$0xf] %v1556_v25  ;;  %v1481_v41 = vmax.f32 %v1442_v32, 0.0 }
 0x14e   : > { %v4857_v33 = vpop.f32.mrb[43].mxu0  ;;  %v5855_v34 = vrot.slane %v1606_v19, 4  ;;  %v5857_v35 = vrot.slane %v1616_v20, 4  ;;  %v4915_v37 = vpop.f32.mrb[43].mxu1 }
 0x14f   : > { %v1359_v36 = vadd.f32 %v4855_v22, %v5823_v10  ;;  %v4858_v28 = vadd.f32 %v4857_v33, %v4856_v23  ;;  %v5860_v38 = vrot.slane %v1853_v27, 4  ;;  %v4916_v43 = vadd.f32 %v4915_v37, %v4914_v26 }
 0x150   : > { %v1586_v39 = vld [vmem:[#allocation2 + $0x8] sm:$0xf]  ;;  %v1587_v40 = vld [vmem:[#allocation2 + $0xc] sm:$0xf]  ;;  %v4681_v10 = vpack.c.bf16 %v1481_v41, %v1480_v30 }
 0x151   : > { %v1619_v45 = vshll.u32 %v1586_v39, 16  ;;  %v1623_v46 = vshrl.u32 %v1586_v39, 16  ;;  %v1629_v48 = vshll.u32 %v1587_v40, 16  ;;  %v1633_v50 = vshrl.u32 %v1587_v40, 16  ;;  %v5862_v51 = vld [vmem:[#allocation2 + $0x8] sm:$0xf] }
 0x152   : > { %v5864_v52 = vld [vmem:[#allocation2 + $0xc] sm:$0xf]  ;;  %v1772_v53 = vrot.slane %v5862_v51, 5  ;;  %v1832_v42 = vld [vmem:[#allocation2 + $0x8] sm:$0xf]  ;;  %v1362_v54 = vadd.f32 %v4858_v28, %v5826_v12  ;;  %v5868_v55 = vadd.f32 %v4913_v60, %v1359_v36  ;;  %4699 = vst [vmem:[#allocation2 + $0x10] sm:$0xff] %v4681_v10  }
 0x153   : > { %v1621_v56 = vrot.slane %v1619_v45, 5  ;;  %v1625_v57 = vrot.slane %v1623_v46, 4  ;;  %v5870_v59 = vrot.slane %v1629_v48, 5  ;;  %v1635_v44 = vrot.slane %v1633_v50, 4  ;;  %v1833_v61 = vld [vmem:[#allocation2 + $0xc] sm:$0xf] }
 0x154   : > { %v1774_v62 = vrot.slane %v1772_v53, 4  ;;  %v1775_v0 = vrot.slane %v5864_v52, 5  ;;  %v1856_v1 = vshrl.u32 %v1832_v42, 16  ;;  %v1859_v2 = vshll.u32 %v1832_v42, 16  ;;  %v4859_v4 = vpop.f32.mrb[44].mxu0  ;;  %v4917_v5 = vpop.f32.mrb[44].mxu1 }
 0x155   : > { %v1626_v6 = vor.u32 %v1625_v57, %v1621_v56  ;;  %v1636_v7 = vor.u32 %v1635_v44, %v5870_v59  ;;  %v1866_v12 = vshrl.u32 %v1833_v61, 16  ;;  %v1869_v8 = vshll.u32 %v1833_v61, 16  ;;  %v4860_v9 = vpop.f32.mrb[45].mxu0  ;;  %v4918_v11 = vpop.f32.mrb[45].mxu1  ;;  %v1557_v13 = vld [vmem:[#allocation2 + $0x8] sm:$0xf] }
 0x156   : > { %v5874_v15 = vrot.slane %v1775_v0, 4  ;;  %v1858_v16 = vrot.slane %v1856_v1, 5  ;;  %v1861_v14 = vrot.slane %v1859_v2, 6  ;;  %v1482_v17 = vmax.f32 %v5868_v55, 0.0  ;;  %v4862_v18 = vpop.f32.mrb[46].mxu0  ;;  %v4920_v19 = vpop.f32.mrb[46].mxu1 }
 0x157   : > { %1569 = vst [vmem:[#allocation3 + $0x20] sm:$0xf] %v1557_v13  ;;  %v1627_v22 = vrot.slane %v1626_v6, 4  ;;  %v5883_v23 = vrot.slane %v1636_v7, 4  ;;  %v1868_v24 = vrot.slane %v1866_v12, 5  ;;  %v1871_v25 = vrot.slane %v1869_v8, 6 }
 0x158   : > { %v4863_v27 = vpop.f32.mrb[47].mxu0  ;;  %v4921_v30 = vpop.f32.mrb[47].mxu1  ;;  %v5891_v33 = vor.u32 %v1861_v14, %v1858_v16  ;;  %v1450_v60 = vadd.f32 %v4916_v43, %v1362_v54  ;;  %v4861_v26 = vadd.f32 %v4860_v9, %v4859_v4  ;;  %v1558_v37 = vld [vmem:[#allocation2 + $0xc] sm:$0xf]  ;;  %v4919_v40 = vadd.f32 %v4918_v11, %v4917_v5 }
 0x159   : > { %v4864_v36 = vadd.f32 %v4863_v27, %v4862_v18  ;;  %v5899_v39 = vor.u32 %v1871_v25, %v1868_v24  ;;  %v4922_v41 = vadd.f32 %v4921_v30, %v4920_v19  ;;  %v1612_v45 = vsel %vm5879_vm6, %v5855_v34, %v5850_v58  ;;  %1570 = vst [vmem:[#allocation3 + $0x30] sm:$0xf] %v1558_v37  ;;  %v1588_v51 = vld [vmem:[#allocation2 + $0x10] sm:$0xf]  ;;  %v1589_v52 = vld [vmem:[#allocation2 + $0x14] sm:$0xf] }
 0x15a   : > { %v1483_v43 = vmax.f32 %v1450_v60, 0.0  ;;  %v1367_v46 = vadd.f32 %v4861_v26, %v5829_v29  ;;  %v1622_v50 = vsel %vm5879_vm6, %v5857_v35, %v1621_v56  ;;  %1729 = vst [vmem:[#allocation3 + $0x4] sm:$0xf] %v1612_v45  ;;  %v5910_v42 = vld [vmem:[#allocation2 + $0x10] sm:$0xf]  ;;  %v1773_v58 = vsel %vm5887_vm7, %v4479_v21, %v1772_v53  ;;  %v4865_v1 = vpop.f32.mrb[48].mxu0 }
 0x15b   : > { %v1370_v48 = vadd.f32 %v4864_v36, %v5832_v31  ;;  %1730 = vst [vmem:[#allocation3 + $0x14] sm:$0xf] %v1622_v50  ;;  %v1776_v29 = vsel %vm5887_vm7, %v1774_v62, %v1775_v0  ;;  %v1863_v31 = vsel %vm5895_vm8, %v5860_v38, %v5891_v33  ;;  %v1632_v34 = vsel %vm5879_vm6, %v1627_v22, %v5870_v59  ;;  %v5925_v3 = vld [vmem:[#allocation2 + $0x14] sm:$0xf]  ;;  %v1834_v56 = vld [vmem:[#allocation2 + $0x10] sm:$0xf] }
 0x15c   : > { %v1639_v35 = vshll.u32 %v1588_v51, 16  ;;  %v1643_v10 = vshrl.u32 %v1588_v51, 16  ;;  %v1649_v54 = vshll.u32 %v1589_v52, 16  ;;  %v1653_v55 = vshrl.u32 %v1589_v52, 16  ;;  %1817 = vst [vmem:[#allocation3 + $0x8] sm:$0xf] %v1773_v58 }
 0x15d   : > { %1818 = vst [vmem:[#allocation3 + $0x18] sm:$0xf] %v1776_v29  ;;  %1977 = vst [vmem:[#allocation3 + $0xc] sm:$0xf] %v1863_v31  ;;  %v1778_v21 = vrot.slane %v5910_v42, 5  ;;  %v1781_v53 = vrot.slane %v5925_v3, 5  ;;  %v4686_v57 = vpack.c.bf16 %v1483_v43, %v1482_v17  ;;  %v1455_v44 = vadd.f32 %v4919_v40, %v1367_v46 }
 0x15e   : > { %1731 = vst [vmem:[#allocation3 + $0x24] sm:$0xf] %v1632_v34  ;;  %v1835_v38 = vld [vmem:[#allocation2 + $0x14] sm:$0xf]  ;;  %v5929_v61 = vrot.slane %v1639_v35, 5  ;;  %v1645_v59 = vrot.slane %v1643_v10, 4  ;;  %v1458_v25 = vadd.f32 %v4922_v41, %v1370_v48 }
 0x15f   : > { %v5931_v62 = vrot.slane %v1649_v54, 5  ;;  %v1655_v0 = vrot.slane %v1653_v55, 4  ;;  %v4923_v2 = vpop.f32.mrb[48].mxu1  ;;  %v5935_v4 = vrot.slane %v1778_v21, 4  ;;  %v5939_v5 = vrot.slane %v1781_v53, 4  ;;  %4700 = vst [vmem:[#allocation2 + $0x18] sm:$0xff] %v4686_v57  }
 0x160   : > { %v1876_v6 = vshrl.u32 %v1834_v56, 16  ;;  %v1879_v7 = vshll.u32 %v1834_v56, 16  ;;  %v4866_v12 = vpop.f32.mrb[49].mxu0  ;;  %v4924_v8 = vpop.f32.mrb[49].mxu1  ;;  %v1646_v9 = vor.u32 %v1645_v59, %v5929_v61  ;;  %v1886_v13 = vshrl.u32 %v1835_v38, 16 }
 0x161   : > { %v1656_v11 = vor.u32 %v1655_v0, %v5931_v62  ;;  %v1889_v16 = vshll.u32 %v1835_v38, 16  ;;  %v4868_v14 = vpop.f32.mrb[50].mxu0  ;;  %v4926_v17 = vpop.f32.mrb[50].mxu1  ;;  %v1559_v18 = vld [vmem:[#allocation2 + $0x10] sm:$0xf]  ;;  %v1484_v24 = vmax.f32 %v1455_v44, 0.0  ;;  %v4867_v43 = vadd.f32 %v4866_v12, %v4865_v1 }
 0x162   : > { %v1878_v19 = vrot.slane %v1876_v6, 5  ;;  %v1881_v22 = vrot.slane %v1879_v7, 6  ;;  %v4869_v27 = vpop.f32.mrb[51].mxu0  ;;  %v4927_v30 = vpop.f32.mrb[51].mxu1  ;;  %1571 = vst [vmem:[#allocation3 + $0x40] sm:$0xf] %v1559_v18  ;;  %v4925_v41 = vadd.f32 %v4924_v8, %v4923_v2 }
 0x163   : > { %v5943_v60 = vrot.slane %v1646_v9, 4  ;;  %v5945_v26 = vrot.slane %v1656_v11, 4  ;;  %v1888_v36 = vrot.slane %v1886_v13, 5  ;;  %v1891_v37 = vrot.slane %v1889_v16, 6  ;;  %v5292_v50 = vld [vmem:[#allocation3] ss:$16 sps:$4 sm:$0xff]  }
 0x164   : > { %v5947_v40 = vor.u32 %v1881_v22, %v1878_v19  ;;  %v1485_v45 = vmax.f32 %v1458_v25, 0.0  ;;  %v4870_v46 = vadd.f32 %v4869_v27, %v4868_v14  ;;  %v5294_v51 = vld [vmem:[#allocation3 + $0x4] ss:$16 sps:$4 sm:$0xff]   ;;  %v4871_v52 = vpop.f32.mrb[52].mxu0  ;;  %v4928_v48 = vadd.f32 %v4927_v30, %v4926_v17  ;;  %v4929_v34 = vpop.f32.mrb[52].mxu1 }
 0x165   : > { %v5949_v58 = vor.u32 %v1891_v37, %v1888_v36  ;;  %v4872_v29 = vpop.f32.mrb[53].mxu0  ;;  %v1864_v31 = vrot.slane %v5891_v33, 4  ;;  %v1375_v10 = vadd.f32 %v4867_v43, %v5835_v47  ;;  %2430 = vmatprep.mubr.bf16.mxu0 %v5294_v51  ;;  %v4930_v56 = vpop.f32.mrb[53].mxu1  ;;  %v1560_v38 = vld [vmem:[#allocation2 + $0x14] sm:$0xf]  ;;  %v1642_v47 = vsel %vm5879_vm6, %v5883_v23, %v5929_v61 }
 0x166   : > { %v4691_v35 = vpack.c.bf16 %v1485_v45, %v1484_v24  ;;  %v1378_v54 = vadd.f32 %v4870_v46, %v5838_v49  ;;  %v4873_v55 = vadd.f32 %v4872_v29, %v4871_v52  ;;  %v4874_v57 = vpop.f32.mrb[54].mxu0  ;;  %v1590_v44 = vld [vmem:[#allocation2 + $0x18] sm:$0xf]  ;;  %v1591_v59 = vld [vmem:[#allocation2 + $0x1c] sm:$0xf]  ;;  %2431 = vmatmul.mubr.bf16.vlgmr.msra.gmra.mrb[56].mxu0 %v5292_v50  ;;  %v5959_v1 = vadd.f32 %v4930_v56, %v4929_v34  ;;  %v4932_v43 = vpop.f32.mrb[54].mxu1 }
 0x167   : > { %v5954_v0 = vld [vmem:[#allocation2 + $0x18] sm:$0xf]  ;;  %v1873_v33 = vsel %vm5895_vm8, %v1864_v31, %v5899_v39  ;;  %v1779_v49 = vsel %vm5887_vm7, %v5874_v15, %v1778_v21  ;;  %1572 = vst [vmem:[#allocation3 + $0x50] sm:$0xf] %v1560_v38  ;;  %v1659_v2 = vshll.u32 %v1590_v44, 16  ;;  %v1663_v6 = vshrl.u32 %v1590_v44, 16 }
 0x168   : > { %v1669_v7 = vshll.u32 %v1591_v59, 16  ;;  %v1673_v12 = vshrl.u32 %v1591_v59, 16  ;;  %v5970_v8 = vld [vmem:[#allocation2 + $0x1c] sm:$0xf]  ;;  %4701 = vst [vmem:[#allocation2 + $0x20] sm:$0xff] %v4691_v35   ;;  %v1784_v9 = vrot.slane %v5954_v0, 5  ;;  %v1463_v11 = vadd.f32 %v4925_v41, %v1375_v10 }
 0x169   : > { %1978 = vst [vmem:[#allocation3 + $0x1c] sm:$0xf] %v1873_v33  ;;  %1732 = vst [vmem:[#allocation3 + $0x34] sm:$0xf] %v1642_v47  ;;  %v1787_v23 = vrot.slane %v5970_v8, 5  ;;  %v1466_v13 = vadd.f32 %v4928_v48, %v1378_v54  ;;  %v5974_v15 = vrot.slane %v1659_v2, 5  ;;  %v1383_v57 = vadd.f32 %v4873_v55, %v5841_v63 }
 0x16a   : > { %1819 = vst [vmem:[#allocation3 + $0x28] sm:$0xf] %v1779_v49  ;;  %v1836_v42 = vld [vmem:[#allocation2 + $0x18] sm:$0xf]  ;;  %v1837_v61 = vld [vmem:[#allocation2 + $0x1c] sm:$0xf]  ;;  %v1782_v44 = vsel %vm5887_vm7, %v5935_v4, %v1781_v53 }
 0x16b   : > { %v1665_v21 = vrot.slane %v1663_v6, 4  ;;  %v5976_v16 = vrot.slane %v1669_v7, 5  ;;  %v1675_v14 = vrot.slane %v1673_v12, 4  ;;  %v1561_v17 = vld [vmem:[#allocation2 + $0x18] sm:$0xf]  ;;  %v5980_v18 = vrot.slane %v1784_v9, 4 }
 0x16c   : > { %v5984_v19 = vrot.slane %v1787_v23, 4  ;;  %v1896_v22 = vshrl.u32 %v1836_v42, 16  ;;  %v1899_v24 = vshll.u32 %v1836_v42, 16  ;;  %v1562_v25 = vld [vmem:[#allocation2 + $0x1c] sm:$0xf]  ;;  %v1906_v36 = vshrl.u32 %v1837_v61, 16 }
 0x16d   : > { %1573 = vst [vmem:[#allocation3 + $0x60] sm:$0xf] %v1561_v17  ;;  %v1666_v27 = vor.u32 %v1665_v21, %v5974_v15  ;;  %v1676_v30 = vor.u32 %v1675_v14, %v5976_v16  ;;  %v1909_v37 = vshll.u32 %v1837_v61, 16  ;;  %1574 = vst [vmem:[#allocation3 + $0x70] sm:$0xf] %v1562_v25  ;;  %v4875_v45 = vpop.f32.mrb[55].mxu0  ;;  %v1471_v3 = vadd.f32 %v5959_v1, %v1383_v57 }
 0x16e   : > { %v1898_v46 = vrot.slane %v1896_v22, 5  ;;  %v1901_v50 = vrot.slane %v1899_v24, 6  ;;  %v1486_v51 = vmax.f32 %v1463_v11, 0.0  ;;  %v1487_v52 = vmax.f32 %v1466_v13, 0.0  ;;  %v4933_v41 = vpop.f32.mrb[55].mxu1 }
 0x16f   : > { %v5988_v48 = vrot.slane %v1666_v27, 4  ;;  %v5990_v29 = vrot.slane %v1676_v30, 4  ;;  %v1908_v31 = vrot.slane %v1906_v36, 5  ;;  %v1911_v34 = vrot.slane %v1909_v37, 6  ;;  %v1592_v10 = vld [vmem:[#allocation2 + $0x20] sm:$0xf] }
 0x170   : > { %v5992_v35 = vor.u32 %v1901_v50, %v1898_v46  ;;  %v1593_v54 = vld [vmem:[#allocation2 + $0x24] sm:$0xf]  ;;  %v5994_v56 = vld [vmem:[#allocation2 + $0x20] sm:$0xf]  ;;  %v4696_v38 = vpack.c.bf16 %v1487_v52, %v1486_v51  ;;  %v1679_v33 = vshll.u32 %v1592_v10, 16  ;;  %v1683_v47 = vshrl.u32 %v1592_v10, 16 }
 0x171   : > { %v6002_v59 = vor.u32 %v1911_v34, %v1908_v31  ;;  %v1689_v49 = vshll.u32 %v1593_v54, 16  ;;  %v6004_v2 = vld [vmem:[#allocation2 + $0x24] sm:$0xf]  ;;  %1820 = vst [vmem:[#allocation3 + $0x38] sm:$0xf] %v1782_v44  ;;  %v1693_v6 = vshrl.u32 %v1593_v54, 16  ;;  %v1652_v46 = vsel %vm5879_vm6, %v5943_v60, %v5931_v62 }
 0x172   : > { %v1790_v7 = vrot.slane %v5994_v56, 5  ;;  %v1793_v12 = vrot.slane %v6004_v2, 5  ;;  %v1838_v63 = vld [vmem:[#allocation2 + $0x20] sm:$0xf]  ;;  %4702 = vst [vmem:[#allocation2 + $0x28] sm:$0xff] %v4696_v38   ;;  %v6009_v55 = vrot.slane %v1679_v33, 5  ;;  %v1662_v33 = vsel %vm5879_vm6, %v5945_v26, %v5974_v15 }
 0x173   : > { %v1685_v53 = vrot.slane %v1683_v47, 4  ;;  %v6011_v4 = vrot.slane %v1689_v49, 5  ;;  %v1839_v42 = vld [vmem:[#allocation2 + $0x24] sm:$0xf]  ;;  %v1916_v61 = vshrl.u32 %v1838_v63, 16  ;;  %v1695_v11 = vrot.slane %v1693_v6, 4 }
 0x174   : > { %v6015_v13 = vrot.slane %v1790_v7, 4  ;;  %v6019_v21 = vrot.slane %v1793_v12, 4  ;;  %v1919_v14 = vshll.u32 %v1838_v63, 16  ;;  %v5295_v17 = vld [vmem:[#allocation3 + $0x8] ss:$16 sps:$4 sm:$0xff]   ;;  %v1926_v24 = vshrl.u32 %v1839_v42, 16 }
 0x175   : > { %v1686_v1 = vor.u32 %v1685_v53, %v6009_v55  ;;  %v1918_v22 = vrot.slane %v1916_v61, 5  ;;  %v1929_v25 = vshll.u32 %v1839_v42, 16  ;;  %v5297_v27 = vld [vmem:[#allocation3 + $0xc] ss:$16 sps:$4 sm:$0xff]   ;;  %v1696_v30 = vor.u32 %v1695_v11, %v6011_v4  ;;  %v5298_v45 = vld [vmem:[#allocation3 + $0x24] ss:$16 sps:$4 sm:$0xff]  }
 0x176   : > { %v1921_v36 = vrot.slane %v1919_v14, 6  ;;  %v1488_v37 = vmax.f32 %v1471_v3, 0.0  ;;  %v5300_v43 = vld [vmem:[#allocation3 + $0x20] ss:$16 sps:$4 sm:$0xff]   ;;  %v1928_v51 = vrot.slane %v1926_v24, 5  ;;  %2511 = vmatprep.mubr.bf16.mxu1 %v5297_v27  ;;  %v1874_v41 = vrot.slane %v5899_v39, 4  ;;  %2438 = vmatprep.mubr.bf16.mxu0 %v5298_v45 }
 0x177   : > { %v6027_v50 = vrot.slane %v1686_v1, 4  ;;  %v1931_v52 = vrot.slane %v1929_v25, 6  ;;  %1733 = vst [vmem:[#allocation3 + $0x44] sm:$0xf] %v1652_v46  ;;  %v1563_v31 = vld [vmem:[#allocation2 + $0x20] sm:$0xf]  ;;  %2512 = vmatmul.mubr.bf16.vlgmr.msra.gmra.mrb[56].mxu1 %v5295_v17  ;;  %2439 = vmatmul.mubr.bf16.gmra.mrb[60].mxu0 %v5300_v43  ;;  %v1785_v47 = vsel %vm5887_vm7, %v5939_v5, %v1784_v9  ;;  %v1788_v9 = vsel %vm5887_vm7, %v5980_v18, %v1787_v23 }
 0x178   : > { %v6030_v34 = vrot.slane %v1696_v30, 4  ;;  %v6032_v10 = vor.u32 %v1921_v36, %v1918_v22  ;;  %v4646_v54 = vpack.c.bf16 %v1488_v37, %v1488_v37  ;;  %v1884_v38 = vrot.slane %v5947_v40, 4  ;;  %v1564_v57 = vld [vmem:[#allocation2 + $0x24] sm:$0xf]  ;;  %1575 = vst [vmem:[#allocation3 + $0x80] sm:$0xf] %v1563_v31 }
 0x179   : > { %v6035_v62 = vor.u32 %v1931_v52, %v1928_v51  ;;  %v1594_v60 = vld [vmem:[#allocation2 + $0x28] sm:$0xf]  ;;  %v6037_v44 = vld [vmem:[#allocation2 + $0x2c] sm:$0x1]  ;;  %v1883_v39 = vsel %vm5895_vm8, %v1874_v41, %v5947_v40  ;;  %1576 = vst [vmem:[#allocation3 + $0x90] sm:$0xf] %v1564_v57  ;;  %v1672_v41 = vsel %vm5879_vm6, %v5988_v48, %v5976_v16  ;;  %v1682_v31 = vsel %vm5879_vm6, %v5990_v29, %v6009_v55 }
 0x17a   : > { %v1699_v49 = vshll.u32 %v1594_v60, 16  ;;  %v1703_v6 = vshrl.u32 %v1594_v60, 16  ;;  %v1709_v63 = vshll.u32 %v6037_v44, 16  ;;  %v1713_v3 = vshrl.u32 %v6037_v44, 16  ;;  %v6053_v53 = vld [vmem:[#allocation2 + $0x28] sm:$0xf] }
 0x17b   : > { %1554 = vst [vmem:[#allocation2 + $0x30] sm:$0xf] %v4646_v54  ;;  %1979 = vst [vmem:[#allocation3 + $0x2c] sm:$0xf] %v1883_v39  ;;  %v6055_v26 = vld [vmem:[#allocation2 + $0x2c] sm:$0xf]  ;;  %v1893_v5 = vsel %vm5895_vm8, %v1884_v38, %v5949_v58  ;;  %v1791_v48 = vsel %vm5887_vm7, %v5984_v19, %v1790_v7  ;;  %v1794_v29 = vsel %vm5887_vm7, %v6015_v13, %v1793_v12 }
 0x17c   : > { %1734 = vst [vmem:[#allocation3 + $0x54] sm:$0xf] %v1662_v33  ;;  %1821 = vst [vmem:[#allocation3 + $0x48] sm:$0xf] %v1785_v47  ;;  %v1796_v40 = vrot.slane %v6053_v53, 5  ;;  %v1894_v15 = vrot.slane %v5949_v58, 4  ;;  %v1692_v19 = vsel %vm5879_vm6, %v6027_v50, %v6011_v4 }
 0x17d   : > { %v1840_v0 = vld [vmem:[#allocation2 + $0x28] sm:$0xf]  ;;  %v1701_v42 = vrot.slane %v1699_v49, 5  ;;  %v1705_v61 = vrot.slane %v1703_v6, 4  ;;  %v6067_v11 = vrot.slane %v1709_v63, 5  ;;  %v1799_v14 = vrot.slane %v6055_v26, 5 }
 0x17e   : > { %v1841_v17 = vld [vmem:[#allocation2 + $0x2c] sm:$0xf]  ;;  %1980 = vst [vmem:[#allocation3 + $0x3c] sm:$0xf] %v1893_v5  ;;  %1822 = vst [vmem:[#allocation3 + $0x58] sm:$0xf] %v1788_v9  ;;  %v1903_v27 = vsel %vm5895_vm8, %v1894_v15, %v5992_v35 }
 0x17f   : > { %v6072_v1 = vrot.slane %v1796_v40, 4  ;;  %v1936_v8 = vshrl.u32 %v1840_v0, 16  ;;  %v1939_v22 = vshll.u32 %v1840_v0, 16  ;;  %v1946_v24 = vshrl.u32 %v1841_v17, 16  ;;  %v1565_v25 = vld [vmem:[#allocation2 + $0x28] sm:$0xf] }
 0x180   : > { %v1706_v23 = vor.u32 %v1705_v61, %v1701_v42  ;;  %v6076_v58 = vrot.slane %v1799_v14, 4  ;;  %v1949_v18 = vshll.u32 %v1841_v17, 16  ;;  %1577 = vst [vmem:[#allocation3 + $0xa0] sm:$0xf] %v1565_v25  ;;  %v1904_v45 = vrot.slane %v5992_v35, 4  ;;  %v5331_v54 = vld [vmem:[%s6864_s5 + $0x8] sm:$0xff]  }
 0x181   : > { %v1938_v30 = vrot.slane %v1936_v8, 5  ;;  %v1941_v36 = vrot.slane %v1939_v22, 6  ;;  %v1948_v37 = vrot.slane %v1946_v24, 5  ;;  %1981 = vst [vmem:[#allocation3 + $0x4c] sm:$0xf] %v1903_v27  ;;  %v1914_v0 = vrot.slane %v6002_v59, 4 }
 0x182   : > { %v1581_v43 = vld [vmem:[#allocation3 + $0xb0] sm:$0x1]  ;;  %v1566_v46 = vld [vmem:[#allocation2 + $0x2c] sm:$0x1]  ;;  %v1707_v51 = vrot.slane %v1706_v23, 4  ;;  %v1951_v52 = vrot.slane %v1949_v18, 6  ;;  %v1913_v16 = vsel %vm5895_vm8, %v1904_v45, %v6002_v59  ;;  %v1702_v2 = vsel %vm5879_vm6, %v6030_v34, %v1701_v42 }
 0x183   : > { %v1740_v35 = vld [vmem:[#allocation3 + $0xb4] sm:$0x1]  ;;  %v6096_v38 = vor.u32 %v1941_v36, %v1938_v30  ;;  %v1754_v57 = vld [vmem:[#allocation2 + $0x30] sm:$0x3]  ;;  %1735 = vst [vmem:[#allocation3 + $0x64] sm:$0xf] %v1672_v41  ;;  %v1582_v7 = vsel %vm6092_vm11, %v1566_v46, %v1581_v43  ;;  %v1923_v59 = vsel %vm5895_vm8, %v1914_v0, %v6032_v10  ;;  %v1797_v34 = vsel %vm5887_vm7, %v6019_v21, %v1796_v40 }
 0x184   : > { %v1842_v60 = vld [vmem:[#allocation2 + $0x30] sm:$0x3]  ;;  %1736 = vst [vmem:[#allocation3 + $0x74] sm:$0xf] %v1682_v31  ;;  %v1952_v55 = vor.u32 %v1951_v52, %v1948_v37  ;;  %v1802_v39 = vrot.slane %v1754_v57, 5  ;;  %v1924_v15 = vrot.slane %v6032_v10, 4  ;;  %v1712_v4 = vsel %vm5879_vm6, %v1707_v51, %v6067_v11 }
 0x185   : > { %v1956_v33 = vshrl.u32 %v1842_v60, 16  ;;  %v1959_v47 = vshll.u32 %v1842_v60, 16  ;;  %v5304_v49 = vld [vmem:[#allocation3 + $0x44] ss:$16 sps:$4 sm:$0xff]   ;;  %1982 = vst [vmem:[#allocation3 + $0x5c] sm:$0xf] %v1913_v16  ;;  %v1741_v50 = vsel %vm6092_vm11, %v1713_v3, %v1740_v35  ;;  %v1800_v44 = vsel %vm5887_vm7, %v6072_v1, %v1799_v14 }
 0x186   : > { %1823 = vst [vmem:[#allocation3 + $0x68] sm:$0xf] %v1791_v48  ;;  %1824 = vst [vmem:[#allocation3 + $0x78] sm:$0xf] %v1794_v29  ;;  %v1828_v6 = vld [vmem:[#allocation3 + $0xb8] sm:$0x1]  ;;  %2446 = vmatprep.mubr.bf16.mxu0 %v5304_v49  ;;  %v1933_v10 = vsel %vm5895_vm8, %v1924_v15, %v6035_v62  ;;  %v1803_v53 = vsel %vm5887_vm7, %v6076_v58, %v1802_v39 }
 0x187   : > { %v5301_v56 = vld [vmem:[#allocation3 + $0x2c] ss:$16 sps:$4 sm:$0xff]   ;;  %v5303_v63 = vld [vmem:[#allocation3 + $0x28] ss:$16 sps:$4 sm:$0xff]   ;;  %v1804_v12 = vrot.slane %v1802_v39, 4  ;;  %v1958_v13 = vrot.slane %v1956_v33, 5 }
 0x188   : > { %v1961_v5 = vrot.slane %v1959_v47, 6  ;;  %v5306_v9 = vld [vmem:[#allocation3 + $0x40] ss:$16 sps:$4 sm:$0xff]   ;;  %1737 = vst [vmem:[#allocation3 + $0x84] sm:$0xf] %v1692_v19  ;;  %2519 = vmatprep.mubr.bf16.mxu1 %v5301_v56  ;;  %v1934_v21 = vrot.slane %v6035_v62, 4 }
 0x189   : > { %1738 = vst [vmem:[#allocation3 + $0x94] sm:$0xf] %v1702_v2  ;;  %1583 = vst [vmem:[#allocation3 + $0xb0] sm:$0x1] %v1582_v7  ;;  %v1988_v42 = vld [vmem:[#allocation3 + $0xbc] sm:$0x1]  ;;  %2520 = vmatmul.mubr.bf16.gmra.mrb[60].mxu1 %v5303_v63  ;;  %2447 = vmatmul.mubr.bf16.gmra.mrb[64].mxu0 %v5306_v9  ;;  %v1829_v40 = vsel %vm6092_vm11, %v1804_v12, %v1828_v6 }
 0x18a   : > { %v1962_v61 = vor.u32 %v1961_v5, %v1958_v13  ;;  %v1964_v17 = vrot.slane %v1958_v13, 4  ;;  %1983 = vst [vmem:[#allocation3 + $0x6c] sm:$0xf] %v1923_v59  ;;  %1739 = vst [vmem:[#allocation3 + $0xa4] sm:$0xf] %v1712_v4  ;;  %v1944_v3 = vrot.slane %v6096_v38, 4  ;;  %v1943_v62 = vsel %vm5895_vm8, %v1934_v21, %v6096_v38 }
 0x18b   : > { %1742 = vst [vmem:[#allocation3 + $0xb4] sm:$0x1] %v1741_v50  ;;  %1825 = vst [vmem:[#allocation3 + $0x88] sm:$0xf] %v1797_v34  ;;  %v5310_v11 = vld [vmem:[#allocation3 + $0x64] ss:$16 sps:$4 sm:$0xff]  }
 0x18c   : > { %1984 = vst [vmem:[#allocation3 + $0x7c] sm:$0xf] %v1933_v10  ;;  %1826 = vst [vmem:[#allocation3 + $0x98] sm:$0xf] %v1800_v44  ;;  %v1954_v26 = vrot.slane %v1952_v55, 4  ;;  %v1989_v14 = vsel %vm6092_vm11, %v1964_v17, %v1988_v42  ;;  %v1953_v8 = vsel %vm5895_vm8, %v1944_v3, %v1952_v55  ;;  %2454 = vmatprep.mubr.bf16.mxu0 %v5310_v11  ;;  %v5328_v51 = vld [vmem:[%s6864_s5 + $0x40] sm:$0xff]  }
 0x18d   : > { %1827 = vst [vmem:[#allocation3 + $0xa8] sm:$0xf] %v1803_v53  ;;  %1830 = vst [vmem:[#allocation3 + $0xb8] sm:$0x1] %v1829_v40  ;;  %v5307_v1 = vld [vmem:[#allocation3 + $0x4c] ss:$16 sps:$4 sm:$0xff]   ;;  %5039 = vmatprep.subr.bf16.mxu0 %v5328_v51 }
 0x18e   : > { %1990 = vst [vmem:[#allocation3 + $0xbc] sm:$0x1] %v1989_v14  ;;  %v5309_v22 = vld [vmem:[#allocation3 + $0x48] ss:$16 sps:$4 sm:$0xff]   ;;  %v5312_v24 = vld [vmem:[#allocation3 + $0x60] ss:$16 sps:$4 sm:$0xff]   ;;  %v1963_v25 = vsel %vm5895_vm8, %v1954_v26, %v1962_v61  ;;  %2527 = vmatprep.mubr.bf16.mxu1 %v5307_v1  ;;  %vm6377_vm11 = vmor %vm2655_vm3, %vm3221_vm5 }
 0x18f   : > { %1985 = vst [vmem:[#allocation3 + $0x8c] sm:$0xf] %v1943_v62  ;;  %1986 = vst [vmem:[#allocation3 + $0x9c] sm:$0xf] %v1953_v8  ;;  %v5315_v18 = vld [vmem:[#allocation3 + $0x68] ss:$16 sps:$4 sm:$0xff]  }
 0x190   : > { %v5316_v23 = vld [vmem:[#allocation3 + $0x84] ss:$16 sps:$4 sm:$0xff]   ;;  %1987 = vst [vmem:[#allocation3 + $0xac] sm:$0xf] %v1963_v25  ;;  %v5318_v27 = vld [vmem:[#allocation3 + $0x80] ss:$16 sps:$4 sm:$0xff]  }
 0x191   : > { %2528 = vmatmul.mubr.bf16.gmra.mrb[64].mxu1 %v5309_v22  ;;  %2455 = vmatmul.mubr.bf16.gmra.mrb[68].mxu0 %v5312_v24  ;;  %v5326_v43 = vld [vmem:[#allocation3 + $0xa0] ss:$16 sps:$4 sm:$0x1f]   ;;  %v5330_v41 = vld [vmem:[%s6864_s5 + $0x48] sm:$0xff]   ;;  %v5334_v55 = vld [vmem:[%s6864_s5 + $0x58] sm:$0xff]   ;;  %vm2785_vm5 = vcmask 1043968  }
 0x192   : > { %2462 = vmatprep.mubr.bf16.mxu0 %v5316_v23  ;;  %v5319_v30 = vld [vmem:[#allocation3 + $0xa4] ss:$16 sps:$4 sm:$0x1f]   ;;  %v5329_v52 = vld [vmem:[%s6864_s5] sm:$0xff]   ;;  %v5332_v38 = vld [vmem:[%s6864_s5 + $0x50] sm:$0xff]  }
 0x193   : > { %v5313_v58 = vld [vmem:[#allocation3 + $0x6c] ss:$16 sps:$4 sm:$0xff]   ;;  %v5323_v37 = vld [vmem:[#allocation3 + $0x88] ss:$16 sps:$4 sm:$0xff]   ;;  %5040 = vmatpush3.bf16.msra.mxu0 %v5329_v52 }
 0x194   : > { %2535 = vmatprep.mubr.bf16.mxu1 %v5313_v58  ;;  %v5327_v46 = vld [vmem:[#allocation3 + $0xa8] ss:$16 sps:$4 sm:$0x1f]   ;;  %5041 = vmatprep.subr.bf16.mxu0 %v5330_v41  ;;  %v5333_v29 = vld [vmem:[%s6864_s5 + $0x10] sm:$0xff]   ;;  %v6185_v39 = vld [vmem:[%s6863_s4] ss:$0 sm:$0xff] }
 0x195   : > { %v5335_v21 = vld [vmem:[%s6864_s5 + $0x18] sm:$0xff]  }
 0x196   : > { %v5321_v36 = vld [vmem:[#allocation3 + $0x8c] ss:$16 sps:$4 sm:$0xff]  }
 0x197   : > { %v5324_v45 = vld [vmem:[#allocation3 + $0xac] ss:$16 sps:$4 sm:$0x1f]   ;;  %5042 = vmatpush3.bf16.msra.mxu0 %v5331_v54 }
 0x198   : > { %5043 = vmatprep.subr.bf16.mxu0 %v5332_v38 }
 0x199   : > { %2536 = vmatmul.mubr.bf16.gmra.mrb[68].mxu1 %v5315_v18  ;;  %2463 = vmatmul.mubr.bf16.gmra.mrb[72].mxu0 %v5318_v27 }
 0x19a   : > { %2470 = vmatprep.mubr.bf16.mxu0 %v5319_v30  ;;  %2543 = vmatprep.mubr.bf16.mxu1 %v5321_v36 }
 0x19b   : > { %5044 = vmatpush3.bf16.msra.mxu0 %v5333_v29 }
 0x19c   : > { %5045 = vmatprep.subr.bf16.mxu0 %v5334_v55 }
 0x19f   : > { %5046 = vmatpush3.bf16.msra.mxu0 %v5335_v21  ;;  %v5339_v21 = vld [vmem:[%s6864_s5 + $0x80] sm:$0xff]  }
 0x1a1   : > { %2544 = vmatmul.mubr.bf16.gmra.mrb[72].mxu1 %v5323_v37  ;;  %2471 = vmatmul.mubr.bf16.gmra.mrb[76].mxu0 %v5326_v43 }
 0x1a2   : > { %2551 = vmatprep.mubr.bf16.mxu1 %v5324_v45 }
 0x1a9   : > { %2552 = vmatmul.mubr.bf16.gmra.mrb[76].mxu1 %v5327_v46 }
 0x239   : > { %v4951_v31 = vpop.f32.mrb[56].mxu0 }
 0x23a   : > { %v4952_v35 = vpop.f32.mrb[57].mxu0 }
 0x23b   : > { %v4953_v57 = vadd.f32 %v4952_v35, %v4951_v31  ;;  %v4954_v60 = vpop.f32.mrb[58].mxu0 }
 0x23c   : > { %v4955_v16 = vpop.f32.mrb[59].mxu0 }
 0x23d   : > { %v4956_v48 = vadd.f32 %v4955_v16, %v4954_v60  ;;  %v2433_v6 = vadd.f32 %v4953_v57, %v6185_v39 }
 0x23f   : > { %v2436_v12 = vadd.f32 %v4956_v48, %v6185_v39 }
 0x24a   : > { %v5003_v33 = vpop.f32.mrb[56].mxu1  ;;  %v4957_v49 = vpop.f32.mrb[60].mxu0 }
 0x24b   : > { %v5004_v47 = vpop.f32.mrb[57].mxu1  ;;  %v4958_v0 = vpop.f32.mrb[61].mxu0 }
 0x24c   : > { %v5005_v56 = vadd.f32 %v5004_v47, %v5003_v33  ;;  %v5006_v63 = vpop.f32.mrb[58].mxu1  ;;  %v4959_v2 = vadd.f32 %v4958_v0, %v4957_v49  ;;  %v4960_v7 = vpop.f32.mrb[62].mxu0  ;;  %v5336_v47 = vld [vmem:[%s6864_s5 + $0x60] sm:$0xff]  }
 0x24d   : > { %v5007_v19 = vpop.f32.mrb[59].mxu1  ;;  %v4961_v9 = vpop.f32.mrb[63].mxu0  ;;  %5047 = vmatprep.subr.bf16.mxu0 %v5336_v47 }
 0x24e   : > { %v2514_v13 = vadd.f32 %v5005_v56, %v2433_v6  ;;  %v5008_v5 = vadd.f32 %v5007_v19, %v5006_v63  ;;  %v4962_v15 = vadd.f32 %v4961_v9, %v4960_v7  ;;  %v2441_v3 = vadd.f32 %v4959_v2, %v6185_v39  ;;  %v5337_v2 = vld [vmem:[%s6864_s5 + $0x20] sm:$0xff]  }
 0x24f   : > { %v5338_v7 = vld [vmem:[%s6864_s5 + $0xc0] sm:$0xff]   ;;  %5048 = vmatpush3.bf16.msra.mxu0 %v5337_v2 }
 0x250   : > { %v2560_v59 = vmax.f32 %v2514_v13, 0.0  ;;  %v2517_v4 = vadd.f32 %v5008_v5, %v2436_v12  ;;  %v2444_v22 = vadd.f32 %v4962_v15, %v6185_v39  ;;  %5085 = vmatprep.subr.bf16.mxu1 %v5338_v7 }
 0x251   : > { %5086 = vmatpush3.bf16.msra.mxu1 %v5339_v21 }
 0x252   : > { %v4647_v50 = vpack.c.bf16 %v2560_v59, %v2560_v59  ;;  %v2561_v34 = vmax.f32 %v2517_v4, 0.0 }
 0x254   : > { %2621 = vst.msk [vmem:[#allocation4] sm:$0xf] %vm2620_vm12, %v4647_v50  ;;  %v4648_v42 = vpack.c.bf16 %v2561_v34, %v2561_v34 }
 0x256   : > { %2622 = vst.msk [vmem:[#allocation4 + $0x4] sm:$0xf] %vm2620_vm12, %v4648_v42 }
 0x25b   : > { %v2660_v62 = vld [vmem:[#allocation4] sm:$0xf] }
 0x25c   : > { %v5009_v61 = vpop.f32.mrb[60].mxu1  ;;  %v4963_v17 = vpop.f32.mrb[64].mxu0  ;;  %v2637_v8 = vld [vmem:[#allocation4] sm:$0xf]  ;;  %v2670_v18 = vshrl.u32 %v2660_v62, 16  ;;  %v2673_v27 = vshll.u32 %v2660_v62, 16 }
 0x25d   : > { %v5010_v10 = vpop.f32.mrb[61].mxu1  ;;  %v4964_v44 = vpop.f32.mrb[65].mxu0  ;;  %2646 = vst.msk [vmem:[#allocation5] sm:$0xf] %vm2620_vm12, %v2637_v8  ;;  %v2661_v58 = vld [vmem:[#allocation4 + $0x4] sm:$0xf] }
 0x25e   : > { %v5011_v53 = vadd.f32 %v5010_v10, %v5009_v61  ;;  %v5012_v40 = vpop.f32.mrb[62].mxu1  ;;  %v4965_v11 = vadd.f32 %v4964_v44, %v4963_v17  ;;  %v4966_v26 = vpop.f32.mrb[66].mxu0  ;;  %v2679_v37 = vshll.u32 %v2661_v58, 16  ;;  %v2799_v45 = vld [vmem:[#allocation4] sm:$0xe]  ;;  %v2672_v46 = vrot.slane %v2670_v18, 4 }
 0x25f   : > { %v5013_v14 = vpop.f32.mrb[63].mxu1  ;;  %v4967_v1 = vpop.f32.mrb[67].mxu0  ;;  %v6197_v43 = vld [vmem:[#allocation4 + $0x4] sm:$0xf]  ;;  %v2675_v51 = vrot.slane %v2673_v27, 5  ;;  %v2683_v52 = vshrl.u32 %v2661_v58, 16 }
 0x260   : > { %v2522_v24 = vadd.f32 %v5011_v53, %v2441_v3  ;;  %v5014_v25 = vadd.f32 %v5013_v14, %v5012_v40  ;;  %v4968_v23 = vadd.f32 %v4967_v1, %v4966_v26  ;;  %v2681_v38 = vrot.slane %v2679_v37, 5  ;;  %v6199_v57 = vld [vmem:[#allocation4 + $0x4] sm:$0xe] }
 0x261   : > { %v2676_v48 = vor.u32 %v2675_v51, %v2672_v46  ;;  %v2685_v29 = vrot.slane %v2683_v52, 4  ;;  %v4549_v55 = vrot.slane %v2799_v45, 9  ;;  %v2819_v33 = vrot.slane %v6197_v43, 5  ;;  %v2638_v4 = vld [vmem:[#allocation4 + $0x4] sm:$0xf] }
 0x262   : > { %v2562_v30 = vmax.f32 %v2522_v24, 0.0  ;;  %v2525_v36 = vadd.f32 %v5014_v25, %v2444_v22  ;;  %v2449_v6 = vadd.f32 %v4965_v11, %v6185_v39  ;;  %v2452_v12 = vadd.f32 %v4968_v23, %v6185_v39  ;;  %v6220_v61 = vld [vmem:[#allocation4 + $0x4] sm:$0xe]  ;;  %2647 = vst.msk [vmem:[#allocation5 + $0x14] sm:$0xf] %vm2620_vm12, %v2638_v4 }
 0x263   : > { %v2677_v9 = vrot.slane %v2676_v48, 4  ;;  %v2820_v15 = vsel %vm5887_vm7, %v4549_v55, %v2819_v33  ;;  %v2955_v59 = vshrl.u32 %v6199_v57, 16  ;;  %v6222_v17 = vld [vmem:[#allocation4 + $0x4] sm:$0xc]  ;;  %v2686_v10 = vor.u32 %v2685_v29, %v2681_v38 }
 0x264   : > { %v4649_v41 = vpack.c.bf16 %v2562_v30, %v2562_v30  ;;  %v2563_v31 = vmax.f32 %v2525_v36, 0.0  ;;  %v5015_v54 = vpop.f32.mrb[64].mxu1  ;;  %v4969_v35 = vpop.f32.mrb[68].mxu0  ;;  %2852 = vst.msk [vmem:[#allocation5 + $0x4] sm:$0xf] %vm2620_vm12, %v2820_v15  ;;  %v5340_v3 = vld [vmem:[%s6864_s5 + $0x68] sm:$0xff]  }
 0x265   : > { %v5016_v60 = vpop.f32.mrb[65].mxu1  ;;  %v4970_v16 = vpop.f32.mrb[69].mxu0  ;;  %v2682_v44 = vsel %vm5879_vm6, %v2677_v9, %v2681_v38  ;;  %v4550_v11 = vrot.slane %v6220_v61, 9  ;;  %v4551_v26 = vrot.slane %v6222_v17, 10  ;;  %v2958_v14 = vshll.u32 %v6199_v57, 16  ;;  %5049 = vmatprep.subr.bf16.mxu0 %v5340_v3  ;;  %v5341_v1 = vld [vmem:[%s6864_s5 + $0x28] sm:$0xff]  }
 0x266   : > { %2623 = vst.msk [vmem:[#allocation4 + $0x8] sm:$0xf] %vm2620_vm12, %v4649_v41  ;;  %v4650_v49 = vpack.c.bf16 %v2563_v31, %v2563_v31  ;;  %v5017_v56 = vadd.f32 %v5016_v60, %v5015_v54  ;;  %v5018_v63 = vpop.f32.mrb[66].mxu1  ;;  %v4971_v0 = vadd.f32 %v4970_v16, %v4969_v35  ;;  %v4972_v19 = vpop.f32.mrb[70].mxu0  ;;  %2758 = vrot.lane.b32.xlu0 %v2682_v44, %s5400_s23  ;;  %v5342_v62 = vld [vmem:[%s6864_s5 + $0xc8] sm:$0xff]   ;;  %v6244_v23 = vrot.slane %v2686_v10, 4 }
 0x267   : > { %v5019_v13 = vpop.f32.mrb[67].mxu1  ;;  %v4973_v5 = vpop.f32.mrb[71].mxu0  ;;  %v6246_v58 = vrot.slane %v2955_v59, 5  ;;  %5050 = vmatpush3.bf16.msra.mxu0 %v5341_v1  ;;  %5087 = vmatprep.subr.bf16.mxu1 %v5342_v62  ;;  %v5343_v38 = vld [vmem:[%s6864_s5 + $0x88] sm:$0xff]   ;;  %v5345_v9 = vld [vmem:[%s6864_s5 + $0x30] sm:$0xff]  }
 0x268   : > { %2624 = vst.msk [vmem:[#allocation4 + $0xc] sm:$0xf] %vm2620_vm12, %v4650_v49  ;;  %v2530_v50 = vadd.f32 %v5017_v56, %v2449_v6  ;;  %v5020_v34 = vadd.f32 %v5019_v13, %v5018_v63  ;;  %v4974_v42 = vadd.f32 %v4973_v5, %v4972_v19  ;;  %v2457_v27 = vadd.f32 %v4971_v0, %v6185_v39  ;;  %v5344_v19 = vld [vmem:[%s6864_s5 + $0x70] sm:$0xff]   ;;  %v4145_v57 = vld [vmem:[#allocation6 + $0x20] sm:$0x3] }
 0x269   : > { %5088 = vmatpush3.bf16.msra.mxu1 %v5343_v38  ;;  %5051 = vmatprep.subr.bf16.mxu0 %v5344_v19  ;;  %v5346_v44 = vld [vmem:[%s6864_s5 + $0xd0] sm:$0xff]  }
 0x26a   : > { %v2564_v53 = vmax.f32 %v2530_v50, 0.0  ;;  %v2533_v40 = vadd.f32 %v5020_v34, %v2452_v12  ;;  %v2460_v49 = vadd.f32 %v4974_v42, %v6185_v39  ;;  %v6287_v34 = vrot.slane %v2958_v14, 6  ;;  %5089 = vmatprep.subr.bf16.mxu1 %v5346_v44 }
 0x26b   : > { %5052 = vmatpush3.bf16.msra.mxu0 %v5345_v9  ;;  %v6334_v9 = vrot.slane %v2819_v33, 4  ;;  %v5350_v33 = vld [vmem:[%s6864_s5 + $0xd8] sm:$0xff]  }
 0x26c   : > { %v4651_v8 = vpack.c.bf16 %v2564_v53, %v2564_v53  ;;  %v2565_v22 = vmax.f32 %v2533_v40, 0.0  ;;  %v5021_v24 = vpop.f32.mrb[68].mxu1  ;;  %v4975_v25 = vpop.f32.mrb[72].mxu0 }
 0x26d   : > { %v3350_v18 = vld [vmem:[#allocation4 + $0x8] sm:$0x8]  ;;  %v5022_v30 = vpop.f32.mrb[69].mxu1  ;;  %v4976_v36 = vpop.f32.mrb[73].mxu0 }
 0x26e   : > { %v2864_v37 = vld [vmem:[#allocation4 + $0x8] sm:$0xf]  ;;  %v4553_v45 = vrot.slane %v3350_v18, 11  ;;  %2625 = vst.msk [vmem:[#allocation4 + $0x10] sm:$0xf] %vm2620_vm12, %v4651_v8  ;;  %v4652_v46 = vpack.c.bf16 %v2565_v22, %v2565_v22  ;;  %v5023_v51 = vadd.f32 %v5022_v30, %v5021_v24  ;;  %v5024_v52 = vpop.f32.mrb[70].mxu1  ;;  %v4977_v41 = vadd.f32 %v4976_v36, %v4975_v25 }
 0x26f   : > { %v4978_v31 = vpop.f32.mrb[74].mxu0  ;;  %v3064_v54 = vld [vmem:[#allocation4 + $0x8] sm:$0xf]  ;;  %v3351_v60 = vld [vmem:[#allocation4 + $0xc] sm:$0xf]  ;;  %v5025_v16 = vpop.f32.mrb[71].mxu1 }
 0x270   : > { %v2883_v48 = vrot.slane %v2864_v37, 5  ;;  %v4979_v29 = vpop.f32.mrb[75].mxu0  ;;  %v3086_v55 = vrot.slane %v3064_v54, 6  ;;  %v3374_v47 = vrot.slane %v3351_v60, 7  ;;  %2626 = vst.msk [vmem:[#allocation4 + $0x14] sm:$0xf] %vm2620_vm12, %v4652_v46  ;;  %v2538_v6 = vadd.f32 %v5023_v51, %v2457_v27 }
 0x271   : > { %v5026_v56 = vadd.f32 %v5025_v16, %v5024_v52  ;;  %v6267_v63 = vld [vmem:[#allocation4 + $0xc] sm:$0xf]  ;;  %v2662_v0 = vld [vmem:[#allocation4 + $0x8] sm:$0xf]  ;;  %v4980_v7 = vadd.f32 %v4979_v29, %v4978_v31  ;;  %v2465_v1 = vadd.f32 %v4977_v41, %v6185_v39  ;;  %v5348_v16 = vld [vmem:[%s6864_s5 + $0x78] sm:$0xff]  }
 0x272   : > { %v2884_v2 = vsel %vm5887_vm7, %v4550_v11, %v2883_v48  ;;  %v3087_v12 = vsel %vm6252_vm1, %v4551_v26, %v3086_v55  ;;  %v2885_v13 = vrot.slane %v2883_v48, 4  ;;  %v6276_v5 = vld [vmem:[#allocation4 + $0xc] sm:$0xf]  ;;  %v3375_v15 = vsel %vm6261_vm2, %v4553_v45, %v3374_v47  ;;  %v3212_v19 = vld [vmem:[#allocation4 + $0x8] sm:$0xc]  ;;  %5053 = vmatprep.subr.bf16.mxu0 %v5348_v16 }
 0x273   : > { %v2566_v59 = vmax.f32 %v2538_v6, 0.0  ;;  %v2541_v4 = vadd.f32 %v5026_v56, %v2460_v49  ;;  %2907 = vrot.lane.b32.xlu1 %v2884_v2, %s5400_s23  ;;  %3110 = vrot.lane.b32.xlu0 %v3087_v12, %s5400_s23  ;;  %v6285_v50 = vld [vmem:[#allocation4 + $0xc] sm:$0xf]  ;;  %v3376_v42 = vrot.slane %v3374_v47, 4  ;;  %3409 = vst.msk [vmem:[#allocation5 + $0x10] sm:$0xf] %vm2620_vm12, %v3375_v15  ;;  %v2468_v52 = vadd.f32 %v4980_v7, %v6185_v39 }
 0x274   : > { %v2886_v61 = vrot.slane %v6267_v63, 5  ;;  %v2689_v17 = vshll.u32 %v2662_v0, 16  ;;  %v2693_v10 = vshrl.u32 %v2662_v0, 16  ;;  %v5027_v53 = vpop.f32.mrb[72].mxu1  ;;  %v4981_v40 = vpop.f32.mrb[76].mxu0  ;;  %v3088_v11 = vrot.slane %v3086_v55, 4 }
 0x275   : > { %v4653_v21 = vpack.c.bf16 %v2566_v59, %v2566_v59  ;;  %v2567_v3 = vmax.f32 %v2541_v4, 0.0  ;;  %v3089_v26 = vrot.slane %v6276_v5, 6  ;;  %v3352_v14 = vld [vmem:[#allocation4 + $0x10] sm:$0xf]  ;;  %v5028_v62 = vpop.f32.mrb[73].mxu1  ;;  %v4982_v24 = vpop.f32.mrb[77].mxu0 }
 0x276   : > { %v2887_v8 = vsel %vm5887_vm7, %v2885_v13, %v2886_v61  ;;  %v2691_v22 = vrot.slane %v2689_v17, 5  ;;  %v2695_v25 = vrot.slane %v2693_v10, 4  ;;  %v3377_v18 = vrot.slane %v3352_v14, 7  ;;  %v5030_v36 = vpop.f32.mrb[74].mxu1  ;;  %v4984_v45 = vpop.f32.mrb[78].mxu0  ;;  %v5347_v46 = vld [vmem:[%s6864_s5 + $0x90] sm:$0xff]  }
 0x277   : > { %2627 = vst.msk [vmem:[#allocation4 + $0x18] sm:$0xf] %vm2620_vm12, %v4653_v21  ;;  %v4654_v27 = vpack.c.bf16 %v2567_v3, %v2567_v3  ;;  %v5029_v30 = vadd.f32 %v5028_v62, %v5027_v53  ;;  %2909 = vrot.lane.b32.xlu1 %v2887_v8, %s5400_s23  ;;  %v4983_v37 = vadd.f32 %v4982_v24, %v4981_v40  ;;  %v6305_v51 = vld [vmem:[#allocation4 + $0x14] sm:$0xf]  ;;  %v5031_v41 = vpop.f32.mrb[75].mxu1  ;;  %v4985_v54 = vpop.f32.mrb[79].mxu0 }
 0x278   : > { %v2692_v31 = vsel %vm5879_vm6, %v6244_v23, %v2691_v22  ;;  %v2696_v38 = vor.u32 %v2695_v25, %v2691_v22  ;;  %v2699_v60 = vshll.u32 %v6285_v50, 16  ;;  %v3378_v48 = vsel %vm6261_vm2, %v3376_v42, %v3377_v18  ;;  %v6323_v47 = vld [vmem:[#allocation4 + $0x10] sm:$0xf]  ;;  %5090 = vmatpush3.bf16.msra.mxu1 %v5347_v46  ;;  %v5349_v2 = vld [vmem:[%s6864_s5 + $0x38] sm:$0xff]   ;;  %v3213_v21 = vld [vmem:[#allocation4 + $0xc] sm:$0xf] }
 0x279   : > { %v3379_v29 = vrot.slane %v3377_v18, 4  ;;  %2628 = vst.msk [vmem:[#allocation4 + $0x1c] sm:$0xf] %vm2620_vm12, %v4654_v27  ;;  %v2546_v55 = vadd.f32 %v5029_v30, %v2465_v1  ;;  %2760 = vrot.lane.b32.xlu0 %v2692_v31, %s5400_s23  ;;  %v3090_v23 = vsel %vm6252_vm1, %v3088_v11, %v3089_v26  ;;  %3410 = vst.msk [vmem:[#allocation5 + $0x24] sm:$0xf] %vm2620_vm12, %v3378_v48  ;;  %v3380_v49 = vrot.slane %v6305_v51, 7 }
 0x27a   : > { %v5032_v6 = vadd.f32 %v5031_v41, %v5030_v36  ;;  %v4986_v56 = vadd.f32 %v4985_v54, %v4984_v45  ;;  %v2697_v0 = vrot.slane %v2696_v38, 4  ;;  %v2701_v12 = vrot.slane %v2699_v60, 5  ;;  %5054 = vmatpush3.bf16.msra.mxu0 %v5349_v2  ;;  %5091 = vmatprep.subr.bf16.mxu1 %v5350_v33  ;;  %v5354_v18 = vld [vmem:[%s6864_s5 + $0x98] sm:$0xff]   ;;  %v2866_v46 = vld [vmem:[#allocation4 + $0x10] sm:$0xf]  ;;  %v5355_v60 = vld [vmem:[%s6864_s5 + $0xe0] sm:$0xff]  }
 0x27b   : > { %v2568_v7 = vmax.f32 %v2546_v55, 0.0  ;;  %3112 = vrot.lane.b32.xlu1 %v3090_v23, %s5400_s23  ;;  %v2703_v13 = vshrl.u32 %v6285_v50, 16  ;;  %v2473_v59 = vadd.f32 %v4983_v37, %v6185_v39  ;;  %v2709_v4 = vshll.u32 %v6323_v47, 16  ;;  %v6362_v38 = vld [vmem:[#allocation4 + $0x14] sm:$0xf]  ;;  %v5356_v2 = vld [vmem:[%s6864_s5 + $0xa0] sm:$0xff]  }
 0x27c   : > { %v2549_v15 = vadd.f32 %v5032_v6, %v2468_v52  ;;  %v2961_v42 = vor.u32 %v6287_v34, %v6246_v58  ;;  %v2702_v10 = vsel %vm5879_vm6, %v2697_v0, %v2701_v12  ;;  %v5033_v44 = vpop.f32.mrb[76].mxu1  ;;  %v3224_v43 = vshrl.u32 %v3212_v19, 16  ;;  %5092 = vmatpush3.bf16.msra.mxu1 %v5354_v18  ;;  %v3066_v23 = vld [vmem:[#allocation4 + $0x10] sm:$0xf] }
 0x27d   : > { %v4655_v17 = vpack.c.bf16 %v2568_v7, %v2568_v7  ;;  %v2705_v50 = vrot.slane %v2703_v13, 4  ;;  %2762 = vrot.lane.b32.xlu0 %v2702_v10, %s5400_s23  ;;  %v5034_v40 = vpop.f32.mrb[77].mxu1  ;;  %v6348_v11 = vrot.slane %v2709_v4, 5  ;;  %v3227_v14 = vshll.u32 %v3212_v19, 16  ;;  %v6381_v19 = vld [vmem:[#allocation4 + $0x14] sm:$0xf]  ;;  %5093 = vmatprep.subr.bf16.mxu1 %v5355_v60 }
 0x27e   : > { %v6345_v3 = vld [vmem:[#allocation4 + $0x18] sm:$0xf]  ;;  %v2569_v53 = vmax.f32 %v2549_v15, 0.0  ;;  %v3381_v1 = vsel %vm6261_vm2, %v3379_v29, %v3380_v49  ;;  %v5035_v8 = vadd.f32 %v5034_v40, %v5033_v44  ;;  %v5036_v24 = vpop.f32.mrb[78].mxu1  ;;  %v3226_v25 = vrot.slane %v3224_v43, 6  ;;  %v5357_v43 = vld [vmem:[%s6864_s5 + $0xe8] sm:$0xff]  }
 0x27f   : > { %v3383_v62 = vrot.slane %v6345_v3, 7  ;;  %2629 = vst.msk [vmem:[#allocation4 + $0x20] sm:$0xf] %vm2620_vm12, %v4655_v17  ;;  %v2706_v22 = vor.u32 %v2705_v50, %v2701_v12  ;;  %3411 = vst.msk [vmem:[#allocation5 + $0x38] sm:$0xf] %vm2620_vm12, %v3381_v1  ;;  %v5037_v30 = vpop.f32.mrb[79].mxu1  ;;  %v2476_v52 = vadd.f32 %v4986_v56, %v6185_v39 }
 0x280   : > { %v4656_v27 = vpack.c.bf16 %v2569_v53, %v2569_v53  ;;  %v3229_v36 = vrot.slane %v3227_v14, 7  ;;  %v3233_v37 = vshrl.u32 %v3213_v21, 16  ;;  %v3236_v45 = vshll.u32 %v3213_v21, 16  ;;  %v6386_v7 = vld [vmem:[#allocation4 + $0x1c] sm:$0xf]  ;;  %5094 = vmatpush3.bf16.msra.mxu1 %v5356_v2 }
 0x281   : > { %v2554_v41 = vadd.f32 %v5035_v8, %v2473_v59  ;;  %v2707_v31 = vrot.slane %v2706_v22, 4  ;;  %v2713_v54 = vshrl.u32 %v6323_v47, 16  ;;  %v5038_v16 = vadd.f32 %v5037_v30, %v5036_v24  ;;  %v2634_v17 = vld [vmem:[#allocation4 + $0x2c] sm:$0x1]  ;;  %v3214_v21 = vld [vmem:[#allocation4 + $0x10] sm:$0xf]  ;;  %5095 = vmatprep.subr.bf16.mxu1 %v5357_v43 }
 0x282   : > { %2630 = vst.msk [vmem:[#allocation4 + $0x24] sm:$0xf] %vm2620_vm12, %v4656_v27  ;;  %v3230_v48 = vor.u32 %v3229_v36, %v3226_v25  ;;  %v3235_v29 = vrot.slane %v3233_v37, 6  ;;  %v3238_v55 = vrot.slane %v3236_v45, 7  ;;  %v6370_v39 = vrot.slane %v3383_v62, 4 }
 0x283   : > { %v2570_v6 = vmax.f32 %v2554_v41, 0.0  ;;  %v2712_v47 = vsel %vm5879_vm6, %v2707_v31, %v6348_v11  ;;  %v2889_v0 = vrot.slane %v2866_v46, 5  ;;  %v2557_v12 = vadd.f32 %v5038_v16, %v2476_v52  ;;  %v2665_v24 = vld [vmem:[#allocation4 + $0x14] sm:$0xf]  ;;  %v6427_v36 = vld [vmem:[#allocation4 + $0x18] sm:$0xf] }
 0x284   : > { %2764 = vrot.lane.b32.xlu1 %v2712_v47, %s5400_s23  ;;  %v3231_v13 = vrot.slane %v3230_v48, 4  ;;  %v6389_v15 = vor.u32 %v3238_v55, %v3235_v29  ;;  %v2892_v59 = vrot.slane %v6362_v38, 5  ;;  %v2888_v44 = vrot.slane %v2886_v61, 4  ;;  %v5358_v61 = vld [vmem:[%s6864_s5 + $0xa8] sm:$0xff]   ;;  %v5359_v31 = vld [vmem:[%s6864_s5 + $0xf0] sm:$0xff]  }
 0x285   : > { %v4657_v4 = vpack.c.bf16 %v2570_v6, %v2570_v6  ;;  %v2891_v10 = vrot.slane %v2889_v0, 4  ;;  %v3092_v50 = vrot.slane %v3066_v23, 6  ;;  %v2571_v53 = vmax.f32 %v2557_v12, 0.0  ;;  %5096 = vmatpush3.bf16.msra.mxu1 %v5358_v61  ;;  %v3215_v55 = vld [vmem:[#allocation4 + $0x14] sm:$0xf]  ;;  %v5362_v23 = vld [vmem:[%s6864_s5 + $0xb0] sm:$0xff]  }
 0x286   : > { %v6397_v33 = vld [vmem:[#allocation4 + $0x20] sm:$0xf]  ;;  %v3240_v40 = vsel %vm6377_vm11, %v3231_v13, %v6389_v15  ;;  %v3095_v14 = vrot.slane %v6381_v19, 6  ;;  %v3091_v63 = vrot.slane %v3089_v26, 4  ;;  %v3386_v1 = vrot.slane %v6386_v7, 7  ;;  %5097 = vmatprep.subr.bf16.mxu1 %v5359_v31  ;;  %v5363_v12 = vld [vmem:[%s6864_s5 + $0xf8] sm:$0xff]  }
 0x287   : > { %v3389_v8 = vrot.slane %v6397_v33, 7  ;;  %2631 = vst.msk [vmem:[#allocation4 + $0x28] sm:$0xf] %vm2620_vm12, %v4657_v4  ;;  %3312 = vrot.lane.b32.xlu0 %v3240_v40, %s5400_s23  ;;  %v2893_v5 = vsel %vm5887_vm7, %v2891_v10, %v2892_v59  ;;  %v3094_v26 = vrot.slane %v3092_v50, 4  ;;  %v4658_v25 = vpack.c.bf16 %v2571_v53, %v2571_v53  ;;  %v2868_v2 = vld [vmem:[#allocation4 + $0x18] sm:$0xf] }
 0x288   : > { %2913 = vrot.lane.b32.xlu1 %v2893_v5, %s5400_s23  ;;  %v2890_v18 = vsel %vm5887_vm7, %v2888_v44, %v2889_v0  ;;  %v3093_v27 = vsel %vm6252_vm1, %v3091_v63, %v3092_v50  ;;  %v3243_v30 = vshrl.u32 %v3214_v21, 16  ;;  %v3246_v52 = vshll.u32 %v3214_v21, 16  ;;  %v6453_v44 = vld [vmem:[#allocation4 + $0x1c] sm:$0xf]  ;;  %v5364_v53 = vld [vmem:[%s6864_s5 + $0xb8] sm:$0xff]  }
 0x289   : > { %v3391_v37 = vrot.slane %v3389_v8, 4  ;;  %v3357_v45 = vld [vmem:[#allocation4 + $0x24] sm:$0xf]  ;;  %v3096_v46 = vsel %vm6252_vm1, %v3094_v26, %v3095_v14  ;;  %v2715_v41 = vrot.slane %v2713_v54, 4  ;;  %v2635_v16 = vsel %vm6413_vm13, %v4658_v25, %v2634_v17  ;;  %5098 = vmatpush3.bf16.msra.mxu1 %v5362_v23  ;;  %v2644_v19 = vld [vmem:[#allocation4 + $0x1c] sm:$0xf] }
 0x28a   : > { %v3392_v60 = vrot.slane %v3357_v45, 7  ;;  %v3245_v48 = vrot.slane %v3243_v30, 6  ;;  %v2719_v29 = vshll.u32 %v2665_v24, 16  ;;  %2636 = vst [vmem:[#allocation4 + $0x2c] sm:$0x1] %v2635_v16  ;;  %v3248_v54 = vrot.slane %v3246_v52, 7  ;;  %5099 = vmatprep.subr.bf16.mxu1 %v5363_v12 }
 0x28b   : > { %2911 = vrot.lane.b32.xlu0 %v2890_v18, %s5400_s23  ;;  %v2716_v6 = vor.u32 %v2715_v41, %v6348_v11  ;;  %v2723_v47 = vshrl.u32 %v2665_v24, 16  ;;  %v2729_v0 = vshll.u32 %v6427_v36, 16  ;;  %v3241_v17 = vrot.slane %v6389_v15, 4  ;;  %v3216_v30 = vld [vmem:[#allocation4 + $0x18] sm:$0xf] }
 0x28c   : > { %v3393_v13 = vsel %vm6261_vm2, %v3391_v37, %v3392_v60  ;;  %v3394_v4 = vrot.slane %v3392_v60, 4  ;;  %3116 = vrot.lane.b32.xlu1 %v3096_v46, %s5400_s23  ;;  %v2721_v10 = vrot.slane %v2719_v29, 5  ;;  %v3249_v11 = vor.u32 %v3248_v54, %v3245_v48  ;;  %v2640_v41 = vld [vmem:[#allocation4 + $0xc] sm:$0xf]  ;;  %v2667_v48 = vld [vmem:[#allocation4 + $0x1c] sm:$0xf] }
 0x28d   : > { %3415 = vst.msk [vmem:[#allocation5 + $0x88] sm:$0xf] %vm2620_vm12, %v3393_v13  ;;  %v2717_v50 = vrot.slane %v2716_v6, 4  ;;  %v2725_v21 = vrot.slane %v2723_v47, 4  ;;  %v2733_v43 = vshrl.u32 %v6427_v36, 16  ;;  %v2731_v63 = vrot.slane %v2729_v0, 5  ;;  %5100 = vmatpush3.bf16.msra.mxu1 %v5364_v53 }
 0x28e   : > { %v3358_v40 = vld [vmem:[#allocation4 + $0x28] sm:$0xf]  ;;  %v3253_v61 = vshrl.u32 %v3215_v55, 16  ;;  %v3256_v5 = vshll.u32 %v3215_v55, 16  ;;  %v2895_v15 = vrot.slane %v2868_v2, 5  ;;  %v3250_v24 = vsel %vm6377_vm11, %v3241_v17, %v3249_v11 }
 0x28f   : > { %v3395_v26 = vrot.slane %v3358_v40, 7  ;;  %3114 = vrot.lane.b32.xlu0 %v3093_v27, %s5400_s23  ;;  %v2726_v25 = vor.u32 %v2725_v21, %v2721_v10  ;;  %v2898_v18 = vrot.slane %v6453_v44, 5  ;;  %v2639_v36 = vld [vmem:[#allocation4 + $0x8] sm:$0xf]  ;;  %v3251_v37 = vrot.slane %v3249_v11, 4 }
 0x290   : > { %3314 = vrot.lane.b32.xlu1 %v3250_v24, %s5400_s23  ;;  %v3255_v45 = vrot.slane %v3253_v61, 6  ;;  %v3258_v46 = vrot.slane %v3256_v5, 7  ;;  %v2897_v52 = vrot.slane %v2895_v15, 4  ;;  %2648 = vst.msk [vmem:[#allocation5 + $0x28] sm:$0xf] %vm2620_vm12, %v2639_v36  ;;  %v2722_v60 = vsel %vm5879_vm6, %v2717_v50, %v2721_v10 }
 0x291   : > { %v3396_v27 = vsel %vm6261_vm2, %v3394_v4, %v3395_v26  ;;  %v3397_v31 = vrot.slane %v3395_v26, 4  ;;  %v2727_v16 = vrot.slane %v2726_v25, 4  ;;  %2649 = vst.msk [vmem:[#allocation5 + $0x3c] sm:$0xf] %vm2620_vm12, %v2640_v41  ;;  %v3359_v29 = vld [vmem:[#allocation4 + $0x2c] sm:$0x1] }
 0x292   : > { %3416 = vst.msk [vmem:[#allocation5 + $0x9c] sm:$0xf] %vm2620_vm12, %v3396_v27  ;;  %v3259_v55 = vor.u32 %v3258_v46, %v3255_v45  ;;  %v2894_v23 = vrot.slane %v2892_v59, 4  ;;  %v3263_v54 = vshrl.u32 %v3216_v30, 16  ;;  %v3266_v6 = vshll.u32 %v3216_v30, 16 }
 0x293   : > { %v3398_v47 = vrot.slane %v3359_v29, 7  ;;  %v3417_v0 = vld [vmem:[#allocation5 + $0xb0] sm:$0x3]  ;;  %2766 = vrot.lane.b32.xlu0 %v2722_v60, %s5400_s23  ;;  %v2732_v2 = vsel %vm5879_vm6, %v2727_v16, %v2731_v63  ;;  %v2899_v12 = vsel %vm5887_vm7, %v2897_v52, %v2898_v18  ;;  %v2735_v13 = vrot.slane %v2733_v43, 4  ;;  %v2871_v40 = vld [vmem:[#allocation4 + $0x24] sm:$0x7] }
 0x294   : > { %v2668_v4 = vld [vmem:[#allocation4 + $0x20] sm:$0x3]  ;;  %2768 = vrot.lane.b32.xlu1 %v2732_v2, %s5400_s23  ;;  %v3260_v38 = vsel %vm6377_vm11, %v3251_v37, %v3259_v55  ;;  %v2896_v59 = vsel %vm5887_vm7, %v2894_v23, %v2895_v15  ;;  %v3265_v17 = vrot.slane %v3263_v54, 6  ;;  %v3268_v10 = vrot.slane %v3266_v6, 7  ;;  %v3068_v61 = vld [vmem:[#allocation4 + $0x18] sm:$0xf] }
 0x295   : > { %v2870_v44 = vld [vmem:[#allocation4 + $0x20] sm:$0xf]  ;;  %v3399_v50 = vsel %vm6261_vm2, %v3397_v31, %v3398_v47  ;;  %v2736_v21 = vor.u32 %v2735_v13, %v2731_v63  ;;  %v2739_v43 = vshll.u32 %v2667_v48, 16  ;;  %v2743_v53 = vshrl.u32 %v2667_v48, 16  ;;  %v2641_v25 = vld [vmem:[#allocation4 + $0x10] sm:$0xf] }
 0x296   : > { %v3418_v5 = vsel %vm6486_vm15, %v3399_v50, %v3417_v0  ;;  %v3261_v15 = vrot.slane %v3259_v55, 4  ;;  %v6494_v26 = vor.u32 %v3268_v10, %v3265_v17  ;;  %v2749_v24 = vshll.u32 %v2668_v4, 16  ;;  %v2642_v30 = vld [vmem:[#allocation4 + $0x14] sm:$0xf]  ;;  %v3069_v46 = vld [vmem:[#allocation4 + $0x1c] sm:$0xf] }
 0x297   : > { %3419 = vst [vmem:[#allocation5 + $0xb0] sm:$0x3] %v3418_v5  ;;  %3316 = vrot.lane.b32.xlu0 %v3260_v38, %s5400_s23  ;;  %v2737_v36 = vrot.slane %v2736_v21, 4  ;;  %v2741_v37 = vrot.slane %v2739_v43, 5  ;;  %v2745_v45 = vrot.slane %v2743_v53, 4  ;;  %v2901_v63 = vrot.slane %v2870_v44, 5 }
 0x298   : > { %2650 = vst.msk [vmem:[#allocation5 + $0x50] sm:$0xf] %vm2620_vm12, %v2641_v25  ;;  %2651 = vst.msk [vmem:[#allocation5 + $0x64] sm:$0xf] %vm2620_vm12, %v2642_v30  ;;  %2917 = vrot.lane.b32.xlu1 %v2899_v12, %s5400_s23  ;;  %v3270_v52 = vsel %vm6377_vm11, %v3261_v15, %v6494_v26  ;;  %v2751_v41 = vrot.slane %v2749_v24, 5  ;;  %v2900_v27 = vrot.slane %v2898_v18, 4 }
 0x299   : > { %v2904_v31 = vrot.slane %v2871_v40, 5  ;;  %v3217_v60 = vld [vmem:[#allocation4 + $0x1c] sm:$0xf]  ;;  %v2742_v16 = vsel %vm5879_vm6, %v2737_v36, %v2741_v37  ;;  %v2746_v48 = vor.u32 %v2745_v45, %v2741_v37  ;;  %v2903_v29 = vrot.slane %v2901_v63, 4  ;;  %v3218_v23 = vld [vmem:[#allocation4 + $0x20] sm:$0xf] }
 0x29a   : > { %v3097_v55 = vrot.slane %v3095_v14, 4  ;;  %v2902_v54 = vsel %vm5887_vm7, %v2900_v27, %v2901_v63  ;;  %v3098_v6 = vrot.slane %v3068_v61, 6  ;;  %v3101_v47 = vrot.slane %v3069_v46, 6  ;;  %v3070_v2 = vld [vmem:[#allocation4 + $0x20] sm:$0xf] }
 0x29b   : > { %v2753_v0 = vshrl.u32 %v2668_v4, 16  ;;  %v2643_v12 = vld [vmem:[#allocation4 + $0x18] sm:$0xf]  ;;  %2915 = vrot.lane.b32.xlu0 %v2896_v59, %s5400_s23  ;;  %v2747_v18 = vrot.slane %v2746_v48, 4  ;;  %v2905_v13 = vsel %vm5887_vm7, %v2903_v29, %v2904_v31  ;;  %v6512_v38 = vrot.slane %v2904_v31, 4 }
 0x29c   : > { %v3273_v17 = vshrl.u32 %v3217_v60, 16  ;;  %2652 = vst.msk [vmem:[#allocation5 + $0x78] sm:$0xf] %vm2620_vm12, %v2643_v12  ;;  %3318 = vrot.lane.b32.xlu1 %v3270_v52, %s5400_s23  ;;  %v3100_v14 = vrot.slane %v3098_v6, 4  ;;  %v3271_v4 = vrot.slane %v6494_v26, 4  ;;  %v3276_v44 = vshll.u32 %v3217_v60, 16 }
 0x29d   : > { %v2755_v10 = vrot.slane %v2753_v0, 4  ;;  %v3071_v50 = vld [vmem:[#allocation4 + $0x24] sm:$0xf]  ;;  %2653 = vst.msk [vmem:[#allocation5 + $0x8c] sm:$0xf] %vm2620_vm12, %v2644_v19  ;;  %v3099_v59 = vsel %vm6252_vm1, %v3097_v55, %v3098_v6  ;;  %v3283_v43 = vshrl.u32 %v3218_v23, 16  ;;  %v2752_v61 = vsel %vm5879_vm6, %v2747_v18, %v2751_v41 }
 0x29e   : > { %v3275_v21 = vrot.slane %v3273_v17, 6  ;;  %v3286_v53 = vshll.u32 %v3218_v23, 16  ;;  %v3219_v40 = vld [vmem:[#allocation4 + $0x24] sm:$0xf]  ;;  %v3102_v5 = vsel %vm6252_vm1, %v3100_v14, %v3101_v47  ;;  %v3278_v24 = vrot.slane %v3276_v44, 7 }
 0x29f   : > { %v2756_v15 = vor.u32 %v2755_v10, %v2751_v41  ;;  %v3220_v26 = vld [vmem:[#allocation4 + $0x28] sm:$0xf]  ;;  %2770 = vrot.lane.b32.xlu0 %v2742_v16, %s5400_s23  ;;  %v3285_v25 = vrot.slane %v3283_v43, 6  ;;  %v3104_v36 = vrot.slane %v3070_v2, 6  ;;  %v3107_v37 = vrot.slane %v3071_v50, 6 }
 0x2a0   : > { %v3288_v30 = vrot.slane %v3286_v53, 7  ;;  %2772 = vrot.lane.b32.xlu1 %v2752_v61, %s5400_s23  ;;  %v3279_v45 = vor.u32 %v3278_v24, %v3275_v21  ;;  %v3103_v63 = vrot.slane %v3101_v47, 4  ;;  %v3293_v46 = vshrl.u32 %v3219_v40, 16  ;;  %v2946_v27 = vld [vmem:[#allocation4 + $0x8] sm:$0xf] }
 0x2a1   : > { %v3296_v52 = vshll.u32 %v3219_v40, 16  ;;  %v2757_v31 = vrot.slane %v2756_v15, 4  ;;  %v3106_v48 = vrot.slane %v3104_v36, 4  ;;  %v3303_v29 = vshrl.u32 %v3220_v26, 16  ;;  %v2801_v41 = vld [vmem:[#allocation4 + $0x8] sm:$0xf] }
 0x2a2   : > { %v3289_v60 = vor.u32 %v3288_v30, %v3285_v25  ;;  %v3281_v55 = vrot.slane %v3279_v45, 4  ;;  %v6528_v16 = vsel %vm6252_vm1, %v3103_v63, %v3104_v36  ;;  %v3295_v23 = vrot.slane %v3293_v46, 6  ;;  %v2947_v0 = vld [vmem:[#allocation4 + $0xc] sm:$0xf]  ;;  %v3148_v17 = vld [vmem:[#allocation4 + $0x8] sm:$0xc] }
 0x2a3   : > { %v3298_v6 = vrot.slane %v3296_v52, 7  ;;  %2919 = vrot.lane.b32.xlu0 %v2902_v54, %s5400_s23  ;;  %v6533_v47 = vsel %vm6377_vm11, %v3271_v4, %v3279_v45  ;;  %v6537_v2 = vsel %vm6252_vm1, %v3106_v48, %v3107_v37  ;;  %v3305_v12 = vrot.slane %v3303_v29, 6  ;;  %v6539_v19 = vld [vmem:[#allocation4 + $0xc] sm:$0xf]  ;;  %v2803_v40 = vld [vmem:[#allocation4 + $0x10] sm:$0xf] }
 0x2a4   : > { %v3306_v18 = vshll.u32 %v3220_v26, 16  ;;  %2921 = vrot.lane.b32.xlu1 %v2905_v13, %s5400_s23  ;;  %v6544_v14 = vsel %vm6377_vm11, %v3281_v55, %v3289_v60  ;;  %v3291_v54 = vrot.slane %v3289_v60, 4  ;;  %v6546_v44 = vrot.slane %v3107_v37, 4  ;;  %v2802_v4 = vld [vmem:[#allocation4 + $0xc] sm:$0xf] }
 0x2a5   : > { %v3299_v10 = vor.u32 %v3298_v6, %v3295_v23  ;;  %v2964_v21 = vshrl.u32 %v2946_v27, 16  ;;  %v2967_v43 = vshll.u32 %v2946_v27, 16  ;;  %v2822_v53 = vrot.slane %v2801_v41, 5  ;;  %v2948_v26 = vld [vmem:[#allocation4 + $0x10] sm:$0xf] }
 0x2a6   : > { %v3308_v50 = vrot.slane %v3306_v18, 7  ;;  %v2962_v15 = vrot.slane %v2961_v42, 4  ;;  %v2974_v13 = vshrl.u32 %v2947_v0, 16  ;;  %v2977_v24 = vshll.u32 %v2947_v0, 16  ;;  %v2949_v52 = vld [vmem:[#allocation4 + $0x14] sm:$0xf] }
 0x2a7   : > { %v3301_v61 = vrot.slane %v3299_v10, 4  ;;  %3118 = vrot.lane.b32.xlu0 %v3099_v59, %s5400_s23  ;;  %v2966_v30 = vrot.slane %v2964_v21, 5  ;;  %v2969_v36 = vrot.slane %v2967_v43, 6  ;;  %v2823_v37 = vsel %vm5887_vm7, %v6334_v9, %v2822_v53  ;;  %v3150_v29 = vld [vmem:[#allocation4 + $0x10] sm:$0xf] }
 0x2a8   : > { %v6552_v25 = vor.u32 %v3308_v50, %v3305_v12  ;;  %3120 = vrot.lane.b32.xlu1 %v3102_v5, %s5400_s23  ;;  %2853 = vst.msk [vmem:[#allocation5 + $0x18] sm:$0xf] %vm2620_vm12, %v2823_v37  ;;  %v2976_v45 = vrot.slane %v2974_v13, 5  ;;  %v2979_v58 = vrot.slane %v2977_v24, 6  ;;  %v4552_v34 = vrot.slane %v3148_v17, 10 }
 0x2a9   : > { %v3168_v42 = vrot.slane %v6539_v19, 6  ;;  %v6562_v59 = vsel %vm6377_vm11, %v3291_v54, %v3299_v10  ;;  %v2970_v46 = vor.u32 %v2969_v36, %v2966_v30  ;;  %v2825_v9 = vrot.slane %v2802_v4, 5  ;;  %v3151_v41 = vld [vmem:[#allocation4 + $0x14] sm:$0xf]  ;;  %v2805_v19 = vld [vmem:[#allocation4 + $0x18] sm:$0xf] }
 0x2aa   : > { %v6567_v63 = vsel %vm6377_vm11, %v3301_v61, %v6552_v25  ;;  %v2980_v5 = vor.u32 %v2979_v58, %v2976_v45  ;;  %v2828_v60 = vrot.slane %v2803_v40, 5  ;;  %v2824_v48 = vrot.slane %v2822_v53, 4  ;;  %v2804_v0 = vld [vmem:[#allocation4 + $0x14] sm:$0xf]  ;;  %v6589_v24 = vld [vmem:[#allocation4 + $0x18] sm:$0xf] }
 0x2ab   : > { %v3169_v27 = vsel %vm6252_vm1, %v4552_v34, %v3168_v42  ;;  %2774 = vrot.lane.b32.xlu0 %v2757_v31, %s5400_s23  ;;  %v2971_v55 = vsel %vm5895_vm8, %v2962_v15, %v2970_v46  ;;  %v2972_v23 = vrot.slane %v2970_v46, 4  ;;  %v2827_v56 = vrot.slane %v2825_v9, 4  ;;  %v2806_v37 = vld [vmem:[#allocation4 + $0x1c] sm:$0xf]  ;;  %v2807_v46 = vld [vmem:[#allocation4 + $0x20] sm:$0x7] }
 0x2ac   : > { %3201 = vst.msk [vmem:[#allocation5 + $0xc] sm:$0xf] %vm2620_vm12, %v3169_v27  ;;  %v2984_v6 = vshrl.u32 %v2948_v26, 16  ;;  %2923 = vrot.lane.b32.xlu1 %v6512_v38, %s5400_s23  ;;  %3052 = vst.msk [vmem:[#allocation5 + $0x8] sm:$0xf] %vm2620_vm12, %v2971_v55  ;;  %v2826_v12 = vsel %vm5887_vm7, %v2824_v48, %v2825_v9  ;;  %v2987_v18 = vshll.u32 %v2948_v26, 16 }
 0x2ad   : > { %v2994_v17 = vshrl.u32 %v2949_v52, 16  ;;  %v2997_v31 = vshll.u32 %v2949_v52, 16  ;;  %v2981_v54 = vsel %vm5895_vm8, %v2972_v23, %v2980_v5  ;;  %v2829_v10 = vsel %vm5887_vm7, %v2827_v56, %v2828_v60  ;;  %2854 = vst.msk [vmem:[#allocation5 + $0x2c] sm:$0xf] %vm2620_vm12, %v2826_v12  ;;  %v2950_v27 = vld [vmem:[#allocation4 + $0x18] sm:$0xf] }
 0x2ae   : > { %v2986_v4 = vrot.slane %v2984_v6, 5  ;;  %v2982_v50 = vrot.slane %v2980_v5, 4  ;;  %3053 = vst.msk [vmem:[#allocation5 + $0x1c] sm:$0xf] %vm2620_vm12, %v2981_v54  ;;  %2855 = vst.msk [vmem:[#allocation5 + $0x40] sm:$0xf] %vm2620_vm12, %v2829_v10 }
 0x2af   : > { %v2989_v38 = vrot.slane %v2987_v18, 6  ;;  %v2996_v21 = vrot.slane %v2994_v17, 5  ;;  %v2999_v43 = vrot.slane %v2997_v31, 6  ;;  %v3170_v53 = vrot.slane %v3168_v42, 4  ;;  %3320 = vrot.lane.b32.xlu0 %v6533_v47, %s5400_s23  ;;  %v2951_v23 = vld [vmem:[#allocation4 + $0x1c] sm:$0xf] }
 0x2b0   : > { %v3171_v40 = vrot.slane %v3150_v29, 6  ;;  %v3174_v61 = vrot.slane %v3151_v41, 6  ;;  %v2831_v15 = vrot.slane %v2804_v0, 5  ;;  %v2834_v13 = vrot.slane %v2805_v19, 5  ;;  %3322 = vrot.lane.b32.xlu1 %v6544_v14, %s5400_s23  ;;  %v2645_v56 = vld [vmem:[#allocation4 + $0x20] sm:$0x3] }
 0x2b1   : > { %v2990_v26 = vor.u32 %v2989_v38, %v2986_v4  ;;  %v6593_v30 = vor.u32 %v2999_v43, %v2996_v21  ;;  %v2830_v36 = vrot.slane %v2828_v60, 4  ;;  %v5401_v47 = vmov 0.0   ;;  %v2657_v60 = vld [vmem:[#allocation5 + $0xa0] sm:$0x3]  ;;  %v2860_v18 = vld [vmem:[#allocation5 + $0xa4] sm:$0x3] }
 0x2b2   : > { %v3172_v45 = vsel %vm6252_vm1, %v3170_v53, %v3171_v40  ;;  %v3173_v58 = vrot.slane %v3171_v40, 4  ;;  %v2833_v34 = vrot.slane %v2831_v15, 4  ;;  %5140 = vmatprep.subr.bf16.mxu0 %v5401_v47  ;;  %v3176_v42 = vrot.slane %v3174_v61, 4  ;;  %5168 = vmatprep.subr.bf16.mxu1 %v5401_v47  ;;  %v3153_v17 = vld [vmem:[#allocation4 + $0x1c] sm:$0xf] }
 0x2b3   : > { %v2992_v9 = vrot.slane %v2990_v26, 4  ;;  %v2991_v14 = vsel %vm5895_vm8, %v2982_v50, %v2990_v26  ;;  %3202 = vst.msk [vmem:[#allocation5 + $0x20] sm:$0xf] %vm2620_vm12, %v3172_v45  ;;  %v2832_v52 = vsel %vm5887_vm7, %v2830_v36, %v2831_v15  ;;  %v3177_v5 = vrot.slane %v6589_v24, 6  ;;  %3122 = vrot.lane.b32.xlu0 %v6528_v16, %s5400_s23  ;;  %v3154_v54 = vld [vmem:[#allocation4 + $0x20] sm:$0xf] }
 0x2b4   : > { %3054 = vst.msk [vmem:[#allocation5 + $0x30] sm:$0xf] %vm2620_vm12, %v2991_v14  ;;  %v3175_v48 = vsel %vm6252_vm1, %v3173_v58, %v3174_v61  ;;  %v2835_v29 = vsel %vm5887_vm7, %v2833_v34, %v2834_v13  ;;  %2856 = vst.msk [vmem:[#allocation5 + $0x54] sm:$0xf] %vm2620_vm12, %v2832_v52  ;;  %v2836_v41 = vrot.slane %v2834_v13, 4  ;;  %v2837_v55 = vrot.slane %v2806_v37, 5  ;;  %3124 = vrot.lane.b32.xlu1 %v6537_v2, %s5400_s23 }
 0x2b5   : > { %v3311_v6 = vrot.slane %v6552_v25, 4  ;;  %v3001_v16 = vsel %vm5895_vm8, %v2992_v9, %v6593_v30  ;;  %3203 = vst.msk [vmem:[#allocation5 + $0x34] sm:$0xf] %vm2620_vm12, %v3175_v48  ;;  %2857 = vst.msk [vmem:[#allocation5 + $0x68] sm:$0xf] %vm2620_vm12, %v2835_v29  ;;  %v3178_v0 = vsel %vm6252_vm1, %v3176_v42, %v3177_v5  ;;  %v2840_v12 = vrot.slane %v2807_v46, 5 }
 0x2b6   : > { %3055 = vst.msk [vmem:[#allocation5 + $0x44] sm:$0xf] %vm2620_vm12, %v3001_v16  ;;  %3204 = vst.msk [vmem:[#allocation5 + $0x48] sm:$0xf] %vm2620_vm12, %v3178_v0  ;;  %v2838_v2 = vsel %vm5887_vm7, %v2836_v41, %v2837_v55  ;;  %v2839_v25 = vrot.slane %v2837_v55, 4  ;;  %v3004_v31 = vshrl.u32 %v2950_v27, 16  ;;  %v2658_v38 = vsel %vm6486_vm15, %v2645_v56, %v2657_v60 }
 0x2b7   : > { %v3007_v19 = vshll.u32 %v2950_v27, 16  ;;  %2858 = vst.msk [vmem:[#allocation5 + $0x7c] sm:$0xf] %vm2620_vm12, %v2838_v2  ;;  %v2842_v10 = vrot.slane %v2840_v12, 4  ;;  %v3014_v4 = vshrl.u32 %v2951_v23, 16  ;;  %v3017_v50 = vshll.u32 %v2951_v23, 16  ;;  %3324 = vrot.lane.b32.xlu0 %v6562_v59, %s5400_s23 }
 0x2b8   : > { %v2952_v21 = vld [vmem:[#allocation4 + $0x20] sm:$0xf]  ;;  %v2841_v43 = vsel %vm5887_vm7, %v2839_v25, %v2840_v12  ;;  %v3002_v53 = vrot.slane %v6593_v30, 4  ;;  %v3006_v40 = vrot.slane %v3004_v31, 5  ;;  %2659 = vst [vmem:[#allocation5 + $0xa0] sm:$0x3] %v2658_v38  ;;  %3326 = vrot.lane.b32.xlu1 %v6567_v63, %s5400_s23 }
 0x2b9   : > { %v3009_v61 = vrot.slane %v3007_v19, 6  ;;  %v2953_v15 = vld [vmem:[#allocation4 + $0x24] sm:$0x7]  ;;  %2859 = vst.msk [vmem:[#allocation5 + $0x90] sm:$0xf] %vm2620_vm12, %v2841_v43  ;;  %v3016_v13 = vrot.slane %v3014_v4, 5  ;;  %v2861_v26 = vsel %vm6486_vm15, %v2842_v10, %v2860_v18 }
 0x2ba   : > { %v3019_v24 = vrot.slane %v3017_v50, 6  ;;  %v3179_v59 = vrot.slane %v3177_v5, 4  ;;  %2862 = vst [vmem:[#allocation5 + $0xa4] sm:$0x3] %v2861_v26  ;;  %v3180_v37 = vrot.slane %v3153_v17, 6  ;;  %v3183_v45 = vrot.slane %v3154_v54, 6 }
 0x2bb   : > { %v3010_v36 = vor.u32 %v3009_v61, %v3006_v40  ;;  %v3024_v30 = vshrl.u32 %v2952_v21, 16  ;;  %v3027_v34 = vshll.u32 %v2952_v21, 16  ;;  %v3034_v42 = vshrl.u32 %v2953_v15, 16  ;;  %3126 = vrot.lane.b32.xlu0 %v6546_v44, %s5400_s23  ;;  %v3155_v5 = vld [vmem:[#allocation4 + $0x24] sm:$0xf]  ;;  %v5368_v40 = vld [vmem:[%s6864_s5 + $0x100] sm:$0xff]  }
 0x2bc   : > { %v3020_v58 = vor.u32 %v3019_v24, %v3016_v13  ;;  %v3037_v46 = vshll.u32 %v2953_v15, 16  ;;  %v3181_v14 = vsel %vm6252_vm1, %v3179_v59, %v3180_v37  ;;  %v3182_v52 = vrot.slane %v3180_v37, 4  ;;  %v3156_v27 = vld [vmem:[#allocation4 + $0x28] sm:$0xf]  ;;  %3328 = vrot.lane.b32.xlu1 %v3311_v6, %s5400_s23  ;;  %v3060_v54 = vld [vmem:[#allocation5 + $0xa8] sm:$0x3] }
 0x2bd   : > { %v3011_v63 = vsel %vm5895_vm8, %v3002_v53, %v3010_v36  ;;  %v3012_v9 = vrot.slane %v3010_v36, 4  ;;  %v3382_v60 = vrot.slane %v3380_v49, 4  ;;  %3205 = vst.msk [vmem:[#allocation5 + $0x5c] sm:$0xf] %vm2620_vm12, %v3181_v14  ;;  %v3026_v44 = vrot.slane %v3024_v30, 5  ;;  %v5371_v24 = vld [vmem:[%s6864_s5 + $0x108] sm:$0xff]  }
 0x2be   : > { %3056 = vst.msk [vmem:[#allocation5 + $0x58] sm:$0xf] %vm2620_vm12, %v3011_v63  ;;  %v3029_v48 = vrot.slane %v3027_v34, 6  ;;  %v3036_v29 = vrot.slane %v3034_v42, 5  ;;  %v3184_v55 = vsel %vm6252_vm1, %v3182_v52, %v3183_v45  ;;  %v3039_v23 = vrot.slane %v3037_v46, 6  ;;  %v5376_v36 = vld [vmem:[%s6864_s5 + $0x110] sm:$0xff]  }
 0x2bf   : > { %v3021_v41 = vsel %vm5895_vm8, %v3012_v9, %v3020_v58  ;;  %v3185_v56 = vrot.slane %v3183_v45, 4  ;;  %3206 = vst.msk [vmem:[#allocation5 + $0x70] sm:$0xf] %vm2620_vm12, %v3184_v55  ;;  %v3022_v51 = vrot.slane %v3020_v58, 4  ;;  %v3186_v6 = vrot.slane %v3155_v5, 6  ;;  %v5379_v30 = vld [vmem:[%s6864_s5 + $0x118] sm:$0xff]  }
 0x2c0   : > { %3057 = vst.msk [vmem:[#allocation5 + $0x6c] sm:$0xf] %vm2620_vm12, %v3021_v41  ;;  %v3030_v49 = vor.u32 %v3029_v48, %v3026_v44  ;;  %v3189_v16 = vrot.slane %v3156_v27, 6  ;;  %v3388_v0 = vrot.slane %v3386_v1, 4  ;;  %v3040_v12 = vor.u32 %v3039_v23, %v3036_v29  ;;  %v3209_v10 = vld [vmem:[#allocation5 + $0xac] sm:$0x3] }
 0x2c1   : > { %v3384_v18 = vsel %vm6261_vm2, %v3382_v60, %v3383_v62  ;;  %v3387_v17 = vsel %vm6261_vm2, %v6370_v39, %v3386_v1  ;;  %v3187_v31 = vsel %vm6252_vm1, %v3185_v56, %v3186_v6  ;;  %v3188_v19 = vrot.slane %v3186_v6, 4 }
 0x2c2   : > { %v3031_v2 = vsel %vm5895_vm8, %v3022_v51, %v3030_v49  ;;  %v3032_v25 = vrot.slane %v3030_v49, 4  ;;  %3412 = vst.msk [vmem:[#allocation5 + $0x4c] sm:$0xf] %vm2620_vm12, %v3384_v18  ;;  %3413 = vst.msk [vmem:[#allocation5 + $0x60] sm:$0xf] %vm2620_vm12, %v3387_v17  ;;  %v3042_v3 = vrot.slane %v3040_v12, 4  ;;  %v3390_v39 = vsel %vm6261_vm2, %v3388_v0, %v3389_v8 }
 0x2c3   : > { %3058 = vst.msk [vmem:[#allocation5 + $0x80] sm:$0xf] %vm2620_vm12, %v3031_v2  ;;  %3207 = vst.msk [vmem:[#allocation5 + $0x84] sm:$0xf] %vm2620_vm12, %v3187_v31  ;;  %v3191_v62 = vrot.slane %v3189_v16, 4  ;;  %v3190_v1 = vsel %vm6252_vm1, %v3188_v19, %v3189_v16  ;;  %vm2794_vm1 = vcmask 1041920  }
 0x2c4   : > { %v3041_v7 = vsel %vm5895_vm8, %v3032_v25, %v3040_v12  ;;  %3414 = vst.msk [vmem:[#allocation5 + $0x74] sm:$0xf] %vm2620_vm12, %v3390_v39  ;;  %3208 = vst.msk [vmem:[#allocation5 + $0x98] sm:$0xf] %vm2620_vm12, %v3190_v1  ;;  %v3061_v4 = vsel %vm6486_vm15, %v3042_v3, %v3060_v54  ;;  %v2796_v19 = vld [vmem:[#allocation5 + $0xa0] sm:$0x3] }
 0x2c5   : > { %3059 = vst.msk [vmem:[#allocation5 + $0x94] sm:$0xf] %vm2620_vm12, %v3041_v7  ;;  %v3210_v33 = vsel %vm6486_vm15, %v3191_v62, %v3209_v10  ;;  %3062 = vst [vmem:[#allocation5 + $0xa8] sm:$0x3] %v3061_v4  ;;  %v2942_v10 = vld [vmem:[#allocation5 + $0xa4] sm:$0x3] }
 0x2c6   : > { %3211 = vst [vmem:[#allocation5 + $0xac] sm:$0x3] %v3210_v33  ;;  %vm6736_vm11 = vmand %vm2794_vm1, %vm2655_vm3  ;;  %vm5402_vm3 = vmmov 0  }
 0x2c7   : > { %vm4150_vm1 = vmand %vm2620_vm12, %vm1596_vm0  ;;  %vm4172_vm0 = vcmask 519171  }
 0x2d8   : > { %v2759_v8 = vpop.permute.xlu0 %2758 }
 0x2d9   : > { %2786 = vst.msk [vmem:[#allocation5] sm:$0xf] %vm2785_vm5, %v2759_v8 }
 0x2e5   : > { %v2908_v35 = vpop.permute.xlu1 %2907  ;;  %v3111_v50 = vpop.permute.xlu0 %3110 }
 0x2e6   : > { %2934 = vst.msk [vmem:[#allocation5 + $0x4] sm:$0xf] %vm2785_vm5, %v2908_v35  ;;  %3137 = vst.msk [vmem:[#allocation5 + $0x8] sm:$0xf] %vm2785_vm5, %v3111_v50 }
 0x2e9   : > { %v2910_v38 = vpop.permute.xlu1 %2909 }
 0x2ea   : > { %2935 = vst.msk [vmem:[#allocation5 + $0x18] sm:$0xf] %vm2785_vm5, %v2910_v38 }
 0x2eb   : > { %v2761_v21 = vpop.permute.xlu0 %2760 }
 0x2ec   : > { %2787 = vst.msk [vmem:[#allocation5 + $0x14] sm:$0xf] %vm2785_vm5, %v2761_v21 }
 0x2ed   : > { %v3113_v43 = vpop.permute.xlu1 %3112 }
 0x2ee   : > { %3138 = vst.msk [vmem:[#allocation5 + $0x1c] sm:$0xf] %vm2785_vm5, %v3113_v43 }
 0x2ef   : > { %v2763_v53 = vpop.permute.xlu0 %2762 }
 0x2f0   : > { %2788 = vst.msk [vmem:[#allocation5 + $0x28] sm:$0xf] %vm2785_vm5, %v2763_v53 }
 0x2f1   : > { %v5353_v15 = vld [vmem:[#allocation5 + $0x4] ss:$20 sps:$4 sm:$0xff]  }
 0x2f2   : > { %3907 = vmatprep.mubr.bf16.mxu0 %v5353_v15 }
 0x2f3   : > { %v5351_v61 = vld [vmem:[#allocation5] ss:$20 sps:$4 sm:$0xff]  }
 0x2f4   : > { %3908 = vmatmul.mubr.bf16.vlgmr.msra.gmra.mrb[80].mxu0 %v5351_v61 }
 0x2f5   : > { %5141 = vmatpush3.bf16.msra.mxu0 %v5368_v40  ;;  %v5365_v60 = vld [vmem:[#allocation5 + $0x8] ss:$20 sps:$4 sm:$0xff]  }
 0x2f6   : > { %v2765_v13 = vpop.permute.xlu1 %2764  ;;  %5142 = vmatprep.subr.bf16.mxu0 %v5401_v47 }
 0x2f7   : > { %2789 = vst.msk [vmem:[#allocation5 + $0x3c] sm:$0xf] %vm2785_vm5, %v2765_v13 }
 0x2f9   : > { %v3313_v26 = vpop.permute.xlu0 %3312  ;;  %5143 = vmatpush3.bf16.msra.mxu0 %v5371_v24 }
 0x2fa   : > { %3339 = vst.msk [vmem:[#allocation5 + $0xc] sm:$0xf] %vm2785_vm5, %v3313_v26  ;;  %v2914_v59 = vpop.permute.xlu1 %2913  ;;  %5144 = vmatprep.subr.bf16.mxu0 %v5401_v47 }
 0x2fb   : > { %2937 = vst.msk [vmem:[#allocation5 + $0x40] sm:$0xf] %vm2785_vm5, %v2914_v59 }
 0x2fd   : > { %v2912_v37 = vpop.permute.xlu0 %2911  ;;  %5145 = vmatpush3.bf16.msra.mxu0 %v5376_v36 }
 0x2fe   : > { %2936 = vst.msk [vmem:[#allocation5 + $0x2c] sm:$0xf] %vm2785_vm5, %v2912_v37  ;;  %v3117_v45 = vpop.permute.xlu1 %3116  ;;  %5146 = vmatprep.subr.bf16.mxu0 %v5401_v47 }
 0x2ff   : > { %3140 = vst.msk [vmem:[#allocation5 + $0x44] sm:$0xf] %vm2785_vm5, %v3117_v45 }
 0x301   : > { %v3115_v58 = vpop.permute.xlu0 %3114  ;;  %5147 = vmatpush3.bf16.msra.mxu0 %v5379_v30 }
 0x302   : > { %3139 = vst.msk [vmem:[#allocation5 + $0x30] sm:$0xf] %vm2785_vm5, %v3115_v58  ;;  %v3315_v34 = vpop.permute.xlu1 %3314  ;;  %v3429_v63 = vld [vmem:[#allocation5 + $0x3c] sm:$0xff] }
 0x303   : > { %3340 = vst.msk [vmem:[#allocation5 + $0x20] sm:$0xf] %vm2785_vm5, %v3315_v34 }
 0x305   : > { %v2767_v42 = vpop.permute.xlu0 %2766  ;;  %v3426_v46 = vld [vmem:[#allocation5 + $0x28] sm:$0xff] }
 0x306   : > { %v5360_v9 = vld [vmem:[#allocation5 + $0x2c] ss:$20 sps:$4 sm:$0xff]   ;;  %2790 = vst.msk [vmem:[#allocation5 + $0x50] sm:$0xf] %vm2785_vm5, %v2767_v42  ;;  %v2769_v14 = vpop.permute.xlu1 %2768  ;;  %v4560_v52 = vcombine.low %v3426_v46, %v3429_v63 }
 0x307   : > { %2791 = vst.msk [vmem:[#allocation5 + $0x64] sm:$0xf] %vm2785_vm5, %v2769_v14  ;;  %3915 = vmatprep.mubr.bf16.mxu0 %v5360_v9  ;;  %v5388_v63 = vld [vmem:[#allocation5 + $0x38] ss:$20 sps:$4 sm:$0xff]   ;;  %v5389_v14 = vld [vmem:[#allocation5 + $0x60] ss:$20 sps:$4 sm:$0xff]  }
 0x308   : > { %3916 = vmatmul.mubr.bf16.gmra.mrb[84].mxu0 %v4560_v52  ;;  %v5390_v52 = vld [vmem:[#allocation5 + $0x88] ss:$20 sps:$4 sm:$0xff]  }
 0x309   : > { %v3317_v5 = vpop.permute.xlu0 %3316 }
 0x30a   : > { %3341 = vst.msk [vmem:[#allocation5 + $0x34] sm:$0xf] %vm2785_vm5, %v3317_v5  ;;  %v2918_v27 = vpop.permute.xlu1 %2917  ;;  %v5367_v44 = vld [vmem:[#allocation5 + $0xc] ss:$20 sps:$4 sm:$0xff]  }
 0x30b   : > { %2939 = vst.msk [vmem:[#allocation5 + $0x68] sm:$0xf] %vm2785_vm5, %v2918_v27  ;;  %3979 = vmatprep.mubr.bf16.mxu1 %v5367_v44  ;;  %v5391_v5 = vld [vmem:[#allocation5 + $0xb0] ss:$0 sps:$4 sm:$0x33]  }
 0x30c   : > { %3980 = vmatmul.mubr.bf16.vlgmr.msra.gmra.mrb[80].mxu1 %v5365_v60 }
 0x30d   : > { %v2916_v48 = vpop.permute.xlu0 %2915  ;;  %5172 = vmatpush3.bf16.msra.mxu1 %v5368_v40 }
 0x30e   : > { %2938 = vst.msk [vmem:[#allocation5 + $0x54] sm:$0xf] %vm2785_vm5, %v2916_v48  ;;  %v3319_v29 = vpop.permute.xlu1 %3318  ;;  %5169 = vmatprep.subr.bf16.mxu1 %v5401_v47 }
 0x30f   : > { %3342 = vst.msk [vmem:[#allocation5 + $0x48] sm:$0xf] %vm2785_vm5, %v3319_v29 }
 0x311   : > { %v2771_v41 = vpop.permute.xlu0 %2770  ;;  %5173 = vmatpush3.bf16.msra.mxu1 %v5371_v24  ;;  %v3427_v0 = vld [vmem:[#allocation5 + $0x30] sm:$0xff]  ;;  %v3145_v24 = vld [vmem:[#allocation5 + $0xa8] sm:$0x3] }
 0x312   : > { %2792 = vst.msk [vmem:[#allocation5 + $0x78] sm:$0xf] %vm2785_vm5, %v2771_v41  ;;  %v2773_v55 = vpop.permute.xlu1 %2772  ;;  %5170 = vmatprep.subr.bf16.mxu1 %v5401_v47  ;;  %v3435_v51 = vld [vmem:[#allocation5 + $0x64] sm:$0xff] }
 0x313   : > { %2793 = vst.msk [vmem:[#allocation5 + $0x8c] sm:$0xf] %vm2785_vm5, %v2773_v55 }
 0x315   : > { %v2920_v23 = vpop.permute.xlu0 %2919  ;;  %v3432_v56 = vld [vmem:[#allocation5 + $0x50] sm:$0xff]  ;;  %5174 = vmatpush3.bf16.msra.mxu1 %v5376_v36  ;;  %v3347_v36 = vld [vmem:[#allocation5 + $0xac] sm:$0x3] }
 0x316   : > { %v5369_v49 = vld [vmem:[#allocation5 + $0x54] ss:$20 sps:$4 sm:$0xff]   ;;  %2940 = vst.msk [vmem:[#allocation5 + $0x7c] sm:$0xf] %vm2785_vm5, %v2920_v23  ;;  %v2922_v6 = vpop.permute.xlu1 %2921  ;;  %v4565_v16 = vcombine.low %v3432_v56, %v3435_v51  ;;  %5171 = vmatprep.subr.bf16.mxu1 %v5401_v47 }
 0x317   : > { %v3430_v12 = vld [vmem:[#allocation5 + $0x44] sm:$0xff]  ;;  %2941 = vst.msk [vmem:[#allocation5 + $0x90] sm:$0xf] %vm2785_vm5, %v2922_v6  ;;  %3923 = vmatprep.mubr.bf16.mxu0 %v5369_v49  ;;  %v6772_v6 = vld [vmem:[%s6865_s6] ss:$0 sm:$0xff] }
 0x318   : > { %v5372_v18 = vld [vmem:[#allocation5 + $0x34] ss:$20 sps:$4 sm:$0xff]   ;;  %v4562_v17 = vcombine.low %v3427_v0, %v3430_v12  ;;  %3924 = vmatmul.mubr.bf16.gmra.mrb[88].mxu0 %v4565_v16 }
 0x319   : > { %3987 = vmatprep.mubr.bf16.mxu1 %v5372_v18  ;;  %v3119_v2 = vpop.permute.xlu0 %3118  ;;  %5175 = vmatpush3.bf16.msra.mxu1 %v5379_v30  ;;  %v5383_v30 = vld [vmem:[#allocation5 + $0x10] ss:$20 sps:$4 sm:$0xff]  }
 0x31a   : > { %3988 = vmatmul.mubr.bf16.gmra.mrb[84].mxu1 %v4562_v17  ;;  %3141 = vst.msk [vmem:[#allocation5 + $0x58] sm:$0xf] %vm2785_vm5, %v3119_v2  ;;  %v3121_v25 = vpop.permute.xlu1 %3120 }
 0x31b   : > { %3142 = vst.msk [vmem:[#allocation5 + $0x6c] sm:$0xf] %vm2785_vm5, %v3121_v25 }
 0x31d   : > { %v2775_v54 = vpop.permute.xlu0 %2774  ;;  %v3438_v39 = vld [vmem:[#allocation5 + $0x78] sm:$0xff] }
 0x31e   : > { %v2797_v3 = vsel %vm6736_vm11, %v2775_v54, %v2796_v19  ;;  %v2924_v62 = vpop.permute.xlu1 %2923  ;;  %v3441_v7 = vld [vmem:[#allocation5 + $0x8c] sm:$0xff] }
 0x31f   : > { %v5374_v1 = vld [vmem:[#allocation5 + $0x7c] ss:$20 sps:$4 sm:$0xff]   ;;  %2798 = vst [vmem:[#allocation5 + $0xa0] sm:$0x3] %v2797_v3  ;;  %v2943_v4 = vsel %vm6736_vm11, %v2924_v62, %v2942_v10  ;;  %v4570_v33 = vcombine.low %v3438_v39, %v3441_v7 }
 0x320   : > { %2944 = vst [vmem:[#allocation5 + $0xa4] sm:$0x3] %v2943_v4  ;;  %3931 = vmatprep.mubr.bf16.mxu0 %v5374_v1 }
 0x321   : > { %v3321_v8 = vpop.permute.xlu0 %3320  ;;  %3932 = vmatmul.mubr.bf16.gmra.mrb[92].mxu0 %v4570_v33 }
 0x322   : > { %3343 = vst.msk [vmem:[#allocation5 + $0x5c] sm:$0xf] %vm2785_vm5, %v3321_v8  ;;  %v3323_v35 = vpop.permute.xlu1 %3322  ;;  %v5382_v13 = vld [vmem:[#allocation5 + $0x58] ss:$20 sps:$4 sm:$0xff]  }
 0x323   : > { %3344 = vst.msk [vmem:[#allocation5 + $0x70] sm:$0xf] %vm2785_vm5, %v3323_v35 }
 0x325   : > { %v3123_v50 = vpop.permute.xlu0 %3122 }
 0x326   : > { %3143 = vst.msk [vmem:[#allocation5 + $0x80] sm:$0xf] %vm2785_vm5, %v3123_v50  ;;  %v3125_v38 = vpop.permute.xlu1 %3124 }
 0x327   : > { %3144 = vst.msk [vmem:[#allocation5 + $0x94] sm:$0xf] %vm2785_vm5, %v3125_v38  ;;  %v3444_v21 = vld [vmem:[#allocation5 + $0xa0] sm:$0x33] }
 0x328   : > { %v4576_v43 = vcombine.high %v3444_v21, %v3444_v21  ;;  %v4575_v53 = vcombine.low %v3444_v21, %v3444_v21 }
 0x329   : > { %v3325_v40 = vpop.permute.xlu0 %3324 }
 0x32a   : > { %3345 = vst.msk [vmem:[#allocation5 + $0x84] sm:$0xf] %vm2785_vm5, %v3325_v40  ;;  %v3327_v61 = vpop.permute.xlu1 %3326  ;;  %3939 = vmatprep.mubr.bf16.mxu0 %v4576_v43  ;;  %v5380_v15 = vld [vmem:[#allocation5 + $0x5c] ss:$20 sps:$4 sm:$0xff]  }
 0x32b   : > { %3346 = vst.msk [vmem:[#allocation5 + $0x98] sm:$0xf] %vm2785_vm5, %v3327_v61  ;;  %3940 = vmatmul.mubr.bf16.gmra.mrb[96].mxu0 %v4575_v53  ;;  %3995 = vmatprep.mubr.bf16.mxu1 %v5380_v15  ;;  %vm3859_vm5 = vcmask 523264  }
 0x32c   : > { %5148 = vmatprep.mubr.msk.bf16.mxu0 %vm5402_vm3, %v5401_v47  ;;  %3996 = vmatmul.mubr.bf16.gmra.mrb[88].mxu1 %v5382_v13 }
 0x32d   : > { %v3127_v26 = vpop.permute.xlu0 %3126 }
 0x32e   : > { %v3146_v59 = vsel %vm6736_vm11, %v3127_v26, %v3145_v24  ;;  %v3329_v37 = vpop.permute.xlu1 %3328  ;;  %v5386_v34 = vld [vmem:[#allocation5 + $0x80] ss:$20 sps:$4 sm:$0xff]  }
 0x32f   : > { %3147 = vst [vmem:[#allocation5 + $0xa8] sm:$0x3] %v3146_v59  ;;  %v3348_v45 = vsel %vm6736_vm11, %v3329_v37, %v3347_v36  ;;  %vm4173_vm11 = vsmask.f32 7950 }
 0x330   : > { %3349 = vst [vmem:[#allocation5 + $0xac] sm:$0x3] %v3348_v45 }
 0x332   : > { %v5384_v58 = vld [vmem:[#allocation5 + $0x84] ss:$20 sps:$4 sm:$0xff]  }
 0x333   : > { %5149 = vmatmul.mubr.msk.bf16.vlgmr.msra.gmra.mrb[100].mxu0 %vm3859_vm5, %v5383_v30  ;;  %4003 = vmatprep.mubr.bf16.mxu1 %v5384_v58 }
 0x334   : > { %5152 = vmatprep.mubr.msk.bf16.mxu0 %vm5402_vm3, %v5401_v47  ;;  %4004 = vmatmul.mubr.bf16.gmra.mrb[92].mxu1 %v5386_v34 }
 0x337   : > { %v3445_v42 = vld [vmem:[#allocation5 + $0xa8] sm:$0x33] }
 0x338   : > { %v4578_v46 = vcombine.high %v3445_v42, %v3445_v42  ;;  %v4577_v9 = vcombine.low %v3445_v42, %v3445_v42 }
 0x33a   : > { %4011 = vmatprep.mubr.bf16.mxu1 %v4578_v46 }
 0x33b   : > { %5153 = vmatmul.mubr.msk.bf16.gmra.mrb[104].mxu0 %vm3859_vm5, %v5388_v63 }
 0x33c   : > { %5156 = vmatprep.mubr.msk.bf16.mxu0 %vm5402_vm3, %v5401_v47  ;;  %4012 = vmatmul.mubr.bf16.gmra.mrb[96].mxu1 %v4577_v9 }
 0x33d   : > { %5160 = vmatprep.mubr.msk.bf16.mxu1 %vm5402_vm3, %v5401_v47 }
 0x343   : > { %5157 = vmatmul.mubr.msk.bf16.gmra.mrb[108].mxu0 %vm3859_vm5, %v5389_v14 }
 0x344   : > { %5161 = vmatmul.mubr.msk.bf16.vlgmr.msra.gmra.mrb[100].mxu1 %vm3859_vm5, %v5390_v52 }
 0x345   : > { %5164 = vmatprep.mubr.msk.bf16.mxu1 %vm5402_vm3, %v5401_v47  ;;  %vm6799_vm3 = vmand %vm4172_vm0, %vm4173_vm11  ;;  %vm4258_vm11 = vsmask.f32 7942 }
 0x34c   : > { %5165 = vmatmul.mubr.msk.bf16.gmra.mrb[104].mxu1 %vm3859_vm5, %v5391_v5  ;;  %vm4178_vm5 = vcmask 518144  }
 0x3c7   : > { %v5055_v27 = vpop.f32.mrb[80].mxu0 }
 0x3c8   : > { %v5056_v60 = vpop.f32.mrb[81].mxu0 }
 0x3c9   : > { %v5057_v44 = vadd.f32 %v5056_v60, %v5055_v27  ;;  %v5058_v48 = vpop.f32.mrb[82].mxu0 }
 0x3ca   : > { %v5059_v29 = vpop.f32.mrb[83].mxu0 }
 0x3cb   : > { %v5060_v41 = vadd.f32 %v5059_v29, %v5058_v48  ;;  %v3910_v12 = vadd.f32 %v5057_v44, %v6772_v6 }
 0x3cd   : > { %v3913_v25 = vadd.f32 %v5060_v41, %v6772_v6 }
 0x3db   : > { %v5061_v55 = vpop.f32.mrb[84].mxu0 }
 0x3dc   : > { %v5062_v23 = vpop.f32.mrb[85].mxu0 }
 0x3dd   : > { %v5063_v56 = vadd.f32 %v5062_v23, %v5061_v55  ;;  %v5064_v51 = vpop.f32.mrb[86].mxu0 }
 0x3de   : > { %v5065_v49 = vpop.f32.mrb[87].mxu0 }
 0x3df   : > { %v5066_v47 = vadd.f32 %v5065_v49, %v5064_v51  ;;  %v5101_v16 = vpop.f32.mrb[80].mxu1  ;;  %v3918_v4 = vadd.f32 %v5063_v56, %v6772_v6 }
 0x3e0   : > { %v5102_v0 = vpop.f32.mrb[81].mxu1 }
 0x3e1   : > { %v5103_v18 = vadd.f32 %v5102_v0, %v5101_v16  ;;  %v5104_v17 = vpop.f32.mrb[82].mxu1  ;;  %v3921_v21 = vadd.f32 %v5066_v47, %v6772_v6 }
 0x3e2   : > { %v5105_v2 = vpop.f32.mrb[83].mxu1 }
 0x3e3   : > { %v5106_v31 = vadd.f32 %v5105_v2, %v5104_v17  ;;  %v3982_v19 = vadd.f32 %v5103_v18, %v3910_v12 }
 0x3e5   : > { %v3985_v54 = vadd.f32 %v5106_v31, %v3913_v25 }
 0x3eb   : > { %v5067_v10 = vpop.f32.mrb[88].mxu0 }
 0x3ec   : > { %v5068_v3 = vpop.f32.mrb[89].mxu0 }
 0x3ed   : > { %v5107_v62 = vpop.f32.mrb[84].mxu1  ;;  %v5069_v39 = vadd.f32 %v5068_v3, %v5067_v10  ;;  %v5070_v7 = vpop.f32.mrb[90].mxu0 }
 0x3ee   : > { %v5108_v1 = vpop.f32.mrb[85].mxu1  ;;  %v5071_v33 = vpop.f32.mrb[91].mxu0 }
 0x3ef   : > { %v5109_v8 = vadd.f32 %v5108_v1, %v5107_v62  ;;  %v5110_v35 = vpop.f32.mrb[86].mxu1  ;;  %v5072_v50 = vadd.f32 %v5071_v33, %v5070_v7  ;;  %v3926_v46 = vadd.f32 %v5069_v39, %v6772_v6 }
 0x3f0   : > { %v5111_v38 = vpop.f32.mrb[87].mxu1 }
 0x3f1   : > { %v5112_v43 = vadd.f32 %v5111_v38, %v5110_v35  ;;  %v3990_v53 = vadd.f32 %v5109_v8, %v3918_v4  ;;  %v3929_v52 = vadd.f32 %v5072_v50, %v6772_v6  ;;  %v4151_v50 = vld [vmem:[%s6788_s14] sm:$0xf] }
 0x3f3   : > { %v3993_v40 = vadd.f32 %v5112_v43, %v3921_v21 }
 0x3f4   : > { %v5073_v61 = vpop.f32.mrb[92].mxu0 }
 0x3f5   : > { %v5074_v15 = vpop.f32.mrb[93].mxu0 }
 0x3f6   : > { %v5075_v13 = vadd.f32 %v5074_v15, %v5073_v61  ;;  %v5076_v24 = vpop.f32.mrb[94].mxu0 }
 0x3f7   : > { %v5077_v26 = vpop.f32.mrb[95].mxu0 }
 0x3f8   : > { %v5078_v59 = vadd.f32 %v5077_v26, %v5076_v24  ;;  %v3934_v47 = vadd.f32 %v5075_v13, %v6772_v6 }
 0x3fa   : > { %v3937_v2 = vadd.f32 %v5078_v59, %v6772_v6 }
 0x3fe   : > { %v5079_v36 = vpop.f32.mrb[96].mxu0 }
 0x3ff   : > { %v5080_v37 = vpop.f32.mrb[97].mxu0  ;;  %v5113_v58 = vpop.f32.mrb[88].mxu1 }
 0x400   : > { %v5081_v45 = vadd.f32 %v5080_v37, %v5079_v36  ;;  %v5082_v30 = vpop.f32.mrb[98].mxu0  ;;  %v5114_v42 = vpop.f32.mrb[89].mxu1 }
 0x401   : > { %v5083_v34 = vpop.f32.mrb[99].mxu0  ;;  %v5115_v63 = vadd.f32 %v5114_v42, %v5113_v58  ;;  %v5116_v9 = vpop.f32.mrb[90].mxu1 }
 0x402   : > { %v5117_v14 = vpop.f32.mrb[91].mxu1  ;;  %v3942_v35 = vadd.f32 %v5081_v45, %v6772_v6 }
 0x403   : > { %v5118_v5 = vadd.f32 %v5117_v14, %v5116_v9  ;;  %v3998_v27 = vadd.f32 %v5115_v63, %v3926_v46 }
 0x405   : > { %v4001_v44 = vadd.f32 %v5118_v5, %v3929_v52 }
 0x406   : > { %v4053_v60 = vpop.f32.mrb[100].mxu0 }
 0x407   : > { %v4054_v48 = vadd.f32 %v4053_v60, %v3982_v19  ;;  %v5150_v29 = vpop.f32.mrb[101].mxu0  ;;  %v5119_v55 = vpop.f32.mrb[92].mxu1 }
 0x408   : > { %v4056_v41 = vpop.f32.mrb[102].mxu0  ;;  %v5120_v49 = vpop.f32.mrb[93].mxu1 }
 0x409   : > { %v4091_v23 = vmax.f32 %v4054_v48, 0.0  ;;  %v4057_v56 = vadd.f32 %v4056_v41, %v3985_v54  ;;  %v5151_v51 = vpop.f32.mrb[103].mxu0  ;;  %v5121_v16 = vadd.f32 %v5120_v49, %v5119_v55  ;;  %v5122_v0 = vpop.f32.mrb[94].mxu1 }
 0x40a   : > { %v5123_v17 = vpop.f32.mrb[95].mxu1 }
 0x40b   : > { %v4659_v12 = vpack.c.bf16 %v4091_v23, %v4091_v23  ;;  %v4092_v18 = vmax.f32 %v4057_v56, 0.0  ;;  %v5124_v25 = vadd.f32 %v5123_v17, %v5122_v0  ;;  %v4006_v31 = vadd.f32 %v5121_v16, %v3934_v47 }
 0x40d   : > { %4137 = vst.msk [vmem:[#allocation6] sm:$0xf] %vm2620_vm12, %v4659_v12  ;;  %v4660_v19 = vpack.c.bf16 %v4092_v18, %v4092_v18  ;;  %v4009_v3 = vadd.f32 %v5124_v25, %v3937_v2 }
 0x40e   : > { %v4061_v10 = vpop.f32.mrb[104].mxu0 }
 0x40f   : > { %4138 = vst.msk [vmem:[#allocation6 + $0x4] sm:$0xf] %vm2620_vm12, %v4660_v19  ;;  %v4062_v54 = vadd.f32 %v4061_v10, %v3990_v53  ;;  %v5154_v62 = vpop.f32.mrb[105].mxu0  ;;  %v5125_v7 = vpop.f32.mrb[96].mxu1 }
 0x410   : > { %v4064_v39 = vpop.f32.mrb[106].mxu0  ;;  %v5126_v8 = vpop.f32.mrb[97].mxu1 }
 0x411   : > { %v4093_v1 = vmax.f32 %v4062_v54, 0.0  ;;  %v4065_v4 = vadd.f32 %v4064_v39, %v3993_v40  ;;  %v5155_v33 = vpop.f32.mrb[107].mxu0  ;;  %v5127_v38 = vadd.f32 %v5126_v8, %v5125_v7  ;;  %v5128_v21 = vpop.f32.mrb[98].mxu1  ;;  %v4194_v54 = vld [vmem:[%s6788_s14 + $0x8] sm:$0x7] }
 0x412   : > { %v5129_v15 = vpop.f32.mrb[99].mxu1 }
 0x413   : > { %v4661_v43 = vpack.c.bf16 %v4093_v1, %v4093_v1  ;;  %v4094_v61 = vmax.f32 %v4065_v4, 0.0  ;;  %v4014_v13 = vadd.f32 %v5127_v38, %v3942_v35 }
 0x414   : > { %v4148_v53 = vld [vmem:[#allocation6] sm:$0xf] }
 0x415   : > { %v4152_v24 = vsel %vm4150_vm1, %v4148_v53, %v4151_v50  ;;  %4139 = vst.msk [vmem:[#allocation6 + $0x8] sm:$0xf] %vm2620_vm12, %v4661_v43  ;;  %v4662_v40 = vpack.c.bf16 %v4094_v61, %v4094_v61  ;;  %vm6812_vm1 = vmand %vm4178_vm5, %vm1843_vm4  ;;  %vm4220_vm4 = vcmask 519170  }
 0x416   : > { %4153 = vst [vmem:[%s6788_s14] sm:$0xf] %v4152_v24  ;;  %v4154_v26 = vld [vmem:[#allocation6 + $0x4] sm:$0xe]  ;;  %v4069_v59 = vpop.f32.mrb[108].mxu0 }
 0x417   : > { %v4157_v36 = vshll.u32 %v4154_v26, 16  ;;  %v4160_v6 = vshrl.u32 %v4154_v26, 16  ;;  %4140 = vst.msk [vmem:[#allocation6 + $0xc] sm:$0xf] %vm2620_vm12, %v4662_v40  ;;  %v4070_v37 = vadd.f32 %v4069_v59, %v3998_v27  ;;  %v5158_v45 = vpop.f32.mrb[109].mxu0  ;;  %v4077_v58 = vpop.f32.mrb[100].mxu1 }
 0x418   : > { %v4072_v30 = vpop.f32.mrb[110].mxu0  ;;  %v5162_v14 = vpop.f32.mrb[101].mxu1  ;;  %v4078_v52 = vadd.f32 %v4077_v58, %v4006_v31  ;;  %v4236_v58 = vld [vmem:[%s6788_s14 + $0x10] sm:$0x3] }
 0x419   : > { %v4159_v34 = vrot.slane %v4157_v36, 6  ;;  %v4162_v42 = vrot.slane %v4160_v6, 5  ;;  %v4095_v46 = vmax.f32 %v4070_v37, 0.0  ;;  %v4073_v63 = vadd.f32 %v4072_v30, %v4001_v44  ;;  %v5159_v9 = vpop.f32.mrb[111].mxu0  ;;  %v4080_v5 = vpop.f32.mrb[102].mxu1 }
 0x41a   : > { %v4081_v41 = vadd.f32 %v4080_v5, %v4009_v3  ;;  %v5163_v55 = vpop.f32.mrb[103].mxu1  ;;  %v4097_v44 = vmax.f32 %v4078_v52, 0.0 }
 0x41b   : > { %v4163_v60 = vor.u32 %v4162_v42, %v4159_v34  ;;  %v4663_v27 = vpack.c.bf16 %v4095_v46, %v4095_v46  ;;  %v4096_v29 = vmax.f32 %v4073_v63, 0.0 }
 0x41c   : > { %v4155_v23 = vld [vmem:[#allocation6 + $0x8] sm:$0x1]  ;;  %v4180_v56 = vld [vmem:[#allocation6 + $0x8] sm:$0xc]  ;;  %v4665_v2 = vpack.c.bf16 %v4097_v44, %v4097_v44  ;;  %v4098_v25 = vmax.f32 %v4081_v41, 0.0 }
 0x41d   : > { %v4175_v51 = vld [vmem:[%s6788_s14] sm:$0x8]  ;;  %v4166_v49 = vshll.u32 %v4155_v23, 16  ;;  %v4184_v47 = vrot.slane %v4180_v56, 7  ;;  %4141 = vst.msk [vmem:[#allocation6 + $0x10] sm:$0xf] %vm2620_vm12, %v4663_v27  ;;  %v4664_v16 = vpack.c.bf16 %v4096_v29, %v4096_v29 }
 0x41e   : > { %v4164_v0 = vrot.slane %v4163_v60, 4  ;;  %v4176_v12 = vsel %vm6799_vm3, %v4159_v34, %v4175_v51  ;;  %v4181_v18 = vld [vmem:[#allocation6 + $0xc] sm:$0x3]  ;;  %v4197_v17 = vld [vmem:[#allocation6 + $0xc] sm:$0x8]  ;;  %v4666_v7 = vpack.c.bf16 %v4098_v25, %v4098_v25 }
 0x41f   : > { %4177 = vst [vmem:[%s6788_s14] sm:$0x8] %v4176_v12  ;;  %v4168_v31 = vrot.slane %v4166_v49, 6  ;;  %v4185_v19 = vrot.slane %v4184_v47, 4  ;;  %4191 = vst.msk [vmem:[%s6788_s14 + $0x4] sm:$0x8] %vm4172_vm0, %v4184_v47  ;;  %v4186_v10 = vrot.slane %v4181_v18, 7 }
 0x420   : > { %v4200_v62 = vshrl.u32 %v4197_v17, 16  ;;  %4142 = vst.msk [vmem:[#allocation6 + $0x14] sm:$0xf] %vm2620_vm12, %v4664_v16  ;;  %v4203_v39 = vshll.u32 %v4197_v17, 16  ;;  %4143 = vst.msk [vmem:[#allocation6 + $0x18] sm:$0xf] %vm2620_vm12, %v4665_v2 }
 0x421   : > { %v4085_v1 = vpop.f32.mrb[104].mxu1  ;;  %v4169_v4 = vsel %vm5895_vm8, %v4164_v0, %v4168_v31  ;;  %v4187_v33 = vsel %vm6261_vm2, %v4185_v19, %v4186_v10  ;;  %4144 = vst.msk [vmem:[#allocation6 + $0x1c] sm:$0xf] %vm2620_vm12, %v4666_v7  ;;  %vm4221_vm8 = vsmask.f32 7946 }
 0x422   : > { %v4202_v8 = vrot.slane %v4200_v62, 4  ;;  %v4086_v35 = vadd.f32 %v4085_v1, %v4014_v13  ;;  %v5166_v50 = vpop.f32.mrb[105].mxu1  ;;  %4179 = vst.msk [vmem:[%s6788_s14 + $0x4] sm:$0x7] %vm4178_vm5, %v4169_v4  ;;  %v4195_v38 = vsel %vm6812_vm1, %v4187_v33, %v4194_v54  ;;  %v4205_v21 = vrot.slane %v4203_v39, 5  ;;  %vm4222_vm12 = vmand %vm4220_vm4, %vm4221_vm8 }
 0x423   : > { %v4088_v43 = vpop.f32.mrb[106].mxu1  ;;  %4196 = vst [vmem:[%s6788_s14 + $0x8] sm:$0x7] %v4195_v38  ;;  %vm4241_vm2 = vsmask.f32 4368 }
 0x424   : > { %v4099_v61 = vmax.f32 %v4086_v35, 0.0  ;;  %v5167_v15 = vpop.f32.mrb[107].mxu1  ;;  %v4206_v28 = vor.u32 %v4205_v21, %v4202_v8  ;;  %v4198_v53 = vld [vmem:[#allocation6 + $0x10] sm:$0x7]  ;;  %vm4242_vm0 = vmor %vm1579_vm10, %vm4241_vm2 }
 0x425   : > { %v4209_v24 = vshll.u32 %v4198_v53, 16  ;;  %v4213_v13 = vshrl.u32 %v4198_v53, 16  ;;  %v4278_v44 = vld [vmem:[%s6788_s14 + $0x18] sm:$0x1] }
 0x426   : > { %v4667_v40 = vpack.c.bf16 %v4099_v61, %v4099_v61  ;;  %v4207_v26 = vrot.slane %v4206_v28, 4 }
 0x427   : > { %v4228_v59 = vld [vmem:[#allocation6 + $0x14] sm:$0xf]  ;;  %v4211_v36 = vrot.slane %v4209_v24, 5  ;;  %v4215_v6 = vrot.slane %v4213_v13, 4  ;;  %v4239_v45 = vld [vmem:[#allocation6 + $0x18] sm:$0xe] }
 0x428   : > { %v4230_v37 = vrot.slane %v4228_v59, 6  ;;  %v4146_v30 = vsel %vm6486_vm15, %v4667_v40, %v4145_v57  ;;  %v4244_v34 = vshrl.u32 %v4239_v45, 16  ;;  %v4240_v9 = vld [vmem:[#allocation6 + $0x1c] sm:$0x1]  ;;  %v4265_v29 = vld [vmem:[#allocation6 + $0x1c] sm:$0xc] }
 0x429   : > { %4147 = vst [vmem:[#allocation6 + $0x20] sm:$0x3] %v4146_v30  ;;  %v4212_v42 = vsel %vm5879_vm6, %v4207_v26, %v4211_v36  ;;  %v4216_v46 = vor.u32 %v4215_v6, %v4211_v36  ;;  %v4252_v27 = vshll.u32 %v4240_v9, 16  ;;  %vm4257_vm6 = vcmask 519169  }
 0x42a   : > { %v4231_v63 = vrot.slane %v4230_v37, 4  ;;  %4235 = vst.msk [vmem:[%s6788_s14 + $0xc] sm:$0xc] %vm4220_vm4, %v4230_v37  ;;  %v4223_v14 = vld [vmem:[%s6788_s14 + $0x8] sm:$0xc]  ;;  %v4246_v52 = vrot.slane %v4244_v34, 7  ;;  %vm4259_vm10 = vmand %vm4257_vm6, %vm4258_vm11 }
 0x42b   : > { %v4217_v5 = vrot.slane %v4216_v46, 4  ;;  %v4224_v60 = vsel %vm4222_vm12, %v4212_v42, %v4223_v14  ;;  %v4247_v55 = vshll.u32 %v4239_v45, 16  ;;  %v4630_v23 = vrot.slane %v4265_v29, 9 }
 0x42c   : > { %v4237_v48 = vsel %vm6486_vm15, %v4231_v63, %v4236_v58  ;;  %4225 = vst [vmem:[%s6788_s14 + $0x8] sm:$0xc] %v4224_v60  ;;  %v4250_v20 = vrot.slane %v4246_v52, 4 }
 0x42d   : > { %4238 = vst [vmem:[%s6788_s14 + $0x10] sm:$0x3] %v4237_v48  ;;  %4227 = vst.msk [vmem:[%s6788_s14 + $0xc] sm:$0x3] %vm2654_vm14, %v4217_v5  ;;  %v4249_v51 = vor.u32 %v4247_v55, %v4246_v52 }
 0x42e   : > { %v4254_v41 = vsel %vm4242_vm0, %v4250_v20, %v4252_v27 }
 0x42f   : > { %4264 = vst.msk [vmem:[%s6788_s14 + $0x14] sm:$0x1] %vm2632_vm9, %v4254_v41 }
 0x430   : > { %v4266_v11 = vld [vmem:[#allocation6 + $0x20] sm:$0x3] }
 0x431   : > { %v4271_v56 = vrot.slane %v4266_v11, 5 }
 0x433   : > { %v4272_v49 = vsel %vm5887_vm7, %v4630_v23, %v4271_v56  ;;  %v4273_v47 = vrot.slane %v4271_v56, 4 }
 0x434   : > { %v4260_v16 = vld [vmem:[%s6788_s14 + $0x10] sm:$0xe]  ;;  %4277 = vst.msk [vmem:[%s6788_s14 + $0x14] sm:$0xe] %vm4257_vm6, %v4272_v49 }
 0x435   : > { %v4261_v0 = vsel %vm4259_vm10, %v4249_v51, %v4260_v16  ;;  %v4279_v12 = vsel %vm6413_vm13, %v4273_v47, %v4278_v44 }
 0x436   : > { %4262 = vst [vmem:[%s6788_s14 + $0x10] sm:$0xe] %v4261_v0  ;;  %4280 = vst [vmem:[%s6788_s14 + $0x18] sm:$0x1] %v4279_v12 }
 0x437 PF: > { %s17_s24 = sadd.s32 1, %s5398_s24  }
 0x438   : > { %p14_p5 = scmp.ge.s32.totalorder %s17_s24, 4  }
 0x43a   :  { %16 = sbr.rel (!%p14_p5) target bundleno = 1 (0x1), region = 78 }

// kernel: mario_net_forward.3
= control target key start
LH: loop header
LB: loop body
LE: loop exit
PB: predicated region body
PF: predicated region fallthrough
CT: control target
= control target key end

     0   :  { %vm4847_vm0 = vcmask 523264   ;;  %s11088_s1 = inlined_call_operand.vmem [shape: bf16[3136,512], index: 1, kind: input, shape index: {}]   ;;  %s11089_s0 = inlined_call_operand.vmem [shape: bf16[8,3136], index: 0, kind: input, shape index: {}]   ;;  %s11090_s3 = inlined_call_operand.vmem [shape: bf16[512,128], index: 3, kind: input, shape index: {}]   ;;  %s11091_s2 = inlined_call_operand.vmem [shape: f32[1,512], index: 2, kind: input, shape index: {}]   ;;  %s11092_s4 = inlined_call_operand.vmem [shape: f32[1,128], index: 4, kind: input, shape index: {}]   ;;  %s11093_s5 = inlined_call_operand.vmem [shape: f32[8,128], index: 5, kind: output, shape index: {}]  }
   0x1   :  { %v7262_v0 = vld [vmem:[%s11088_s1 + $0x4] ss:$16 sps:$4 sm:$0xff]   ;;  %v7264_v1 = vld [vmem:[%s11088_s1 + $0xc] ss:$16 sps:$4 sm:$0xff]   ;;  %v7266_v2 = vld [vmem:[%s11088_s1] ss:$16 sps:$4 sm:$0xff]  }
   0x2   :  { %4851 = vmatprep.subr.bf16.mxu0 %v7262_v0  ;;  %v7267_v3 = vld [vmem:[%s11088_s1 + $0x8] ss:$16 sps:$4 sm:$0xff]   ;;  %5384 = vmatprep.subr.bf16.mxu1 %v7264_v1  ;;  %v7268_v4 = vld [vmem:[%s11088_s1 + $0x24] ss:$16 sps:$4 sm:$0xff]   ;;  %v7270_v5 = vld [vmem:[%s11088_s1 + $0x2c] ss:$16 sps:$4 sm:$0xff]  }
   0x3   :  { %4852 = vmatpush1.bf16.msra.mxu0 %v7266_v2  ;;  %5385 = vmatpush1.bf16.msra.mxu1 %v7267_v3  ;;  %v7272_v6 = vld [vmem:[%s11088_s1 + $0x20] ss:$16 sps:$4 sm:$0xff]   ;;  %v7273_v7 = vld [vmem:[%s11088_s1 + $0x28] ss:$16 sps:$4 sm:$0xff]   ;;  %v7274_v8 = vld [vmem:[%s11088_s1 + $0x44] ss:$16 sps:$4 sm:$0xff]  }
   0x4   :  { %4853 = vmatprep.subr.bf16.mxu0 %v7268_v4  ;;  %5386 = vmatprep.subr.bf16.mxu1 %v7270_v5  ;;  %v7276_v9 = vld [vmem:[%s11088_s1 + $0x4c] ss:$16 sps:$4 sm:$0xff]   ;;  %v7278_v10 = vld [vmem:[%s11088_s1 + $0x40] ss:$16 sps:$4 sm:$0xff]   ;;  %v7279_v11 = vld [vmem:[%s11088_s1 + $0x48] ss:$16 sps:$4 sm:$0xff]  }
   0x5   :  { %v7280_v12 = vld [vmem:[%s11088_s1 + $0x64] ss:$16 sps:$4 sm:$0xff]   ;;  %v7282_v13 = vld [vmem:[%s11088_s1 + $0x6c] ss:$16 sps:$4 sm:$0xff]   ;;  %v7284_v14 = vld [vmem:[%s11088_s1 + $0x60] ss:$16 sps:$4 sm:$0xff]  }
   0x6   :  { %v7285_v15 = vld [vmem:[%s11088_s1 + $0x68] ss:$16 sps:$4 sm:$0xff]   ;;  %v7286_v16 = vld [vmem:[%s11088_s1 + $0x84] ss:$16 sps:$4 sm:$0xff]   ;;  %v7288_v17 = vld [vmem:[%s11088_s1 + $0x8c] ss:$16 sps:$4 sm:$0xff]  }
   0x7   :  { %4854 = vmatpush1.bf16.msra.mxu0 %v7272_v6  ;;  %5387 = vmatpush1.bf16.msra.mxu1 %v7273_v7  ;;  %v7290_v18 = vld [vmem:[%s11088_s1 + $0x80] ss:$16 sps:$4 sm:$0xff]   ;;  %v7291_v19 = vld [vmem:[%s11088_s1 + $0x88] ss:$16 sps:$4 sm:$0xff]   ;;  %v7292_v20 = vld [vmem:[%s11088_s1 + $0xa4] ss:$16 sps:$4 sm:$0xff]  }
   0x8   :  { %4855 = vmatprep.subr.bf16.mxu0 %v7274_v8  ;;  %5388 = vmatprep.subr.bf16.mxu1 %v7276_v9  ;;  %v7294_v21 = vld [vmem:[%s11088_s1 + $0xac] ss:$16 sps:$4 sm:$0xff]   ;;  %v7296_v22 = vld [vmem:[%s11088_s1 + $0xa0] ss:$16 sps:$4 sm:$0xff]   ;;  %v7297_v23 = vld [vmem:[%s11088_s1 + $0xa8] ss:$16 sps:$4 sm:$0xff]  }
   0x9   :  { %v7298_v24 = vld [vmem:[%s11088_s1 + $0xc4] ss:$16 sps:$4 sm:$0xff]   ;;  %v7300_v25 = vld [vmem:[%s11088_s1 + $0xcc] ss:$16 sps:$4 sm:$0xff]   ;;  %v7302_v26 = vld [vmem:[%s11088_s1 + $0xc0] ss:$16 sps:$4 sm:$0xff]  }
   0xa   :  { %v7303_v27 = vld [vmem:[%s11088_s1 + $0xc8] ss:$16 sps:$4 sm:$0xff]   ;;  %v7304_v28 = vld [vmem:[%s11088_s1 + $0xe4] ss:$16 sps:$4 sm:$0xff]   ;;  %v7306_v29 = vld [vmem:[%s11088_s1 + $0xec] ss:$16 sps:$4 sm:$0xff]  }
   0xb   :  { %4856 = vmatpush1.bf16.msra.mxu0 %v7278_v10  ;;  %5389 = vmatpush1.bf16.msra.mxu1 %v7279_v11  ;;  %v7308_v30 = vld [vmem:[%s11088_s1 + $0xe0] ss:$16 sps:$4 sm:$0xff]   ;;  %v7309_v31 = vld [vmem:[%s11088_s1 + $0xe8] ss:$16 sps:$4 sm:$0xff]   ;;  %v7310_v32 = vld [vmem:[%s11088_s1 + $0x104] ss:$16 sps:$4 sm:$0xff]  }
   0xc   :  { %4857 = vmatprep.subr.bf16.mxu0 %v7280_v12  ;;  %5390 = vmatprep.subr.bf16.mxu1 %v7282_v13  ;;  %v7312_v33 = vld [vmem:[%s11088_s1 + $0x10c] ss:$16 sps:$4 sm:$0xff]   ;;  %v7314_v34 = vld [vmem:[%s11088_s1 + $0x100] ss:$16 sps:$4 sm:$0xff]   ;;  %v7315_v35 = vld [vmem:[%s11088_s1 + $0x108] ss:$16 sps:$4 sm:$0xff]  }
   0xd   :  { %v7316_v36 = vld [vmem:[%s11088_s1 + $0x124] ss:$16 sps:$4 sm:$0xff]   ;;  %v7318_v37 = vld [vmem:[%s11088_s1 + $0x12c] ss:$16 sps:$4 sm:$0xff]   ;;  %v7320_v38 = vld [vmem:[%s11088_s1 + $0x120] ss:$16 sps:$4 sm:$0xff]  }
   0xe   :  { %v7321_v39 = vld [vmem:[%s11088_s1 + $0x128] ss:$16 sps:$4 sm:$0xff]   ;;  %v7322_v40 = vld [vmem:[%s11088_s1 + $0x144] ss:$16 sps:$4 sm:$0xff]   ;;  %v7324_v41 = vld [vmem:[%s11088_s1 + $0x14c] ss:$16 sps:$4 sm:$0xff]  }
   0xf   :  { %4858 = vmatpush1.bf16.msra.mxu0 %v7284_v14  ;;  %5391 = vmatpush1.bf16.msra.mxu1 %v7285_v15  ;;  %v7326_v42 = vld [vmem:[%s11088_s1 + $0x140] ss:$16 sps:$4 sm:$0xff]   ;;  %v7327_v43 = vld [vmem:[%s11088_s1 + $0x148] ss:$16 sps:$4 sm:$0xff]   ;;  %v7328_v44 = vld [vmem:[%s11088_s1 + $0x164] ss:$16 sps:$4 sm:$0xff]  }
  0x10   :  { %4859 = vmatprep.subr.bf16.mxu0 %v7286_v16  ;;  %5392 = vmatprep.subr.bf16.mxu1 %v7288_v17  ;;  %v7330_v45 = vld [vmem:[%s11088_s1 + $0x16c] ss:$16 sps:$4 sm:$0xff]   ;;  %v21_v46 = vld [vmem:[%s11089_s0] sm:$0xff]  ;;  %v7333_v49 = vld [vmem:[%s11088_s1 + $0x168] ss:$16 sps:$4 sm:$0xff]  }
  0x11   :  { %v7332_v47 = vld [vmem:[%s11088_s1 + $0x160] ss:$16 sps:$4 sm:$0xff]   ;;  %v6274_v48 = vcombine.high %v21_v46, %v21_v46  ;;  %v7334_v50 = vld [vmem:[%s11088_s1 + $0x184] ss:$16 sps:$4 sm:$0xff]   ;;  %v7336_v51 = vld [vmem:[%s11088_s1 + $0x18c] ss:$16 sps:$4 sm:$0xff]   ;;  %v6273_v4 = vcombine.low %v21_v46, %v21_v46 }
  0x12   :  { %v7338_v52 = vld [vmem:[%s11088_s1 + $0x180] ss:$16 sps:$4 sm:$0xff]   ;;  %v7339_v53 = vld [vmem:[%s11088_s1 + $0x188] ss:$16 sps:$4 sm:$0xff]   ;;  %v7340_v54 = vld [vmem:[%s11088_s1 + $0x1a4] ss:$16 sps:$4 sm:$0xff]  }
  0x13   :  { %4860 = vmatpush1.bf16.msra.mxu0 %v7290_v18  ;;  %5393 = vmatpush1.bf16.msra.mxu1 %v7291_v19  ;;  %v7342_v55 = vld [vmem:[%s11088_s1 + $0x1ac] ss:$16 sps:$4 sm:$0xff]   ;;  %v7344_v56 = vld [vmem:[%s11088_s1 + $0x1a0] ss:$16 sps:$4 sm:$0xff]   ;;  %v7345_v57 = vld [vmem:[%s11088_s1 + $0x1a8] ss:$16 sps:$4 sm:$0xff]  }
  0x14   :  { %4861 = vmatprep.subr.bf16.mxu0 %v7292_v20  ;;  %5394 = vmatprep.subr.bf16.mxu1 %v7294_v21  ;;  %v7346_v58 = vld [vmem:[%s11088_s1 + $0x1c4] ss:$16 sps:$4 sm:$0xff]   ;;  %v7348_v59 = vld [vmem:[%s11088_s1 + $0x1cc] ss:$16 sps:$4 sm:$0xff]   ;;  %v7350_v60 = vld [vmem:[%s11088_s1 + $0x1c0] ss:$16 sps:$4 sm:$0xff]  }
  0x15   :  { %4883 = vmatprep.mubr.bf16.mxu0 %v6274_v48  ;;  %5416 = vmatprep.mubr.bf16.mxu1 %v6274_v48  ;;  %v7351_v61 = vld [vmem:[%s11088_s1 + $0x1c8] ss:$16 sps:$4 sm:$0xff]   ;;  %v7352_v62 = vld [vmem:[%s11088_s1 + $0x1e4] ss:$16 sps:$4 sm:$0xff]   ;;  %v7354_v63 = vld [vmem:[%s11088_s1 + $0x1ec] ss:$16 sps:$4 sm:$0xff]  }
  0x16   :  { %v7356_v0 = vld [vmem:[%s11088_s1 + $0x1e0] ss:$16 sps:$4 sm:$0xff]   ;;  %v7357_v1 = vld [vmem:[%s11088_s1 + $0x1e8] ss:$16 sps:$4 sm:$0xff]   ;;  %v7362_v2 = vld [vmem:[%s11088_s1 + $0x204] ss:$16 sps:$4 sm:$0xff]  }
  0x17   :  { %4862 = vmatpush1.bf16.msra.mxu0 %v7296_v22  ;;  %5395 = vmatpush1.bf16.msra.mxu1 %v7297_v23  ;;  %v7365_v3 = vld [vmem:[%s11088_s1 + $0x20c] ss:$16 sps:$4 sm:$0xff]   ;;  %v7360_v5 = vld [vmem:[%s11088_s1 + $0x200] ss:$16 sps:$4 sm:$0xff]   ;;  %v7363_v6 = vld [vmem:[%s11088_s1 + $0x208] ss:$16 sps:$4 sm:$0xff]  }
  0x18   :  { %4863 = vmatprep.subr.bf16.mxu0 %v7298_v24  ;;  %5396 = vmatprep.subr.bf16.mxu1 %v7300_v25  ;;  %v7368_v7 = vld [vmem:[%s11088_s1 + $0x224] ss:$16 sps:$4 sm:$0xff]   ;;  %v7371_v8 = vld [vmem:[%s11088_s1 + $0x22c] ss:$16 sps:$4 sm:$0xff]   ;;  %v7366_v9 = vld [vmem:[%s11088_s1 + $0x220] ss:$16 sps:$4 sm:$0xff]  }
  0x19   :  { %v7369_v10 = vld [vmem:[%s11088_s1 + $0x228] ss:$16 sps:$4 sm:$0xff]   ;;  %v7374_v11 = vld [vmem:[%s11088_s1 + $0x244] ss:$16 sps:$4 sm:$0xff]   ;;  %v7377_v12 = vld [vmem:[%s11088_s1 + $0x24c] ss:$16 sps:$4 sm:$0xff]  }
  0x1a   :  { %v7372_v13 = vld [vmem:[%s11088_s1 + $0x240] ss:$16 sps:$4 sm:$0xff]   ;;  %v7375_v14 = vld [vmem:[%s11088_s1 + $0x248] ss:$16 sps:$4 sm:$0xff]   ;;  %v7380_v15 = vld [vmem:[%s11088_s1 + $0x264] ss:$16 sps:$4 sm:$0xff]  }
  0x1b   :  { %4864 = vmatpush1.bf16.msra.mxu0 %v7302_v26  ;;  %5397 = vmatpush1.bf16.msra.mxu1 %v7303_v27  ;;  %v7383_v16 = vld [vmem:[%s11088_s1 + $0x26c] ss:$16 sps:$4 sm:$0xff]   ;;  %v7378_v17 = vld [vmem:[%s11088_s1 + $0x260] ss:$16 sps:$4 sm:$0xff]   ;;  %v7381_v18 = vld [vmem:[%s11088_s1 + $0x268] ss:$16 sps:$4 sm:$0xff]  }
  0x1c   :  { %4865 = vmatprep.subr.bf16.mxu0 %v7304_v28  ;;  %5398 = vmatprep.subr.bf16.mxu1 %v7306_v29  ;;  %v7386_v19 = vld [vmem:[%s11088_s1 + $0x284] ss:$16 sps:$4 sm:$0xff]   ;;  %v7389_v20 = vld [vmem:[%s11088_s1 + $0x28c] ss:$16 sps:$4 sm:$0xff]   ;;  %v7384_v21 = vld [vmem:[%s11088_s1 + $0x280] ss:$16 sps:$4 sm:$0xff]  }
  0x1d   :  { %v7387_v22 = vld [vmem:[%s11088_s1 + $0x288] ss:$16 sps:$4 sm:$0xff]   ;;  %v7392_v23 = vld [vmem:[%s11088_s1 + $0x2a4] ss:$16 sps:$4 sm:$0xff]   ;;  %v7395_v24 = vld [vmem:[%s11088_s1 + $0x2ac] ss:$16 sps:$4 sm:$0xff]  }
  0x1e   :  { %v7390_v25 = vld [vmem:[%s11088_s1 + $0x2a0] ss:$16 sps:$4 sm:$0xff]   ;;  %v7393_v26 = vld [vmem:[%s11088_s1 + $0x2a8] ss:$16 sps:$4 sm:$0xff]   ;;  %v7398_v27 = vld [vmem:[%s11088_s1 + $0x2c4] ss:$16 sps:$4 sm:$0xff]  }
  0x1f   :  { %4866 = vmatpush1.bf16.msra.mxu0 %v7308_v30  ;;  %5399 = vmatpush1.bf16.msra.mxu1 %v7309_v31  ;;  %v7401_v28 = vld [vmem:[%s11088_s1 + $0x2cc] ss:$16 sps:$4 sm:$0xff]   ;;  %v7396_v31 = vld [vmem:[%s11088_s1 + $0x2c0] ss:$16 sps:$4 sm:$0xff]   ;;  %v7423_v48 = vld [vmem:[%s11088_s1 + $0x348] ss:$16 sps:$4 sm:$0xff]  }
  0x20   :  { %4867 = vmatprep.subr.bf16.mxu0 %v7310_v32  ;;  %5400 = vmatprep.subr.bf16.mxu1 %v7312_v33  ;;  %v8802_v29 = vld [vmem:[%s11089_s0 + $0x8] sm:$0xff]  ;;  %v7404_v33 = vld [vmem:[%s11088_s1 + $0x2e4] ss:$16 sps:$4 sm:$0xff]  }
  0x21   :  { %v6276_v30 = vcombine.high %v8802_v29, %v8802_v29  ;;  %v7399_v32 = vld [vmem:[%s11088_s1 + $0x2c8] ss:$16 sps:$4 sm:$0xff]   ;;  %v7425_v46 = vld [vmem:[%s11088_s1 + $0x34c] ss:$16 sps:$4 sm:$0xff]  }
  0x23   :  { %4868 = vmatpush1.bf16.msra.mxu0 %v7314_v34  ;;  %5401 = vmatpush1.bf16.msra.mxu1 %v7315_v35  ;;  %v7407_v34 = vld [vmem:[%s11088_s1 + $0x2ec] ss:$16 sps:$4 sm:$0xff]   ;;  %v7402_v35 = vld [vmem:[%s11088_s1 + $0x2e0] ss:$16 sps:$4 sm:$0xff]  }
  0x24   :  { %4869 = vmatprep.subr.bf16.mxu0 %v7316_v36  ;;  %5402 = vmatprep.subr.bf16.mxu1 %v7318_v37  ;;  %v7405_v36 = vld [vmem:[%s11088_s1 + $0x2e8] ss:$16 sps:$4 sm:$0xff]   ;;  %v7410_v37 = vld [vmem:[%s11088_s1 + $0x304] ss:$16 sps:$4 sm:$0xff]  }
  0x27   :  { %4870 = vmatpush1.bf16.msra.mxu0 %v7320_v38  ;;  %5403 = vmatpush1.bf16.msra.mxu1 %v7321_v39  ;;  %v7413_v38 = vld [vmem:[%s11088_s1 + $0x30c] ss:$16 sps:$4 sm:$0xff]   ;;  %v7408_v39 = vld [vmem:[%s11088_s1 + $0x300] ss:$16 sps:$4 sm:$0xff]  }
  0x28   :  { %4871 = vmatprep.subr.bf16.mxu0 %v7322_v40  ;;  %5404 = vmatprep.subr.bf16.mxu1 %v7324_v41  ;;  %v7411_v40 = vld [vmem:[%s11088_s1 + $0x308] ss:$16 sps:$4 sm:$0xff]   ;;  %v7416_v41 = vld [vmem:[%s11088_s1 + $0x324] ss:$16 sps:$4 sm:$0xff]  }
  0x2b   :  { %4872 = vmatpush1.bf16.msra.mxu0 %v7326_v42  ;;  %5405 = vmatpush1.bf16.msra.mxu1 %v7327_v43  ;;  %v7419_v42 = vld [vmem:[%s11088_s1 + $0x32c] ss:$16 sps:$4 sm:$0xff]   ;;  %v7414_v43 = vld [vmem:[%s11088_s1 + $0x320] ss:$16 sps:$4 sm:$0xff]  }
  0x2c   :  { %4873 = vmatprep.subr.bf16.mxu0 %v7328_v44  ;;  %5406 = vmatprep.subr.bf16.mxu1 %v7330_v45  ;;  %v7417_v44 = vld [vmem:[%s11088_s1 + $0x328] ss:$16 sps:$4 sm:$0xff]   ;;  %v7422_v45 = vld [vmem:[%s11088_s1 + $0x344] ss:$16 sps:$4 sm:$0xff]  }
  0x2f   :  { %4874 = vmatpush1.bf16.msra.mxu0 %v7332_v47  ;;  %5407 = vmatpush1.bf16.msra.mxu1 %v7333_v49  ;;  %v7420_v47 = vld [vmem:[%s11088_s1 + $0x340] ss:$16 sps:$4 sm:$0xff]   ;;  %v7428_v49 = vld [vmem:[%s11088_s1 + $0x364] ss:$16 sps:$4 sm:$0xff]  }
  0x30   :  { %4875 = vmatprep.subr.bf16.mxu0 %v7334_v50  ;;  %5408 = vmatprep.subr.bf16.mxu1 %v7336_v51  ;;  %v7431_v50 = vld [vmem:[%s11088_s1 + $0x36c] ss:$16 sps:$4 sm:$0xff]   ;;  %v7426_v51 = vld [vmem:[%s11088_s1 + $0x360] ss:$16 sps:$4 sm:$0xff]  }
  0x33   :  { %4876 = vmatpush1.bf16.msra.mxu0 %v7338_v52  ;;  %5409 = vmatpush1.bf16.msra.mxu1 %v7339_v53  ;;  %v7429_v52 = vld [vmem:[%s11088_s1 + $0x368] ss:$16 sps:$4 sm:$0xff]   ;;  %v7434_v53 = vld [vmem:[%s11088_s1 + $0x384] ss:$16 sps:$4 sm:$0xff]  }
  0x34   :  { %4877 = vmatprep.subr.bf16.mxu0 %v7340_v54  ;;  %5410 = vmatprep.subr.bf16.mxu1 %v7342_v55  ;;  %v7437_v54 = vld [vmem:[%s11088_s1 + $0x38c] ss:$16 sps:$4 sm:$0xff]   ;;  %v7432_v55 = vld [vmem:[%s11088_s1 + $0x380] ss:$16 sps:$4 sm:$0xff]  }
  0x37   :  { %4878 = vmatpush1.bf16.msra.mxu0 %v7344_v56  ;;  %5411 = vmatpush1.bf16.msra.mxu1 %v7345_v57  ;;  %v7435_v56 = vld [vmem:[%s11088_s1 + $0x388] ss:$16 sps:$4 sm:$0xff]   ;;  %v7440_v57 = vld [vmem:[%s11088_s1 + $0x3a4] ss:$16 sps:$4 sm:$0xff]  }
  0x38   :  { %4879 = vmatprep.subr.bf16.mxu0 %v7346_v58  ;;  %5412 = vmatprep.subr.bf16.mxu1 %v7348_v59  ;;  %v7443_v58 = vld [vmem:[%s11088_s1 + $0x3ac] ss:$16 sps:$4 sm:$0xff]   ;;  %v7438_v59 = vld [vmem:[%s11088_s1 + $0x3a0] ss:$16 sps:$4 sm:$0xff]  }
  0x3b   :  { %4880 = vmatpush1.bf16.msra.mxu0 %v7350_v60  ;;  %5413 = vmatpush1.bf16.msra.mxu1 %v7351_v61  ;;  %v7441_v60 = vld [vmem:[%s11088_s1 + $0x3a8] ss:$16 sps:$4 sm:$0xff]   ;;  %v7446_v61 = vld [vmem:[%s11088_s1 + $0x3c4] ss:$16 sps:$4 sm:$0xff]  }
  0x3c   :  { %4881 = vmatprep.subr.bf16.mxu0 %v7352_v62  ;;  %5414 = vmatprep.subr.bf16.mxu1 %v7354_v63  ;;  %v7449_v62 = vld [vmem:[%s11088_s1 + $0x3cc] ss:$16 sps:$4 sm:$0xff]   ;;  %v7444_v63 = vld [vmem:[%s11088_s1 + $0x3c0] ss:$16 sps:$4 sm:$0xff]  }
  0x3f   :  { %4882 = vmatpush1.bf16.msra.mxu0 %v7356_v0  ;;  %5415 = vmatpush1.bf16.msra.mxu1 %v7357_v1  ;;  %v7447_v0 = vld [vmem:[%s11088_s1 + $0x3c8] ss:$16 sps:$4 sm:$0xff]   ;;  %v7452_v1 = vld [vmem:[%s11088_s1 + $0x3e4] ss:$16 sps:$4 sm:$0xff]  }
  0x40   :  { %4892 = vmatprep.subr.bf16.mxu0 %v7362_v2  ;;  %5425 = vmatprep.subr.bf16.mxu1 %v7365_v3  ;;  %v7455_v2 = vld [vmem:[%s11088_s1 + $0x3ec] ss:$16 sps:$4 sm:$0xff]   ;;  %v7450_v3 = vld [vmem:[%s11088_s1 + $0x3e0] ss:$16 sps:$4 sm:$0xff]  }
  0x42   :  { %4884 = vmatmul.mubr.bf16.vlgmr.msra.gmra.mrb[0].mxu0 %v6273_v4  ;;  %5417 = vmatmul.mubr.bf16.vlgmr.msra.gmra.mrb[0].mxu1 %v6273_v4  ;;  %v7453_v4 = vld [vmem:[%s11088_s1 + $0x3e8] ss:$16 sps:$4 sm:$0xff]  }
  0x43   :  { %4893 = vmatpush1.bf16.msra.mxu0 %v7360_v5  ;;  %5426 = vmatpush1.bf16.msra.mxu1 %v7363_v6  ;;  %v7460_v5 = vld [vmem:[%s11088_s1 + $0x404] ss:$16 sps:$4 sm:$0xff]   ;;  %v7463_v6 = vld [vmem:[%s11088_s1 + $0x40c] ss:$16 sps:$4 sm:$0xff]  }
  0x44   :  { %4894 = vmatprep.subr.bf16.mxu0 %v7368_v7  ;;  %5427 = vmatprep.subr.bf16.mxu1 %v7371_v8  ;;  %v6275_v7 = vcombine.low %v8802_v29, %v8802_v29  ;;  %v7458_v8 = vld [vmem:[%s11088_s1 + $0x400] ss:$16 sps:$4 sm:$0xff]   ;;  %v7493_v29 = vld [vmem:[%s11088_s1 + $0x4ac] ss:$16 sps:$4 sm:$0xff]  }
  0x45   :  { %4924 = vmatprep.mubr.bf16.mxu0 %v6276_v30  ;;  %5457 = vmatprep.mubr.bf16.mxu1 %v6276_v30  ;;  %v7488_v30 = vld [vmem:[%s11088_s1 + $0x4a0] ss:$16 sps:$4 sm:$0xff]  }
  0x47   :  { %4895 = vmatpush1.bf16.msra.mxu0 %v7366_v9  ;;  %5428 = vmatpush1.bf16.msra.mxu1 %v7369_v10  ;;  %v7461_v9 = vld [vmem:[%s11088_s1 + $0x408] ss:$16 sps:$4 sm:$0xff]   ;;  %v7466_v10 = vld [vmem:[%s11088_s1 + $0x424] ss:$16 sps:$4 sm:$0xff]  }
  0x48   :  { %4896 = vmatprep.subr.bf16.mxu0 %v7374_v11  ;;  %5429 = vmatprep.subr.bf16.mxu1 %v7377_v12  ;;  %v8940_v11 = vld [vmem:[%s11089_s0 + $0x10] sm:$0xff]  ;;  %v7469_v12 = vld [vmem:[%s11088_s1 + $0x42c] ss:$16 sps:$4 sm:$0xff]  }
  0x4b   :  { %4897 = vmatpush1.bf16.msra.mxu0 %v7372_v13  ;;  %5430 = vmatpush1.bf16.msra.mxu1 %v7375_v14  ;;  %v6278_v13 = vcombine.high %v8940_v11, %v8940_v11  ;;  %v7464_v14 = vld [vmem:[%s11088_s1 + $0x420] ss:$16 sps:$4 sm:$0xff]  }
  0x4c   :  { %4898 = vmatprep.subr.bf16.mxu0 %v7380_v15  ;;  %5431 = vmatprep.subr.bf16.mxu1 %v7383_v16  ;;  %v7467_v15 = vld [vmem:[%s11088_s1 + $0x428] ss:$16 sps:$4 sm:$0xff]   ;;  %v7472_v16 = vld [vmem:[%s11088_s1 + $0x444] ss:$16 sps:$4 sm:$0xff]  }
  0x4f   :  { %4899 = vmatpush1.bf16.msra.mxu0 %v7378_v17  ;;  %5432 = vmatpush1.bf16.msra.mxu1 %v7381_v18  ;;  %v7475_v17 = vld [vmem:[%s11088_s1 + $0x44c] ss:$16 sps:$4 sm:$0xff]   ;;  %v7470_v18 = vld [vmem:[%s11088_s1 + $0x440] ss:$16 sps:$4 sm:$0xff]  }
  0x50   :  { %4900 = vmatprep.subr.bf16.mxu0 %v7386_v19  ;;  %5433 = vmatprep.subr.bf16.mxu1 %v7389_v20  ;;  %v7473_v19 = vld [vmem:[%s11088_s1 + $0x448] ss:$16 sps:$4 sm:$0xff]   ;;  %v7478_v20 = vld [vmem:[%s11088_s1 + $0x464] ss:$16 sps:$4 sm:$0xff]  }
  0x53   :  { %4901 = vmatpush1.bf16.msra.mxu0 %v7384_v21  ;;  %5434 = vmatpush1.bf16.msra.mxu1 %v7387_v22  ;;  %v7481_v21 = vld [vmem:[%s11088_s1 + $0x46c] ss:$16 sps:$4 sm:$0xff]   ;;  %v7476_v22 = vld [vmem:[%s11088_s1 + $0x460] ss:$16 sps:$4 sm:$0xff]  }
  0x54   :  { %4902 = vmatprep.subr.bf16.mxu0 %v7392_v23  ;;  %5435 = vmatprep.subr.bf16.mxu1 %v7395_v24  ;;  %v7479_v23 = vld [vmem:[%s11088_s1 + $0x468] ss:$16 sps:$4 sm:$0xff]   ;;  %v7484_v24 = vld [vmem:[%s11088_s1 + $0x484] ss:$16 sps:$4 sm:$0xff]  }
  0x57   :  { %4903 = vmatpush1.bf16.msra.mxu0 %v7390_v25  ;;  %5436 = vmatpush1.bf16.msra.mxu1 %v7393_v26  ;;  %v7487_v25 = vld [vmem:[%s11088_s1 + $0x48c] ss:$16 sps:$4 sm:$0xff]   ;;  %v7482_v26 = vld [vmem:[%s11088_s1 + $0x480] ss:$16 sps:$4 sm:$0xff]  }
  0x58   :  { %4904 = vmatprep.subr.bf16.mxu0 %v7398_v27  ;;  %5437 = vmatprep.subr.bf16.mxu1 %v7401_v28  ;;  %v7485_v27 = vld [vmem:[%s11088_s1 + $0x488] ss:$16 sps:$4 sm:$0xff]   ;;  %v7490_v28 = vld [vmem:[%s11088_s1 + $0x4a4] ss:$16 sps:$4 sm:$0xff]  }
  0x5b   :  { %4905 = vmatpush1.bf16.msra.mxu0 %v7396_v31  ;;  %5438 = vmatpush1.bf16.msra.mxu1 %v7399_v32  ;;  %v7491_v31 = vld [vmem:[%s11088_s1 + $0x4a8] ss:$16 sps:$4 sm:$0xff]   ;;  %v7496_v32 = vld [vmem:[%s11088_s1 + $0x4c4] ss:$16 sps:$4 sm:$0xff]  }
  0x5c   :  { %4906 = vmatprep.subr.bf16.mxu0 %v7404_v33  ;;  %5439 = vmatprep.subr.bf16.mxu1 %v7407_v34  ;;  %v7499_v33 = vld [vmem:[%s11088_s1 + $0x4cc] ss:$16 sps:$4 sm:$0xff]   ;;  %v7494_v34 = vld [vmem:[%s11088_s1 + $0x4c0] ss:$16 sps:$4 sm:$0xff]  }
  0x5f   :  { %4907 = vmatpush1.bf16.msra.mxu0 %v7402_v35  ;;  %5440 = vmatpush1.bf16.msra.mxu1 %v7405_v36  ;;  %v7497_v35 = vld [vmem:[%s11088_s1 + $0x4c8] ss:$16 sps:$4 sm:$0xff]   ;;  %v7502_v36 = vld [vmem:[%s11088_s1 + $0x4e4] ss:$16 sps:$4 sm:$0xff]  }
  0x60   :  { %4908 = vmatprep.subr.bf16.mxu0 %v7410_v37  ;;  %5441 = vmatprep.subr.bf16.mxu1 %v7413_v38  ;;  %v7505_v37 = vld [vmem:[%s11088_s1 + $0x4ec] ss:$16 sps:$4 sm:$0xff]   ;;  %v7500_v38 = vld [vmem:[%s11088_s1 + $0x4e0] ss:$16 sps:$4 sm:$0xff]  }
  0x63   :  { %4909 = vmatpush1.bf16.msra.mxu0 %v7408_v39  ;;  %5442 = vmatpush1.bf16.msra.mxu1 %v7411_v40  ;;  %v7503_v39 = vld [vmem:[%s11088_s1 + $0x4e8] ss:$16 sps:$4 sm:$0xff]   ;;  %v7508_v40 = vld [vmem:[%s11088_s1 + $0x504] ss:$16 sps:$4 sm:$0xff]  }
  0x64   :  { %4910 = vmatprep.subr.bf16.mxu0 %v7416_v41  ;;  %5443 = vmatprep.subr.bf16.mxu1 %v7419_v42  ;;  %v7511_v41 = vld [vmem:[%s11088_s1 + $0x50c] ss:$16 sps:$4 sm:$0xff]   ;;  %v7506_v42 = vld [vmem:[%s11088_s1 + $0x500] ss:$16 sps:$4 sm:$0xff]  }
  0x67   :  { %4911 = vmatpush1.bf16.msra.mxu0 %v7414_v43  ;;  %5444 = vmatpush1.bf16.msra.mxu1 %v7417_v44  ;;  %v7509_v43 = vld [vmem:[%s11088_s1 + $0x508] ss:$16 sps:$4 sm:$0xff]   ;;  %v7514_v44 = vld [vmem:[%s11088_s1 + $0x524] ss:$16 sps:$4 sm:$0xff]  }
  0x68   :  { %4912 = vmatprep.subr.bf16.mxu0 %v7422_v45  ;;  %5445 = vmatprep.subr.bf16.mxu1 %v7425_v46  ;;  %v7517_v45 = vld [vmem:[%s11088_s1 + $0x52c] ss:$16 sps:$4 sm:$0xff]   ;;  %v7512_v46 = vld [vmem:[%s11088_s1 + $0x520] ss:$16 sps:$4 sm:$0xff]  }
  0x6b   :  { %4913 = vmatpush1.bf16.msra.mxu0 %v7420_v47  ;;  %5446 = vmatpush1.bf16.msra.mxu1 %v7423_v48  ;;  %v7515_v47 = vld [vmem:[%s11088_s1 + $0x528] ss:$16 sps:$4 sm:$0xff]   ;;  %v7520_v48 = vld [vmem:[%s11088_s1 + $0x544] ss:$16 sps:$4 sm:$0xff]  }
  0x6c   :  { %4914 = vmatprep.subr.bf16.mxu0 %v7428_v49  ;;  %5447 = vmatprep.subr.bf16.mxu1 %v7431_v50  ;;  %v7523_v49 = vld [vmem:[%s11088_s1 + $0x54c] ss:$16 sps:$4 sm:$0xff]   ;;  %v7518_v50 = vld [vmem:[%s11088_s1 + $0x540] ss:$16 sps:$4 sm:$0xff]  }
  0x6f   :  { %4915 = vmatpush1.bf16.msra.mxu0 %v7426_v51  ;;  %5448 = vmatpush1.bf16.msra.mxu1 %v7429_v52  ;;  %v7521_v51 = vld [vmem:[%s11088_s1 + $0x548] ss:$16 sps:$4 sm:$0xff]   ;;  %v7526_v52 = vld [vmem:[%s11088_s1 + $0x564] ss:$16 sps:$4 sm:$0xff]  }
  0x70   :  { %4916 = vmatprep.subr.bf16.mxu0 %v7434_v53  ;;  %5449 = vmatprep.subr.bf16.mxu1 %v7437_v54  ;;  %v7529_v53 = vld [vmem:[%s11088_s1 + $0x56c] ss:$16 sps:$4 sm:$0xff]   ;;  %v7524_v54 = vld [vmem:[%s11088_s1 + $0x560] ss:$16 sps:$4 sm:$0xff]  }
  0x73   :  { %4917 = vmatpush1.bf16.msra.mxu0 %v7432_v55  ;;  %5450 = vmatpush1.bf16.msra.mxu1 %v7435_v56  ;;  %v7527_v55 = vld [vmem:[%s11088_s1 + $0x568] ss:$16 sps:$4 sm:$0xff]   ;;  %v7532_v56 = vld [vmem:[%s11088_s1 + $0x584] ss:$16 sps:$4 sm:$0xff]  }
  0x74   :  { %4918 = vmatprep.subr.bf16.mxu0 %v7440_v57  ;;  %5451 = vmatprep.subr.bf16.mxu1 %v7443_v58  ;;  %v7535_v57 = vld [vmem:[%s11088_s1 + $0x58c] ss:$16 sps:$4 sm:$0xff]   ;;  %v7530_v58 = vld [vmem:[%s11088_s1 + $0x580] ss:$16 sps:$4 sm:$0xff]  }
  0x77   :  { %4919 = vmatpush1.bf16.msra.mxu0 %v7438_v59  ;;  %5452 = vmatpush1.bf16.msra.mxu1 %v7441_v60  ;;  %v7533_v59 = vld [vmem:[%s11088_s1 + $0x588] ss:$16 sps:$4 sm:$0xff]   ;;  %v7538_v60 = vld [vmem:[%s11088_s1 + $0x5a4] ss:$16 sps:$4 sm:$0xff]  }
  0x78   :  { %4920 = vmatprep.subr.bf16.mxu0 %v7446_v61  ;;  %5453 = vmatprep.subr.bf16.mxu1 %v7449_v62  ;;  %v7541_v61 = vld [vmem:[%s11088_s1 + $0x5ac] ss:$16 sps:$4 sm:$0xff]   ;;  %v7536_v62 = vld [vmem:[%s11088_s1 + $0x5a0] ss:$16 sps:$4 sm:$0xff]  }
  0x7b   :  { %4921 = vmatpush1.bf16.msra.mxu0 %v7444_v63  ;;  %5454 = vmatpush1.bf16.msra.mxu1 %v7447_v0  ;;  %v7539_v63 = vld [vmem:[%s11088_s1 + $0x5a8] ss:$16 sps:$4 sm:$0xff]   ;;  %v7544_v0 = vld [vmem:[%s11088_s1 + $0x5c4] ss:$16 sps:$4 sm:$0xff]  }
  0x7c   :  { %4922 = vmatprep.subr.bf16.mxu0 %v7452_v1  ;;  %5455 = vmatprep.subr.bf16.mxu1 %v7455_v2  ;;  %v7547_v1 = vld [vmem:[%s11088_s1 + $0x5cc] ss:$16 sps:$4 sm:$0xff]   ;;  %v7542_v2 = vld [vmem:[%s11088_s1 + $0x5c0] ss:$16 sps:$4 sm:$0xff]  }
  0x7f   :  { %4923 = vmatpush1.bf16.msra.mxu0 %v7450_v3  ;;  %5456 = vmatpush1.bf16.msra.mxu1 %v7453_v4  ;;  %v7545_v3 = vld [vmem:[%s11088_s1 + $0x5c8] ss:$16 sps:$4 sm:$0xff]   ;;  %v7550_v4 = vld [vmem:[%s11088_s1 + $0x5e4] ss:$16 sps:$4 sm:$0xff]  }
  0x80   :  { %4933 = vmatprep.subr.bf16.mxu0 %v7460_v5  ;;  %5466 = vmatprep.subr.bf16.mxu1 %v7463_v6  ;;  %v7553_v5 = vld [vmem:[%s11088_s1 + $0x5ec] ss:$16 sps:$4 sm:$0xff]   ;;  %v7548_v6 = vld [vmem:[%s11088_s1 + $0x5e0] ss:$16 sps:$4 sm:$0xff]  }
  0x82   :  { %4925 = vmatmul.mubr.bf16.vlgmr.msra.gmra.mrb[0].mxu0 %v6275_v7  ;;  %5458 = vmatmul.mubr.bf16.vlgmr.msra.gmra.mrb[0].mxu1 %v6275_v7  ;;  %v7551_v7 = vld [vmem:[%s11088_s1 + $0x5e8] ss:$16 sps:$4 sm:$0xff]  }
  0x83   :  { %4934 = vmatpush1.bf16.msra.mxu0 %v7458_v8  ;;  %5467 = vmatpush1.bf16.msra.mxu1 %v7461_v9  ;;  %v7558_v8 = vld [vmem:[%s11088_s1 + $0x604] ss:$16 sps:$4 sm:$0xff]   ;;  %v7561_v9 = vld [vmem:[%s11088_s1 + $0x60c] ss:$16 sps:$4 sm:$0xff]  }
  0x84   :  { %4935 = vmatprep.subr.bf16.mxu0 %v7466_v10  ;;  %5468 = vmatprep.subr.bf16.mxu1 %v7469_v12  ;;  %v7556_v10 = vld [vmem:[%s11088_s1 + $0x600] ss:$16 sps:$4 sm:$0xff]   ;;  %v6277_v12 = vcombine.low %v8940_v11, %v8940_v11  ;;  %v7567_v11 = vld [vmem:[%s11088_s1 + $0x62c] ss:$16 sps:$4 sm:$0xff]  }
  0x85   :  { %4965 = vmatprep.mubr.bf16.mxu0 %v6278_v13  ;;  %5498 = vmatprep.mubr.bf16.mxu1 %v6278_v13  ;;  %v7559_v13 = vld [vmem:[%s11088_s1 + $0x608] ss:$16 sps:$4 sm:$0xff]  }
  0x87   :  { %4936 = vmatpush1.bf16.msra.mxu0 %v7464_v14  ;;  %5469 = vmatpush1.bf16.msra.mxu1 %v7467_v15  ;;  %v9138_v14 = vld [vmem:[%s11089_s0 + $0x18] sm:$0xff]  ;;  %v7564_v15 = vld [vmem:[%s11088_s1 + $0x624] ss:$16 sps:$4 sm:$0xff]  }
  0x88   :  { %4937 = vmatprep.subr.bf16.mxu0 %v7472_v16  ;;  %5470 = vmatprep.subr.bf16.mxu1 %v7475_v17  ;;  %v6280_v16 = vcombine.high %v9138_v14, %v9138_v14  ;;  %v7562_v17 = vld [vmem:[%s11088_s1 + $0x620] ss:$16 sps:$4 sm:$0xff]  }
  0x8b   :  { %4938 = vmatpush1.bf16.msra.mxu0 %v7470_v18  ;;  %5471 = vmatpush1.bf16.msra.mxu1 %v7473_v19  ;;  %v7565_v18 = vld [vmem:[%s11088_s1 + $0x628] ss:$16 sps:$4 sm:$0xff]   ;;  %v7570_v19 = vld [vmem:[%s11088_s1 + $0x644] ss:$16 sps:$4 sm:$0xff]  }
  0x8c   :  { %4939 = vmatprep.subr.bf16.mxu0 %v7478_v20  ;;  %5472 = vmatprep.subr.bf16.mxu1 %v7481_v21  ;;  %v7573_v20 = vld [vmem:[%s11088_s1 + $0x64c] ss:$16 sps:$4 sm:$0xff]   ;;  %v7568_v21 = vld [vmem:[%s11088_s1 + $0x640] ss:$16 sps:$4 sm:$0xff]  }
  0x8f   :  { %4940 = vmatpush1.bf16.msra.mxu0 %v7476_v22  ;;  %5473 = vmatpush1.bf16.msra.mxu1 %v7479_v23  ;;  %v7571_v22 = vld [vmem:[%s11088_s1 + $0x648] ss:$16 sps:$4 sm:$0xff]   ;;  %v7576_v23 = vld [vmem:[%s11088_s1 + $0x664] ss:$16 sps:$4 sm:$0xff]  }
  0x90   :  { %4941 = vmatprep.subr.bf16.mxu0 %v7484_v24  ;;  %5474 = vmatprep.subr.bf16.mxu1 %v7487_v25  ;;  %v7579_v24 = vld [vmem:[%s11088_s1 + $0x66c] ss:$16 sps:$4 sm:$0xff]   ;;  %v7574_v25 = vld [vmem:[%s11088_s1 + $0x660] ss:$16 sps:$4 sm:$0xff]  }
  0x93   :  { %4942 = vmatpush1.bf16.msra.mxu0 %v7482_v26  ;;  %5475 = vmatpush1.bf16.msra.mxu1 %v7485_v27  ;;  %v7577_v26 = vld [vmem:[%s11088_s1 + $0x668] ss:$16 sps:$4 sm:$0xff]   ;;  %v7582_v27 = vld [vmem:[%s11088_s1 + $0x684] ss:$16 sps:$4 sm:$0xff]  }
  0x94   :  { %4943 = vmatprep.subr.bf16.mxu0 %v7490_v28  ;;  %5476 = vmatprep.subr.bf16.mxu1 %v7493_v29  ;;  %v7585_v28 = vld [vmem:[%s11088_s1 + $0x68c] ss:$16 sps:$4 sm:$0xff]   ;;  %v7580_v29 = vld [vmem:[%s11088_s1 + $0x680] ss:$16 sps:$4 sm:$0xff]  }
  0x97   :  { %4944 = vmatpush1.bf16.msra.mxu0 %v7488_v30  ;;  %5477 = vmatpush1.bf16.msra.mxu1 %v7491_v31  ;;  %v7583_v30 = vld [vmem:[%s11088_s1 + $0x688] ss:$16 sps:$4 sm:$0xff]   ;;  %v7588_v31 = vld [vmem:[%s11088_s1 + $0x6a4] ss:$16 sps:$4 sm:$0xff]  }
  0x98   :  { %4945 = vmatprep.subr.bf16.mxu0 %v7496_v32  ;;  %5478 = vmatprep.subr.bf16.mxu1 %v7499_v33  ;;  %v7591_v32 = vld [vmem:[%s11088_s1 + $0x6ac] ss:$16 sps:$4 sm:$0xff]   ;;  %v7586_v33 = vld [vmem:[%s11088_s1 + $0x6a0] ss:$16 sps:$4 sm:$0xff]  }
  0x9b   :  { %4946 = vmatpush1.bf16.msra.mxu0 %v7494_v34  ;;  %5479 = vmatpush1.bf16.msra.mxu1 %v7497_v35  ;;  %v7589_v34 = vld [vmem:[%s11088_s1 + $0x6a8] ss:$16 sps:$4 sm:$0xff]   ;;  %v7594_v35 = vld [vmem:[%s11088_s1 + $0x6c4] ss:$16 sps:$4 sm:$0xff]  }
  0x9c   :  { %4947 = vmatprep.subr.bf16.mxu0 %v7502_v36  ;;  %5480 = vmatprep.subr.bf16.mxu1 %v7505_v37  ;;  %v7597_v36 = vld [vmem:[%s11088_s1 + $0x6cc] ss:$16 sps:$4 sm:$0xff]   ;;  %v7592_v37 = vld [vmem:[%s11088_s1 + $0x6c0] ss:$16 sps:$4 sm:$0xff]  }
  0x9f   :  { %4948 = vmatpush1.bf16.msra.mxu0 %v7500_v38  ;;  %5481 = vmatpush1.bf16.msra.mxu1 %v7503_v39  ;;  %v7595_v38 = vld [vmem:[%s11088_s1 + $0x6c8] ss:$16 sps:$4 sm:$0xff]   ;;  %v7600_v39 = vld [vmem:[%s11088_s1 + $0x6e4] ss:$16 sps:$4 sm:$0xff]  }
  0xa0   :  { %4949 = vmatprep.subr.bf16.mxu0 %v7508_v40  ;;  %5482 = vmatprep.subr.bf16.mxu1 %v7511_v41  ;;  %v7603_v40 = vld [vmem:[%s11088_s1 + $0x6ec] ss:$16 sps:$4 sm:$0xff]   ;;  %v7598_v41 = vld [vmem:[%s11088_s1 + $0x6e0] ss:$16 sps:$4 sm:$0xff]  }
  0xa3   :  { %4950 = vmatpush1.bf16.msra.mxu0 %v7506_v42  ;;  %5483 = vmatpush1.bf16.msra.mxu1 %v7509_v43  ;;  %v7601_v42 = vld [vmem:[%s11088_s1 + $0x6e8] ss:$16 sps:$4 sm:$0xff]   ;;  %v7606_v43 = vld [vmem:[%s11088_s1 + $0x704] ss:$16 sps:$4 sm:$0xff]  }
  0xa4   :  { %4951 = vmatprep.subr.bf16.mxu0 %v7514_v44  ;;  %5484 = vmatprep.subr.bf16.mxu1 %v7517_v45  ;;  %v7609_v44 = vld [vmem:[%s11088_s1 + $0x70c] ss:$16 sps:$4 sm:$0xff]   ;;  %v7604_v45 = vld [vmem:[%s11088_s1 + $0x700] ss:$16 sps:$4 sm:$0xff]  }
  0xa7   :  { %4952 = vmatpush1.bf16.msra.mxu0 %v7512_v46  ;;  %5485 = vmatpush1.bf16.msra.mxu1 %v7515_v47  ;;  %v7607_v46 = vld [vmem:[%s11088_s1 + $0x708] ss:$16 sps:$4 sm:$0xff]   ;;  %v7612_v47 = vld [vmem:[%s11088_s1 + $0x724] ss:$16 sps:$4 sm:$0xff]  }
  0xa8   :  { %4953 = vmatprep.subr.bf16.mxu0 %v7520_v48  ;;  %5486 = vmatprep.subr.bf16.mxu1 %v7523_v49  ;;  %v7615_v48 = vld [vmem:[%s11088_s1 + $0x72c] ss:$16 sps:$4 sm:$0xff]   ;;  %v7610_v49 = vld [vmem:[%s11088_s1 + $0x720] ss:$16 sps:$4 sm:$0xff]  }
  0xab   :  { %4954 = vmatpush1.bf16.msra.mxu0 %v7518_v50  ;;  %5487 = vmatpush1.bf16.msra.mxu1 %v7521_v51  ;;  %v7613_v50 = vld [vmem:[%s11088_s1 + $0x728] ss:$16 sps:$4 sm:$0xff]   ;;  %v7618_v51 = vld [vmem:[%s11088_s1 + $0x744] ss:$16 sps:$4 sm:$0xff]  }
  0xac   :  { %4955 = vmatprep.subr.bf16.mxu0 %v7526_v52  ;;  %5488 = vmatprep.subr.bf16.mxu1 %v7529_v53  ;;  %v7621_v52 = vld [vmem:[%s11088_s1 + $0x74c] ss:$16 sps:$4 sm:$0xff]   ;;  %v7616_v53 = vld [vmem:[%s11088_s1 + $0x740] ss:$16 sps:$4 sm:$0xff]  }
  0xaf   :  { %4956 = vmatpush1.bf16.msra.mxu0 %v7524_v54  ;;  %5489 = vmatpush1.bf16.msra.mxu1 %v7527_v55  ;;  %v7619_v54 = vld [vmem:[%s11088_s1 + $0x748] ss:$16 sps:$4 sm:$0xff]   ;;  %v7624_v55 = vld [vmem:[%s11088_s1 + $0x764] ss:$16 sps:$4 sm:$0xff]  }
  0xb0   :  { %4957 = vmatprep.subr.bf16.mxu0 %v7532_v56  ;;  %5490 = vmatprep.subr.bf16.mxu1 %v7535_v57  ;;  %v7627_v56 = vld [vmem:[%s11088_s1 + $0x76c] ss:$16 sps:$4 sm:$0xff]   ;;  %v7622_v57 = vld [vmem:[%s11088_s1 + $0x760] ss:$16 sps:$4 sm:$0xff]  }
  0xb3   :  { %4958 = vmatpush1.bf16.msra.mxu0 %v7530_v58  ;;  %5491 = vmatpush1.bf16.msra.mxu1 %v7533_v59  ;;  %v7625_v58 = vld [vmem:[%s11088_s1 + $0x768] ss:$16 sps:$4 sm:$0xff]   ;;  %v7630_v59 = vld [vmem:[%s11088_s1 + $0x784] ss:$16 sps:$4 sm:$0xff]  }
  0xb4   :  { %4959 = vmatprep.subr.bf16.mxu0 %v7538_v60  ;;  %5492 = vmatprep.subr.bf16.mxu1 %v7541_v61  ;;  %v7633_v60 = vld [vmem:[%s11088_s1 + $0x78c] ss:$16 sps:$4 sm:$0xff]   ;;  %v7628_v61 = vld [vmem:[%s11088_s1 + $0x780] ss:$16 sps:$4 sm:$0xff]  }
  0xb7   :  { %4960 = vmatpush1.bf16.msra.mxu0 %v7536_v62  ;;  %5493 = vmatpush1.bf16.msra.mxu1 %v7539_v63  ;;  %v7631_v62 = vld [vmem:[%s11088_s1 + $0x788] ss:$16 sps:$4 sm:$0xff]   ;;  %v7636_v63 = vld [vmem:[%s11088_s1 + $0x7a4] ss:$16 sps:$4 sm:$0xff]  }
  0xb8   :  { %4961 = vmatprep.subr.bf16.mxu0 %v7544_v0  ;;  %5494 = vmatprep.subr.bf16.mxu1 %v7547_v1  ;;  %v7639_v0 = vld [vmem:[%s11088_s1 + $0x7ac] ss:$16 sps:$4 sm:$0xff]   ;;  %v7634_v1 = vld [vmem:[%s11088_s1 + $0x7a0] ss:$16 sps:$4 sm:$0xff]  }
  0xbb   :  { %4962 = vmatpush1.bf16.msra.mxu0 %v7542_v2  ;;  %5495 = vmatpush1.bf16.msra.mxu1 %v7545_v3  ;;  %v7637_v2 = vld [vmem:[%s11088_s1 + $0x7a8] ss:$16 sps:$4 sm:$0xff]   ;;  %v7642_v3 = vld [vmem:[%s11088_s1 + $0x7c4] ss:$16 sps:$4 sm:$0xff]  }
  0xbc   :  { %4963 = vmatprep.subr.bf16.mxu0 %v7550_v4  ;;  %5496 = vmatprep.subr.bf16.mxu1 %v7553_v5  ;;  %v7645_v4 = vld [vmem:[%s11088_s1 + $0x7cc] ss:$16 sps:$4 sm:$0xff]   ;;  %v7640_v5 = vld [vmem:[%s11088_s1 + $0x7c0] ss:$16 sps:$4 sm:$0xff]  }
  0xbf   :  { %4964 = vmatpush1.bf16.msra.mxu0 %v7548_v6  ;;  %5497 = vmatpush1.bf16.msra.mxu1 %v7551_v7  ;;  %v7643_v6 = vld [vmem:[%s11088_s1 + $0x7c8] ss:$16 sps:$4 sm:$0xff]   ;;  %v7648_v7 = vld [vmem:[%s11088_s1 + $0x7e4] ss:$16 sps:$4 sm:$0xff]  }
  0xc0   :  { %4974 = vmatprep.subr.bf16.mxu0 %v7558_v8  ;;  %5507 = vmatprep.subr.bf16.mxu1 %v7561_v9  ;;  %v7651_v8 = vld [vmem:[%s11088_s1 + $0x7ec] ss:$16 sps:$4 sm:$0xff]   ;;  %v7646_v9 = vld [vmem:[%s11088_s1 + $0x7e0] ss:$16 sps:$4 sm:$0xff]  }
  0xc2   :  { %4966 = vmatmul.mubr.bf16.vlgmr.msra.gmra.mrb[0].mxu0 %v6277_v12  ;;  %5499 = vmatmul.mubr.bf16.vlgmr.msra.gmra.mrb[0].mxu1 %v6277_v12  ;;  %v7656_v12 = vld [vmem:[%s11088_s1 + $0x804] ss:$16 sps:$4 sm:$0xff]  }
  0xc3   :  { %4975 = vmatpush1.bf16.msra.mxu0 %v7556_v10  ;;  %5508 = vmatpush1.bf16.msra.mxu1 %v7559_v13  ;;  %v7649_v10 = vld [vmem:[%s11088_s1 + $0x7e8] ss:$16 sps:$4 sm:$0xff]   ;;  %v7659_v13 = vld [vmem:[%s11088_s1 + $0x80c] ss:$16 sps:$4 sm:$0xff]  }
  0xc4   :  { %4976 = vmatprep.subr.bf16.mxu0 %v7564_v15  ;;  %5509 = vmatprep.subr.bf16.mxu1 %v7567_v11  ;;  %v7654_v15 = vld [vmem:[%s11088_s1 + $0x800] ss:$16 sps:$4 sm:$0xff]   ;;  %v6279_v11 = vcombine.low %v9138_v14, %v9138_v14  ;;  %v7665_v14 = vld [vmem:[%s11088_s1 + $0x82c] ss:$16 sps:$4 sm:$0xff]  }
  0xc5   :  { %5006 = vmatprep.mubr.bf16.mxu0 %v6280_v16  ;;  %5539 = vmatprep.mubr.bf16.mxu1 %v6280_v16  ;;  %v9336_v16 = vld [vmem:[%s11089_s0 + $0x20] sm:$0xff] }
  0xc7   :  { %4977 = vmatpush1.bf16.msra.mxu0 %v7562_v17  ;;  %5510 = vmatpush1.bf16.msra.mxu1 %v7565_v18  ;;  %v7657_v17 = vld [vmem:[%s11088_s1 + $0x808] ss:$16 sps:$4 sm:$0xff]   ;;  %v7662_v18 = vld [vmem:[%s11088_s1 + $0x824] ss:$16 sps:$4 sm:$0xff]  }
  0xc8   :  { %4978 = vmatprep.subr.bf16.mxu0 %v7570_v19  ;;  %5511 = vmatprep.subr.bf16.mxu1 %v7573_v20  ;;  %v6282_v19 = vcombine.high %v9336_v16, %v9336_v16  ;;  %v7660_v20 = vld [vmem:[%s11088_s1 + $0x820] ss:$16 sps:$4 sm:$0xff]  }
  0xcb   :  { %4979 = vmatpush1.bf16.msra.mxu0 %v7568_v21  ;;  %5512 = vmatpush1.bf16.msra.mxu1 %v7571_v22  ;;  %v7663_v21 = vld [vmem:[%s11088_s1 + $0x828] ss:$16 sps:$4 sm:$0xff]   ;;  %v7668_v22 = vld [vmem:[%s11088_s1 + $0x844] ss:$16 sps:$4 sm:$0xff]  }
  0xcc   :  { %4980 = vmatprep.subr.bf16.mxu0 %v7576_v23  ;;  %5513 = vmatprep.subr.bf16.mxu1 %v7579_v24  ;;  %v7671_v23 = vld [vmem:[%s11088_s1 + $0x84c] ss:$16 sps:$4 sm:$0xff]   ;;  %v7666_v24 = vld [vmem:[%s11088_s1 + $0x840] ss:$16 sps:$4 sm:$0xff]  }
  0xcf   :  { %4981 = vmatpush1.bf16.msra.mxu0 %v7574_v25  ;;  %5514 = vmatpush1.bf16.msra.mxu1 %v7577_v26  ;;  %v7669_v25 = vld [vmem:[%s11088_s1 + $0x848] ss:$16 sps:$4 sm:$0xff]   ;;  %v7674_v26 = vld [vmem:[%s11088_s1 + $0x864] ss:$16 sps:$4 sm:$0xff]  }
  0xd0   :  { %4982 = vmatprep.subr.bf16.mxu0 %v7582_v27  ;;  %5515 = vmatprep.subr.bf16.mxu1 %v7585_v28  ;;  %v7677_v27 = vld [vmem:[%s11088_s1 + $0x86c] ss:$16 sps:$4 sm:$0xff]   ;;  %v7672_v28 = vld [vmem:[%s11088_s1 + $0x860] ss:$16 sps:$4 sm:$0xff]  }
  0xd3   :  { %4983 = vmatpush1.bf16.msra.mxu0 %v7580_v29  ;;  %5516 = vmatpush1.bf16.msra.mxu1 %v7583_v30  ;;  %v7675_v29 = vld [vmem:[%s11088_s1 + $0x868] ss:$16 sps:$4 sm:$0xff]   ;;  %v7680_v30 = vld [vmem:[%s11088_s1 + $0x884] ss:$16 sps:$4 sm:$0xff]  }
  0xd4   :  { %4984 = vmatprep.subr.bf16.mxu0 %v7588_v31  ;;  %5517 = vmatprep.subr.bf16.mxu1 %v7591_v32  ;;  %v7683_v31 = vld [vmem:[%s11088_s1 + $0x88c] ss:$16 sps:$4 sm:$0xff]   ;;  %v7678_v32 = vld [vmem:[%s11088_s1 + $0x880] ss:$16 sps:$4 sm:$0xff]  }
  0xd7   :  { %4985 = vmatpush1.bf16.msra.mxu0 %v7586_v33  ;;  %5518 = vmatpush1.bf16.msra.mxu1 %v7589_v34  ;;  %v7681_v33 = vld [vmem:[%s11088_s1 + $0x888] ss:$16 sps:$4 sm:$0xff]   ;;  %v7686_v34 = vld [vmem:[%s11088_s1 + $0x8a4] ss:$16 sps:$4 sm:$0xff]  }
  0xd8   :  { %4986 = vmatprep.subr.bf16.mxu0 %v7594_v35  ;;  %5519 = vmatprep.subr.bf16.mxu1 %v7597_v36  ;;  %v7689_v35 = vld [vmem:[%s11088_s1 + $0x8ac] ss:$16 sps:$4 sm:$0xff]   ;;  %v7684_v36 = vld [vmem:[%s11088_s1 + $0x8a0] ss:$16 sps:$4 sm:$0xff]  }
  0xdb   :  { %4987 = vmatpush1.bf16.msra.mxu0 %v7592_v37  ;;  %5520 = vmatpush1.bf16.msra.mxu1 %v7595_v38  ;;  %v7687_v37 = vld [vmem:[%s11088_s1 + $0x8a8] ss:$16 sps:$4 sm:$0xff]   ;;  %v7692_v38 = vld [vmem:[%s11088_s1 + $0x8c4] ss:$16 sps:$4 sm:$0xff]  }
  0xdc   :  { %4988 = vmatprep.subr.bf16.mxu0 %v7600_v39  ;;  %5521 = vmatprep.subr.bf16.mxu1 %v7603_v40  ;;  %v7695_v39 = vld [vmem:[%s11088_s1 + $0x8cc] ss:$16 sps:$4 sm:$0xff]   ;;  %v7690_v40 = vld [vmem:[%s11088_s1 + $0x8c0] ss:$16 sps:$4 sm:$0xff]  }
  0xdf   :  { %4989 = vmatpush1.bf16.msra.mxu0 %v7598_v41  ;;  %5522 = vmatpush1.bf16.msra.mxu1 %v7601_v42  ;;  %v7693_v41 = vld [vmem:[%s11088_s1 + $0x8c8] ss:$16 sps:$4 sm:$0xff]   ;;  %v7698_v42 = vld [vmem:[%s11088_s1 + $0x8e4] ss:$16 sps:$4 sm:$0xff]  }
  0xe0   :  { %4990 = vmatprep.subr.bf16.mxu0 %v7606_v43  ;;  %5523 = vmatprep.subr.bf16.mxu1 %v7609_v44  ;;  %v7701_v43 = vld [vmem:[%s11088_s1 + $0x8ec] ss:$16 sps:$4 sm:$0xff]   ;;  %v7696_v44 = vld [vmem:[%s11088_s1 + $0x8e0] ss:$16 sps:$4 sm:$0xff]  }
  0xe3   :  { %4991 = vmatpush1.bf16.msra.mxu0 %v7604_v45  ;;  %5524 = vmatpush1.bf16.msra.mxu1 %v7607_v46  ;;  %v7699_v45 = vld [vmem:[%s11088_s1 + $0x8e8] ss:$16 sps:$4 sm:$0xff]   ;;  %v7704_v46 = vld [vmem:[%s11088_s1 + $0x904] ss:$16 sps:$4 sm:$0xff]  }
  0xe4   :  { %4992 = vmatprep.subr.bf16.mxu0 %v7612_v47  ;;  %5525 = vmatprep.subr.bf16.mxu1 %v7615_v48  ;;  %v7707_v47 = vld [vmem:[%s11088_s1 + $0x90c] ss:$16 sps:$4 sm:$0xff]   ;;  %v7702_v48 = vld [vmem:[%s11088_s1 + $0x900] ss:$16 sps:$4 sm:$0xff]  }
  0xe7   :  { %4993 = vmatpush1.bf16.msra.mxu0 %v7610_v49  ;;  %5526 = vmatpush1.bf16.msra.mxu1 %v7613_v50  ;;  %v7705_v49 = vld [vmem:[%s11088_s1 + $0x908] ss:$16 sps:$4 sm:$0xff]   ;;  %v7710_v50 = vld [vmem:[%s11088_s1 + $0x924] ss:$16 sps:$4 sm:$0xff]  }
  0xe8   :  { %4994 = vmatprep.subr.bf16.mxu0 %v7618_v51  ;;  %5527 = vmatprep.subr.bf16.mxu1 %v7621_v52  ;;  %v7713_v51 = vld [vmem:[%s11088_s1 + $0x92c] ss:$16 sps:$4 sm:$0xff]   ;;  %v7708_v52 = vld [vmem:[%s11088_s1 + $0x920] ss:$16 sps:$4 sm:$0xff]  }
  0xeb   :  { %4995 = vmatpush1.bf16.msra.mxu0 %v7616_v53  ;;  %5528 = vmatpush1.bf16.msra.mxu1 %v7619_v54  ;;  %v7711_v53 = vld [vmem:[%s11088_s1 + $0x928] ss:$16 sps:$4 sm:$0xff]   ;;  %v7716_v54 = vld [vmem:[%s11088_s1 + $0x944] ss:$16 sps:$4 sm:$0xff]  }
  0xec   :  { %4996 = vmatprep.subr.bf16.mxu0 %v7624_v55  ;;  %5529 = vmatprep.subr.bf16.mxu1 %v7627_v56  ;;  %v7719_v55 = vld [vmem:[%s11088_s1 + $0x94c] ss:$16 sps:$4 sm:$0xff]   ;;  %v7714_v56 = vld [vmem:[%s11088_s1 + $0x940] ss:$16 sps:$4 sm:$0xff]  }
  0xef   :  { %4997 = vmatpush1.bf16.msra.mxu0 %v7622_v57  ;;  %5530 = vmatpush1.bf16.msra.mxu1 %v7625_v58  ;;  %v7717_v57 = vld [vmem:[%s11088_s1 + $0x948] ss:$16 sps:$4 sm:$0xff]   ;;  %v7722_v58 = vld [vmem:[%s11088_s1 + $0x964] ss:$16 sps:$4 sm:$0xff]  }
  0xf0   :  { %4998 = vmatprep.subr.bf16.mxu0 %v7630_v59  ;;  %5531 = vmatprep.subr.bf16.mxu1 %v7633_v60  ;;  %v7725_v59 = vld [vmem:[%s11088_s1 + $0x96c] ss:$16 sps:$4 sm:$0xff]   ;;  %v7720_v60 = vld [vmem:[%s11088_s1 + $0x960] ss:$16 sps:$4 sm:$0xff]  }
  0xf3   :  { %4999 = vmatpush1.bf16.msra.mxu0 %v7628_v61  ;;  %5532 = vmatpush1.bf16.msra.mxu1 %v7631_v62  ;;  %v7723_v61 = vld [vmem:[%s11088_s1 + $0x968] ss:$16 sps:$4 sm:$0xff]   ;;  %v7728_v62 = vld [vmem:[%s11088_s1 + $0x984] ss:$16 sps:$4 sm:$0xff]  }
  0xf4   :  { %5000 = vmatprep.subr.bf16.mxu0 %v7636_v63  ;;  %5533 = vmatprep.subr.bf16.mxu1 %v7639_v0  ;;  %v7731_v63 = vld [vmem:[%s11088_s1 + $0x98c] ss:$16 sps:$4 sm:$0xff]   ;;  %v7726_v0 = vld [vmem:[%s11088_s1 + $0x980] ss:$16 sps:$4 sm:$0xff]  }
  0xf7   :  { %5001 = vmatpush1.bf16.msra.mxu0 %v7634_v1  ;;  %5534 = vmatpush1.bf16.msra.mxu1 %v7637_v2  ;;  %v7729_v1 = vld [vmem:[%s11088_s1 + $0x988] ss:$16 sps:$4 sm:$0xff]   ;;  %v7734_v2 = vld [vmem:[%s11088_s1 + $0x9a4] ss:$16 sps:$4 sm:$0xff]  }
  0xf8   :  { %5002 = vmatprep.subr.bf16.mxu0 %v7642_v3  ;;  %5535 = vmatprep.subr.bf16.mxu1 %v7645_v4  ;;  %v7737_v3 = vld [vmem:[%s11088_s1 + $0x9ac] ss:$16 sps:$4 sm:$0xff]   ;;  %v7732_v4 = vld [vmem:[%s11088_s1 + $0x9a0] ss:$16 sps:$4 sm:$0xff]  }
  0xfb   :  { %5003 = vmatpush1.bf16.msra.mxu0 %v7640_v5  ;;  %5536 = vmatpush1.bf16.msra.mxu1 %v7643_v6  ;;  %v7735_v5 = vld [vmem:[%s11088_s1 + $0x9a8] ss:$16 sps:$4 sm:$0xff]   ;;  %v7740_v6 = vld [vmem:[%s11088_s1 + $0x9c4] ss:$16 sps:$4 sm:$0xff]  }
  0xfc   :  { %5004 = vmatprep.subr.bf16.mxu0 %v7648_v7  ;;  %5537 = vmatprep.subr.bf16.mxu1 %v7651_v8  ;;  %v7743_v7 = vld [vmem:[%s11088_s1 + $0x9cc] ss:$16 sps:$4 sm:$0xff]   ;;  %v7738_v8 = vld [vmem:[%s11088_s1 + $0x9c0] ss:$16 sps:$4 sm:$0xff]  }
  0xff   :  { %5005 = vmatpush1.bf16.msra.mxu0 %v7646_v9  ;;  %5538 = vmatpush1.bf16.msra.mxu1 %v7649_v10  ;;  %v7741_v9 = vld [vmem:[%s11088_s1 + $0x9c8] ss:$16 sps:$4 sm:$0xff]   ;;  %v7746_v10 = vld [vmem:[%s11088_s1 + $0x9e4] ss:$16 sps:$4 sm:$0xff]  }
 0x100   :  { %5015 = vmatprep.subr.bf16.mxu0 %v7656_v12  ;;  %5548 = vmatprep.subr.bf16.mxu1 %v7659_v13  ;;  %v7749_v12 = vld [vmem:[%s11088_s1 + $0x9ec] ss:$16 sps:$4 sm:$0xff]   ;;  %v7744_v13 = vld [vmem:[%s11088_s1 + $0x9e0] ss:$16 sps:$4 sm:$0xff]  }
 0x102   :  { %5007 = vmatmul.mubr.bf16.vlgmr.msra.gmra.mrb[0].mxu0 %v6279_v11  ;;  %5540 = vmatmul.mubr.bf16.vlgmr.msra.gmra.mrb[0].mxu1 %v6279_v11  ;;  %v7754_v11 = vld [vmem:[%s11088_s1 + $0xa04] ss:$16 sps:$4 sm:$0xff]  }
 0x103   :  { %5016 = vmatpush1.bf16.msra.mxu0 %v7654_v15  ;;  %5549 = vmatpush1.bf16.msra.mxu1 %v7657_v17  ;;  %v7747_v15 = vld [vmem:[%s11088_s1 + $0x9e8] ss:$16 sps:$4 sm:$0xff]   ;;  %v7757_v17 = vld [vmem:[%s11088_s1 + $0xa0c] ss:$16 sps:$4 sm:$0xff]  }
 0x104   :  { %5017 = vmatprep.subr.bf16.mxu0 %v7662_v18  ;;  %5550 = vmatprep.subr.bf16.mxu1 %v7665_v14  ;;  %v9532_v18 = vld [vmem:[%s11089_s0 + $0x28] sm:$0xff]  ;;  %v6281_v14 = vcombine.low %v9336_v16, %v9336_v16 }
 0x105   :  { %5047 = vmatprep.mubr.bf16.mxu0 %v6282_v19  ;;  %5580 = vmatprep.mubr.bf16.mxu1 %v6282_v19  ;;  %v7752_v19 = vld [vmem:[%s11088_s1 + $0xa00] ss:$16 sps:$4 sm:$0xff]   ;;  %v7763_v16 = vld [vmem:[%s11088_s1 + $0xa2c] ss:$16 sps:$4 sm:$0xff]  }
 0x107   :  { %5018 = vmatpush1.bf16.msra.mxu0 %v7660_v20  ;;  %5551 = vmatpush1.bf16.msra.mxu1 %v7663_v21  ;;  %v7755_v20 = vld [vmem:[%s11088_s1 + $0xa08] ss:$16 sps:$4 sm:$0xff]   ;;  %v7760_v21 = vld [vmem:[%s11088_s1 + $0xa24] ss:$16 sps:$4 sm:$0xff]  }
 0x108   :  { %5019 = vmatprep.subr.bf16.mxu0 %v7668_v22  ;;  %5552 = vmatprep.subr.bf16.mxu1 %v7671_v23  ;;  %v6284_v22 = vcombine.high %v9532_v18, %v9532_v18  ;;  %v7758_v23 = vld [vmem:[%s11088_s1 + $0xa20] ss:$16 sps:$4 sm:$0xff]  }
 0x10b   :  { %5020 = vmatpush1.bf16.msra.mxu0 %v7666_v24  ;;  %5553 = vmatpush1.bf16.msra.mxu1 %v7669_v25  ;;  %v7761_v24 = vld [vmem:[%s11088_s1 + $0xa28] ss:$16 sps:$4 sm:$0xff]   ;;  %v7766_v25 = vld [vmem:[%s11088_s1 + $0xa44] ss:$16 sps:$4 sm:$0xff]  }
 0x10c   :  { %5021 = vmatprep.subr.bf16.mxu0 %v7674_v26  ;;  %5554 = vmatprep.subr.bf16.mxu1 %v7677_v27  ;;  %v7769_v26 = vld [vmem:[%s11088_s1 + $0xa4c] ss:$16 sps:$4 sm:$0xff]   ;;  %v7764_v27 = vld [vmem:[%s11088_s1 + $0xa40] ss:$16 sps:$4 sm:$0xff]  }
 0x10f   :  { %5022 = vmatpush1.bf16.msra.mxu0 %v7672_v28  ;;  %5555 = vmatpush1.bf16.msra.mxu1 %v7675_v29  ;;  %v7767_v28 = vld [vmem:[%s11088_s1 + $0xa48] ss:$16 sps:$4 sm:$0xff]   ;;  %v7772_v29 = vld [vmem:[%s11088_s1 + $0xa64] ss:$16 sps:$4 sm:$0xff]  }
 0x110   :  { %5023 = vmatprep.subr.bf16.mxu0 %v7680_v30  ;;  %5556 = vmatprep.subr.bf16.mxu1 %v7683_v31  ;;  %v7775_v30 = vld [vmem:[%s11088_s1 + $0xa6c] ss:$16 sps:$4 sm:$0xff]   ;;  %v7770_v31 = vld [vmem:[%s11088_s1 + $0xa60] ss:$16 sps:$4 sm:$0xff]  }
 0x113   :  { %5024 = vmatpush1.bf16.msra.mxu0 %v7678_v32  ;;  %5557 = vmatpush1.bf16.msra.mxu1 %v7681_v33  ;;  %v7773_v32 = vld [vmem:[%s11088_s1 + $0xa68] ss:$16 sps:$4 sm:$0xff]   ;;  %v7778_v33 = vld [vmem:[%s11088_s1 + $0xa84] ss:$16 sps:$4 sm:$0xff]  }
 0x114   :  { %5025 = vmatprep.subr.bf16.mxu0 %v7686_v34  ;;  %5558 = vmatprep.subr.bf16.mxu1 %v7689_v35  ;;  %v7781_v34 = vld [vmem:[%s11088_s1 + $0xa8c] ss:$16 sps:$4 sm:$0xff]   ;;  %v7776_v35 = vld [vmem:[%s11088_s1 + $0xa80] ss:$16 sps:$4 sm:$0xff]  }
 0x117   :  { %5026 = vmatpush1.bf16.msra.mxu0 %v7684_v36  ;;  %5559 = vmatpush1.bf16.msra.mxu1 %v7687_v37  ;;  %v7779_v36 = vld [vmem:[%s11088_s1 + $0xa88] ss:$16 sps:$4 sm:$0xff]   ;;  %v7784_v37 = vld [vmem:[%s11088_s1 + $0xaa4] ss:$16 sps:$4 sm:$0xff]  }
 0x118   :  { %5027 = vmatprep.subr.bf16.mxu0 %v7692_v38  ;;  %5560 = vmatprep.subr.bf16.mxu1 %v7695_v39  ;;  %v7787_v38 = vld [vmem:[%s11088_s1 + $0xaac] ss:$16 sps:$4 sm:$0xff]   ;;  %v7782_v39 = vld [vmem:[%s11088_s1 + $0xaa0] ss:$16 sps:$4 sm:$0xff]  }
 0x11b   :  { %5028 = vmatpush1.bf16.msra.mxu0 %v7690_v40  ;;  %5561 = vmatpush1.bf16.msra.mxu1 %v7693_v41  ;;  %v7785_v40 = vld [vmem:[%s11088_s1 + $0xaa8] ss:$16 sps:$4 sm:$0xff]   ;;  %v7790_v41 = vld [vmem:[%s11088_s1 + $0xac4] ss:$16 sps:$4 sm:$0xff]  }
 0x11c   :  { %5029 = vmatprep.subr.bf16.mxu0 %v7698_v42  ;;  %5562 = vmatprep.subr.bf16.mxu1 %v7701_v43  ;;  %v7793_v42 = vld [vmem:[%s11088_s1 + $0xacc] ss:$16 sps:$4 sm:$0xff]   ;;  %v7788_v43 = vld [vmem:[%s11088_s1 + $0xac0] ss:$16 sps:$4 sm:$0xff]  }
 0x11f   :  { %5030 = vmatpush1.bf16.msra.mxu0 %v7696_v44  ;;  %5563 = vmatpush1.bf16.msra.mxu1 %v7699_v45  ;;  %v7791_v44 = vld [vmem:[%s11088_s1 + $0xac8] ss:$16 sps:$4 sm:$0xff]   ;;  %v7796_v45 = vld [vmem:[%s11088_s1 + $0xae4] ss:$16 sps:$4 sm:$0xff]  }
 0x120   :  { %5031 = vmatprep.subr.bf16.mxu0 %v7704_v46  ;;  %5564 = vmatprep.subr.bf16.mxu1 %v7707_v47  ;;  %v7799_v46 = vld [vmem:[%s11088_s1 + $0xaec] ss:$16 sps:$4 sm:$0xff]   ;;  %v7794_v47 = vld [vmem:[%s11088_s1 + $0xae0] ss:$16 sps:$4 sm:$0xff]  }
 0x123   :  { %5032 = vmatpush1.bf16.msra.mxu0 %v7702_v48  ;;  %5565 = vmatpush1.bf16.msra.mxu1 %v7705_v49  ;;  %v7797_v48 = vld [vmem:[%s11088_s1 + $0xae8] ss:$16 sps:$4 sm:$0xff]   ;;  %v7802_v49 = vld [vmem:[%s11088_s1 + $0xb04] ss:$16 sps:$4 sm:$0xff]  }
 0x124   :  { %5033 = vmatprep.subr.bf16.mxu0 %v7710_v50  ;;  %5566 = vmatprep.subr.bf16.mxu1 %v7713_v51  ;;  %v7805_v50 = vld [vmem:[%s11088_s1 + $0xb0c] ss:$16 sps:$4 sm:$0xff]   ;;  %v7800_v51 = vld [vmem:[%s11088_s1 + $0xb00] ss:$16 sps:$4 sm:$0xff]  }
 0x127   :  { %5034 = vmatpush1.bf16.msra.mxu0 %v7708_v52  ;;  %5567 = vmatpush1.bf16.msra.mxu1 %v7711_v53  ;;  %v7803_v52 = vld [vmem:[%s11088_s1 + $0xb08] ss:$16 sps:$4 sm:$0xff]   ;;  %v7808_v53 = vld [vmem:[%s11088_s1 + $0xb24] ss:$16 sps:$4 sm:$0xff]  }
 0x128   :  { %5035 = vmatprep.subr.bf16.mxu0 %v7716_v54  ;;  %5568 = vmatprep.subr.bf16.mxu1 %v7719_v55  ;;  %v7811_v54 = vld [vmem:[%s11088_s1 + $0xb2c] ss:$16 sps:$4 sm:$0xff]   ;;  %v7806_v55 = vld [vmem:[%s11088_s1 + $0xb20] ss:$16 sps:$4 sm:$0xff]  }
 0x12b   :  { %5036 = vmatpush1.bf16.msra.mxu0 %v7714_v56  ;;  %5569 = vmatpush1.bf16.msra.mxu1 %v7717_v57  ;;  %v7809_v56 = vld [vmem:[%s11088_s1 + $0xb28] ss:$16 sps:$4 sm:$0xff]   ;;  %v7814_v57 = vld [vmem:[%s11088_s1 + $0xb44] ss:$16 sps:$4 sm:$0xff]  }
 0x12c   :  { %5037 = vmatprep.subr.bf16.mxu0 %v7722_v58  ;;  %5570 = vmatprep.subr.bf16.mxu1 %v7725_v59  ;;  %v7817_v58 = vld [vmem:[%s11088_s1 + $0xb4c] ss:$16 sps:$4 sm:$0xff]   ;;  %v7812_v59 = vld [vmem:[%s11088_s1 + $0xb40] ss:$16 sps:$4 sm:$0xff]  }
 0x12f   :  { %5038 = vmatpush1.bf16.msra.mxu0 %v7720_v60  ;;  %5571 = vmatpush1.bf16.msra.mxu1 %v7723_v61  ;;  %v7815_v60 = vld [vmem:[%s11088_s1 + $0xb48] ss:$16 sps:$4 sm:$0xff]   ;;  %v7820_v61 = vld [vmem:[%s11088_s1 + $0xb64] ss:$16 sps:$4 sm:$0xff]  }
 0x130   :  { %5039 = vmatprep.subr.bf16.mxu0 %v7728_v62  ;;  %5572 = vmatprep.subr.bf16.mxu1 %v7731_v63  ;;  %v7823_v62 = vld [vmem:[%s11088_s1 + $0xb6c] ss:$16 sps:$4 sm:$0xff]   ;;  %v7818_v63 = vld [vmem:[%s11088_s1 + $0xb60] ss:$16 sps:$4 sm:$0xff]  }
 0x133   :  { %5040 = vmatpush1.bf16.msra.mxu0 %v7726_v0  ;;  %5573 = vmatpush1.bf16.msra.mxu1 %v7729_v1  ;;  %v7821_v0 = vld [vmem:[%s11088_s1 + $0xb68] ss:$16 sps:$4 sm:$0xff]   ;;  %v7826_v1 = vld [vmem:[%s11088_s1 + $0xb84] ss:$16 sps:$4 sm:$0xff]  }
 0x134   :  { %5041 = vmatprep.subr.bf16.mxu0 %v7734_v2  ;;  %5574 = vmatprep.subr.bf16.mxu1 %v7737_v3  ;;  %v7829_v2 = vld [vmem:[%s11088_s1 + $0xb8c] ss:$16 sps:$4 sm:$0xff]   ;;  %v7824_v3 = vld [vmem:[%s11088_s1 + $0xb80] ss:$16 sps:$4 sm:$0xff]  }
 0x137   :  { %5042 = vmatpush1.bf16.msra.mxu0 %v7732_v4  ;;  %5575 = vmatpush1.bf16.msra.mxu1 %v7735_v5  ;;  %v7827_v4 = vld [vmem:[%s11088_s1 + $0xb88] ss:$16 sps:$4 sm:$0xff]   ;;  %v7832_v5 = vld [vmem:[%s11088_s1 + $0xba4] ss:$16 sps:$4 sm:$0xff]  }
 0x138   :  { %5043 = vmatprep.subr.bf16.mxu0 %v7740_v6  ;;  %5576 = vmatprep.subr.bf16.mxu1 %v7743_v7  ;;  %v7835_v6 = vld [vmem:[%s11088_s1 + $0xbac] ss:$16 sps:$4 sm:$0xff]   ;;  %v7830_v7 = vld [vmem:[%s11088_s1 + $0xba0] ss:$16 sps:$4 sm:$0xff]  }
 0x13b   :  { %5044 = vmatpush1.bf16.msra.mxu0 %v7738_v8  ;;  %5577 = vmatpush1.bf16.msra.mxu1 %v7741_v9  ;;  %v7833_v8 = vld [vmem:[%s11088_s1 + $0xba8] ss:$16 sps:$4 sm:$0xff]   ;;  %v7838_v9 = vld [vmem:[%s11088_s1 + $0xbc4] ss:$16 sps:$4 sm:$0xff]  }
 0x13c   :  { %5045 = vmatprep.subr.bf16.mxu0 %v7746_v10  ;;  %5578 = vmatprep.subr.bf16.mxu1 %v7749_v12  ;;  %v7841_v10 = vld [vmem:[%s11088_s1 + $0xbcc] ss:$16 sps:$4 sm:$0xff]   ;;  %v7836_v12 = vld [vmem:[%s11088_s1 + $0xbc0] ss:$16 sps:$4 sm:$0xff]  }
 0x13f   :  { %5046 = vmatpush1.bf16.msra.mxu0 %v7744_v13  ;;  %5579 = vmatpush1.bf16.msra.mxu1 %v7747_v15  ;;  %v7839_v13 = vld [vmem:[%s11088_s1 + $0xbc8] ss:$16 sps:$4 sm:$0xff]   ;;  %v7844_v15 = vld [vmem:[%s11088_s1 + $0xbe4] ss:$16 sps:$4 sm:$0xff]  }
 0x140   :  { %5056 = vmatprep.subr.bf16.mxu0 %v7754_v11  ;;  %5589 = vmatprep.subr.bf16.mxu1 %v7757_v17  ;;  %v7847_v11 = vld [vmem:[%s11088_s1 + $0xbec] ss:$16 sps:$4 sm:$0xff]   ;;  %v7842_v17 = vld [vmem:[%s11088_s1 + $0xbe0] ss:$16 sps:$4 sm:$0xff]  }
 0x142   :  { %5048 = vmatmul.mubr.bf16.vlgmr.msra.gmra.mrb[0].mxu0 %v6281_v14  ;;  %5581 = vmatmul.mubr.bf16.vlgmr.msra.gmra.mrb[0].mxu1 %v6281_v14  ;;  %v7845_v14 = vld [vmem:[%s11088_s1 + $0xbe8] ss:$16 sps:$4 sm:$0xff]  }
 0x143   :  { %5057 = vmatpush1.bf16.msra.mxu0 %v7752_v19  ;;  %5590 = vmatpush1.bf16.msra.mxu1 %v7755_v20  ;;  %v7852_v19 = vld [vmem:[%s11088_s1 + $0xc04] ss:$16 sps:$4 sm:$0xff]   ;;  %v7855_v20 = vld [vmem:[%s11088_s1 + $0xc0c] ss:$16 sps:$4 sm:$0xff]  }
 0x144   :  { %5058 = vmatprep.subr.bf16.mxu0 %v7760_v21  ;;  %5591 = vmatprep.subr.bf16.mxu1 %v7763_v16  ;;  %v9733_v21 = vld [vmem:[%s11089_s0 + $0x30] sm:$0xff]  ;;  %v6283_v16 = vcombine.low %v9532_v18, %v9532_v18  ;;  %v7861_v18 = vld [vmem:[%s11088_s1 + $0xc2c] ss:$16 sps:$4 sm:$0xff]  }
 0x145   :  { %5088 = vmatprep.mubr.bf16.mxu0 %v6284_v22  ;;  %5621 = vmatprep.mubr.bf16.mxu1 %v6284_v22  ;;  %v7850_v22 = vld [vmem:[%s11088_s1 + $0xc00] ss:$16 sps:$4 sm:$0xff]  }
 0x147   :  { %5059 = vmatpush1.bf16.msra.mxu0 %v7758_v23  ;;  %5592 = vmatpush1.bf16.msra.mxu1 %v7761_v24  ;;  %v7853_v23 = vld [vmem:[%s11088_s1 + $0xc08] ss:$16 sps:$4 sm:$0xff]   ;;  %v7858_v24 = vld [vmem:[%s11088_s1 + $0xc24] ss:$16 sps:$4 sm:$0xff]  }
 0x148   :  { %5060 = vmatprep.subr.bf16.mxu0 %v7766_v25  ;;  %5593 = vmatprep.subr.bf16.mxu1 %v7769_v26  ;;  %v6286_v25 = vcombine.high %v9733_v21, %v9733_v21  ;;  %v7856_v26 = vld [vmem:[%s11088_s1 + $0xc20] ss:$16 sps:$4 sm:$0xff]  }
 0x14b   :  { %5061 = vmatpush1.bf16.msra.mxu0 %v7764_v27  ;;  %5594 = vmatpush1.bf16.msra.mxu1 %v7767_v28  ;;  %v7859_v27 = vld [vmem:[%s11088_s1 + $0xc28] ss:$16 sps:$4 sm:$0xff]   ;;  %v7864_v28 = vld [vmem:[%s11088_s1 + $0xc44] ss:$16 sps:$4 sm:$0xff]  }
 0x14c   :  { %5062 = vmatprep.subr.bf16.mxu0 %v7772_v29  ;;  %5595 = vmatprep.subr.bf16.mxu1 %v7775_v30  ;;  %v7867_v29 = vld [vmem:[%s11088_s1 + $0xc4c] ss:$16 sps:$4 sm:$0xff]   ;;  %v7862_v30 = vld [vmem:[%s11088_s1 + $0xc40] ss:$16 sps:$4 sm:$0xff]  }
 0x14f   :  { %5063 = vmatpush1.bf16.msra.mxu0 %v7770_v31  ;;  %5596 = vmatpush1.bf16.msra.mxu1 %v7773_v32  ;;  %v7865_v31 = vld [vmem:[%s11088_s1 + $0xc48] ss:$16 sps:$4 sm:$0xff]   ;;  %v7870_v32 = vld [vmem:[%s11088_s1 + $0xc64] ss:$16 sps:$4 sm:$0xff]  }
 0x150   :  { %5064 = vmatprep.subr.bf16.mxu0 %v7778_v33  ;;  %5597 = vmatprep.subr.bf16.mxu1 %v7781_v34  ;;  %v7873_v33 = vld [vmem:[%s11088_s1 + $0xc6c] ss:$16 sps:$4 sm:$0xff]   ;;  %v7868_v34 = vld [vmem:[%s11088_s1 + $0xc60] ss:$16 sps:$4 sm:$0xff]  }
 0x153   :  { %5065 = vmatpush1.bf16.msra.mxu0 %v7776_v35  ;;  %5598 = vmatpush1.bf16.msra.mxu1 %v7779_v36  ;;  %v7871_v35 = vld [vmem:[%s11088_s1 + $0xc68] ss:$16 sps:$4 sm:$0xff]   ;;  %v7876_v36 = vld [vmem:[%s11088_s1 + $0xc84] ss:$16 sps:$4 sm:$0xff]  }
 0x154   :  { %5066 = vmatprep.subr.bf16.mxu0 %v7784_v37  ;;  %5599 = vmatprep.subr.bf16.mxu1 %v7787_v38  ;;  %v7879_v37 = vld [vmem:[%s11088_s1 + $0xc8c] ss:$16 sps:$4 sm:$0xff]   ;;  %v7874_v38 = vld [vmem:[%s11088_s1 + $0xc80] ss:$16 sps:$4 sm:$0xff]  }
 0x157   :  { %5067 = vmatpush1.bf16.msra.mxu0 %v7782_v39  ;;  %5600 = vmatpush1.bf16.msra.mxu1 %v7785_v40  ;;  %v7877_v39 = vld [vmem:[%s11088_s1 + $0xc88] ss:$16 sps:$4 sm:$0xff]   ;;  %v7882_v40 = vld [vmem:[%s11088_s1 + $0xca4] ss:$16 sps:$4 sm:$0xff]  }
 0x158   :  { %5068 = vmatprep.subr.bf16.mxu0 %v7790_v41  ;;  %5601 = vmatprep.subr.bf16.mxu1 %v7793_v42  ;;  %v7885_v41 = vld [vmem:[%s11088_s1 + $0xcac] ss:$16 sps:$4 sm:$0xff]   ;;  %v7880_v42 = vld [vmem:[%s11088_s1 + $0xca0] ss:$16 sps:$4 sm:$0xff]  }
 0x15b   :  { %5069 = vmatpush1.bf16.msra.mxu0 %v7788_v43  ;;  %5602 = vmatpush1.bf16.msra.mxu1 %v7791_v44  ;;  %v7883_v43 = vld [vmem:[%s11088_s1 + $0xca8] ss:$16 sps:$4 sm:$0xff]   ;;  %v7888_v44 = vld [vmem:[%s11088_s1 + $0xcc4] ss:$16 sps:$4 sm:$0xff]  }
 0x15c   :  { %5070 = vmatprep.subr.bf16.mxu0 %v7796_v45  ;;  %5603 = vmatprep.subr.bf16.mxu1 %v7799_v46  ;;  %v7891_v45 = vld [vmem:[%s11088_s1 + $0xccc] ss:$16 sps:$4 sm:$0xff]   ;;  %v7886_v46 = vld [vmem:[%s11088_s1 + $0xcc0] ss:$16 sps:$4 sm:$0xff]  }
 0x15f   :  { %5071 = vmatpush1.bf16.msra.mxu0 %v7794_v47  ;;  %5604 = vmatpush1.bf16.msra.mxu1 %v7797_v48  ;;  %v7889_v47 = vld [vmem:[%s11088_s1 + $0xcc8] ss:$16 sps:$4 sm:$0xff]   ;;  %v7894_v48 = vld [vmem:[%s11088_s1 + $0xce4] ss:$16 sps:$4 sm:$0xff]  }
 0x160   :  { %5072 = vmatprep.subr.bf16.mxu0 %v7802_v49  ;;  %5605 = vmatprep.subr.bf16.mxu1 %v7805_v50  ;;  %v7897_v49 = vld [vmem:[%s11088_s1 + $0xcec] ss:$16 sps:$4 sm:$0xff]   ;;  %v7892_v50 = vld [vmem:[%s11088_s1 + $0xce0] ss:$16 sps:$4 sm:$0xff]  }
 0x163   :  { %5073 = vmatpush1.bf16.msra.mxu0 %v7800_v51  ;;  %5606 = vmatpush1.bf16.msra.mxu1 %v7803_v52  ;;  %v7895_v51 = vld [vmem:[%s11088_s1 + $0xce8] ss:$16 sps:$4 sm:$0xff]   ;;  %v7900_v52 = vld [vmem:[%s11088_s1 + $0xd04] ss:$16 sps:$4 sm:$0xff]  }
 0x164   :  { %5074 = vmatprep.subr.bf16.mxu0 %v7808_v53  ;;  %5607 = vmatprep.subr.bf16.mxu1 %v7811_v54  ;;  %v7903_v53 = vld [vmem:[%s11088_s1 + $0xd0c] ss:$16 sps:$4 sm:$0xff]   ;;  %v7898_v54 = vld [vmem:[%s11088_s1 + $0xd00] ss:$16 sps:$4 sm:$0xff]  }
 0x167   :  { %5075 = vmatpush1.bf16.msra.mxu0 %v7806_v55  ;;  %5608 = vmatpush1.bf16.msra.mxu1 %v7809_v56  ;;  %v7901_v55 = vld [vmem:[%s11088_s1 + $0xd08] ss:$16 sps:$4 sm:$0xff]   ;;  %v7906_v56 = vld [vmem:[%s11088_s1 + $0xd24] ss:$16 sps:$4 sm:$0xff]  }
 0x168   :  { %5076 = vmatprep.subr.bf16.mxu0 %v7814_v57  ;;  %5609 = vmatprep.subr.bf16.mxu1 %v7817_v58  ;;  %v7909_v57 = vld [vmem:[%s11088_s1 + $0xd2c] ss:$16 sps:$4 sm:$0xff]   ;;  %v7904_v58 = vld [vmem:[%s11088_s1 + $0xd20] ss:$16 sps:$4 sm:$0xff]  }
 0x16b   :  { %5077 = vmatpush1.bf16.msra.mxu0 %v7812_v59  ;;  %5610 = vmatpush1.bf16.msra.mxu1 %v7815_v60  ;;  %v7907_v59 = vld [vmem:[%s11088_s1 + $0xd28] ss:$16 sps:$4 sm:$0xff]   ;;  %v7912_v60 = vld [vmem:[%s11088_s1 + $0xd44] ss:$16 sps:$4 sm:$0xff]  }
 0x16c   :  { %5078 = vmatprep.subr.bf16.mxu0 %v7820_v61  ;;  %5611 = vmatprep.subr.bf16.mxu1 %v7823_v62  ;;  %v7915_v61 = vld [vmem:[%s11088_s1 + $0xd4c] ss:$16 sps:$4 sm:$0xff]   ;;  %v7910_v62 = vld [vmem:[%s11088_s1 + $0xd40] ss:$16 sps:$4 sm:$0xff]  }
 0x16f   :  { %5079 = vmatpush1.bf16.msra.mxu0 %v7818_v63  ;;  %5612 = vmatpush1.bf16.msra.mxu1 %v7821_v0  ;;  %v7913_v63 = vld [vmem:[%s11088_s1 + $0xd48] ss:$16 sps:$4 sm:$0xff]   ;;  %v7918_v0 = vld [vmem:[%s11088_s1 + $0xd64] ss:$16 sps:$4 sm:$0xff]  }
 0x170   :  { %5080 = vmatprep.subr.bf16.mxu0 %v7826_v1  ;;  %5613 = vmatprep.subr.bf16.mxu1 %v7829_v2  ;;  %v7921_v1 = vld [vmem:[%s11088_s1 + $0xd6c] ss:$16 sps:$4 sm:$0xff]   ;;  %v7916_v2 = vld [vmem:[%s11088_s1 + $0xd60] ss:$16 sps:$4 sm:$0xff]  }
 0x173   :  { %5081 = vmatpush1.bf16.msra.mxu0 %v7824_v3  ;;  %5614 = vmatpush1.bf16.msra.mxu1 %v7827_v4  ;;  %v7919_v3 = vld [vmem:[%s11088_s1 + $0xd68] ss:$16 sps:$4 sm:$0xff]   ;;  %v7924_v4 = vld [vmem:[%s11088_s1 + $0xd84] ss:$16 sps:$4 sm:$0xff]  }
 0x174   :  { %5082 = vmatprep.subr.bf16.mxu0 %v7832_v5  ;;  %5615 = vmatprep.subr.bf16.mxu1 %v7835_v6  ;;  %v7927_v5 = vld [vmem:[%s11088_s1 + $0xd8c] ss:$16 sps:$4 sm:$0xff]   ;;  %v7922_v6 = vld [vmem:[%s11088_s1 + $0xd80] ss:$16 sps:$4 sm:$0xff]  }
 0x177   :  { %5083 = vmatpush1.bf16.msra.mxu0 %v7830_v7  ;;  %5616 = vmatpush1.bf16.msra.mxu1 %v7833_v8  ;;  %v7925_v7 = vld [vmem:[%s11088_s1 + $0xd88] ss:$16 sps:$4 sm:$0xff]   ;;  %v7930_v8 = vld [vmem:[%s11088_s1 + $0xda4] ss:$16 sps:$4 sm:$0xff]  }
 0x178   :  { %5084 = vmatprep.subr.bf16.mxu0 %v7838_v9  ;;  %5617 = vmatprep.subr.bf16.mxu1 %v7841_v10  ;;  %v7933_v9 = vld [vmem:[%s11088_s1 + $0xdac] ss:$16 sps:$4 sm:$0xff]   ;;  %v7928_v10 = vld [vmem:[%s11088_s1 + $0xda0] ss:$16 sps:$4 sm:$0xff]  }
 0x17b   :  { %5085 = vmatpush1.bf16.msra.mxu0 %v7836_v12  ;;  %5618 = vmatpush1.bf16.msra.mxu1 %v7839_v13  ;;  %v7931_v12 = vld [vmem:[%s11088_s1 + $0xda8] ss:$16 sps:$4 sm:$0xff]   ;;  %v7936_v13 = vld [vmem:[%s11088_s1 + $0xdc4] ss:$16 sps:$4 sm:$0xff]  }
 0x17c   :  { %5086 = vmatprep.subr.bf16.mxu0 %v7844_v15  ;;  %5619 = vmatprep.subr.bf16.mxu1 %v7847_v11  ;;  %v7939_v15 = vld [vmem:[%s11088_s1 + $0xdcc] ss:$16 sps:$4 sm:$0xff]   ;;  %v7934_v11 = vld [vmem:[%s11088_s1 + $0xdc0] ss:$16 sps:$4 sm:$0xff]  }
 0x17f   :  { %5087 = vmatpush1.bf16.msra.mxu0 %v7842_v17  ;;  %5620 = vmatpush1.bf16.msra.mxu1 %v7845_v14  ;;  %v7937_v17 = vld [vmem:[%s11088_s1 + $0xdc8] ss:$16 sps:$4 sm:$0xff]   ;;  %v7942_v14 = vld [vmem:[%s11088_s1 + $0xde4] ss:$16 sps:$4 sm:$0xff]  }
 0x180   :  { %5097 = vmatprep.subr.bf16.mxu0 %v7852_v19  ;;  %5630 = vmatprep.subr.bf16.mxu1 %v7855_v20  ;;  %v7945_v19 = vld [vmem:[%s11088_s1 + $0xdec] ss:$16 sps:$4 sm:$0xff]   ;;  %v7940_v20 = vld [vmem:[%s11088_s1 + $0xde0] ss:$16 sps:$4 sm:$0xff]  }
 0x182   :  { %5089 = vmatmul.mubr.bf16.vlgmr.msra.gmra.mrb[0].mxu0 %v6283_v16  ;;  %5622 = vmatmul.mubr.bf16.vlgmr.msra.gmra.mrb[0].mxu1 %v6283_v16  ;;  %v7943_v16 = vld [vmem:[%s11088_s1 + $0xde8] ss:$16 sps:$4 sm:$0xff]  }
 0x183   :  { %5098 = vmatpush1.bf16.msra.mxu0 %v7850_v22  ;;  %5631 = vmatpush1.bf16.msra.mxu1 %v7853_v23  ;;  %v7950_v22 = vld [vmem:[%s11088_s1 + $0xe04] ss:$16 sps:$4 sm:$0xff]   ;;  %v7953_v23 = vld [vmem:[%s11088_s1 + $0xe0c] ss:$16 sps:$4 sm:$0xff]  }
 0x184   :  { %5099 = vmatprep.subr.bf16.mxu0 %v7858_v24  ;;  %5632 = vmatprep.subr.bf16.mxu1 %v7861_v18  ;;  %v9934_v24 = vld [vmem:[%s11089_s0 + $0x38] sm:$0xff]  ;;  %v6285_v18 = vcombine.low %v9733_v21, %v9733_v21 }
 0x185   :  { %5129 = vmatprep.mubr.bf16.mxu0 %v6286_v25  ;;  %5662 = vmatprep.mubr.bf16.mxu1 %v6286_v25  ;;  %v7948_v25 = vld [vmem:[%s11088_s1 + $0xe00] ss:$16 sps:$4 sm:$0xff]   ;;  %v7959_v21 = vld [vmem:[%s11088_s1 + $0xe2c] ss:$16 sps:$4 sm:$0xff]  }
 0x187   :  { %5100 = vmatpush1.bf16.msra.mxu0 %v7856_v26  ;;  %5633 = vmatpush1.bf16.msra.mxu1 %v7859_v27  ;;  %v7951_v26 = vld [vmem:[%s11088_s1 + $0xe08] ss:$16 sps:$4 sm:$0xff]   ;;  %v7956_v27 = vld [vmem:[%s11088_s1 + $0xe24] ss:$16 sps:$4 sm:$0xff]  }
 0x188   :  { %5101 = vmatprep.subr.bf16.mxu0 %v7864_v28  ;;  %5634 = vmatprep.subr.bf16.mxu1 %v7867_v29  ;;  %v6288_v28 = vcombine.high %v9934_v24, %v9934_v24  ;;  %v7954_v29 = vld [vmem:[%s11088_s1 + $0xe20] ss:$16 sps:$4 sm:$0xff]  }
 0x18b   :  { %5102 = vmatpush1.bf16.msra.mxu0 %v7862_v30  ;;  %5635 = vmatpush1.bf16.msra.mxu1 %v7865_v31  ;;  %v7957_v30 = vld [vmem:[%s11088_s1 + $0xe28] ss:$16 sps:$4 sm:$0xff]   ;;  %v7962_v31 = vld [vmem:[%s11088_s1 + $0xe44] ss:$16 sps:$4 sm:$0xff]  }
 0x18c   :  { %5103 = vmatprep.subr.bf16.mxu0 %v7870_v32  ;;  %5636 = vmatprep.subr.bf16.mxu1 %v7873_v33  ;;  %v7965_v32 = vld [vmem:[%s11088_s1 + $0xe4c] ss:$16 sps:$4 sm:$0xff]   ;;  %v7960_v33 = vld [vmem:[%s11088_s1 + $0xe40] ss:$16 sps:$4 sm:$0xff]  }
 0x18f   :  { %5104 = vmatpush1.bf16.msra.mxu0 %v7868_v34  ;;  %5637 = vmatpush1.bf16.msra.mxu1 %v7871_v35  ;;  %v7963_v34 = vld [vmem:[%s11088_s1 + $0xe48] ss:$16 sps:$4 sm:$0xff]   ;;  %v7968_v35 = vld [vmem:[%s11088_s1 + $0xe64] ss:$16 sps:$4 sm:$0xff]  }
 0x190   :  { %5105 = vmatprep.subr.bf16.mxu0 %v7876_v36  ;;  %5638 = vmatprep.subr.bf16.mxu1 %v7879_v37  ;;  %v7971_v36 = vld [vmem:[%s11088_s1 + $0xe6c] ss:$16 sps:$4 sm:$0xff]   ;;  %v7966_v37 = vld [vmem:[%s11088_s1 + $0xe60] ss:$16 sps:$4 sm:$0xff]  }
 0x193   :  { %5106 = vmatpush1.bf16.msra.mxu0 %v7874_v38  ;;  %5639 = vmatpush1.bf16.msra.mxu1 %v7877_v39  ;;  %v7969_v38 = vld [vmem:[%s11088_s1 + $0xe68] ss:$16 sps:$4 sm:$0xff]   ;;  %v7974_v39 = vld [vmem:[%s11088_s1 + $0xe84] ss:$16 sps:$4 sm:$0xff]  }
 0x194   :  { %5107 = vmatprep.subr.bf16.mxu0 %v7882_v40  ;;  %5640 = vmatprep.subr.bf16.mxu1 %v7885_v41  ;;  %v7977_v40 = vld [vmem:[%s11088_s1 + $0xe8c] ss:$16 sps:$4 sm:$0xff]   ;;  %v7972_v41 = vld [vmem:[%s11088_s1 + $0xe80] ss:$16 sps:$4 sm:$0xff]  }
 0x197   :  { %5108 = vmatpush1.bf16.msra.mxu0 %v7880_v42  ;;  %5641 = vmatpush1.bf16.msra.mxu1 %v7883_v43  ;;  %v7975_v42 = vld [vmem:[%s11088_s1 + $0xe88] ss:$16 sps:$4 sm:$0xff]   ;;  %v7980_v43 = vld [vmem:[%s11088_s1 + $0xea4] ss:$16 sps:$4 sm:$0xff]  }
 0x198   :  { %5109 = vmatprep.subr.bf16.mxu0 %v7888_v44  ;;  %5642 = vmatprep.subr.bf16.mxu1 %v7891_v45  ;;  %v7983_v44 = vld [vmem:[%s11088_s1 + $0xeac] ss:$16 sps:$4 sm:$0xff]   ;;  %v7978_v45 = vld [vmem:[%s11088_s1 + $0xea0] ss:$16 sps:$4 sm:$0xff]  }
 0x19b   :  { %5110 = vmatpush1.bf16.msra.mxu0 %v7886_v46  ;;  %5643 = vmatpush1.bf16.msra.mxu1 %v7889_v47  ;;  %v7981_v46 = vld [vmem:[%s11088_s1 + $0xea8] ss:$16 sps:$4 sm:$0xff]   ;;  %v7986_v47 = vld [vmem:[%s11088_s1 + $0xec4] ss:$16 sps:$4 sm:$0xff]  }
 0x19c   :  { %5111 = vmatprep.subr.bf16.mxu0 %v7894_v48  ;;  %5644 = vmatprep.subr.bf16.mxu1 %v7897_v49  ;;  %v7989_v48 = vld [vmem:[%s11088_s1 + $0xecc] ss:$16 sps:$4 sm:$0xff]   ;;  %v7984_v49 = vld [vmem:[%s11088_s1 + $0xec0] ss:$16 sps:$4 sm:$0xff]  }
 0x19f   :  { %5112 = vmatpush1.bf16.msra.mxu0 %v7892_v50  ;;  %5645 = vmatpush1.bf16.msra.mxu1 %v7895_v51  ;;  %v7987_v50 = vld [vmem:[%s11088_s1 + $0xec8] ss:$16 sps:$4 sm:$0xff]   ;;  %v7992_v51 = vld [vmem:[%s11088_s1 + $0xee4] ss:$16 sps:$4 sm:$0xff]  }
 0x1a0   :  { %5113 = vmatprep.subr.bf16.mxu0 %v7900_v52  ;;  %5646 = vmatprep.subr.bf16.mxu1 %v7903_v53  ;;  %v7995_v52 = vld [vmem:[%s11088_s1 + $0xeec] ss:$16 sps:$4 sm:$0xff]   ;;  %v7990_v53 = vld [vmem:[%s11088_s1 + $0xee0] ss:$16 sps:$4 sm:$0xff]  }
 0x1a3   :  { %5114 = vmatpush1.bf16.msra.mxu0 %v7898_v54  ;;  %5647 = vmatpush1.bf16.msra.mxu1 %v7901_v55  ;;  %v7993_v54 = vld [vmem:[%s11088_s1 + $0xee8] ss:$16 sps:$4 sm:$0xff]   ;;  %v7998_v55 = vld [vmem:[%s11088_s1 + $0xf04] ss:$16 sps:$4 sm:$0xff]  }
 0x1a4   :  { %5115 = vmatprep.subr.bf16.mxu0 %v7906_v56  ;;  %5648 = vmatprep.subr.bf16.mxu1 %v7909_v57  ;;  %v8001_v56 = vld [vmem:[%s11088_s1 + $0xf0c] ss:$16 sps:$4 sm:$0xff]   ;;  %v7996_v57 = vld [vmem:[%s11088_s1 + $0xf00] ss:$16 sps:$4 sm:$0xff]  }
 0x1a7   :  { %5116 = vmatpush1.bf16.msra.mxu0 %v7904_v58  ;;  %5649 = vmatpush1.bf16.msra.mxu1 %v7907_v59  ;;  %v7999_v58 = vld [vmem:[%s11088_s1 + $0xf08] ss:$16 sps:$4 sm:$0xff]   ;;  %v8004_v59 = vld [vmem:[%s11088_s1 + $0xf24] ss:$16 sps:$4 sm:$0xff]  }
 0x1a8   :  { %5117 = vmatprep.subr.bf16.mxu0 %v7912_v60  ;;  %5650 = vmatprep.subr.bf16.mxu1 %v7915_v61  ;;  %v8007_v60 = vld [vmem:[%s11088_s1 + $0xf2c] ss:$16 sps:$4 sm:$0xff]   ;;  %v8002_v61 = vld [vmem:[%s11088_s1 + $0xf20] ss:$16 sps:$4 sm:$0xff]  }
 0x1ab   :  { %5118 = vmatpush1.bf16.msra.mxu0 %v7910_v62  ;;  %5651 = vmatpush1.bf16.msra.mxu1 %v7913_v63  ;;  %v8005_v62 = vld [vmem:[%s11088_s1 + $0xf28] ss:$16 sps:$4 sm:$0xff]   ;;  %v8010_v63 = vld [vmem:[%s11088_s1 + $0xf44] ss:$16 sps:$4 sm:$0xff]  }
 0x1ac   :  { %5119 = vmatprep.subr.bf16.mxu0 %v7918_v0  ;;  %5652 = vmatprep.subr.bf16.mxu1 %v7921_v1  ;;  %v8013_v0 = vld [vmem:[%s11088_s1 + $0xf4c] ss:$16 sps:$4 sm:$0xff]   ;;  %v8008_v1 = vld [vmem:[%s11088_s1 + $0xf40] ss:$16 sps:$4 sm:$0xff]  }
 0x1af   :  { %5120 = vmatpush1.bf16.msra.mxu0 %v7916_v2  ;;  %5653 = vmatpush1.bf16.msra.mxu1 %v7919_v3  ;;  %v8011_v2 = vld [vmem:[%s11088_s1 + $0xf48] ss:$16 sps:$4 sm:$0xff]   ;;  %v8016_v3 = vld [vmem:[%s11088_s1 + $0xf64] ss:$16 sps:$4 sm:$0xff]  }
 0x1b0   :  { %5121 = vmatprep.subr.bf16.mxu0 %v7924_v4  ;;  %5654 = vmatprep.subr.bf16.mxu1 %v7927_v5  ;;  %v8019_v4 = vld [vmem:[%s11088_s1 + $0xf6c] ss:$16 sps:$4 sm:$0xff]   ;;  %v8014_v5 = vld [vmem:[%s11088_s1 + $0xf60] ss:$16 sps:$4 sm:$0xff]  }
 0x1b3   :  { %5122 = vmatpush1.bf16.msra.mxu0 %v7922_v6  ;;  %5655 = vmatpush1.bf16.msra.mxu1 %v7925_v7  ;;  %v8017_v6 = vld [vmem:[%s11088_s1 + $0xf68] ss:$16 sps:$4 sm:$0xff]   ;;  %v8022_v7 = vld [vmem:[%s11088_s1 + $0xf84] ss:$16 sps:$4 sm:$0xff]  }
 0x1b4   :  { %5123 = vmatprep.subr.bf16.mxu0 %v7930_v8  ;;  %5656 = vmatprep.subr.bf16.mxu1 %v7933_v9  ;;  %v8025_v8 = vld [vmem:[%s11088_s1 + $0xf8c] ss:$16 sps:$4 sm:$0xff]   ;;  %v8020_v9 = vld [vmem:[%s11088_s1 + $0xf80] ss:$16 sps:$4 sm:$0xff]  }
 0x1b7   :  { %5124 = vmatpush1.bf16.msra.mxu0 %v7928_v10  ;;  %5657 = vmatpush1.bf16.msra.mxu1 %v7931_v12  ;;  %v8023_v10 = vld [vmem:[%s11088_s1 + $0xf88] ss:$16 sps:$4 sm:$0xff]   ;;  %v8028_v12 = vld [vmem:[%s11088_s1 + $0xfa4] ss:$16 sps:$4 sm:$0xff]  }
 0x1b8   :  { %5125 = vmatprep.subr.bf16.mxu0 %v7936_v13  ;;  %5658 = vmatprep.subr.bf16.mxu1 %v7939_v15  ;;  %v8031_v13 = vld [vmem:[%s11088_s1 + $0xfac] ss:$16 sps:$4 sm:$0xff]   ;;  %v8026_v15 = vld [vmem:[%s11088_s1 + $0xfa0] ss:$16 sps:$4 sm:$0xff]  }
 0x1bb   :  { %5126 = vmatpush1.bf16.msra.mxu0 %v7934_v11  ;;  %5659 = vmatpush1.bf16.msra.mxu1 %v7937_v17  ;;  %v8029_v11 = vld [vmem:[%s11088_s1 + $0xfa8] ss:$16 sps:$4 sm:$0xff]   ;;  %v8034_v17 = vld [vmem:[%s11088_s1 + $0xfc4] ss:$16 sps:$4 sm:$0xff]  }
 0x1bc   :  { %5127 = vmatprep.subr.bf16.mxu0 %v7942_v14  ;;  %5660 = vmatprep.subr.bf16.mxu1 %v7945_v19  ;;  %v8037_v14 = vld [vmem:[%s11088_s1 + $0xfcc] ss:$16 sps:$4 sm:$0xff]   ;;  %v8032_v19 = vld [vmem:[%s11088_s1 + $0xfc0] ss:$16 sps:$4 sm:$0xff]  }
 0x1bf   :  { %5128 = vmatpush1.bf16.msra.mxu0 %v7940_v20  ;;  %5661 = vmatpush1.bf16.msra.mxu1 %v7943_v16  ;;  %v8035_v20 = vld [vmem:[%s11088_s1 + $0xfc8] ss:$16 sps:$4 sm:$0xff]   ;;  %v8040_v16 = vld [vmem:[%s11088_s1 + $0xfe4] ss:$16 sps:$4 sm:$0xff]  }
 0x1c0   :  { %5138 = vmatprep.subr.bf16.mxu0 %v7950_v22  ;;  %5671 = vmatprep.subr.bf16.mxu1 %v7953_v23  ;;  %v8043_v22 = vld [vmem:[%s11088_s1 + $0xfec] ss:$16 sps:$4 sm:$0xff]   ;;  %v8038_v23 = vld [vmem:[%s11088_s1 + $0xfe0] ss:$16 sps:$4 sm:$0xff]  }
 0x1c2   :  { %5130 = vmatmul.mubr.bf16.vlgmr.msra.gmra.mrb[0].mxu0 %v6285_v18  ;;  %5663 = vmatmul.mubr.bf16.vlgmr.msra.gmra.mrb[0].mxu1 %v6285_v18  ;;  %v8041_v18 = vld [vmem:[%s11088_s1 + $0xfe8] ss:$16 sps:$4 sm:$0xff]  }
 0x1c3   :  { %5139 = vmatpush1.bf16.msra.mxu0 %v7948_v25  ;;  %5672 = vmatpush1.bf16.msra.mxu1 %v7951_v26  ;;  %v8048_v25 = vld [vmem:[%s11088_s1 + $0x1004] ss:$16 sps:$4 sm:$0xff]   ;;  %v8051_v26 = vld [vmem:[%s11088_s1 + $0x100c] ss:$16 sps:$4 sm:$0xff]  }
 0x1c4   :  { %5140 = vmatprep.subr.bf16.mxu0 %v7956_v27  ;;  %5673 = vmatprep.subr.bf16.mxu1 %v7959_v21  ;;  %v6287_v27 = vcombine.low %v9934_v24, %v9934_v24  ;;  %v10137_v21 = vld [vmem:[%s11089_s0 + $0x40] sm:$0xff] }
 0x1c5   :  { %5170 = vmatprep.mubr.bf16.mxu0 %v6288_v28  ;;  %5703 = vmatprep.mubr.bf16.mxu1 %v6288_v28  ;;  %v8046_v28 = vld [vmem:[%s11088_s1 + $0x1000] ss:$16 sps:$4 sm:$0xff]   ;;  %v8054_v24 = vld [vmem:[%s11088_s1 + $0x1024] ss:$16 sps:$4 sm:$0xff]  }
 0x1c7   :  { %5141 = vmatpush1.bf16.msra.mxu0 %v7954_v29  ;;  %5674 = vmatpush1.bf16.msra.mxu1 %v7957_v30  ;;  %v8049_v29 = vld [vmem:[%s11088_s1 + $0x1008] ss:$16 sps:$4 sm:$0xff]   ;;  %v8057_v30 = vld [vmem:[%s11088_s1 + $0x102c] ss:$16 sps:$4 sm:$0xff]  }
 0x1c8   :  { %5142 = vmatprep.subr.bf16.mxu0 %v7962_v31  ;;  %5675 = vmatprep.subr.bf16.mxu1 %v7965_v32  ;;  %v6290_v31 = vcombine.high %v10137_v21, %v10137_v21  ;;  %v8052_v32 = vld [vmem:[%s11088_s1 + $0x1020] ss:$16 sps:$4 sm:$0xff]  }
 0x1cb   :  { %5143 = vmatpush1.bf16.msra.mxu0 %v7960_v33  ;;  %5676 = vmatpush1.bf16.msra.mxu1 %v7963_v34  ;;  %v8055_v33 = vld [vmem:[%s11088_s1 + $0x1028] ss:$16 sps:$4 sm:$0xff]   ;;  %v8060_v34 = vld [vmem:[%s11088_s1 + $0x1044] ss:$16 sps:$4 sm:$0xff]  }
 0x1cc   :  { %5144 = vmatprep.subr.bf16.mxu0 %v7968_v35  ;;  %5677 = vmatprep.subr.bf16.mxu1 %v7971_v36  ;;  %v8063_v35 = vld [vmem:[%s11088_s1 + $0x104c] ss:$16 sps:$4 sm:$0xff]   ;;  %v8058_v36 = vld [vmem:[%s11088_s1 + $0x1040] ss:$16 sps:$4 sm:$0xff]  }
 0x1cf   :  { %5145 = vmatpush1.bf16.msra.mxu0 %v7966_v37  ;;  %5678 = vmatpush1.bf16.msra.mxu1 %v7969_v38  ;;  %v8061_v37 = vld [vmem:[%s11088_s1 + $0x1048] ss:$16 sps:$4 sm:$0xff]   ;;  %v8066_v38 = vld [vmem:[%s11088_s1 + $0x1064] ss:$16 sps:$4 sm:$0xff]  }
 0x1d0   :  { %5146 = vmatprep.subr.bf16.mxu0 %v7974_v39  ;;  %5679 = vmatprep.subr.bf16.mxu1 %v7977_v40  ;;  %v8069_v39 = vld [vmem:[%s11088_s1 + $0x106c] ss:$16 sps:$4 sm:$0xff]   ;;  %v8064_v40 = vld [vmem:[%s11088_s1 + $0x1060] ss:$16 sps:$4 sm:$0xff]  }
 0x1d3   :  { %5147 = vmatpush1.bf16.msra.mxu0 %v7972_v41  ;;  %5680 = vmatpush1.bf16.msra.mxu1 %v7975_v42  ;;  %v8067_v41 = vld [vmem:[%s11088_s1 + $0x1068] ss:$16 sps:$4 sm:$0xff]   ;;  %v8072_v42 = vld [vmem:[%s11088_s1 + $0x1084] ss:$16 sps:$4 sm:$0xff]  }
 0x1d4   :  { %5148 = vmatprep.subr.bf16.mxu0 %v7980_v43  ;;  %5681 = vmatprep.subr.bf16.mxu1 %v7983_v44  ;;  %v8075_v43 = vld [vmem:[%s11088_s1 + $0x108c] ss:$16 sps:$4 sm:$0xff]   ;;  %v8070_v44 = vld [vmem:[%s11088_s1 + $0x1080] ss:$16 sps:$4 sm:$0xff]  }
 0x1d7   :  { %5149 = vmatpush1.bf16.msra.mxu0 %v7978_v45  ;;  %5682 = vmatpush1.bf16.msra.mxu1 %v7981_v46  ;;  %v8073_v45 = vld [vmem:[%s11088_s1 + $0x1088] ss:$16 sps:$4 sm:$0xff]   ;;  %v8078_v46 = vld [vmem:[%s11088_s1 + $0x10a4] ss:$16 sps:$4 sm:$0xff]  }
 0x1d8   :  { %5150 = vmatprep.subr.bf16.mxu0 %v7986_v47  ;;  %5683 = vmatprep.subr.bf16.mxu1 %v7989_v48  ;;  %v8081_v47 = vld [vmem:[%s11088_s1 + $0x10ac] ss:$16 sps:$4 sm:$0xff]   ;;  %v8076_v48 = vld [vmem:[%s11088_s1 + $0x10a0] ss:$16 sps:$4 sm:$0xff]  }
 0x1db   :  { %5151 = vmatpush1.bf16.msra.mxu0 %v7984_v49  ;;  %5684 = vmatpush1.bf16.msra.mxu1 %v7987_v50  ;;  %v8079_v49 = vld [vmem:[%s11088_s1 + $0x10a8] ss:$16 sps:$4 sm:$0xff]   ;;  %v8084_v50 = vld [vmem:[%s11088_s1 + $0x10c4] ss:$16 sps:$4 sm:$0xff]  }
 0x1dc   :  { %5152 = vmatprep.subr.bf16.mxu0 %v7992_v51  ;;  %5685 = vmatprep.subr.bf16.mxu1 %v7995_v52  ;;  %v8087_v51 = vld [vmem:[%s11088_s1 + $0x10cc] ss:$16 sps:$4 sm:$0xff]   ;;  %v8082_v52 = vld [vmem:[%s11088_s1 + $0x10c0] ss:$16 sps:$4 sm:$0xff]  }
 0x1df   :  { %5153 = vmatpush1.bf16.msra.mxu0 %v7990_v53  ;;  %5686 = vmatpush1.bf16.msra.mxu1 %v7993_v54  ;;  %v8085_v53 = vld [vmem:[%s11088_s1 + $0x10c8] ss:$16 sps:$4 sm:$0xff]   ;;  %v8090_v54 = vld [vmem:[%s11088_s1 + $0x10e4] ss:$16 sps:$4 sm:$0xff]  }
 0x1e0   :  { %5154 = vmatprep.subr.bf16.mxu0 %v7998_v55  ;;  %5687 = vmatprep.subr.bf16.mxu1 %v8001_v56  ;;  %v8093_v55 = vld [vmem:[%s11088_s1 + $0x10ec] ss:$16 sps:$4 sm:$0xff]   ;;  %v8088_v56 = vld [vmem:[%s11088_s1 + $0x10e0] ss:$16 sps:$4 sm:$0xff]  }
 0x1e3   :  { %5155 = vmatpush1.bf16.msra.mxu0 %v7996_v57  ;;  %5688 = vmatpush1.bf16.msra.mxu1 %v7999_v58  ;;  %v8091_v57 = vld [vmem:[%s11088_s1 + $0x10e8] ss:$16 sps:$4 sm:$0xff]   ;;  %v8096_v58 = vld [vmem:[%s11088_s1 + $0x1104] ss:$16 sps:$4 sm:$0xff]  }
 0x1e4   :  { %5156 = vmatprep.subr.bf16.mxu0 %v8004_v59  ;;  %5689 = vmatprep.subr.bf16.mxu1 %v8007_v60  ;;  %v8099_v59 = vld [vmem:[%s11088_s1 + $0x110c] ss:$16 sps:$4 sm:$0xff]   ;;  %v8094_v60 = vld [vmem:[%s11088_s1 + $0x1100] ss:$16 sps:$4 sm:$0xff]  }
 0x1e7   :  { %5157 = vmatpush1.bf16.msra.mxu0 %v8002_v61  ;;  %5690 = vmatpush1.bf16.msra.mxu1 %v8005_v62  ;;  %v8097_v61 = vld [vmem:[%s11088_s1 + $0x1108] ss:$16 sps:$4 sm:$0xff]   ;;  %v8102_v62 = vld [vmem:[%s11088_s1 + $0x1124] ss:$16 sps:$4 sm:$0xff]  }
 0x1e8   :  { %5158 = vmatprep.subr.bf16.mxu0 %v8010_v63  ;;  %5691 = vmatprep.subr.bf16.mxu1 %v8013_v0  ;;  %v8105_v63 = vld [vmem:[%s11088_s1 + $0x112c] ss:$16 sps:$4 sm:$0xff]   ;;  %v8100_v0 = vld [vmem:[%s11088_s1 + $0x1120] ss:$16 sps:$4 sm:$0xff]  }
 0x1eb   :  { %5159 = vmatpush1.bf16.msra.mxu0 %v8008_v1  ;;  %5692 = vmatpush1.bf16.msra.mxu1 %v8011_v2  ;;  %v8103_v1 = vld [vmem:[%s11088_s1 + $0x1128] ss:$16 sps:$4 sm:$0xff]   ;;  %v8108_v2 = vld [vmem:[%s11088_s1 + $0x1144] ss:$16 sps:$4 sm:$0xff]  }
 0x1ec   :  { %5160 = vmatprep.subr.bf16.mxu0 %v8016_v3  ;;  %5693 = vmatprep.subr.bf16.mxu1 %v8019_v4  ;;  %v8111_v3 = vld [vmem:[%s11088_s1 + $0x114c] ss:$16 sps:$4 sm:$0xff]   ;;  %v8106_v4 = vld [vmem:[%s11088_s1 + $0x1140] ss:$16 sps:$4 sm:$0xff]  }
 0x1ef   :  { %5161 = vmatpush1.bf16.msra.mxu0 %v8014_v5  ;;  %5694 = vmatpush1.bf16.msra.mxu1 %v8017_v6  ;;  %v8109_v5 = vld [vmem:[%s11088_s1 + $0x1148] ss:$16 sps:$4 sm:$0xff]   ;;  %v8114_v6 = vld [vmem:[%s11088_s1 + $0x1164] ss:$16 sps:$4 sm:$0xff]  }
 0x1f0   :  { %5162 = vmatprep.subr.bf16.mxu0 %v8022_v7  ;;  %5695 = vmatprep.subr.bf16.mxu1 %v8025_v8  ;;  %v8117_v7 = vld [vmem:[%s11088_s1 + $0x116c] ss:$16 sps:$4 sm:$0xff]   ;;  %v8112_v8 = vld [vmem:[%s11088_s1 + $0x1160] ss:$16 sps:$4 sm:$0xff]  }
 0x1f3   :  { %5163 = vmatpush1.bf16.msra.mxu0 %v8020_v9  ;;  %5696 = vmatpush1.bf16.msra.mxu1 %v8023_v10  ;;  %v8115_v9 = vld [vmem:[%s11088_s1 + $0x1168] ss:$16 sps:$4 sm:$0xff]   ;;  %v8120_v10 = vld [vmem:[%s11088_s1 + $0x1184] ss:$16 sps:$4 sm:$0xff]  }
 0x1f4   :  { %5164 = vmatprep.subr.bf16.mxu0 %v8028_v12  ;;  %5697 = vmatprep.subr.bf16.mxu1 %v8031_v13  ;;  %v8123_v12 = vld [vmem:[%s11088_s1 + $0x118c] ss:$16 sps:$4 sm:$0xff]   ;;  %v8118_v13 = vld [vmem:[%s11088_s1 + $0x1180] ss:$16 sps:$4 sm:$0xff]  }
 0x1f7   :  { %5165 = vmatpush1.bf16.msra.mxu0 %v8026_v15  ;;  %5698 = vmatpush1.bf16.msra.mxu1 %v8029_v11  ;;  %v8121_v15 = vld [vmem:[%s11088_s1 + $0x1188] ss:$16 sps:$4 sm:$0xff]   ;;  %v8126_v11 = vld [vmem:[%s11088_s1 + $0x11a4] ss:$16 sps:$4 sm:$0xff]  }
 0x1f8   :  { %5166 = vmatprep.subr.bf16.mxu0 %v8034_v17  ;;  %5699 = vmatprep.subr.bf16.mxu1 %v8037_v14  ;;  %v8129_v17 = vld [vmem:[%s11088_s1 + $0x11ac] ss:$16 sps:$4 sm:$0xff]   ;;  %v8124_v14 = vld [vmem:[%s11088_s1 + $0x11a0] ss:$16 sps:$4 sm:$0xff]  }
 0x1fb   :  { %5167 = vmatpush1.bf16.msra.mxu0 %v8032_v19  ;;  %5700 = vmatpush1.bf16.msra.mxu1 %v8035_v20  ;;  %v8127_v19 = vld [vmem:[%s11088_s1 + $0x11a8] ss:$16 sps:$4 sm:$0xff]   ;;  %v8132_v20 = vld [vmem:[%s11088_s1 + $0x11c4] ss:$16 sps:$4 sm:$0xff]  }
 0x1fc   :  { %5168 = vmatprep.subr.bf16.mxu0 %v8040_v16  ;;  %5701 = vmatprep.subr.bf16.mxu1 %v8043_v22  ;;  %v8135_v16 = vld [vmem:[%s11088_s1 + $0x11cc] ss:$16 sps:$4 sm:$0xff]   ;;  %v8130_v22 = vld [vmem:[%s11088_s1 + $0x11c0] ss:$16 sps:$4 sm:$0xff]  }
 0x1ff   :  { %5169 = vmatpush1.bf16.msra.mxu0 %v8038_v23  ;;  %5702 = vmatpush1.bf16.msra.mxu1 %v8041_v18  ;;  %v8133_v23 = vld [vmem:[%s11088_s1 + $0x11c8] ss:$16 sps:$4 sm:$0xff]   ;;  %v8138_v18 = vld [vmem:[%s11088_s1 + $0x11e4] ss:$16 sps:$4 sm:$0xff]  }
 0x200   :  { %5179 = vmatprep.subr.bf16.mxu0 %v8048_v25  ;;  %5712 = vmatprep.subr.bf16.mxu1 %v8051_v26  ;;  %v8141_v25 = vld [vmem:[%s11088_s1 + $0x11ec] ss:$16 sps:$4 sm:$0xff]   ;;  %v8136_v26 = vld [vmem:[%s11088_s1 + $0x11e0] ss:$16 sps:$4 sm:$0xff]  }
 0x202   :  { %5171 = vmatmul.mubr.bf16.vlgmr.msra.gmra.mrb[0].mxu0 %v6287_v27  ;;  %5704 = vmatmul.mubr.bf16.vlgmr.msra.gmra.mrb[0].mxu1 %v6287_v27  ;;  %v8139_v27 = vld [vmem:[%s11088_s1 + $0x11e8] ss:$16 sps:$4 sm:$0xff]  }
 0x203   :  { %5180 = vmatpush1.bf16.msra.mxu0 %v8046_v28  ;;  %5713 = vmatpush1.bf16.msra.mxu1 %v8049_v29  ;;  %v8146_v28 = vld [vmem:[%s11088_s1 + $0x1204] ss:$16 sps:$4 sm:$0xff]   ;;  %v8149_v29 = vld [vmem:[%s11088_s1 + $0x120c] ss:$16 sps:$4 sm:$0xff]  }
 0x204   :  { %5181 = vmatprep.subr.bf16.mxu0 %v8054_v24  ;;  %5714 = vmatprep.subr.bf16.mxu1 %v8057_v30  ;;  %v6289_v24 = vcombine.low %v10137_v21, %v10137_v21  ;;  %v10338_v30 = vld [vmem:[%s11089_s0 + $0x48] sm:$0xff]  ;;  %v8152_v21 = vld [vmem:[%s11088_s1 + $0x1224] ss:$16 sps:$4 sm:$0xff]  }
 0x205   :  { %5211 = vmatprep.mubr.bf16.mxu0 %v6290_v31  ;;  %5744 = vmatprep.mubr.bf16.mxu1 %v6290_v31  ;;  %v8144_v31 = vld [vmem:[%s11088_s1 + $0x1200] ss:$16 sps:$4 sm:$0xff]  }
 0x207   :  { %5182 = vmatpush1.bf16.msra.mxu0 %v8052_v32  ;;  %5715 = vmatpush1.bf16.msra.mxu1 %v8055_v33  ;;  %v8147_v32 = vld [vmem:[%s11088_s1 + $0x1208] ss:$16 sps:$4 sm:$0xff]   ;;  %v8155_v33 = vld [vmem:[%s11088_s1 + $0x122c] ss:$16 sps:$4 sm:$0xff]  }
 0x208   :  { %5183 = vmatprep.subr.bf16.mxu0 %v8060_v34  ;;  %5716 = vmatprep.subr.bf16.mxu1 %v8063_v35  ;;  %v6292_v34 = vcombine.high %v10338_v30, %v10338_v30  ;;  %v8150_v35 = vld [vmem:[%s11088_s1 + $0x1220] ss:$16 sps:$4 sm:$0xff]  }
 0x20b   :  { %5184 = vmatpush1.bf16.msra.mxu0 %v8058_v36  ;;  %5717 = vmatpush1.bf16.msra.mxu1 %v8061_v37  ;;  %v8153_v36 = vld [vmem:[%s11088_s1 + $0x1228] ss:$16 sps:$4 sm:$0xff]   ;;  %v8158_v37 = vld [vmem:[%s11088_s1 + $0x1244] ss:$16 sps:$4 sm:$0xff]  }
 0x20c   :  { %5185 = vmatprep.subr.bf16.mxu0 %v8066_v38  ;;  %5718 = vmatprep.subr.bf16.mxu1 %v8069_v39  ;;  %v8161_v38 = vld [vmem:[%s11088_s1 + $0x124c] ss:$16 sps:$4 sm:$0xff]   ;;  %v8156_v39 = vld [vmem:[%s11088_s1 + $0x1240] ss:$16 sps:$4 sm:$0xff]  }
 0x20f   :  { %5186 = vmatpush1.bf16.msra.mxu0 %v8064_v40  ;;  %5719 = vmatpush1.bf16.msra.mxu1 %v8067_v41  ;;  %v8159_v40 = vld [vmem:[%s11088_s1 + $0x1248] ss:$16 sps:$4 sm:$0xff]   ;;  %v8164_v41 = vld [vmem:[%s11088_s1 + $0x1264] ss:$16 sps:$4 sm:$0xff]  }
 0x210   :  { %5187 = vmatprep.subr.bf16.mxu0 %v8072_v42  ;;  %5720 = vmatprep.subr.bf16.mxu1 %v8075_v43  ;;  %v8167_v42 = vld [vmem:[%s11088_s1 + $0x126c] ss:$16 sps:$4 sm:$0xff]   ;;  %v8162_v43 = vld [vmem:[%s11088_s1 + $0x1260] ss:$16 sps:$4 sm:$0xff]  }
 0x213   :  { %5188 = vmatpush1.bf16.msra.mxu0 %v8070_v44  ;;  %5721 = vmatpush1.bf16.msra.mxu1 %v8073_v45  ;;  %v8165_v44 = vld [vmem:[%s11088_s1 + $0x1268] ss:$16 sps:$4 sm:$0xff]   ;;  %v8170_v45 = vld [vmem:[%s11088_s1 + $0x1284] ss:$16 sps:$4 sm:$0xff]  }
 0x214   :  { %5189 = vmatprep.subr.bf16.mxu0 %v8078_v46  ;;  %5722 = vmatprep.subr.bf16.mxu1 %v8081_v47  ;;  %v8173_v46 = vld [vmem:[%s11088_s1 + $0x128c] ss:$16 sps:$4 sm:$0xff]   ;;  %v8168_v47 = vld [vmem:[%s11088_s1 + $0x1280] ss:$16 sps:$4 sm:$0xff]  }
 0x217   :  { %5190 = vmatpush1.bf16.msra.mxu0 %v8076_v48  ;;  %5723 = vmatpush1.bf16.msra.mxu1 %v8079_v49  ;;  %v8171_v48 = vld [vmem:[%s11088_s1 + $0x1288] ss:$16 sps:$4 sm:$0xff]   ;;  %v8176_v49 = vld [vmem:[%s11088_s1 + $0x12a4] ss:$16 sps:$4 sm:$0xff]  }
 0x218   :  { %5191 = vmatprep.subr.bf16.mxu0 %v8084_v50  ;;  %5724 = vmatprep.subr.bf16.mxu1 %v8087_v51  ;;  %v8179_v50 = vld [vmem:[%s11088_s1 + $0x12ac] ss:$16 sps:$4 sm:$0xff]   ;;  %v8174_v51 = vld [vmem:[%s11088_s1 + $0x12a0] ss:$16 sps:$4 sm:$0xff]  }
 0x21b   :  { %5192 = vmatpush1.bf16.msra.mxu0 %v8082_v52  ;;  %5725 = vmatpush1.bf16.msra.mxu1 %v8085_v53  ;;  %v8177_v52 = vld [vmem:[%s11088_s1 + $0x12a8] ss:$16 sps:$4 sm:$0xff]   ;;  %v8182_v53 = vld [vmem:[%s11088_s1 + $0x12c4] ss:$16 sps:$4 sm:$0xff]  }
 0x21c   :  { %5193 = vmatprep.subr.bf16.mxu0 %v8090_v54  ;;  %5726 = vmatprep.subr.bf16.mxu1 %v8093_v55  ;;  %v8185_v54 = vld [vmem:[%s11088_s1 + $0x12cc] ss:$16 sps:$4 sm:$0xff]   ;;  %v8180_v55 = vld [vmem:[%s11088_s1 + $0x12c0] ss:$16 sps:$4 sm:$0xff]  }
 0x21f   :  { %5194 = vmatpush1.bf16.msra.mxu0 %v8088_v56  ;;  %5727 = vmatpush1.bf16.msra.mxu1 %v8091_v57  ;;  %v8183_v56 = vld [vmem:[%s11088_s1 + $0x12c8] ss:$16 sps:$4 sm:$0xff]   ;;  %v8188_v57 = vld [vmem:[%s11088_s1 + $0x12e4] ss:$16 sps:$4 sm:$0xff]  }
 0x220   :  { %5195 = vmatprep.subr.bf16.mxu0 %v8096_v58  ;;  %5728 = vmatprep.subr.bf16.mxu1 %v8099_v59  ;;  %v8191_v58 = vld [vmem:[%s11088_s1 + $0x12ec] ss:$16 sps:$4 sm:$0xff]   ;;  %v8186_v59 = vld [vmem:[%s11088_s1 + $0x12e0] ss:$16 sps:$4 sm:$0xff]  }
 0x223   :  { %5196 = vmatpush1.bf16.msra.mxu0 %v8094_v60  ;;  %5729 = vmatpush1.bf16.msra.mxu1 %v8097_v61  ;;  %v8189_v60 = vld [vmem:[%s11088_s1 + $0x12e8] ss:$16 sps:$4 sm:$0xff]   ;;  %v8194_v61 = vld [vmem:[%s11088_s1 + $0x1304] ss:$16 sps:$4 sm:$0xff]  }
 0x224   :  { %5197 = vmatprep.subr.bf16.mxu0 %v8102_v62  ;;  %5730 = vmatprep.subr.bf16.mxu1 %v8105_v63  ;;  %v8197_v62 = vld [vmem:[%s11088_s1 + $0x130c] ss:$16 sps:$4 sm:$0xff]   ;;  %v8192_v63 = vld [vmem:[%s11088_s1 + $0x1300] ss:$16 sps:$4 sm:$0xff]  }
 0x227   :  { %5198 = vmatpush1.bf16.msra.mxu0 %v8100_v0  ;;  %5731 = vmatpush1.bf16.msra.mxu1 %v8103_v1  ;;  %v8195_v0 = vld [vmem:[%s11088_s1 + $0x1308] ss:$16 sps:$4 sm:$0xff]   ;;  %v8200_v1 = vld [vmem:[%s11088_s1 + $0x1324] ss:$16 sps:$4 sm:$0xff]  }
 0x228   :  { %5199 = vmatprep.subr.bf16.mxu0 %v8108_v2  ;;  %5732 = vmatprep.subr.bf16.mxu1 %v8111_v3  ;;  %v8203_v2 = vld [vmem:[%s11088_s1 + $0x132c] ss:$16 sps:$4 sm:$0xff]   ;;  %v8198_v3 = vld [vmem:[%s11088_s1 + $0x1320] ss:$16 sps:$4 sm:$0xff]  }
 0x22b   :  { %5200 = vmatpush1.bf16.msra.mxu0 %v8106_v4  ;;  %5733 = vmatpush1.bf16.msra.mxu1 %v8109_v5  ;;  %v8201_v4 = vld [vmem:[%s11088_s1 + $0x1328] ss:$16 sps:$4 sm:$0xff]   ;;  %v8206_v5 = vld [vmem:[%s11088_s1 + $0x1344] ss:$16 sps:$4 sm:$0xff]  }
 0x22c   :  { %5201 = vmatprep.subr.bf16.mxu0 %v8114_v6  ;;  %5734 = vmatprep.subr.bf16.mxu1 %v8117_v7  ;;  %v8209_v6 = vld [vmem:[%s11088_s1 + $0x134c] ss:$16 sps:$4 sm:$0xff]   ;;  %v8204_v7 = vld [vmem:[%s11088_s1 + $0x1340] ss:$16 sps:$4 sm:$0xff]  }
 0x22f   :  { %5202 = vmatpush1.bf16.msra.mxu0 %v8112_v8  ;;  %5735 = vmatpush1.bf16.msra.mxu1 %v8115_v9  ;;  %v8207_v8 = vld [vmem:[%s11088_s1 + $0x1348] ss:$16 sps:$4 sm:$0xff]   ;;  %v8212_v9 = vld [vmem:[%s11088_s1 + $0x1364] ss:$16 sps:$4 sm:$0xff]  }
 0x230   :  { %5203 = vmatprep.subr.bf16.mxu0 %v8120_v10  ;;  %5736 = vmatprep.subr.bf16.mxu1 %v8123_v12  ;;  %v8215_v10 = vld [vmem:[%s11088_s1 + $0x136c] ss:$16 sps:$4 sm:$0xff]   ;;  %v8210_v12 = vld [vmem:[%s11088_s1 + $0x1360] ss:$16 sps:$4 sm:$0xff]  }
 0x233   :  { %5204 = vmatpush1.bf16.msra.mxu0 %v8118_v13  ;;  %5737 = vmatpush1.bf16.msra.mxu1 %v8121_v15  ;;  %v8213_v13 = vld [vmem:[%s11088_s1 + $0x1368] ss:$16 sps:$4 sm:$0xff]   ;;  %v8218_v15 = vld [vmem:[%s11088_s1 + $0x1384] ss:$16 sps:$4 sm:$0xff]  }
 0x234   :  { %5205 = vmatprep.subr.bf16.mxu0 %v8126_v11  ;;  %5738 = vmatprep.subr.bf16.mxu1 %v8129_v17  ;;  %v8221_v11 = vld [vmem:[%s11088_s1 + $0x138c] ss:$16 sps:$4 sm:$0xff]   ;;  %v8216_v17 = vld [vmem:[%s11088_s1 + $0x1380] ss:$16 sps:$4 sm:$0xff]  }
 0x237   :  { %5206 = vmatpush1.bf16.msra.mxu0 %v8124_v14  ;;  %5739 = vmatpush1.bf16.msra.mxu1 %v8127_v19  ;;  %v8219_v14 = vld [vmem:[%s11088_s1 + $0x1388] ss:$16 sps:$4 sm:$0xff]   ;;  %v8224_v19 = vld [vmem:[%s11088_s1 + $0x13a4] ss:$16 sps:$4 sm:$0xff]  }
 0x238   :  { %5207 = vmatprep.subr.bf16.mxu0 %v8132_v20  ;;  %5740 = vmatprep.subr.bf16.mxu1 %v8135_v16  ;;  %v8227_v20 = vld [vmem:[%s11088_s1 + $0x13ac] ss:$16 sps:$4 sm:$0xff]   ;;  %v8222_v16 = vld [vmem:[%s11088_s1 + $0x13a0] ss:$16 sps:$4 sm:$0xff]  }
 0x23b   :  { %5208 = vmatpush1.bf16.msra.mxu0 %v8130_v22  ;;  %5741 = vmatpush1.bf16.msra.mxu1 %v8133_v23  ;;  %v8225_v22 = vld [vmem:[%s11088_s1 + $0x13a8] ss:$16 sps:$4 sm:$0xff]   ;;  %v8230_v23 = vld [vmem:[%s11088_s1 + $0x13c4] ss:$16 sps:$4 sm:$0xff]  }
 0x23c   :  { %5209 = vmatprep.subr.bf16.mxu0 %v8138_v18  ;;  %5742 = vmatprep.subr.bf16.mxu1 %v8141_v25  ;;  %v8233_v18 = vld [vmem:[%s11088_s1 + $0x13cc] ss:$16 sps:$4 sm:$0xff]   ;;  %v8228_v25 = vld [vmem:[%s11088_s1 + $0x13c0] ss:$16 sps:$4 sm:$0xff]  }
 0x23f   :  { %5210 = vmatpush1.bf16.msra.mxu0 %v8136_v26  ;;  %5743 = vmatpush1.bf16.msra.mxu1 %v8139_v27  ;;  %v8231_v26 = vld [vmem:[%s11088_s1 + $0x13c8] ss:$16 sps:$4 sm:$0xff]   ;;  %v8236_v27 = vld [vmem:[%s11088_s1 + $0x13e4] ss:$16 sps:$4 sm:$0xff]  }
 0x240   :  { %5220 = vmatprep.subr.bf16.mxu0 %v8146_v28  ;;  %5753 = vmatprep.subr.bf16.mxu1 %v8149_v29  ;;  %v8239_v28 = vld [vmem:[%s11088_s1 + $0x13ec] ss:$16 sps:$4 sm:$0xff]   ;;  %v8234_v29 = vld [vmem:[%s11088_s1 + $0x13e0] ss:$16 sps:$4 sm:$0xff]  }
 0x242   :  { %5212 = vmatmul.mubr.bf16.vlgmr.msra.gmra.mrb[0].mxu0 %v6289_v24  ;;  %5745 = vmatmul.mubr.bf16.vlgmr.msra.gmra.mrb[0].mxu1 %v6289_v24  ;;  %v8237_v24 = vld [vmem:[%s11088_s1 + $0x13e8] ss:$16 sps:$4 sm:$0xff]  }
 0x243   :  { %5221 = vmatpush1.bf16.msra.mxu0 %v8144_v31  ;;  %5754 = vmatpush1.bf16.msra.mxu1 %v8147_v32  ;;  %v8244_v31 = vld [vmem:[%s11088_s1 + $0x1404] ss:$16 sps:$4 sm:$0xff]   ;;  %v8247_v32 = vld [vmem:[%s11088_s1 + $0x140c] ss:$16 sps:$4 sm:$0xff]  }
 0x244   :  { %5222 = vmatprep.subr.bf16.mxu0 %v8152_v21  ;;  %5755 = vmatprep.subr.bf16.mxu1 %v8155_v33  ;;  %v6291_v21 = vcombine.low %v10338_v30, %v10338_v30  ;;  %v10539_v33 = vld [vmem:[%s11089_s0 + $0x50] sm:$0xff] }
 0x245   :  { %5252 = vmatprep.mubr.bf16.mxu0 %v6292_v34  ;;  %5785 = vmatprep.mubr.bf16.mxu1 %v6292_v34  ;;  %v8242_v34 = vld [vmem:[%s11088_s1 + $0x1400] ss:$16 sps:$4 sm:$0xff]   ;;  %v8250_v30 = vld [vmem:[%s11088_s1 + $0x1424] ss:$16 sps:$4 sm:$0xff]  }
 0x247   :  { %5223 = vmatpush1.bf16.msra.mxu0 %v8150_v35  ;;  %5756 = vmatpush1.bf16.msra.mxu1 %v8153_v36  ;;  %v8245_v35 = vld [vmem:[%s11088_s1 + $0x1408] ss:$16 sps:$4 sm:$0xff]   ;;  %v8253_v36 = vld [vmem:[%s11088_s1 + $0x142c] ss:$16 sps:$4 sm:$0xff]  }
 0x248   :  { %5224 = vmatprep.subr.bf16.mxu0 %v8158_v37  ;;  %5757 = vmatprep.subr.bf16.mxu1 %v8161_v38  ;;  %v6294_v37 = vcombine.high %v10539_v33, %v10539_v33  ;;  %v8248_v38 = vld [vmem:[%s11088_s1 + $0x1420] ss:$16 sps:$4 sm:$0xff]  }
 0x24b   :  { %5225 = vmatpush1.bf16.msra.mxu0 %v8156_v39  ;;  %5758 = vmatpush1.bf16.msra.mxu1 %v8159_v40  ;;  %v8251_v39 = vld [vmem:[%s11088_s1 + $0x1428] ss:$16 sps:$4 sm:$0xff]   ;;  %v8256_v40 = vld [vmem:[%s11088_s1 + $0x1444] ss:$16 sps:$4 sm:$0xff]  }
 0x24c   :  { %5226 = vmatprep.subr.bf16.mxu0 %v8164_v41  ;;  %5759 = vmatprep.subr.bf16.mxu1 %v8167_v42  ;;  %v8259_v41 = vld [vmem:[%s11088_s1 + $0x144c] ss:$16 sps:$4 sm:$0xff]   ;;  %v8254_v42 = vld [vmem:[%s11088_s1 + $0x1440] ss:$16 sps:$4 sm:$0xff]  }
 0x24f   :  { %5227 = vmatpush1.bf16.msra.mxu0 %v8162_v43  ;;  %5760 = vmatpush1.bf16.msra.mxu1 %v8165_v44  ;;  %v8257_v43 = vld [vmem:[%s11088_s1 + $0x1448] ss:$16 sps:$4 sm:$0xff]   ;;  %v8262_v44 = vld [vmem:[%s11088_s1 + $0x1464] ss:$16 sps:$4 sm:$0xff]  }
 0x250   :  { %5228 = vmatprep.subr.bf16.mxu0 %v8170_v45  ;;  %5761 = vmatprep.subr.bf16.mxu1 %v8173_v46  ;;  %v8265_v45 = vld [vmem:[%s11088_s1 + $0x146c] ss:$16 sps:$4 sm:$0xff]   ;;  %v8260_v46 = vld [vmem:[%s11088_s1 + $0x1460] ss:$16 sps:$4 sm:$0xff]  }
 0x253   :  { %5229 = vmatpush1.bf16.msra.mxu0 %v8168_v47  ;;  %5762 = vmatpush1.bf16.msra.mxu1 %v8171_v48  ;;  %v8263_v47 = vld [vmem:[%s11088_s1 + $0x1468] ss:$16 sps:$4 sm:$0xff]   ;;  %v8268_v48 = vld [vmem:[%s11088_s1 + $0x1484] ss:$16 sps:$4 sm:$0xff]  }
 0x254   :  { %5230 = vmatprep.subr.bf16.mxu0 %v8176_v49  ;;  %5763 = vmatprep.subr.bf16.mxu1 %v8179_v50  ;;  %v8271_v49 = vld [vmem:[%s11088_s1 + $0x148c] ss:$16 sps:$4 sm:$0xff]   ;;  %v8266_v50 = vld [vmem:[%s11088_s1 + $0x1480] ss:$16 sps:$4 sm:$0xff]  }
 0x257   :  { %5231 = vmatpush1.bf16.msra.mxu0 %v8174_v51  ;;  %5764 = vmatpush1.bf16.msra.mxu1 %v8177_v52  ;;  %v8269_v51 = vld [vmem:[%s11088_s1 + $0x1488] ss:$16 sps:$4 sm:$0xff]   ;;  %v8274_v52 = vld [vmem:[%s11088_s1 + $0x14a4] ss:$16 sps:$4 sm:$0xff]  }
 0x258   :  { %5232 = vmatprep.subr.bf16.mxu0 %v8182_v53  ;;  %5765 = vmatprep.subr.bf16.mxu1 %v8185_v54  ;;  %v8277_v53 = vld [vmem:[%s11088_s1 + $0x14ac] ss:$16 sps:$4 sm:$0xff]   ;;  %v8272_v54 = vld [vmem:[%s11088_s1 + $0x14a0] ss:$16 sps:$4 sm:$0xff]  }
 0x25b   :  { %5233 = vmatpush1.bf16.msra.mxu0 %v8180_v55  ;;  %5766 = vmatpush1.bf16.msra.mxu1 %v8183_v56  ;;  %v8275_v55 = vld [vmem:[%s11088_s1 + $0x14a8] ss:$16 sps:$4 sm:$0xff]   ;;  %v8280_v56 = vld [vmem:[%s11088_s1 + $0x14c4] ss:$16 sps:$4 sm:$0xff]  }
 0x25c   :  { %5234 = vmatprep.subr.bf16.mxu0 %v8188_v57  ;;  %5767 = vmatprep.subr.bf16.mxu1 %v8191_v58  ;;  %v8283_v57 = vld [vmem:[%s11088_s1 + $0x14cc] ss:$16 sps:$4 sm:$0xff]   ;;  %v8278_v58 = vld [vmem:[%s11088_s1 + $0x14c0] ss:$16 sps:$4 sm:$0xff]  }
 0x25f   :  { %5235 = vmatpush1.bf16.msra.mxu0 %v8186_v59  ;;  %5768 = vmatpush1.bf16.msra.mxu1 %v8189_v60  ;;  %v8281_v59 = vld [vmem:[%s11088_s1 + $0x14c8] ss:$16 sps:$4 sm:$0xff]   ;;  %v8286_v60 = vld [vmem:[%s11088_s1 + $0x14e4] ss:$16 sps:$4 sm:$0xff]  }
 0x260   :  { %5236 = vmatprep.subr.bf16.mxu0 %v8194_v61  ;;  %5769 = vmatprep.subr.bf16.mxu1 %v8197_v62  ;;  %v8289_v61 = vld [vmem:[%s11088_s1 + $0x14ec] ss:$16 sps:$4 sm:$0xff]   ;;  %v8284_v62 = vld [vmem:[%s11088_s1 + $0x14e0] ss:$16 sps:$4 sm:$0xff]  }
 0x263   :  { %5237 = vmatpush1.bf16.msra.mxu0 %v8192_v63  ;;  %5770 = vmatpush1.bf16.msra.mxu1 %v8195_v0  ;;  %v8287_v63 = vld [vmem:[%s11088_s1 + $0x14e8] ss:$16 sps:$4 sm:$0xff]   ;;  %v8292_v0 = vld [vmem:[%s11088_s1 + $0x1504] ss:$16 sps:$4 sm:$0xff]  }
 0x264   :  { %5238 = vmatprep.subr.bf16.mxu0 %v8200_v1  ;;  %5771 = vmatprep.subr.bf16.mxu1 %v8203_v2  ;;  %v8295_v1 = vld [vmem:[%s11088_s1 + $0x150c] ss:$16 sps:$4 sm:$0xff]   ;;  %v8290_v2 = vld [vmem:[%s11088_s1 + $0x1500] ss:$16 sps:$4 sm:$0xff]  }
 0x267   :  { %5239 = vmatpush1.bf16.msra.mxu0 %v8198_v3  ;;  %5772 = vmatpush1.bf16.msra.mxu1 %v8201_v4  ;;  %v8293_v3 = vld [vmem:[%s11088_s1 + $0x1508] ss:$16 sps:$4 sm:$0xff]   ;;  %v8298_v4 = vld [vmem:[%s11088_s1 + $0x1524] ss:$16 sps:$4 sm:$0xff]  }
 0x268   :  { %5240 = vmatprep.subr.bf16.mxu0 %v8206_v5  ;;  %5773 = vmatprep.subr.bf16.mxu1 %v8209_v6  ;;  %v8301_v5 = vld [vmem:[%s11088_s1 + $0x152c] ss:$16 sps:$4 sm:$0xff]   ;;  %v8296_v6 = vld [vmem:[%s11088_s1 + $0x1520] ss:$16 sps:$4 sm:$0xff]  }
 0x26b   :  { %5241 = vmatpush1.bf16.msra.mxu0 %v8204_v7  ;;  %5774 = vmatpush1.bf16.msra.mxu1 %v8207_v8  ;;  %v8299_v7 = vld [vmem:[%s11088_s1 + $0x1528] ss:$16 sps:$4 sm:$0xff]   ;;  %v8304_v8 = vld [vmem:[%s11088_s1 + $0x1544] ss:$16 sps:$4 sm:$0xff]  }
 0x26c   :  { %5242 = vmatprep.subr.bf16.mxu0 %v8212_v9  ;;  %5775 = vmatprep.subr.bf16.mxu1 %v8215_v10  ;;  %v8307_v9 = vld [vmem:[%s11088_s1 + $0x154c] ss:$16 sps:$4 sm:$0xff]   ;;  %v8302_v10 = vld [vmem:[%s11088_s1 + $0x1540] ss:$16 sps:$4 sm:$0xff]  }
 0x26f   :  { %5243 = vmatpush1.bf16.msra.mxu0 %v8210_v12  ;;  %5776 = vmatpush1.bf16.msra.mxu1 %v8213_v13  ;;  %v8305_v12 = vld [vmem:[%s11088_s1 + $0x1548] ss:$16 sps:$4 sm:$0xff]   ;;  %v8310_v13 = vld [vmem:[%s11088_s1 + $0x1564] ss:$16 sps:$4 sm:$0xff]  }
 0x270   :  { %5244 = vmatprep.subr.bf16.mxu0 %v8218_v15  ;;  %5777 = vmatprep.subr.bf16.mxu1 %v8221_v11  ;;  %v8313_v15 = vld [vmem:[%s11088_s1 + $0x156c] ss:$16 sps:$4 sm:$0xff]   ;;  %v8308_v11 = vld [vmem:[%s11088_s1 + $0x1560] ss:$16 sps:$4 sm:$0xff]  }
 0x273   :  { %5245 = vmatpush1.bf16.msra.mxu0 %v8216_v17  ;;  %5778 = vmatpush1.bf16.msra.mxu1 %v8219_v14  ;;  %v8311_v17 = vld [vmem:[%s11088_s1 + $0x1568] ss:$16 sps:$4 sm:$0xff]   ;;  %v8316_v14 = vld [vmem:[%s11088_s1 + $0x1584] ss:$16 sps:$4 sm:$0xff]  }
 0x274   :  { %5246 = vmatprep.subr.bf16.mxu0 %v8224_v19  ;;  %5779 = vmatprep.subr.bf16.mxu1 %v8227_v20  ;;  %v8319_v19 = vld [vmem:[%s11088_s1 + $0x158c] ss:$16 sps:$4 sm:$0xff]   ;;  %v8314_v20 = vld [vmem:[%s11088_s1 + $0x1580] ss:$16 sps:$4 sm:$0xff]  }
 0x277   :  { %5247 = vmatpush1.bf16.msra.mxu0 %v8222_v16  ;;  %5780 = vmatpush1.bf16.msra.mxu1 %v8225_v22  ;;  %v8317_v16 = vld [vmem:[%s11088_s1 + $0x1588] ss:$16 sps:$4 sm:$0xff]   ;;  %v8322_v22 = vld [vmem:[%s11088_s1 + $0x15a4] ss:$16 sps:$4 sm:$0xff]  }
 0x278   :  { %5248 = vmatprep.subr.bf16.mxu0 %v8230_v23  ;;  %5781 = vmatprep.subr.bf16.mxu1 %v8233_v18  ;;  %v8325_v23 = vld [vmem:[%s11088_s1 + $0x15ac] ss:$16 sps:$4 sm:$0xff]   ;;  %v8320_v18 = vld [vmem:[%s11088_s1 + $0x15a0] ss:$16 sps:$4 sm:$0xff]  }
 0x27b   :  { %5249 = vmatpush1.bf16.msra.mxu0 %v8228_v25  ;;  %5782 = vmatpush1.bf16.msra.mxu1 %v8231_v26  ;;  %v8323_v25 = vld [vmem:[%s11088_s1 + $0x15a8] ss:$16 sps:$4 sm:$0xff]   ;;  %v8328_v26 = vld [vmem:[%s11088_s1 + $0x15c4] ss:$16 sps:$4 sm:$0xff]  }
 0x27c   :  { %5250 = vmatprep.subr.bf16.mxu0 %v8236_v27  ;;  %5783 = vmatprep.subr.bf16.mxu1 %v8239_v28  ;;  %v8331_v27 = vld [vmem:[%s11088_s1 + $0x15cc] ss:$16 sps:$4 sm:$0xff]   ;;  %v8326_v28 = vld [vmem:[%s11088_s1 + $0x15c0] ss:$16 sps:$4 sm:$0xff]  }
 0x27f   :  { %5251 = vmatpush1.bf16.msra.mxu0 %v8234_v29  ;;  %5784 = vmatpush1.bf16.msra.mxu1 %v8237_v24  ;;  %v8329_v29 = vld [vmem:[%s11088_s1 + $0x15c8] ss:$16 sps:$4 sm:$0xff]   ;;  %v8334_v24 = vld [vmem:[%s11088_s1 + $0x15e4] ss:$16 sps:$4 sm:$0xff]  }
 0x280   :  { %5261 = vmatprep.subr.bf16.mxu0 %v8244_v31  ;;  %5794 = vmatprep.subr.bf16.mxu1 %v8247_v32  ;;  %v8337_v31 = vld [vmem:[%s11088_s1 + $0x15ec] ss:$16 sps:$4 sm:$0xff]   ;;  %v8332_v32 = vld [vmem:[%s11088_s1 + $0x15e0] ss:$16 sps:$4 sm:$0xff]  }
 0x282   :  { %5253 = vmatmul.mubr.bf16.vlgmr.msra.gmra.mrb[0].mxu0 %v6291_v21  ;;  %5786 = vmatmul.mubr.bf16.vlgmr.msra.gmra.mrb[0].mxu1 %v6291_v21  ;;  %v8335_v21 = vld [vmem:[%s11088_s1 + $0x15e8] ss:$16 sps:$4 sm:$0xff]  }
 0x283   :  { %5262 = vmatpush1.bf16.msra.mxu0 %v8242_v34  ;;  %5795 = vmatpush1.bf16.msra.mxu1 %v8245_v35  ;;  %v8342_v34 = vld [vmem:[%s11088_s1 + $0x1604] ss:$16 sps:$4 sm:$0xff]   ;;  %v8345_v35 = vld [vmem:[%s11088_s1 + $0x160c] ss:$16 sps:$4 sm:$0xff]  }
 0x284   :  { %5263 = vmatprep.subr.bf16.mxu0 %v8250_v30  ;;  %5796 = vmatprep.subr.bf16.mxu1 %v8253_v36  ;;  %v6293_v30 = vcombine.low %v10539_v33, %v10539_v33  ;;  %v10740_v36 = vld [vmem:[%s11089_s0 + $0x58] sm:$0xff]  ;;  %v8348_v33 = vld [vmem:[%s11088_s1 + $0x1624] ss:$16 sps:$4 sm:$0xff]  }
 0x285   :  { %5293 = vmatprep.mubr.bf16.mxu0 %v6294_v37  ;;  %5826 = vmatprep.mubr.bf16.mxu1 %v6294_v37  ;;  %v8340_v37 = vld [vmem:[%s11088_s1 + $0x1600] ss:$16 sps:$4 sm:$0xff]  }
 0x287   :  { %5264 = vmatpush1.bf16.msra.mxu0 %v8248_v38  ;;  %5797 = vmatpush1.bf16.msra.mxu1 %v8251_v39  ;;  %v8343_v38 = vld [vmem:[%s11088_s1 + $0x1608] ss:$16 sps:$4 sm:$0xff]   ;;  %v8351_v39 = vld [vmem:[%s11088_s1 + $0x162c] ss:$16 sps:$4 sm:$0xff]  }
 0x288   :  { %5265 = vmatprep.subr.bf16.mxu0 %v8256_v40  ;;  %5798 = vmatprep.subr.bf16.mxu1 %v8259_v41  ;;  %v6296_v40 = vcombine.high %v10740_v36, %v10740_v36  ;;  %v8346_v41 = vld [vmem:[%s11088_s1 + $0x1620] ss:$16 sps:$4 sm:$0xff]  }
 0x28b   :  { %5266 = vmatpush1.bf16.msra.mxu0 %v8254_v42  ;;  %5799 = vmatpush1.bf16.msra.mxu1 %v8257_v43  ;;  %v8349_v42 = vld [vmem:[%s11088_s1 + $0x1628] ss:$16 sps:$4 sm:$0xff]   ;;  %v8354_v43 = vld [vmem:[%s11088_s1 + $0x1644] ss:$16 sps:$4 sm:$0xff]  }
 0x28c   :  { %5267 = vmatprep.subr.bf16.mxu0 %v8262_v44  ;;  %5800 = vmatprep.subr.bf16.mxu1 %v8265_v45  ;;  %v8357_v44 = vld [vmem:[%s11088_s1 + $0x164c] ss:$16 sps:$4 sm:$0xff]   ;;  %v8352_v45 = vld [vmem:[%s11088_s1 + $0x1640] ss:$16 sps:$4 sm:$0xff]  }
 0x28f   :  { %5268 = vmatpush1.bf16.msra.mxu0 %v8260_v46  ;;  %5801 = vmatpush1.bf16.msra.mxu1 %v8263_v47  ;;  %v8355_v46 = vld [vmem:[%s11088_s1 + $0x1648] ss:$16 sps:$4 sm:$0xff]   ;;  %v8360_v47 = vld [vmem:[%s11088_s1 + $0x1664] ss:$16 sps:$4 sm:$0xff]  }
 0x290   :  { %5269 = vmatprep.subr.bf16.mxu0 %v8268_v48  ;;  %5802 = vmatprep.subr.bf16.mxu1 %v8271_v49  ;;  %v8363_v48 = vld [vmem:[%s11088_s1 + $0x166c] ss:$16 sps:$4 sm:$0xff]   ;;  %v8358_v49 = vld [vmem:[%s11088_s1 + $0x1660] ss:$16 sps:$4 sm:$0xff]  }
 0x293   :  { %5270 = vmatpush1.bf16.msra.mxu0 %v8266_v50  ;;  %5803 = vmatpush1.bf16.msra.mxu1 %v8269_v51  ;;  %v8361_v50 = vld [vmem:[%s11088_s1 + $0x1668] ss:$16 sps:$4 sm:$0xff]   ;;  %v8366_v51 = vld [vmem:[%s11088_s1 + $0x1684] ss:$16 sps:$4 sm:$0xff]  }
 0x294   :  { %5271 = vmatprep.subr.bf16.mxu0 %v8274_v52  ;;  %5804 = vmatprep.subr.bf16.mxu1 %v8277_v53  ;;  %v8369_v52 = vld [vmem:[%s11088_s1 + $0x168c] ss:$16 sps:$4 sm:$0xff]   ;;  %v8364_v53 = vld [vmem:[%s11088_s1 + $0x1680] ss:$16 sps:$4 sm:$0xff]  }
 0x297   :  { %5272 = vmatpush1.bf16.msra.mxu0 %v8272_v54  ;;  %5805 = vmatpush1.bf16.msra.mxu1 %v8275_v55  ;;  %v8367_v54 = vld [vmem:[%s11088_s1 + $0x1688] ss:$16 sps:$4 sm:$0xff]   ;;  %v8372_v55 = vld [vmem:[%s11088_s1 + $0x16a4] ss:$16 sps:$4 sm:$0xff]  }
 0x298   :  { %5273 = vmatprep.subr.bf16.mxu0 %v8280_v56  ;;  %5806 = vmatprep.subr.bf16.mxu1 %v8283_v57  ;;  %v8375_v56 = vld [vmem:[%s11088_s1 + $0x16ac] ss:$16 sps:$4 sm:$0xff]   ;;  %v8370_v57 = vld [vmem:[%s11088_s1 + $0x16a0] ss:$16 sps:$4 sm:$0xff]  }
 0x29b   :  { %5274 = vmatpush1.bf16.msra.mxu0 %v8278_v58  ;;  %5807 = vmatpush1.bf16.msra.mxu1 %v8281_v59  ;;  %v8373_v58 = vld [vmem:[%s11088_s1 + $0x16a8] ss:$16 sps:$4 sm:$0xff]   ;;  %v8378_v59 = vld [vmem:[%s11088_s1 + $0x16c4] ss:$16 sps:$4 sm:$0xff]  }
 0x29c   :  { %5275 = vmatprep.subr.bf16.mxu0 %v8286_v60  ;;  %5808 = vmatprep.subr.bf16.mxu1 %v8289_v61  ;;  %v8381_v60 = vld [vmem:[%s11088_s1 + $0x16cc] ss:$16 sps:$4 sm:$0xff]   ;;  %v8376_v61 = vld [vmem:[%s11088_s1 + $0x16c0] ss:$16 sps:$4 sm:$0xff]  }
 0x29f   :  { %5276 = vmatpush1.bf16.msra.mxu0 %v8284_v62  ;;  %5809 = vmatpush1.bf16.msra.mxu1 %v8287_v63  ;;  %v8379_v62 = vld [vmem:[%s11088_s1 + $0x16c8] ss:$16 sps:$4 sm:$0xff]   ;;  %v8384_v63 = vld [vmem:[%s11088_s1 + $0x16e4] ss:$16 sps:$4 sm:$0xff]  }
 0x2a0   :  { %5277 = vmatprep.subr.bf16.mxu0 %v8292_v0  ;;  %5810 = vmatprep.subr.bf16.mxu1 %v8295_v1  ;;  %v8387_v0 = vld [vmem:[%s11088_s1 + $0x16ec] ss:$16 sps:$4 sm:$0xff]   ;;  %v8382_v1 = vld [vmem:[%s11088_s1 + $0x16e0] ss:$16 sps:$4 sm:$0xff]  }
 0x2a3   :  { %5278 = vmatpush1.bf16.msra.mxu0 %v8290_v2  ;;  %5811 = vmatpush1.bf16.msra.mxu1 %v8293_v3  ;;  %v8385_v2 = vld [vmem:[%s11088_s1 + $0x16e8] ss:$16 sps:$4 sm:$0xff]   ;;  %v8390_v3 = vld [vmem:[%s11088_s1 + $0x1704] ss:$16 sps:$4 sm:$0xff]  }
 0x2a4   :  { %5279 = vmatprep.subr.bf16.mxu0 %v8298_v4  ;;  %5812 = vmatprep.subr.bf16.mxu1 %v8301_v5  ;;  %v8393_v4 = vld [vmem:[%s11088_s1 + $0x170c] ss:$16 sps:$4 sm:$0xff]   ;;  %v8388_v5 = vld [vmem:[%s11088_s1 + $0x1700] ss:$16 sps:$4 sm:$0xff]  }
 0x2a7   :  { %5280 = vmatpush1.bf16.msra.mxu0 %v8296_v6  ;;  %5813 = vmatpush1.bf16.msra.mxu1 %v8299_v7  ;;  %v8391_v6 = vld [vmem:[%s11088_s1 + $0x1708] ss:$16 sps:$4 sm:$0xff]   ;;  %v8396_v7 = vld [vmem:[%s11088_s1 + $0x1724] ss:$16 sps:$4 sm:$0xff]  }
 0x2a8   :  { %5281 = vmatprep.subr.bf16.mxu0 %v8304_v8  ;;  %5814 = vmatprep.subr.bf16.mxu1 %v8307_v9  ;;  %v8399_v8 = vld [vmem:[%s11088_s1 + $0x172c] ss:$16 sps:$4 sm:$0xff]   ;;  %v8394_v9 = vld [vmem:[%s11088_s1 + $0x1720] ss:$16 sps:$4 sm:$0xff]  }
 0x2ab   :  { %5282 = vmatpush1.bf16.msra.mxu0 %v8302_v10  ;;  %5815 = vmatpush1.bf16.msra.mxu1 %v8305_v12  ;;  %v8397_v10 = vld [vmem:[%s11088_s1 + $0x1728] ss:$16 sps:$4 sm:$0xff]   ;;  %v8402_v12 = vld [vmem:[%s11088_s1 + $0x1744] ss:$16 sps:$4 sm:$0xff]  }
 0x2ac   :  { %5283 = vmatprep.subr.bf16.mxu0 %v8310_v13  ;;  %5816 = vmatprep.subr.bf16.mxu1 %v8313_v15  ;;  %v8405_v13 = vld [vmem:[%s11088_s1 + $0x174c] ss:$16 sps:$4 sm:$0xff]   ;;  %v8400_v15 = vld [vmem:[%s11088_s1 + $0x1740] ss:$16 sps:$4 sm:$0xff]  }
 0x2af   :  { %5284 = vmatpush1.bf16.msra.mxu0 %v8308_v11  ;;  %5817 = vmatpush1.bf16.msra.mxu1 %v8311_v17  ;;  %v8403_v11 = vld [vmem:[%s11088_s1 + $0x1748] ss:$16 sps:$4 sm:$0xff]   ;;  %v8408_v17 = vld [vmem:[%s11088_s1 + $0x1764] ss:$16 sps:$4 sm:$0xff]  }
 0x2b0   :  { %5285 = vmatprep.subr.bf16.mxu0 %v8316_v14  ;;  %5818 = vmatprep.subr.bf16.mxu1 %v8319_v19  ;;  %v8411_v14 = vld [vmem:[%s11088_s1 + $0x176c] ss:$16 sps:$4 sm:$0xff]   ;;  %v8406_v19 = vld [vmem:[%s11088_s1 + $0x1760] ss:$16 sps:$4 sm:$0xff]  }
 0x2b3   :  { %5286 = vmatpush1.bf16.msra.mxu0 %v8314_v20  ;;  %5819 = vmatpush1.bf16.msra.mxu1 %v8317_v16  ;;  %v8409_v20 = vld [vmem:[%s11088_s1 + $0x1768] ss:$16 sps:$4 sm:$0xff]   ;;  %v8414_v16 = vld [vmem:[%s11088_s1 + $0x1784] ss:$16 sps:$4 sm:$0xff]  }
 0x2b4   :  { %5287 = vmatprep.subr.bf16.mxu0 %v8322_v22  ;;  %5820 = vmatprep.subr.bf16.mxu1 %v8325_v23  ;;  %v8417_v22 = vld [vmem:[%s11088_s1 + $0x178c] ss:$16 sps:$4 sm:$0xff]   ;;  %v8412_v23 = vld [vmem:[%s11088_s1 + $0x1780] ss:$16 sps:$4 sm:$0xff]  }
 0x2b7   :  { %5288 = vmatpush1.bf16.msra.mxu0 %v8320_v18  ;;  %5821 = vmatpush1.bf16.msra.mxu1 %v8323_v25  ;;  %v8415_v18 = vld [vmem:[%s11088_s1 + $0x1788] ss:$16 sps:$4 sm:$0xff]   ;;  %v8420_v25 = vld [vmem:[%s11088_s1 + $0x17a4] ss:$16 sps:$4 sm:$0xff]  }
 0x2b8   :  { %5289 = vmatprep.subr.bf16.mxu0 %v8328_v26  ;;  %5822 = vmatprep.subr.bf16.mxu1 %v8331_v27  ;;  %v8423_v26 = vld [vmem:[%s11088_s1 + $0x17ac] ss:$16 sps:$4 sm:$0xff]   ;;  %v8418_v27 = vld [vmem:[%s11088_s1 + $0x17a0] ss:$16 sps:$4 sm:$0xff]  }
 0x2bb   :  { %5290 = vmatpush1.bf16.msra.mxu0 %v8326_v28  ;;  %5823 = vmatpush1.bf16.msra.mxu1 %v8329_v29  ;;  %v8421_v28 = vld [vmem:[%s11088_s1 + $0x17a8] ss:$16 sps:$4 sm:$0xff]   ;;  %v8426_v29 = vld [vmem:[%s11088_s1 + $0x17c4] ss:$16 sps:$4 sm:$0xff]  }
 0x2bc   :  { %5291 = vmatprep.subr.bf16.mxu0 %v8334_v24  ;;  %5824 = vmatprep.subr.bf16.mxu1 %v8337_v31  ;;  %v8429_v24 = vld [vmem:[%s11088_s1 + $0x17cc] ss:$16 sps:$4 sm:$0xff]   ;;  %v8424_v31 = vld [vmem:[%s11088_s1 + $0x17c0] ss:$16 sps:$4 sm:$0xff]  }
 0x2bf   :  { %5292 = vmatpush1.bf16.msra.mxu0 %v8332_v32  ;;  %5825 = vmatpush1.bf16.msra.mxu1 %v8335_v21  ;;  %v8427_v32 = vld [vmem:[%s11088_s1 + $0x17c8] ss:$16 sps:$4 sm:$0xff]   ;;  %v8432_v21 = vld [vmem:[%s11088_s1 + $0x17e4] ss:$16 sps:$4 sm:$0xff]  }
 0x2c0   :  { %5302 = vmatprep.subr.bf16.mxu0 %v8342_v34  ;;  %5835 = vmatprep.subr.bf16.mxu1 %v8345_v35  ;;  %v8435_v34 = vld [vmem:[%s11088_s1 + $0x17ec] ss:$16 sps:$4 sm:$0xff]   ;;  %v8430_v35 = vld [vmem:[%s11088_s1 + $0x17e0] ss:$16 sps:$4 sm:$0xff]  }
 0x2c2   :  { %5294 = vmatmul.mubr.bf16.vlgmr.msra.gmra.mrb[0].mxu0 %v6293_v30  ;;  %5827 = vmatmul.mubr.bf16.vlgmr.msra.gmra.mrb[0].mxu1 %v6293_v30  ;;  %v8433_v30 = vld [vmem:[%s11088_s1 + $0x17e8] ss:$16 sps:$4 sm:$0xff]  }
 0x2c3   :  { %5303 = vmatpush1.bf16.msra.mxu0 %v8340_v37  ;;  %5836 = vmatpush1.bf16.msra.mxu1 %v8343_v38  ;;  %v8440_v37 = vld [vmem:[%s11088_s1 + $0x1804] ss:$16 sps:$4 sm:$0xff]   ;;  %v8443_v38 = vld [vmem:[%s11088_s1 + $0x180c] ss:$16 sps:$4 sm:$0xff]  }
 0x2c4   :  { %5304 = vmatprep.subr.bf16.mxu0 %v8348_v33  ;;  %5837 = vmatprep.subr.bf16.mxu1 %v8351_v39  ;;  %v6295_v33 = vcombine.low %v10740_v36, %v10740_v36  ;;  %v8438_v39 = vld [vmem:[%s11088_s1 + $0x1800] ss:$16 sps:$4 sm:$0xff]   ;;  %v8449_v36 = vld [vmem:[%s11088_s1 + $0x182c] ss:$16 sps:$4 sm:$0xff]  }
 0x2c5   :  { %5334 = vmatprep.mubr.bf16.mxu0 %v6296_v40  ;;  %5867 = vmatprep.mubr.bf16.mxu1 %v6296_v40  ;;  %v8441_v40 = vld [vmem:[%s11088_s1 + $0x1808] ss:$16 sps:$4 sm:$0xff]  }
 0x2c7   :  { %5305 = vmatpush1.bf16.msra.mxu0 %v8346_v41  ;;  %5838 = vmatpush1.bf16.msra.mxu1 %v8349_v42  ;;  %v8446_v41 = vld [vmem:[%s11088_s1 + $0x1824] ss:$16 sps:$4 sm:$0xff]   ;;  %v8444_v42 = vld [vmem:[%s11088_s1 + $0x1820] ss:$16 sps:$4 sm:$0xff]  }
 0x2c8   :  { %5306 = vmatprep.subr.bf16.mxu0 %v8354_v43  ;;  %5839 = vmatprep.subr.bf16.mxu1 %v8357_v44  ;;  %v8447_v43 = vld [vmem:[%s11088_s1 + $0x1828] ss:$16 sps:$4 sm:$0xff]   ;;  %v8452_v44 = vld [vmem:[%s11088_s1 + $0x1844] ss:$16 sps:$4 sm:$0xff]  }
 0x2cb   :  { %5307 = vmatpush1.bf16.msra.mxu0 %v8352_v45  ;;  %5840 = vmatpush1.bf16.msra.mxu1 %v8355_v46  ;;  %v8455_v45 = vld [vmem:[%s11088_s1 + $0x184c] ss:$16 sps:$4 sm:$0xff]   ;;  %v8495_v46 = vmov 0  }
 0x2cc   :  { %5308 = vmatprep.subr.bf16.mxu0 %v8360_v47  ;;  %5841 = vmatprep.subr.bf16.mxu1 %v8363_v48  ;;  %v8450_v47 = vld [vmem:[%s11088_s1 + $0x1840] ss:$16 sps:$4 sm:$0xff]   ;;  %v8453_v48 = vld [vmem:[%s11088_s1 + $0x1848] ss:$16 sps:$4 sm:$0xff]  }
 0x2cf   :  { %5309 = vmatpush1.bf16.msra.mxu0 %v8358_v49  ;;  %5842 = vmatpush1.bf16.msra.mxu1 %v8361_v50  ;;  %v8458_v49 = vld [vmem:[%s11088_s1 + $0x1864] ss:$16 sps:$4 sm:$0xff]   ;;  %v8461_v50 = vld [vmem:[%s11088_s1 + $0x186c] ss:$16 sps:$4 sm:$0xff]  }
 0x2d0   :  { %5310 = vmatprep.subr.bf16.mxu0 %v8366_v51  ;;  %5843 = vmatprep.subr.bf16.mxu1 %v8369_v52  ;;  %v8456_v51 = vld [vmem:[%s11088_s1 + $0x1860] ss:$16 sps:$4 sm:$0xff]   ;;  %v8459_v52 = vld [vmem:[%s11088_s1 + $0x1868] ss:$16 sps:$4 sm:$0xff]  }
 0x2d3   :  { %5311 = vmatpush1.bf16.msra.mxu0 %v8364_v53  ;;  %5844 = vmatpush1.bf16.msra.mxu1 %v8367_v54  ;;  %v8463_v53 = vld [vmem:[%s11090_s3 + $0x40] sm:$0xff]  }
 0x2d4   :  { %5312 = vmatprep.subr.bf16.mxu0 %v8372_v55  ;;  %5845 = vmatprep.subr.bf16.mxu1 %v8375_v56  ;;  %v8464_v54 = vld [vmem:[%s11090_s3 + $0xc0] sm:$0xff]  }
 0x2d5   :  { %v8462_v55 = vld [vmem:[%s11089_s0 + $0x60] ss:$0 sps:$4 sm:$0xff]  }
 0x2d6   :  { %v8465_v56 = vld [vmem:[%s11090_s3] sm:$0xff]  }
 0x2d7   :  { %5313 = vmatpush1.bf16.msra.mxu0 %v8370_v57  ;;  %5846 = vmatpush1.bf16.msra.mxu1 %v8373_v58  ;;  %v8466_v57 = vld [vmem:[%s11090_s3 + $0x80] sm:$0xff]   ;;  %v8467_v58 = vld [vmem:[%s11090_s3 + $0x48] sm:$0xff]  }
 0x2d8   :  { %5314 = vmatprep.subr.bf16.mxu0 %v8378_v59  ;;  %5847 = vmatprep.subr.bf16.mxu1 %v8381_v60  ;;  %v8468_v59 = vld [vmem:[%s11090_s3 + $0xc8] sm:$0xff]  }
 0x2d9   :  { %v8469_v60 = vld [vmem:[%s11090_s3 + $0x8] sm:$0xff]  }
 0x2db   :  { %5315 = vmatpush1.bf16.msra.mxu0 %v8376_v61  ;;  %5848 = vmatpush1.bf16.msra.mxu1 %v8379_v62  ;;  %v8470_v61 = vld [vmem:[%s11090_s3 + $0x88] sm:$0xff]   ;;  %v8471_v62 = vld [vmem:[%s11090_s3 + $0x50] sm:$0xff]  }
 0x2dc   :  { %5316 = vmatprep.subr.bf16.mxu0 %v8384_v63  ;;  %5849 = vmatprep.subr.bf16.mxu1 %v8387_v0  ;;  %v8472_v63 = vld [vmem:[%s11090_s3 + $0xd0] sm:$0xff]  }
 0x2dd   :  { %v8473_v0 = vld [vmem:[%s11090_s3 + $0x10] sm:$0xff]  }
 0x2df   :  { %5317 = vmatpush1.bf16.msra.mxu0 %v8382_v1  ;;  %5850 = vmatpush1.bf16.msra.mxu1 %v8385_v2  ;;  %v8474_v1 = vld [vmem:[%s11090_s3 + $0x90] sm:$0xff]   ;;  %v8475_v2 = vld [vmem:[%s11090_s3 + $0x58] sm:$0xff]  }
 0x2e0   :  { %5318 = vmatprep.subr.bf16.mxu0 %v8390_v3  ;;  %5851 = vmatprep.subr.bf16.mxu1 %v8393_v4  ;;  %v8476_v3 = vld [vmem:[%s11090_s3 + $0xd8] sm:$0xff]  }
 0x2e1   :  { %v8477_v4 = vld [vmem:[%s11090_s3 + $0x18] sm:$0xff]  }
 0x2e3   :  { %5319 = vmatpush1.bf16.msra.mxu0 %v8388_v5  ;;  %5852 = vmatpush1.bf16.msra.mxu1 %v8391_v6  ;;  %v8478_v5 = vld [vmem:[%s11090_s3 + $0x98] sm:$0xff]   ;;  %v8479_v6 = vld [vmem:[%s11090_s3 + $0x60] sm:$0xff]  }
 0x2e4   :  { %5320 = vmatprep.subr.bf16.mxu0 %v8396_v7  ;;  %5853 = vmatprep.subr.bf16.mxu1 %v8399_v8  ;;  %v8480_v7 = vld [vmem:[%s11090_s3 + $0xe0] sm:$0xff]  }
 0x2e5   :  { %v8481_v8 = vld [vmem:[%s11090_s3 + $0x20] sm:$0xff]  }
 0x2e7   :  { %5321 = vmatpush1.bf16.msra.mxu0 %v8394_v9  ;;  %5854 = vmatpush1.bf16.msra.mxu1 %v8397_v10  ;;  %v8482_v9 = vld [vmem:[%s11090_s3 + $0xa0] sm:$0xff]   ;;  %v8483_v10 = vld [vmem:[%s11090_s3 + $0x68] sm:$0xff]  }
 0x2e8   :  { %5322 = vmatprep.subr.bf16.mxu0 %v8402_v12  ;;  %5855 = vmatprep.subr.bf16.mxu1 %v8405_v13  ;;  %v8484_v12 = vld [vmem:[%s11090_s3 + $0xe8] sm:$0xff]  }
 0x2e9   :  { %v8485_v13 = vld [vmem:[%s11090_s3 + $0x28] sm:$0xff]  }
 0x2eb   :  { %5323 = vmatpush1.bf16.msra.mxu0 %v8400_v15  ;;  %5856 = vmatpush1.bf16.msra.mxu1 %v8403_v11  ;;  %v8486_v15 = vld [vmem:[%s11090_s3 + $0xa8] sm:$0xff]   ;;  %v8487_v11 = vld [vmem:[%s11090_s3 + $0x70] sm:$0xff]  }
 0x2ec   :  { %5324 = vmatprep.subr.bf16.mxu0 %v8408_v17  ;;  %5857 = vmatprep.subr.bf16.mxu1 %v8411_v14  ;;  %v8488_v17 = vld [vmem:[%s11090_s3 + $0xf0] sm:$0xff]  }
 0x2ed   :  { %v8489_v14 = vld [vmem:[%s11090_s3 + $0x30] sm:$0xff]  }
 0x2ef   :  { %5325 = vmatpush1.bf16.msra.mxu0 %v8406_v19  ;;  %5858 = vmatpush1.bf16.msra.mxu1 %v8409_v20  ;;  %v8490_v19 = vld [vmem:[%s11090_s3 + $0xb0] sm:$0xff]   ;;  %v8491_v20 = vld [vmem:[%s11090_s3 + $0x78] sm:$0xff]  }
 0x2f0   :  { %5326 = vmatprep.subr.bf16.mxu0 %v8414_v16  ;;  %5859 = vmatprep.subr.bf16.mxu1 %v8417_v22  ;;  %v8492_v16 = vld [vmem:[%s11090_s3 + $0xf8] sm:$0xff]  }
 0x2f1   :  { %v8493_v22 = vld [vmem:[%s11090_s3 + $0x38] sm:$0xff]  }
 0x2f3   :  { %5327 = vmatpush1.bf16.msra.mxu0 %v8412_v23  ;;  %5860 = vmatpush1.bf16.msra.mxu1 %v8415_v18  ;;  %v8494_v23 = vld [vmem:[%s11090_s3 + $0xb8] sm:$0xff]   ;;  %v820_v18 = vlaneseq }
 0x2f4   :  { %5328 = vmatprep.subr.bf16.mxu0 %v8420_v25  ;;  %5861 = vmatprep.subr.bf16.mxu1 %v8423_v26 }
 0x2f5   :  { %v821_v25 = vshrl.u32 %v820_v18, 7 }
 0x2f7   :  { %5329 = vmatpush1.bf16.msra.mxu0 %v8418_v27  ;;  %5862 = vmatpush1.bf16.msra.mxu1 %v8421_v28  ;;  %v822_v26 = vsub.s32 0, %v821_v25  ;;  %v830_v27 = vsub.s32 2, %v821_v25  ;;  %v818_v28 = vld [vmem:[%s11091_s2] sm:$0xf] }
 0x2f8   :  { %5330 = vmatprep.subr.bf16.mxu0 %v8426_v29  ;;  %5863 = vmatprep.subr.bf16.mxu1 %v8429_v24  ;;  %v826_v29 = vsub.s32 1, %v821_v25  ;;  %v834_v24 = vsub.s32 3, %v821_v25 }
 0x2fb   :  { %5331 = vmatpush1.bf16.msra.mxu0 %v8424_v31  ;;  %5864 = vmatpush1.bf16.msra.mxu1 %v8427_v32  ;;  %v823_v31 = vrot.slane %v818_v28, %v822_v26  ;;  %v831_v32 = vrot.slane %v818_v28, %v830_v27 }
 0x2fc   :  { %5332 = vmatprep.subr.bf16.mxu0 %v8432_v21  ;;  %5865 = vmatprep.subr.bf16.mxu1 %v8435_v34  ;;  %v827_v21 = vrot.slane %v818_v28, %v826_v29  ;;  %v835_v34 = vrot.slane %v818_v28, %v834_v24 }
 0x2ff   :  { %5333 = vmatpush1.bf16.msra.mxu0 %v8430_v35  ;;  %5866 = vmatpush1.bf16.msra.mxu1 %v8433_v30 }
 0x300   :  { %5343 = vmatprep.subr.bf16.mxu0 %v8440_v37  ;;  %5876 = vmatprep.subr.bf16.mxu1 %v8443_v38 }
 0x302   :  { %5335 = vmatmul.mubr.bf16.vlgmr.msra.gmra.mrb[0].mxu0 %v6295_v33  ;;  %5868 = vmatmul.mubr.bf16.vlgmr.msra.gmra.mrb[0].mxu1 %v6295_v33 }
 0x303   :  { %5344 = vmatpush1.bf16.msra.mxu0 %v8438_v39  ;;  %5877 = vmatpush1.bf16.msra.mxu1 %v8441_v40 }
 0x304   :  { %5345 = vmatprep.subr.bf16.mxu0 %v8446_v41  ;;  %5878 = vmatprep.subr.bf16.mxu1 %v8449_v36 }
 0x305   :  { %5375 = vmatprep.mubr.bf16.mxu0 %v8495_v46  ;;  %5908 = vmatprep.mubr.bf16.mxu1 %v8495_v46 }
 0x307   :  { %5346 = vmatpush1.bf16.msra.mxu0 %v8444_v42  ;;  %5879 = vmatpush1.bf16.msra.mxu1 %v8447_v43 }
 0x308   :  { %5347 = vmatprep.subr.bf16.mxu0 %v8452_v44  ;;  %5880 = vmatprep.subr.bf16.mxu1 %v8455_v45 }
 0x30b   :  { %5348 = vmatpush1.bf16.msra.mxu0 %v8450_v47  ;;  %5881 = vmatpush1.bf16.msra.mxu1 %v8453_v48 }
 0x30c   :  { %5349 = vmatprep.subr.bf16.mxu0 %v8458_v49  ;;  %5882 = vmatprep.subr.bf16.mxu1 %v8461_v50 }
 0x30f   :  { %5350 = vmatpush1.bf16.msra.mxu0 %v8456_v51  ;;  %5883 = vmatpush1.bf16.msra.mxu1 %v8459_v52 }
 0x310   :  { %7117 = vmatprep.subr.bf16.mxu0 %v8463_v53  ;;  %7139 = vmatprep.subr.bf16.mxu1 %v8464_v54 }
 0x312   :  { %7082 = vmatmul.mubr.msk.bf16.vlgmr.msra.gmra.mrb[0].mxu0 %vm4847_vm0, %v8462_v55  ;;  %7083 = vmatmul.mubr.msk.bf16.vlgmr.msra.gmra.mrb[0].mxu1 %vm4847_vm0, %v8462_v55  ;;  %v7084_v55 = vld [vmem:[%s11092_s4] ss:$0 sm:$0xff] }
 0x313   :  { %7118 = vmatpush3.bf16.msra.mxu0 %v8465_v56  ;;  %7140 = vmatpush3.bf16.msra.mxu1 %v8466_v57 }
 0x314   :  { %7119 = vmatprep.subr.bf16.mxu0 %v8467_v58  ;;  %7141 = vmatprep.subr.bf16.mxu1 %v8468_v59 }
 0x317   :  { %7120 = vmatpush3.bf16.msra.mxu0 %v8469_v60  ;;  %7142 = vmatpush3.bf16.msra.mxu1 %v8470_v61 }
 0x318   :  { %7121 = vmatprep.subr.bf16.mxu0 %v8471_v62  ;;  %7143 = vmatprep.subr.bf16.mxu1 %v8472_v63 }
 0x31b   :  { %7122 = vmatpush3.bf16.msra.mxu0 %v8473_v0  ;;  %7144 = vmatpush3.bf16.msra.mxu1 %v8474_v1 }
 0x31c   :  { %7123 = vmatprep.subr.bf16.mxu0 %v8475_v2  ;;  %7145 = vmatprep.subr.bf16.mxu1 %v8476_v3 }
 0x31f   :  { %7124 = vmatpush3.bf16.msra.mxu0 %v8477_v4  ;;  %7146 = vmatpush3.bf16.msra.mxu1 %v8478_v5 }
 0x320   :  { %7125 = vmatprep.subr.bf16.mxu0 %v8479_v6  ;;  %7147 = vmatprep.subr.bf16.mxu1 %v8480_v7 }
 0x323   :  { %7126 = vmatpush3.bf16.msra.mxu0 %v8481_v8  ;;  %7148 = vmatpush3.bf16.msra.mxu1 %v8482_v9 }
 0x324   :  { %7127 = vmatprep.subr.bf16.mxu0 %v8483_v10  ;;  %7149 = vmatprep.subr.bf16.mxu1 %v8484_v12 }
 0x327   :  { %7128 = vmatpush3.bf16.msra.mxu0 %v8485_v13  ;;  %7150 = vmatpush3.bf16.msra.mxu1 %v8486_v15 }
 0x328   :  { %7129 = vmatprep.subr.bf16.mxu0 %v8487_v11  ;;  %7151 = vmatprep.subr.bf16.mxu1 %v8488_v17 }
 0x32b   :  { %7130 = vmatpush3.bf16.msra.mxu0 %v8489_v14  ;;  %7152 = vmatpush3.bf16.msra.mxu1 %v8490_v19 }
 0x32c   :  { %7131 = vmatprep.subr.bf16.mxu0 %v8491_v20  ;;  %7153 = vmatprep.subr.bf16.mxu1 %v8492_v16 }
 0x32f   :  { %7132 = vmatpush3.bf16.msra.mxu0 %v8493_v22  ;;  %7154 = vmatpush3.bf16.msra.mxu1 %v8494_v23 }
 0x3e5   :  { %v5377_v35 = vpop.f32.mrb[0].mxu0  ;;  %v5910_v30 = vpop.f32.mrb[0].mxu1 }
 0x3e6   :  { %v7161_v37 = vadd.f32 %v5377_v35, %v823_v31  ;;  %v7163_v38 = vadd.f32 %v5910_v30, %v831_v32  ;;  %v5379_v33 = vpop.f32.mrb[1].mxu0  ;;  %v5912_v39 = vpop.f32.mrb[1].mxu1 }
 0x3e7   :  { %v7162_v40 = vadd.f32 %v5379_v33, %v827_v21  ;;  %v7164_v41 = vadd.f32 %v5912_v39, %v835_v34  ;;  %v5381_v36 = vpop.f32.mrb[2].mxu0  ;;  %v5914_v42 = vpop.f32.mrb[2].mxu1 }
 0x3e8   :  { %v5917_v43 = vmax.f32 %v7161_v37, 0.0  ;;  %v5919_v44 = vmax.f32 %v7163_v38, 0.0  ;;  %v5382_v45 = vpop.f32.mrb[3].mxu0  ;;  %v5915_v46 = vpop.f32.mrb[3].mxu1 }
 0x3e9   :  { %v5918_v47 = vmax.f32 %v7162_v40, 0.0  ;;  %v5920_v48 = vmax.f32 %v7164_v41, 0.0 }
 0x3ea   :  { %v5921_v51 = vpack.c.bf16 %v5917_v43, %v5917_v43  ;;  %v5923_v52 = vpack.c.bf16 %v5919_v44, %v5919_v44 }
 0x3eb   :  { %v5922_v49 = vpack.c.bf16 %v5918_v47, %v5918_v47  ;;  %v5924_v50 = vpack.c.bf16 %v5920_v48, %v5920_v48 }
 0x3ed   :  { %6220 = vmatprep.mubr.bf16.mxu0 %v5922_v49  ;;  %6260 = vmatprep.mubr.bf16.mxu1 %v5924_v50 }
 0x3ee   :  { %6221 = vmatmul.mubr.bf16.vlgmr.msra.gmra.mrb[4].mxu0 %v5921_v51  ;;  %6261 = vmatmul.mubr.bf16.vlgmr.msra.gmra.mrb[4].mxu1 %v5923_v52 }
 0x4c1   :  { %v7133_v53 = vpop.f32.mrb[4].mxu0  ;;  %v7155_v54 = vpop.f32.mrb[4].mxu1 }
 0x4c2   :  { %v7134_v56 = vpop.f32.mrb[5].mxu0  ;;  %v7156_v57 = vpop.f32.mrb[5].mxu1 }
 0x4c3   :  { %v7135_v58 = vadd.f32 %v7134_v56, %v7133_v53  ;;  %v7157_v59 = vadd.f32 %v7156_v57, %v7155_v54  ;;  %v7136_v60 = vpop.f32.mrb[6].mxu0  ;;  %v7158_v61 = vpop.f32.mrb[6].mxu1 }
 0x4c4   :  { %v7137_v62 = vpop.f32.mrb[7].mxu0  ;;  %v7159_v63 = vpop.f32.mrb[7].mxu1 }
 0x4c5   :  { %v6223_v0 = vadd.f32 %v7135_v58, %v7084_v55 }
 0x4c7   :  { %v6263_v1 = vadd.f32 %v7157_v59, %v6223_v0 }
 0x4c9   :  { %6268 = vst [vmem:[%s11093_s5] sm:$0xff] %v6263_v1 }

</bundles_post_ra>
